<compile_context>
chip_gen: v5e
topology: v5e:2x2
jax: 0.10.0
libtpu: 0.0.40
codegen_flags: <defaults>
</compile_context>

<pallas_src>
import functools

import jax
import jax.numpy as jnp
from jax import lax
from jax.experimental import pallas as pl
from jax.experimental.pallas import tpu as pltpu


# ---------------------------------------------------------------------------
# Kernel: one batch element per grid step, all heads fused.
# ---------------------------------------------------------------------------
def _attention_kernel(x_ref, mask_ref, wqkv_ref, bqkv_ref, wproj_ref, bproj_ref,
                      o_ref, cls_ref, patch_ref, *, num_heads, scale, eps):
    f32 = jnp.float32
    hi = lax.Precision.HIGHEST

    x = x_ref[0].astype(f32)          # (N, C)
    mask = mask_ref[0].astype(f32)    # (N, N)
    N, C = x.shape
    H = num_heads
    Dh = C // H

    # Fused QKV projection: single large MXU matmul, bias broadcast over rows.
    qkv = jnp.dot(x, wqkv_ref[...].astype(f32),
                  preferred_element_type=f32, precision=hi)
    qkv = qkv + bqkv_ref[...].astype(f32)                      # (N, 3C)

    ctx_heads = []
    cls_acc = jnp.zeros((1, N - 1), f32)
    patch_acc = jnp.zeros((N - 1, N - 1), f32)

    for h in range(H):                                          # static unroll
        q = qkv[:, h * Dh:(h + 1) * Dh]                         # (N, Dh)
        k = qkv[:, C + h * Dh:C + (h + 1) * Dh]                 # (N, Dh)
        v = qkv[:, 2 * C + h * Dh:2 * C + (h + 1) * Dh]         # (N, Dh)

        # q @ k^T without an explicit transpose (contract over Dh).
        s = lax.dot_general(q, k, (((1,), (1,)), ((), ())),
                            preferred_element_type=f32, precision=hi) * scale
        s = s - jnp.max(s, axis=-1, keepdims=True)
        e = jnp.exp(s) * mask
        attn = (e + eps / N) / (jnp.sum(e, axis=-1, keepdims=True) + eps)
        # attn_drop: p = 0.0 -> identity.

        ctx_heads.append(jnp.dot(attn, v, preferred_element_type=f32,
                                 precision=hi))                  # (N, Dh)
        cls_acc = cls_acc + attn[0:1, 1:]
        patch_acc = patch_acc + attn[1:, 1:]

    ctx = jnp.concatenate(ctx_heads, axis=-1)                    # (N, C)
    out = jnp.dot(ctx, wproj_ref[...].astype(f32),
                  preferred_element_type=f32, precision=hi)
    out = out + bproj_ref[...].astype(f32)
    # proj_drop: p = 0.0 -> identity.
    # TODO(synk): training-mode dropout (attn_drop/proj_drop > 0) not implemented.

    o_ref[0] = out.astype(o_ref.dtype)
    cls_ref[0] = (cls_acc * (1.0 / H)).astype(cls_ref.dtype)
    patch_ref[0] = (patch_acc * (1.0 / H)).astype(patch_ref.dtype)


# ---------------------------------------------------------------------------
# Wrapper
# ---------------------------------------------------------------------------
def attention_forward(x, attn_mask, wqkv, bqkv, wproj, bproj, *, num_heads):
    """x: (B, N, C); attn_mask: (B, N, N); wqkv: (C, 3C); bqkv: (3C,);
    wproj: (C, C); bproj: (C,).  Returns (out (B,N,C), cls (B,N-1),
    patch (B,N-1,N-1))."""
    B, N, C = x.shape
    assert C % num_heads == 0
    assert attn_mask.shape == (B, N, N)
    Dh = C // num_heads
    scale = float(Dh) ** (-0.5)
    eps = 1e-6

    bqkv2 = bqkv.reshape(1, 3 * C)
    bproj2 = bproj.reshape(1, C)

    kernel = functools.partial(_attention_kernel, num_heads=num_heads,
                               scale=scale, eps=eps)

    out_shape = (
        jax.ShapeDtypeStruct((B, N, C), x.dtype),
        jax.ShapeDtypeStruct((B, 1, N - 1), jnp.float32),
        jax.ShapeDtypeStruct((B, N - 1, N - 1), jnp.float32),
    )

    grid_spec = pltpu.PrefetchScalarGridSpec(
        num_scalar_prefetch=0,
        grid=(B,),
        in_specs=[
            pl.BlockSpec((1, N, C), lambda b: (b, 0, 0)),       # x
            pl.BlockSpec((1, N, N), lambda b: (b, 0, 0)),       # attn_mask
            pl.BlockSpec((C, 3 * C), lambda b: (0, 0)),         # wqkv (resident)
            pl.BlockSpec((1, 3 * C), lambda b: (0, 0)),         # bqkv (resident)
            pl.BlockSpec((C, C), lambda b: (0, 0)),             # wproj (resident)
            pl.BlockSpec((1, C), lambda b: (0, 0)),             # bproj (resident)
        ],
        out_specs=(
            pl.BlockSpec((1, N, C), lambda b: (b, 0, 0)),       # out
            pl.BlockSpec((1, 1, N - 1), lambda b: (b, 0, 0)),   # cls_attn
            pl.BlockSpec((1, N - 1, N - 1), lambda b: (b, 0, 0)),  # patch_attn
        ),
    )

    out, cls3, patch = pl.pallas_call(
        kernel,
        out_shape=out_shape,
        grid_spec=grid_spec,
        compiler_params=pltpu.CompilerParams(
            dimension_semantics=("parallel",),
        ),
    )(x, attn_mask, wqkv, bqkv2, wproj, bproj2)

    return out, cls3.reshape(B, N - 1), patch


# ---------------------------------------------------------------------------
# Pure-JAX reference (mirrors the PyTorch forward exactly)
# ---------------------------------------------------------------------------
def attention_ref(x, attn_mask, wqkv, bqkv, wproj, bproj, num_heads):
    hi = lax.Precision.HIGHEST
    B, N, C = x.shape
    H = num_heads
    Dh = C // H
    scale = float(Dh) ** (-0.5)
    eps = 1e-6

    qkv = jnp.einsum('bnc,cd->bnd', x, wqkv, precision=hi) + bqkv
    qkv = qkv.reshape(B, N, 3, H, Dh).transpose(2, 0, 3, 1, 4)
    q, k, v = qkv[0], qkv[1], qkv[2]                            # (B, H, N, Dh)

    attn = jnp.einsum('bhid,bhjd->bhij', q, k, precision=hi) * scale
    attn = attn - attn.max(axis=-1, keepdims=True)
    attn = jnp.exp(attn.astype(jnp.float32)) * attn_mask[:, None].astype(jnp.float32)
    attn = (attn + eps / N) / (attn.sum(axis=-1, keepdims=True) + eps)

    out = jnp.einsum('bhij,bhjd->bhid', attn, v, precision=hi)
    out = out.transpose(0, 2, 1, 3).reshape(B, N, C)
    out = jnp.einsum('bnc,cd->bnd', out, wproj, precision=hi) + bproj

    cls_attn = attn[:, :, 0, 1:].sum(axis=1) / H
    patch_attn = attn[:, :, 1:, 1:].sum(axis=1) / H
    return out, cls_attn, patch_attn


# ---------------------------------------------------------------------------
# Demo
# ---------------------------------------------------------------------------
if __name__ == "__main__":
    B, N, C, H = 2, 32, 128, 8          # batch, tokens, dim (lane-dense), heads
    key = jax.random.PRNGKey(0)
    k1, k2, k3, k4, k5 = jax.random.split(key, 5)

    x = jax.random.normal(k1, (B, N, C), jnp.float32)
    attn_mask = (jax.random.uniform(k2, (B, N, N)) > 0.2).astype(jnp.float32)
    wqkv = jax.random.normal(k3, (C, 3 * C), jnp.float32) * (C ** -0.5)
    bqkv = jnp.zeros((3 * C,), jnp.float32)       # qkv_bias=False (module default)
    wproj = jax.random.normal(k4, (C, C), jnp.float32) * (C ** -0.5)
    bproj = jax.random.normal(k5, (C,), jnp.float32) * 0.02

    out, cls_attn, patch_attn = attention_forward(
        x, attn_mask, wqkv, bqkv, wproj, bproj, num_heads=H)
    out, cls_attn, patch_attn = jax.block_until_ready((out, cls_attn, patch_attn))

    ref_out, ref_cls, ref_patch = attention_ref(
        x, attn_mask, wqkv, bqkv, wproj, bproj, H)

    assert out.shape == (B, N, C)
    assert cls_attn.shape == (B, N - 1)
    assert patch_attn.shape == (B, N - 1, N - 1)
    assert jnp.allclose(out, ref_out, atol=2e-3, rtol=2e-3), \
        float(jnp.max(jnp.abs(out - ref_out)))
    assert jnp.allclose(cls_attn, ref_cls, atol=1e-4, rtol=1e-4)
    assert jnp.allclose(patch_attn, ref_patch, atol=1e-4, rtol=1e-4)

    print("KERNEL_OK")
</pallas_src>

<mosaic_0001>
module attributes {stable_mosaic.version = 11 : i64} {
  func.func @_attention_kernel(%arg0: i32, %arg1: memref<1x32x128xf32, #tpu.memory_space<vmem>>, %arg2: memref<1x32x32xf32, #tpu.memory_space<vmem>>, %arg3: memref<128x384xf32, #tpu.memory_space<vmem>>, %arg4: memref<1x384xf32, #tpu.memory_space<vmem>>, %arg5: memref<128x128xf32, #tpu.memory_space<vmem>>, %arg6: memref<1x128xf32, #tpu.memory_space<vmem>>, %arg7: memref<1x32x128xf32, #tpu.memory_space<vmem>>, %arg8: memref<1x1x31xf32, #tpu.memory_space<vmem>>, %arg9: memref<1x31x31xf32, #tpu.memory_space<vmem>>) attributes {dimension_semantics = [#tpu.dimension_semantics<parallel>], iteration_bounds = array<i64: 2>, scalar_prefetch = 0 : i64, scratch_operands = 0 : i64, tpu.core_type = #tpu.core_type<tc>, window_params = [{transform_indices = @transform_0, window_bounds = array<i64: 1, 32, 128>}, {transform_indices = @transform_1, window_bounds = array<i64: 1, 32, 32>}, {pipeline_mode = #tpu.pipeline_mode<synchronous>, transform_indices = @transform_2, window_bounds = array<i64: 128, 384>}, {pipeline_mode = #tpu.pipeline_mode<synchronous>, transform_indices = @transform_3, window_bounds = array<i64: 1, 384>}, {pipeline_mode = #tpu.pipeline_mode<synchronous>, transform_indices = @transform_4, window_bounds = array<i64: 128, 128>}, {pipeline_mode = #tpu.pipeline_mode<synchronous>, transform_indices = @transform_5, window_bounds = array<i64: 1, 128>}, {transform_indices = @transform_6, window_bounds = array<i64: 1, 32, 128>}, {transform_indices = @transform_7, window_bounds = array<i64: 1, 1, 31>}, {transform_indices = @transform_8, window_bounds = array<i64: 1, 31, 31>}]} {
    %c0 = arith.constant 0 : index
    %c0_0 = arith.constant 0 : index
    %c0_1 = arith.constant 0 : index
    %0 = vector.load %arg1[%c0, %c0_0, %c0_1] : memref<1x32x128xf32, #tpu.memory_space<vmem>>, vector<1x32x128xf32>
    %1 = vector.shape_cast %0 : vector<1x32x128xf32> to vector<32x128xf32>
    %c0_2 = arith.constant 0 : index
    %c0_3 = arith.constant 0 : index
    %c0_4 = arith.constant 0 : index
    %2 = vector.load %arg2[%c0_2, %c0_3, %c0_4] : memref<1x32x32xf32, #tpu.memory_space<vmem>>, vector<1x32x32xf32>
    %3 = vector.shape_cast %2 : vector<1x32x32xf32> to vector<32x32xf32>
    %c0_5 = arith.constant 0 : index
    %c0_6 = arith.constant 0 : index
    %4 = vector.load %arg3[%c0_5, %c0_6] : memref<128x384xf32, #tpu.memory_space<vmem>>, vector<128x384xf32>
    %cst = arith.constant dense<0.000000e+00> : vector<32x384xf32>
    %5 = tpu.matmul %1, %4, %cst {dimension_numbers = #tpu.dot_dimension_numbers<[1], [0], [0], [1], [0, 0, 1, 1], [], []>, precision = #tpu.contract_precision<fp32>} : vector<32x128xf32>, vector<128x384xf32>, vector<32x384xf32> -> vector<32x384xf32>
    %c0_7 = arith.constant 0 : index
    %c0_8 = arith.constant 0 : index
    %6 = vector.load %arg4[%c0_7, %c0_8] : memref<1x384xf32, #tpu.memory_space<vmem>>, vector<1x384xf32>
    %7 = vector.broadcast %6 : vector<1x384xf32> to vector<32x384xf32>
    %8 = arith.addf %5, %7 : vector<32x384xf32>
    %cst_9 = arith.constant 0.000000e+00 : f32
    %9 = vector.broadcast %cst_9 : f32 to vector<1x31xf32>
    %cst_10 = arith.constant 0.000000e+00 : f32
    %10 = vector.broadcast %cst_10 : f32 to vector<31x31xf32>
    %11 = vector.extract_strided_slice %8 {offsets = [0, 0], sizes = [32, 16], strides = [1, 1]} : vector<32x384xf32> to vector<32x16xf32>
    %12 = vector.extract_strided_slice %8 {offsets = [0, 128], sizes = [32, 16], strides = [1, 1]} : vector<32x384xf32> to vector<32x16xf32>
    %13 = vector.extract_strided_slice %8 {offsets = [0, 256], sizes = [32, 16], strides = [1, 1]} : vector<32x384xf32> to vector<32x16xf32>
    %cst_11 = arith.constant dense<0.000000e+00> : vector<32x32xf32>
    %14 = tpu.matmul %11, %12, %cst_11 {dimension_numbers = #tpu.dot_dimension_numbers<[1], [1], [0], [0], [0, 0, 1, 0], [], []>, precision = #tpu.contract_precision<fp32>} : vector<32x16xf32>, vector<32x16xf32>, vector<32x32xf32> -> vector<32x32xf32>
    %cst_12 = arith.constant 2.500000e-01 : f32
    %15 = vector.broadcast %cst_12 : f32 to vector<32x32xf32>
    %16 = arith.mulf %14, %15 : vector<32x32xf32>
    %cst_13 = arith.constant dense<0xFF800000> : vector<32xf32>
    %17 = vector.multi_reduction <maximumf>, %16, %cst_13 [1] : vector<32x32xf32> to vector<32xf32>
    %18 = vector.shape_cast %17 : vector<32xf32> to vector<32x1xf32>
    %19 = vector.broadcast %18 : vector<32x1xf32> to vector<32x32xf32>
    %20 = arith.subf %16, %19 : vector<32x32xf32>
    %21 = math.exp %20 : vector<32x32xf32>
    %22 = arith.mulf %21, %3 : vector<32x32xf32>
    %cst_14 = arith.constant 3.125000e-08 : f32
    %23 = vector.broadcast %cst_14 : f32 to vector<32x32xf32>
    %24 = arith.addf %22, %23 : vector<32x32xf32>
    %cst_15 = arith.constant dense<0.000000e+00> : vector<32xf32>
    %25 = vector.multi_reduction <add>, %22, %cst_15 [1] : vector<32x32xf32> to vector<32xf32>
    %26 = vector.shape_cast %25 : vector<32xf32> to vector<32x1xf32>
    %cst_16 = arith.constant 9.99999997E-7 : f32
    %27 = vector.broadcast %cst_16 : f32 to vector<32x1xf32>
    %28 = arith.addf %26, %27 : vector<32x1xf32>
    %29 = vector.broadcast %28 : vector<32x1xf32> to vector<32x32xf32>
    %30 = arith.divf %24, %29 : vector<32x32xf32>
    %cst_17 = arith.constant dense<0.000000e+00> : vector<32x16xf32>
    %31 = tpu.matmul %30, %13, %cst_17 {dimension_numbers = #tpu.dot_dimension_numbers<[1], [0], [0], [1], [0, 0, 1, 1], [], []>, precision = #tpu.contract_precision<fp32>} : vector<32x32xf32>, vector<32x16xf32>, vector<32x16xf32> -> vector<32x16xf32>
    %32 = vector.extract_strided_slice %30 {offsets = [0, 1], sizes = [1, 31], strides = [1, 1]} : vector<32x32xf32> to vector<1x31xf32>
    %33 = arith.addf %9, %32 : vector<1x31xf32>
    %34 = vector.extract_strided_slice %30 {offsets = [1, 1], sizes = [31, 31], strides = [1, 1]} : vector<32x32xf32> to vector<31x31xf32>
    %35 = arith.addf %10, %34 : vector<31x31xf32>
    %36 = vector.extract_strided_slice %8 {offsets = [0, 16], sizes = [32, 16], strides = [1, 1]} : vector<32x384xf32> to vector<32x16xf32>
    %37 = vector.extract_strided_slice %8 {offsets = [0, 144], sizes = [32, 16], strides = [1, 1]} : vector<32x384xf32> to vector<32x16xf32>
    %38 = vector.extract_strided_slice %8 {offsets = [0, 272], sizes = [32, 16], strides = [1, 1]} : vector<32x384xf32> to vector<32x16xf32>
    %cst_18 = arith.constant dense<0.000000e+00> : vector<32x32xf32>
    %39 = tpu.matmul %36, %37, %cst_18 {dimension_numbers = #tpu.dot_dimension_numbers<[1], [1], [0], [0], [0, 0, 1, 0], [], []>, precision = #tpu.contract_precision<fp32>} : vector<32x16xf32>, vector<32x16xf32>, vector<32x32xf32> -> vector<32x32xf32>
    %cst_19 = arith.constant 2.500000e-01 : f32
    %40 = vector.broadcast %cst_19 : f32 to vector<32x32xf32>
    %41 = arith.mulf %39, %40 : vector<32x32xf32>
    %cst_20 = arith.constant dense<0xFF800000> : vector<32xf32>
    %42 = vector.multi_reduction <maximumf>, %41, %cst_20 [1] : vector<32x32xf32> to vector<32xf32>
    %43 = vector.shape_cast %42 : vector<32xf32> to vector<32x1xf32>
    %44 = vector.broadcast %43 : vector<32x1xf32> to vector<32x32xf32>
    %45 = arith.subf %41, %44 : vector<32x32xf32>
    %46 = math.exp %45 : vector<32x32xf32>
    %47 = arith.mulf %46, %3 : vector<32x32xf32>
    %cst_21 = arith.constant 3.125000e-08 : f32
    %48 = vector.broadcast %cst_21 : f32 to vector<32x32xf32>
    %49 = arith.addf %47, %48 : vector<32x32xf32>
    %cst_22 = arith.constant dense<0.000000e+00> : vector<32xf32>
    %50 = vector.multi_reduction <add>, %47, %cst_22 [1] : vector<32x32xf32> to vector<32xf32>
    %51 = vector.shape_cast %50 : vector<32xf32> to vector<32x1xf32>
    %cst_23 = arith.constant 9.99999997E-7 : f32
    %52 = vector.broadcast %cst_23 : f32 to vector<32x1xf32>
    %53 = arith.addf %51, %52 : vector<32x1xf32>
    %54 = vector.broadcast %53 : vector<32x1xf32> to vector<32x32xf32>
    %55 = arith.divf %49, %54 : vector<32x32xf32>
    %cst_24 = arith.constant dense<0.000000e+00> : vector<32x16xf32>
    %56 = tpu.matmul %55, %38, %cst_24 {dimension_numbers = #tpu.dot_dimension_numbers<[1], [0], [0], [1], [0, 0, 1, 1], [], []>, precision = #tpu.contract_precision<fp32>} : vector<32x32xf32>, vector<32x16xf32>, vector<32x16xf32> -> vector<32x16xf32>
    %57 = vector.extract_strided_slice %55 {offsets = [0, 1], sizes = [1, 31], strides = [1, 1]} : vector<32x32xf32> to vector<1x31xf32>
    %58 = arith.addf %33, %57 : vector<1x31xf32>
    %59 = vector.extract_strided_slice %55 {offsets = [1, 1], sizes = [31, 31], strides = [1, 1]} : vector<32x32xf32> to vector<31x31xf32>
    %60 = arith.addf %35, %59 : vector<31x31xf32>
    %61 = vector.extract_strided_slice %8 {offsets = [0, 32], sizes = [32, 16], strides = [1, 1]} : vector<32x384xf32> to vector<32x16xf32>
    %62 = vector.extract_strided_slice %8 {offsets = [0, 160], sizes = [32, 16], strides = [1, 1]} : vector<32x384xf32> to vector<32x16xf32>
    %63 = vector.extract_strided_slice %8 {offsets = [0, 288], sizes = [32, 16], strides = [1, 1]} : vector<32x384xf32> to vector<32x16xf32>
    %cst_25 = arith.constant dense<0.000000e+00> : vector<32x32xf32>
    %64 = tpu.matmul %61, %62, %cst_25 {dimension_numbers = #tpu.dot_dimension_numbers<[1], [1], [0], [0], [0, 0, 1, 0], [], []>, precision = #tpu.contract_precision<fp32>} : vector<32x16xf32>, vector<32x16xf32>, vector<32x32xf32> -> vector<32x32xf32>
    %cst_26 = arith.constant 2.500000e-01 : f32
    %65 = vector.broadcast %cst_26 : f32 to vector<32x32xf32>
    %66 = arith.mulf %64, %65 : vector<32x32xf32>
    %cst_27 = arith.constant dense<0xFF800000> : vector<32xf32>
    %67 = vector.multi_reduction <maximumf>, %66, %cst_27 [1] : vector<32x32xf32> to vector<32xf32>
    %68 = vector.shape_cast %67 : vector<32xf32> to vector<32x1xf32>
    %69 = vector.broadcast %68 : vector<32x1xf32> to vector<32x32xf32>
    %70 = arith.subf %66, %69 : vector<32x32xf32>
    %71 = math.exp %70 : vector<32x32xf32>
    %72 = arith.mulf %71, %3 : vector<32x32xf32>
    %cst_28 = arith.constant 3.125000e-08 : f32
    %73 = vector.broadcast %cst_28 : f32 to vector<32x32xf32>
    %74 = arith.addf %72, %73 : vector<32x32xf32>
    %cst_29 = arith.constant dense<0.000000e+00> : vector<32xf32>
    %75 = vector.multi_reduction <add>, %72, %cst_29 [1] : vector<32x32xf32> to vector<32xf32>
    %76 = vector.shape_cast %75 : vector<32xf32> to vector<32x1xf32>
    %cst_30 = arith.constant 9.99999997E-7 : f32
    %77 = vector.broadcast %cst_30 : f32 to vector<32x1xf32>
    %78 = arith.addf %76, %77 : vector<32x1xf32>
    %79 = vector.broadcast %78 : vector<32x1xf32> to vector<32x32xf32>
    %80 = arith.divf %74, %79 : vector<32x32xf32>
    %cst_31 = arith.constant dense<0.000000e+00> : vector<32x16xf32>
    %81 = tpu.matmul %80, %63, %cst_31 {dimension_numbers = #tpu.dot_dimension_numbers<[1], [0], [0], [1], [0, 0, 1, 1], [], []>, precision = #tpu.contract_precision<fp32>} : vector<32x32xf32>, vector<32x16xf32>, vector<32x16xf32> -> vector<32x16xf32>
    %82 = vector.extract_strided_slice %80 {offsets = [0, 1], sizes = [1, 31], strides = [1, 1]} : vector<32x32xf32> to vector<1x31xf32>
    %83 = arith.addf %58, %82 : vector<1x31xf32>
    %84 = vector.extract_strided_slice %80 {offsets = [1, 1], sizes = [31, 31], strides = [1, 1]} : vector<32x32xf32> to vector<31x31xf32>
    %85 = arith.addf %60, %84 : vector<31x31xf32>
    %86 = vector.extract_strided_slice %8 {offsets = [0, 48], sizes = [32, 16], strides = [1, 1]} : vector<32x384xf32> to vector<32x16xf32>
    %87 = vector.extract_strided_slice %8 {offsets = [0, 176], sizes = [32, 16], strides = [1, 1]} : vector<32x384xf32> to vector<32x16xf32>
    %88 = vector.extract_strided_slice %8 {offsets = [0, 304], sizes = [32, 16], strides = [1, 1]} : vector<32x384xf32> to vector<32x16xf32>
    %cst_32 = arith.constant dense<0.000000e+00> : vector<32x32xf32>
    %89 = tpu.matmul %86, %87, %cst_32 {dimension_numbers = #tpu.dot_dimension_numbers<[1], [1], [0], [0], [0, 0, 1, 0], [], []>, precision = #tpu.contract_precision<fp32>} : vector<32x16xf32>, vector<32x16xf32>, vector<32x32xf32> -> vector<32x32xf32>
    %cst_33 = arith.constant 2.500000e-01 : f32
    %90 = vector.broadcast %cst_33 : f32 to vector<32x32xf32>
    %91 = arith.mulf %89, %90 : vector<32x32xf32>
    %cst_34 = arith.constant dense<0xFF800000> : vector<32xf32>
    %92 = vector.multi_reduction <maximumf>, %91, %cst_34 [1] : vector<32x32xf32> to vector<32xf32>
    %93 = vector.shape_cast %92 : vector<32xf32> to vector<32x1xf32>
    %94 = vector.broadcast %93 : vector<32x1xf32> to vector<32x32xf32>
    %95 = arith.subf %91, %94 : vector<32x32xf32>
    %96 = math.exp %95 : vector<32x32xf32>
    %97 = arith.mulf %96, %3 : vector<32x32xf32>
    %cst_35 = arith.constant 3.125000e-08 : f32
    %98 = vector.broadcast %cst_35 : f32 to vector<32x32xf32>
    %99 = arith.addf %97, %98 : vector<32x32xf32>
    %cst_36 = arith.constant dense<0.000000e+00> : vector<32xf32>
    %100 = vector.multi_reduction <add>, %97, %cst_36 [1] : vector<32x32xf32> to vector<32xf32>
    %101 = vector.shape_cast %100 : vector<32xf32> to vector<32x1xf32>
    %cst_37 = arith.constant 9.99999997E-7 : f32
    %102 = vector.broadcast %cst_37 : f32 to vector<32x1xf32>
    %103 = arith.addf %101, %102 : vector<32x1xf32>
    %104 = vector.broadcast %103 : vector<32x1xf32> to vector<32x32xf32>
    %105 = arith.divf %99, %104 : vector<32x32xf32>
    %cst_38 = arith.constant dense<0.000000e+00> : vector<32x16xf32>
    %106 = tpu.matmul %105, %88, %cst_38 {dimension_numbers = #tpu.dot_dimension_numbers<[1], [0], [0], [1], [0, 0, 1, 1], [], []>, precision = #tpu.contract_precision<fp32>} : vector<32x32xf32>, vector<32x16xf32>, vector<32x16xf32> -> vector<32x16xf32>
    %107 = vector.extract_strided_slice %105 {offsets = [0, 1], sizes = [1, 31], strides = [1, 1]} : vector<32x32xf32> to vector<1x31xf32>
    %108 = arith.addf %83, %107 : vector<1x31xf32>
    %109 = vector.extract_strided_slice %105 {offsets = [1, 1], sizes = [31, 31], strides = [1, 1]} : vector<32x32xf32> to vector<31x31xf32>
    %110 = arith.addf %85, %109 : vector<31x31xf32>
    %111 = vector.extract_strided_slice %8 {offsets = [0, 64], sizes = [32, 16], strides = [1, 1]} : vector<32x384xf32> to vector<32x16xf32>
    %112 = vector.extract_strided_slice %8 {offsets = [0, 192], sizes = [32, 16], strides = [1, 1]} : vector<32x384xf32> to vector<32x16xf32>
    %113 = vector.extract_strided_slice %8 {offsets = [0, 320], sizes = [32, 16], strides = [1, 1]} : vector<32x384xf32> to vector<32x16xf32>
    %cst_39 = arith.constant dense<0.000000e+00> : vector<32x32xf32>
    %114 = tpu.matmul %111, %112, %cst_39 {dimension_numbers = #tpu.dot_dimension_numbers<[1], [1], [0], [0], [0, 0, 1, 0], [], []>, precision = #tpu.contract_precision<fp32>} : vector<32x16xf32>, vector<32x16xf32>, vector<32x32xf32> -> vector<32x32xf32>
    %cst_40 = arith.constant 2.500000e-01 : f32
    %115 = vector.broadcast %cst_40 : f32 to vector<32x32xf32>
    %116 = arith.mulf %114, %115 : vector<32x32xf32>
    %cst_41 = arith.constant dense<0xFF800000> : vector<32xf32>
    %117 = vector.multi_reduction <maximumf>, %116, %cst_41 [1] : vector<32x32xf32> to vector<32xf32>
    %118 = vector.shape_cast %117 : vector<32xf32> to vector<32x1xf32>
    %119 = vector.broadcast %118 : vector<32x1xf32> to vector<32x32xf32>
    %120 = arith.subf %116, %119 : vector<32x32xf32>
    %121 = math.exp %120 : vector<32x32xf32>
    %122 = arith.mulf %121, %3 : vector<32x32xf32>
    %cst_42 = arith.constant 3.125000e-08 : f32
    %123 = vector.broadcast %cst_42 : f32 to vector<32x32xf32>
    %124 = arith.addf %122, %123 : vector<32x32xf32>
    %cst_43 = arith.constant dense<0.000000e+00> : vector<32xf32>
    %125 = vector.multi_reduction <add>, %122, %cst_43 [1] : vector<32x32xf32> to vector<32xf32>
    %126 = vector.shape_cast %125 : vector<32xf32> to vector<32x1xf32>
    %cst_44 = arith.constant 9.99999997E-7 : f32
    %127 = vector.broadcast %cst_44 : f32 to vector<32x1xf32>
    %128 = arith.addf %126, %127 : vector<32x1xf32>
    %129 = vector.broadcast %128 : vector<32x1xf32> to vector<32x32xf32>
    %130 = arith.divf %124, %129 : vector<32x32xf32>
    %cst_45 = arith.constant dense<0.000000e+00> : vector<32x16xf32>
    %131 = tpu.matmul %130, %113, %cst_45 {dimension_numbers = #tpu.dot_dimension_numbers<[1], [0], [0], [1], [0, 0, 1, 1], [], []>, precision = #tpu.contract_precision<fp32>} : vector<32x32xf32>, vector<32x16xf32>, vector<32x16xf32> -> vector<32x16xf32>
    %132 = vector.extract_strided_slice %130 {offsets = [0, 1], sizes = [1, 31], strides = [1, 1]} : vector<32x32xf32> to vector<1x31xf32>
    %133 = arith.addf %108, %132 : vector<1x31xf32>
    %134 = vector.extract_strided_slice %130 {offsets = [1, 1], sizes = [31, 31], strides = [1, 1]} : vector<32x32xf32> to vector<31x31xf32>
    %135 = arith.addf %110, %134 : vector<31x31xf32>
    %136 = vector.extract_strided_slice %8 {offsets = [0, 80], sizes = [32, 16], strides = [1, 1]} : vector<32x384xf32> to vector<32x16xf32>
    %137 = vector.extract_strided_slice %8 {offsets = [0, 208], sizes = [32, 16], strides = [1, 1]} : vector<32x384xf32> to vector<32x16xf32>
    %138 = vector.extract_strided_slice %8 {offsets = [0, 336], sizes = [32, 16], strides = [1, 1]} : vector<32x384xf32> to vector<32x16xf32>
    %cst_46 = arith.constant dense<0.000000e+00> : vector<32x32xf32>
    %139 = tpu.matmul %136, %137, %cst_46 {dimension_numbers = #tpu.dot_dimension_numbers<[1], [1], [0], [0], [0, 0, 1, 0], [], []>, precision = #tpu.contract_precision<fp32>} : vector<32x16xf32>, vector<32x16xf32>, vector<32x32xf32> -> vector<32x32xf32>
    %cst_47 = arith.constant 2.500000e-01 : f32
    %140 = vector.broadcast %cst_47 : f32 to vector<32x32xf32>
    %141 = arith.mulf %139, %140 : vector<32x32xf32>
    %cst_48 = arith.constant dense<0xFF800000> : vector<32xf32>
    %142 = vector.multi_reduction <maximumf>, %141, %cst_48 [1] : vector<32x32xf32> to vector<32xf32>
    %143 = vector.shape_cast %142 : vector<32xf32> to vector<32x1xf32>
    %144 = vector.broadcast %143 : vector<32x1xf32> to vector<32x32xf32>
    %145 = arith.subf %141, %144 : vector<32x32xf32>
    %146 = math.exp %145 : vector<32x32xf32>
    %147 = arith.mulf %146, %3 : vector<32x32xf32>
    %cst_49 = arith.constant 3.125000e-08 : f32
    %148 = vector.broadcast %cst_49 : f32 to vector<32x32xf32>
    %149 = arith.addf %147, %148 : vector<32x32xf32>
    %cst_50 = arith.constant dense<0.000000e+00> : vector<32xf32>
    %150 = vector.multi_reduction <add>, %147, %cst_50 [1] : vector<32x32xf32> to vector<32xf32>
    %151 = vector.shape_cast %150 : vector<32xf32> to vector<32x1xf32>
    %cst_51 = arith.constant 9.99999997E-7 : f32
    %152 = vector.broadcast %cst_51 : f32 to vector<32x1xf32>
    %153 = arith.addf %151, %152 : vector<32x1xf32>
    %154 = vector.broadcast %153 : vector<32x1xf32> to vector<32x32xf32>
    %155 = arith.divf %149, %154 : vector<32x32xf32>
    %cst_52 = arith.constant dense<0.000000e+00> : vector<32x16xf32>
    %156 = tpu.matmul %155, %138, %cst_52 {dimension_numbers = #tpu.dot_dimension_numbers<[1], [0], [0], [1], [0, 0, 1, 1], [], []>, precision = #tpu.contract_precision<fp32>} : vector<32x32xf32>, vector<32x16xf32>, vector<32x16xf32> -> vector<32x16xf32>
    %157 = vector.extract_strided_slice %155 {offsets = [0, 1], sizes = [1, 31], strides = [1, 1]} : vector<32x32xf32> to vector<1x31xf32>
    %158 = arith.addf %133, %157 : vector<1x31xf32>
    %159 = vector.extract_strided_slice %155 {offsets = [1, 1], sizes = [31, 31], strides = [1, 1]} : vector<32x32xf32> to vector<31x31xf32>
    %160 = arith.addf %135, %159 : vector<31x31xf32>
    %161 = vector.extract_strided_slice %8 {offsets = [0, 96], sizes = [32, 16], strides = [1, 1]} : vector<32x384xf32> to vector<32x16xf32>
    %162 = vector.extract_strided_slice %8 {offsets = [0, 224], sizes = [32, 16], strides = [1, 1]} : vector<32x384xf32> to vector<32x16xf32>
    %163 = vector.extract_strided_slice %8 {offsets = [0, 352], sizes = [32, 16], strides = [1, 1]} : vector<32x384xf32> to vector<32x16xf32>
    %cst_53 = arith.constant dense<0.000000e+00> : vector<32x32xf32>
    %164 = tpu.matmul %161, %162, %cst_53 {dimension_numbers = #tpu.dot_dimension_numbers<[1], [1], [0], [0], [0, 0, 1, 0], [], []>, precision = #tpu.contract_precision<fp32>} : vector<32x16xf32>, vector<32x16xf32>, vector<32x32xf32> -> vector<32x32xf32>
    %cst_54 = arith.constant 2.500000e-01 : f32
    %165 = vector.broadcast %cst_54 : f32 to vector<32x32xf32>
    %166 = arith.mulf %164, %165 : vector<32x32xf32>
    %cst_55 = arith.constant dense<0xFF800000> : vector<32xf32>
    %167 = vector.multi_reduction <maximumf>, %166, %cst_55 [1] : vector<32x32xf32> to vector<32xf32>
    %168 = vector.shape_cast %167 : vector<32xf32> to vector<32x1xf32>
    %169 = vector.broadcast %168 : vector<32x1xf32> to vector<32x32xf32>
    %170 = arith.subf %166, %169 : vector<32x32xf32>
    %171 = math.exp %170 : vector<32x32xf32>
    %172 = arith.mulf %171, %3 : vector<32x32xf32>
    %cst_56 = arith.constant 3.125000e-08 : f32
    %173 = vector.broadcast %cst_56 : f32 to vector<32x32xf32>
    %174 = arith.addf %172, %173 : vector<32x32xf32>
    %cst_57 = arith.constant dense<0.000000e+00> : vector<32xf32>
    %175 = vector.multi_reduction <add>, %172, %cst_57 [1] : vector<32x32xf32> to vector<32xf32>
    %176 = vector.shape_cast %175 : vector<32xf32> to vector<32x1xf32>
    %cst_58 = arith.constant 9.99999997E-7 : f32
    %177 = vector.broadcast %cst_58 : f32 to vector<32x1xf32>
    %178 = arith.addf %176, %177 : vector<32x1xf32>
    %179 = vector.broadcast %178 : vector<32x1xf32> to vector<32x32xf32>
    %180 = arith.divf %174, %179 : vector<32x32xf32>
    %cst_59 = arith.constant dense<0.000000e+00> : vector<32x16xf32>
    %181 = tpu.matmul %180, %163, %cst_59 {dimension_numbers = #tpu.dot_dimension_numbers<[1], [0], [0], [1], [0, 0, 1, 1], [], []>, precision = #tpu.contract_precision<fp32>} : vector<32x32xf32>, vector<32x16xf32>, vector<32x16xf32> -> vector<32x16xf32>
    %182 = vector.extract_strided_slice %180 {offsets = [0, 1], sizes = [1, 31], strides = [1, 1]} : vector<32x32xf32> to vector<1x31xf32>
    %183 = arith.addf %158, %182 : vector<1x31xf32>
    %184 = vector.extract_strided_slice %180 {offsets = [1, 1], sizes = [31, 31], strides = [1, 1]} : vector<32x32xf32> to vector<31x31xf32>
    %185 = arith.addf %160, %184 : vector<31x31xf32>
    %186 = vector.extract_strided_slice %8 {offsets = [0, 112], sizes = [32, 16], strides = [1, 1]} : vector<32x384xf32> to vector<32x16xf32>
    %187 = vector.extract_strided_slice %8 {offsets = [0, 240], sizes = [32, 16], strides = [1, 1]} : vector<32x384xf32> to vector<32x16xf32>
    %188 = vector.extract_strided_slice %8 {offsets = [0, 368], sizes = [32, 16], strides = [1, 1]} : vector<32x384xf32> to vector<32x16xf32>
    %cst_60 = arith.constant dense<0.000000e+00> : vector<32x32xf32>
    %189 = tpu.matmul %186, %187, %cst_60 {dimension_numbers = #tpu.dot_dimension_numbers<[1], [1], [0], [0], [0, 0, 1, 0], [], []>, precision = #tpu.contract_precision<fp32>} : vector<32x16xf32>, vector<32x16xf32>, vector<32x32xf32> -> vector<32x32xf32>
    %cst_61 = arith.constant 2.500000e-01 : f32
    %190 = vector.broadcast %cst_61 : f32 to vector<32x32xf32>
    %191 = arith.mulf %189, %190 : vector<32x32xf32>
    %cst_62 = arith.constant dense<0xFF800000> : vector<32xf32>
    %192 = vector.multi_reduction <maximumf>, %191, %cst_62 [1] : vector<32x32xf32> to vector<32xf32>
    %193 = vector.shape_cast %192 : vector<32xf32> to vector<32x1xf32>
    %194 = vector.broadcast %193 : vector<32x1xf32> to vector<32x32xf32>
    %195 = arith.subf %191, %194 : vector<32x32xf32>
    %196 = math.exp %195 : vector<32x32xf32>
    %197 = arith.mulf %196, %3 : vector<32x32xf32>
    %cst_63 = arith.constant 3.125000e-08 : f32
    %198 = vector.broadcast %cst_63 : f32 to vector<32x32xf32>
    %199 = arith.addf %197, %198 : vector<32x32xf32>
    %cst_64 = arith.constant dense<0.000000e+00> : vector<32xf32>
    %200 = vector.multi_reduction <add>, %197, %cst_64 [1] : vector<32x32xf32> to vector<32xf32>
    %201 = vector.shape_cast %200 : vector<32xf32> to vector<32x1xf32>
    %cst_65 = arith.constant 9.99999997E-7 : f32
    %202 = vector.broadcast %cst_65 : f32 to vector<32x1xf32>
    %203 = arith.addf %201, %202 : vector<32x1xf32>
    %204 = vector.broadcast %203 : vector<32x1xf32> to vector<32x32xf32>
    %205 = arith.divf %199, %204 : vector<32x32xf32>
    %cst_66 = arith.constant dense<0.000000e+00> : vector<32x16xf32>
    %206 = tpu.matmul %205, %188, %cst_66 {dimension_numbers = #tpu.dot_dimension_numbers<[1], [0], [0], [1], [0, 0, 1, 1], [], []>, precision = #tpu.contract_precision<fp32>} : vector<32x32xf32>, vector<32x16xf32>, vector<32x16xf32> -> vector<32x16xf32>
    %207 = vector.extract_strided_slice %205 {offsets = [0, 1], sizes = [1, 31], strides = [1, 1]} : vector<32x32xf32> to vector<1x31xf32>
    %208 = arith.addf %183, %207 : vector<1x31xf32>
    %209 = vector.extract_strided_slice %205 {offsets = [1, 1], sizes = [31, 31], strides = [1, 1]} : vector<32x32xf32> to vector<31x31xf32>
    %210 = arith.addf %185, %209 : vector<31x31xf32>
    %211 = tpu.concatenate %31, %56, %81, %106, %131, %156, %181, %206 in 1 : vector<32x16xf32>, vector<32x16xf32>, vector<32x16xf32>, vector<32x16xf32>, vector<32x16xf32>, vector<32x16xf32>, vector<32x16xf32>, vector<32x16xf32> -> vector<32x128xf32>
    %c0_67 = arith.constant 0 : index
    %c0_68 = arith.constant 0 : index
    %212 = vector.load %arg5[%c0_67, %c0_68] : memref<128x128xf32, #tpu.memory_space<vmem>>, vector<128x128xf32>
    %cst_69 = arith.constant dense<0.000000e+00> : vector<32x128xf32>
    %213 = tpu.matmul %211, %212, %cst_69 {dimension_numbers = #tpu.dot_dimension_numbers<[1], [0], [0], [1], [0, 0, 1, 1], [], []>, precision = #tpu.contract_precision<fp32>} : vector<32x128xf32>, vector<128x128xf32>, vector<32x128xf32> -> vector<32x128xf32>
    %c0_70 = arith.constant 0 : index
    %c0_71 = arith.constant 0 : index
    %214 = vector.load %arg6[%c0_70, %c0_71] : memref<1x128xf32, #tpu.memory_space<vmem>>, vector<1x128xf32>
    %215 = vector.broadcast %214 : vector<1x128xf32> to vector<32x128xf32>
    %216 = arith.addf %213, %215 : vector<32x128xf32>
    %c0_72 = arith.constant 0 : index
    %c0_73 = arith.constant 0 : index
    %c0_74 = arith.constant 0 : index
    %217 = vector.load %arg7[%c0_72, %c0_73, %c0_74] : memref<1x32x128xf32, #tpu.memory_space<vmem>>, vector<1x32x128xf32>
    %218 = vector.shape_cast %217 : vector<1x32x128xf32> to vector<32x128xf32>
    %219 = vector.shape_cast %216 : vector<32x128xf32> to vector<1x32x128xf32>
    tpu.vector_store %arg7[%c0_72, %c0_73, %c0_74], %219 {strides = array<i32>} : memref<1x32x128xf32, #tpu.memory_space<vmem>>, vector<1x32x128xf32>,
    %cst_75 = arith.constant 1.250000e-01 : f32
    %220 = vector.broadcast %cst_75 : f32 to vector<1x31xf32>
    %221 = arith.mulf %208, %220 : vector<1x31xf32>
    %c0_76 = arith.constant 0 : index
    %c0_77 = arith.constant 0 : index
    %c0_78 = arith.constant 0 : index
    %222 = vector.load %arg8[%c0_76, %c0_77, %c0_78] : memref<1x1x31xf32, #tpu.memory_space<vmem>>, vector<1x1x31xf32>
    %223 = vector.shape_cast %222 : vector<1x1x31xf32> to vector<1x31xf32>
    %224 = vector.shape_cast %221 : vector<1x31xf32> to vector<1x1x31xf32>
    tpu.vector_store %arg8[%c0_76, %c0_77, %c0_78], %224 {strides = array<i32>} : memref<1x1x31xf32, #tpu.memory_space<vmem>>, vector<1x1x31xf32>,
    %cst_79 = arith.constant 1.250000e-01 : f32
    %225 = vector.broadcast %cst_79 : f32 to vector<31x31xf32>
    %226 = arith.mulf %210, %225 : vector<31x31xf32>
    %c0_80 = arith.constant 0 : index
    %c0_81 = arith.constant 0 : index
    %c0_82 = arith.constant 0 : index
    %227 = vector.load %arg9[%c0_80, %c0_81, %c0_82] : memref<1x31x31xf32, #tpu.memory_space<vmem>>, vector<1x31x31xf32>
    %228 = vector.shape_cast %227 : vector<1x31x31xf32> to vector<31x31xf32>
    %229 = vector.shape_cast %226 : vector<31x31xf32> to vector<1x31x31xf32>
    tpu.vector_store %arg9[%c0_80, %c0_81, %c0_82], %229 {strides = array<i32>} : memref<1x31x31xf32, #tpu.memory_space<vmem>>, vector<1x31x31xf32>,
    return
  }
  func.func @transform_0(%arg0: i32) -> (i32, i32, i32) {
    %c0_i32 = arith.constant 0 : i32
    %c0_i32_0 = arith.constant 0 : i32
    %c0_i32_1 = arith.constant 0 : i32
    return %arg0, %c0_i32, %c0_i32_0 : i32, i32, i32
  }
  func.func @transform_1(%arg0: i32) -> (i32, i32, i32) {
    %c0_i32 = arith.constant 0 : i32
    %c0_i32_0 = arith.constant 0 : i32
    %c0_i32_1 = arith.constant 0 : i32
    return %arg0, %c0_i32, %c0_i32_0 : i32, i32, i32
  }
  func.func @transform_2(%arg0: i32) -> (i32, i32) {
    %c0_i32 = arith.constant 0 : i32
    %c0_i32_0 = arith.constant 0 : i32
    %c0_i32_1 = arith.constant 0 : i32
    return %c0_i32, %c0_i32_0 : i32, i32
  }
  func.func @transform_3(%arg0: i32) -> (i32, i32) {
    %c0_i32 = arith.constant 0 : i32
    %c0_i32_0 = arith.constant 0 : i32
    %c0_i32_1 = arith.constant 0 : i32
    return %c0_i32, %c0_i32_0 : i32, i32
  }
  func.func @transform_4(%arg0: i32) -> (i32, i32) {
    %c0_i32 = arith.constant 0 : i32
    %c0_i32_0 = arith.constant 0 : i32
    %c0_i32_1 = arith.constant 0 : i32
    return %c0_i32, %c0_i32_0 : i32, i32
  }
  func.func @transform_5(%arg0: i32) -> (i32, i32) {
    %c0_i32 = arith.constant 0 : i32
    %c0_i32_0 = arith.constant 0 : i32
    %c0_i32_1 = arith.constant 0 : i32
    return %c0_i32, %c0_i32_0 : i32, i32
  }
  func.func @transform_6(%arg0: i32) -> (i32, i32, i32) {
    %c0_i32 = arith.constant 0 : i32
    %c0_i32_0 = arith.constant 0 : i32
    %c0_i32_1 = arith.constant 0 : i32
    return %arg0, %c0_i32, %c0_i32_0 : i32, i32, i32
  }
  func.func @transform_7(%arg0: i32) -> (i32, i32, i32) {
    %c0_i32 = arith.constant 0 : i32
    %c0_i32_0 = arith.constant 0 : i32
    %c0_i32_1 = arith.constant 0 : i32
    return %arg0, %c0_i32, %c0_i32_0 : i32, i32, i32
  }
  func.func @transform_8(%arg0: i32) -> (i32, i32, i32) {
    %c0_i32 = arith.constant 0 : i32
    %c0_i32_0 = arith.constant 0 : i32
    %c0_i32_1 = arith.constant 0 : i32
    return %arg0, %c0_i32, %c0_i32_0 : i32, i32, i32
  }
}

</mosaic_0001>

<bundles_post_ra>
// kernel: tpu_custom_call.1
= control target key start
LH: loop header
LB: loop body
LE: loop exit
PB: predicated region body
PF: predicated region fallthrough
CT: control target
= control target key end

     0   :  { %s12572_s0 = inlined_call_operand.hbm [shape: f32[2,32,128], index: 0, kind: input, shape index: {}]   ;;  %s12573_s1 = inlined_call_operand.hbm [shape: f32[2,32,32], index: 1, kind: input, shape index: {}]   ;;  %s12574_s2 = inlined_call_operand.hbm [shape: f32[128,384], index: 2, kind: input, shape index: {}]   ;;  %s12575_s3 = inlined_call_operand.hbm [shape: f32[1,384], index: 3, kind: input, shape index: {}]   ;;  %s12576_s4 = inlined_call_operand.hbm [shape: f32[128,128], index: 4, kind: input, shape index: {}]   ;;  %s12577_s5 = inlined_call_operand.vmem [shape: f32[1,128], index: 5, kind: input, shape index: {}]   ;;  %s12578_s6 = inlined_call_operand.hbm [shape: f32[2,32,128], index: 6, kind: output, shape index: {0}]   ;;  %s12579_s7 = inlined_call_operand.hbm [shape: f32[2,1,31], index: 7, kind: output, shape index: {1}]   ;;  %s12580_s8 = inlined_call_operand.vmem [shape: f32[2,31,31], index: 8, kind: output, shape index: {2}]  }
   0x1   :  { %12646 = sst [smem:[#allocation147_spill]] %s12572_s0 }
   0x2   :  { %12647 = sst [smem:[#allocation148_spill]] %s12574_s2 }
   0x3   :  { %12648 = sst [smem:[#allocation149_spill]] %s12575_s3 }
   0x4   :  { %12649 = sst [smem:[#allocation150_spill]] %s12576_s4 }
   0x5   :  { %14 = vsyncpa [#allocation3], 0 }
   0x6   :  { %16 = vsyncpa [#allocation3 + $0x1], 0 }
   0x7   :  { %17 = vsyncpa [#allocation6], 0 }
   0x8   :  { %19 = vsyncpa [#allocation6 + $0x1], 0 }
   0x9   :  { %20 = vsyncpa [#allocation9], 0 }
   0xa   :  { %21 = vsyncpa [#allocation4], 0 }
   0xb   :  { %23 = vsyncpa [#allocation4 + $0x1], 0 }
   0xc   :  { %24 = vsyncpa [#allocation13], 0 }
   0xd   :  { %26 = vsyncpa [#allocation13 + $0x1], 0  ;;  %s9058_s27 = smov 0   ;;  %s9060_s28 = smov 0  }
   0xe   :  { %s9062_s29 = smov 0   ;;  %s9064_s30 = smov 0  }
   0xf LB: > { %12650 = sst [smem:[#allocation20_spill]] %s8990_s29  ;;  %s9079_s9 = sadd.s32 4294967295, %s8994_s30   ;;  %s8994_s30 = sphi %s9064_s30, %s13016_s30   ;;  %s8990_s29 = sphi %s9062_s29, %s13013_s29   ;;  %s8986_s28 = sphi %s9060_s28, %s13015_s28   ;;  %s8982_s27 = sphi %s9058_s27, %s13014_s27  }
  0x10   : > { %s8462_s10 = sadd.s32 4294967294, %s8994_s30   ;;  %p52_p0 = scmp.ne.s32.totalorder %s8986_s28, %s8982_s27 }
  0x11   : > { %p53_p1 = scmp.eq.s32.totalorder %s9079_s9, 0  ;;  %p186_p2 = scmp.eq.s32.totalorder %s9079_s9, 1 }
  0x12   : > { %p192_p3 = scmp.eq.s32.totalorder %s8462_s10, 1  ;;  %p8463_p5 = scmp.ge.s32.totalorder %s8994_s30, 1 }
  0x13   : > { %p9088_p4 = por %p53_p1, %p52_p0  ;;  %p251_p7 = scmp.lt.s32.totalorder %s8994_s30, 3 }
  0x14   : > { %p9093_p6 = por %p192_p3, %p52_p0  ;;  %s12653_s2 = sld [smem:[#allocation148_spill]] }
  0x15   : > { %p9101_p8 = pnand %p8463_p5, %p251_p7  ;;  %s8996_s17 = smov [#allocation7]  }
  0x16   : > { %s264_s18 = sshll.u32 %s8996_s17, 4  ;;  %s12656_s3 = sld [smem:[#allocation149_spill]]  ;;  %s265_s18 = int_to_ptr.vmem [resolvable:$true] %s264_s18 }
  0x17   : > { %p8512_p9 = pneg %p9101_p8  ;;  %s8997_s23 = smov 384  }
  0x18   : > { %s8998_s24 = smov 24   ;;  %s8999_s25 = smov [#allocation8]  }
  0x19   : > { %p9109_p10 = pnand %p8512_p9, %p53_p1  ;;  %s279_s26 = sshll.u32 %s8999_s25, 4  ;;  %s280_s26 = int_to_ptr.vmem [resolvable:$true] %s279_s26 }
  0x1a   : > { %s262_s15 = sshll.u32 %s12653_s2, 4  ;;  %s12657_s4 = sld [smem:[#allocation150_spill]]  ;;  %s263_s15 = int_to_ptr.hbm [resolvable:$true] %s262_s15 }
  0x1b   : > { %8515 = dma.hbm_to_vmem [thread:$0]  (!%p9109_p10), %s263_s15, 6144, %s265_s18, [#allocation6], %s8997_s23, %s8997_s23, %s8998_s24  }
  0x1c   : > { %s277_s22 = sshll.u32 %s12656_s3, 4  ;;  %s9000_s17 = smov [#allocation10]   ;;  %s278_s22 = int_to_ptr.hbm [resolvable:$true] %s277_s22 }
  0x1d   : > { %8518 = dma.hbm_to_vmem [thread:$0]  (!%p9109_p10), %s278_s22, 48, %s280_s26, [#allocation9]  }
  0x1e   : > { %s290_s20 = sshll.u32 %s9000_s17, 4  ;;  %s12581_s15 = smov 128   ;;  %s291_s20 = int_to_ptr.vmem [resolvable:$true] %s290_s20 }
  0x1f   : > { %s12583_s18 = smov 8   ;;  %s9130_s21 = sadd.s32 1, %s8994_s30  }
  0x20   : > { %s288_s14 = sshll.u32 %s12657_s4, 4  ;;  %s36_s23 = ssub.s32 %s8994_s30, %s9130_s21  ;;  %s289_s14 = int_to_ptr.hbm [resolvable:$true] %s288_s14 }
  0x21   : > { %8521 = dma.hbm_to_vmem [thread:$0]  (!%p9109_p10), %s289_s14, 2048, %s291_s20, [#allocation9], %s12581_s15, %s12581_s15, %s12583_s18  }
  0x22   : > { %s39_s24 = sadd.s32 1, %s8990_s29  ;;  %p37_p12 = scmp.eq.s32.totalorder %s36_s23, 0 }
  0x23   : > { %p46_p13 = scmp.ne.s32.totalorder %s8990_s29, %s8986_s28  ;;  %p47_p0 = scmp.eq.s32.totalorder %s8994_s30, 0 }
  0x24   : > { %p8539_p3 = scmp.lt.s32.totalorder %s8994_s30, 2  ;;  %s307_s25 = sand.u32 1, %s8990_s29  }
  0x25   : > { %s9140_s22 = scalar_select %p37_p12, %s8990_s29, %s39_s24  }
  0x26   : > { %p48_p5 = por %p47_p0, %p46_p13  ;;  %p9144_p7 = por %p186_p2, %p46_p13 }
  0x27   : > { %12658 = sst [smem:[#allocation21_spill]] %s9140_s22  ;;  %s8488_s26 = sshll.u32 %s8994_s30, 5 }
  0x28   : > { %s8468_s10 = sshll.u32 %s307_s25, 5  ;;  %s12660_s0 = sld [smem:[#allocation147_spill]] }
  0x29   : > { %s311_s23 = scalar_lea.vmem [#allocation2], %s8468_s10  ;;  %p9155_p9 = pnand %p8539_p3, %p48_p5 }
  0x2a   : > { %s319_s15 = sshll.u32 %s311_s23, 4  ;;  %s338_s3 = scalar_lea.hbm %s12573_s1, %s8488_s26  ;;  %s320_s15 = int_to_ptr.vmem [resolvable:$true] %s319_s15 }
  0x2b   : > { %s333_s4 = scalar_lea.vmem [#allocation5], %s8468_s10  ;;  %s339_s13 = sshll.u32 %s338_s3, 4  ;;  %s340_s13 = int_to_ptr.hbm [resolvable:$true] %s339_s13 }
  0x2c   : > { %s9162_s22 = sshll.u32 %s333_s4, 4  ;;  %s308_s14 = scalar_lea.sflag [#allocation3], %s307_s25  ;;  %s342_s22 = int_to_ptr.vmem [resolvable:$true] %s9162_s22 }
  0x2d   : > { %p8828_p10 = pneg %p9155_p9 }
  0x2e   : > { %s316_s17 = scalar_lea.hbm %s12660_s0, %s8488_s26  ;;  %s8831_s18 = scalar_lea.hbm %s12660_s0, 64 }
  0x2f   : > { %s317_s20 = sshll.u32 %s316_s17, 4  ;;  %s318_s20 = int_to_ptr.hbm [resolvable:$true] %s317_s20 }
  0x30   : > { %s8824_s17 = sshra.s32 %s318_s20, 4  ;;  %s8825_s17 = int_to_ptr.hbm [resolvable:$true] %s8824_s17 }
  0x31   : > { %s8826_s23 = scalar_lea.hbm %s8825_s17, 32  ;;  %p8832_p0 = scmp.lt.s32.totalorder %s8825_s17, %s12660_s0 }
  0x32   : > { %p8827_p2 = scmp.ne.s32.totalorder %s8825_s17, %s8826_s23  ;;  %p8833_p3 = scmp.lt.s32.totalorder %s8831_s18, %s8826_s23 }
  0x34   : > { %p8829_p12 = pnand %p8828_p10, %p8827_p2  ;;  %p8834_p5 = por %p8833_p3, %p8832_p0 }
  0x36   : > { %p8830_p13 = pneg %p8829_p12 }
  0x38   : > { %p8835_p11 = pnand %p8834_p5, %p8830_p13 }
  0x3a   : > { %8838 = shalt.err (!%p8835_p11)
}
  0x3b   : > { %s12662_s3 = smov 8   ;;  %s12663_s4 = smov 128  }
  0x3c   : > { %8525 = dma.hbm_to_vmem [thread:$0]  (!%p9155_p9), %s318_s20, 512, %s320_s15, %s308_s14, %s12663_s4, %s12663_s4, %s12662_s3  }
  0x3d   : > { %s329_s29 = sand.u32 1, %s8994_s30   ;;  %s8854_s2 = sshra.s32 %s340_s13, 4  ;;  %s8855_s2 = int_to_ptr.hbm [resolvable:$true] %s8854_s2 }
  0x3e   : > { %s330_s25 = scalar_lea.sflag [#allocation6], %s329_s29  ;;  %s8856_s17 = scalar_lea.hbm %s8855_s2, 32 }
  0x3f   : > { %p8857_p2 = scmp.ne.s32.totalorder %s8855_s2, %s8856_s17  ;;  %s8861_s26 = scalar_lea.hbm %s12573_s1, 64 }
  0x40   : > { %p8862_p13 = scmp.lt.s32.totalorder %s8855_s2, %s12573_s1  ;;  %p8863_p0 = scmp.lt.s32.totalorder %s8861_s26, %s8856_s17 }
  0x41   : > { %p8859_p11 = pnand %p8857_p2, %p8828_p10 }
  0x42   : > { %p8864_p3 = por %p8863_p0, %p8862_p13 }
  0x43   : > { %p8860_p12 = pneg %p8859_p11 }
  0x45   : > { %p8865_p5 = pnand %p8864_p3, %p8860_p12 }
  0x47   : > { %8868 = shalt.err (!%p8865_p5)
}
  0x48   : > { %8528 = dma.hbm_to_vmem [thread:$0]  (!%p9155_p9), %s340_s13, 512, %s342_s22, %s330_s25, %s12663_s4, %s12663_s4, %s12662_s3  }
  0x49   : > { %353 = sbr.rel (%p9101_p8) target bundleno = 4729 (0x1279), region = 44 }
  0x4e   : > { %s9199_s15 = sand.u32 1, %s8986_s28  }
  0x4f   : > { %s9202_s0 = sshll.u32 %s9199_s15, 5  ;;  %s356_s20 = scalar_lea.sflag [#allocation3], %s9199_s15 }
  0x50   : > { %s9206_s14 = scalar_lea.vmem [#allocation2], %s9202_s0 }
  0x51   : > { %8957 = dma.done.wait (%p9088_p4), %s356_s20, 512  }
  0x52   : > { %8959 = vsyncadd (%p9088_p4), %s356_s20, 4294966784  ;;  %s365_s16 = sand.u32 1, %s9079_s9   ;;  %s9214_s24 = scalar_lea.vmem [#allocation5], %s9202_s0 }
  0x53   : > { %s366_s22 = scalar_lea.sflag [#allocation6], %s365_s16 }
  0x54   : > { %8961 = dma.done.wait (%p9088_p4), %s366_s22, 512  }
  0x55   : > { %8963 = vsyncadd (%p9088_p4), %s366_s22, 4294966784 }
  0x56   : > { %8965 = dma.done.wait (%p53_p1), [#allocation6], 6144  }
  0x57   : > { %8967 = vsyncadd (%p53_p1), [#allocation6], 4294961152 }
  0x58   : > { %8969 = dma.done.wait (%p53_p1), [#allocation9], 2096  }
  0x59   : > { %8971 = vsyncadd (%p53_p1), [#allocation9], 4294965200  ;;  %v490_v0 = vld [vmem:[#allocation7 + $0x168] sm:$0xff]  ;;  %v487_v1 = vld [vmem:[#allocation7 + $0x150] sm:$0xff]  ;;  %vm1803_vm0 = vcmask 130048   ;;  %vm2110_vm1 = vcmask 261120  }
  0x5a   : > { %v484_v2 = vld [vmem:[#allocation7 + $0x138] sm:$0xff]  ;;  %v9228_v3 = vand.u32 4294901760, %v490_v0  ;;  %v9230_v4 = vand.u32 4294901760, %v487_v1  ;;  %v481_v6 = vld [vmem:[#allocation7 + $0x120] sm:$0xff]  ;;  %v478_v7 = vld [vmem:[#allocation7 + $0x108] sm:$0xff]  ;;  %s9003_s11 = smov 112  }
  0x5b   : > { %v9232_v5 = vand.u32 4294901760, %v484_v2  ;;  %v475_v8 = vld [vmem:[#allocation7 + $0xf0] sm:$0xff]  ;;  %v9234_v9 = vand.u32 4294901760, %v481_v6  ;;  %v9236_v10 = vand.u32 4294901760, %v478_v7  ;;  %v472_v12 = vld [vmem:[#allocation7 + $0xd8] sm:$0xff]  ;;  %v469_v13 = vld [vmem:[#allocation7 + $0xc0] sm:$0xff] }
  0x5c   : > { %v9238_v11 = vand.u32 4294901760, %v475_v8  ;;  %502 = vmatpush.msra.mxu0 %v9228_v3  ;;  %v9242_v14 = vsub.f32 %v490_v0, %v9228_v3  ;;  %v9245_v15 = vsub.f32 %v487_v1, %v9230_v4  ;;  %749 = vmatpush.msra.mxu3 %v9228_v3  ;;  %v9251_v17 = vand.u32 4294901760, %v472_v12  ;;  %v466_v18 = vld [vmem:[#allocation7 + $0xa8] sm:$0xff]  ;;  %v463_v26 = vld [vmem:[#allocation7 + $0x90] sm:$0xff]  ;;  %v460_v36 = vld [vmem:[#allocation7 + $0x78] sm:$0xff]  ;;  %s9004_s13 = smov 96  }
  0x5d   : > { %v9249_v16 = vsub.f32 %v484_v2, %v9232_v5  ;;  %v9254_v19 = vsub.f32 %v481_v6, %v9234_v9  ;;  %v9257_v20 = vsub.f32 %v478_v7, %v9236_v10  ;;  %v9267_v25 = vand.u32 4294901760, %v469_v13  ;;  %v457_v41 = vld [vmem:[#allocation7 + $0x60] sm:$0xff]  ;;  %v454_v49 = vld [vmem:[#allocation7 + $0x48] sm:$0xff]  ;;  %v451_v55 = vld [vmem:[#allocation7 + $0x30] sm:$0xff]  ;;  %s9005_s3 = smov 80   ;;  %s9006_s4 = smov 64  }
  0x5e   : > { %v9260_v21 = vsub.f32 %v475_v8, %v9238_v11  ;;  %504 = vmatpush.msra.mxu0 %v9230_v4  ;;  %681 = vmatpush.msra.mxu2 %v9242_v14  ;;  %v12601_v22 = vand.u32 4294901760, %v9242_v14  ;;  %v12599_v23 = vand.u32 4294901760, %v9245_v15  ;;  %v9271_v28 = vand.u32 4294901760, %v466_v18  ;;  %v437_v56 = vld [vmem:[%s9206_s14] sm:$0xff]  ;;  %v448_v62 = vld [vmem:[#allocation7 + $0x18] sm:$0xff]  ;;  %v491_v6 = vld [vmem:[#allocation7 + $0x170] sm:$0xff] }
  0x5f   : > { %v12597_v24 = vand.u32 4294901760, %v9249_v16  ;;  %751 = vmatpush.msra.mxu3 %v9230_v4  ;;  %v12596_v27 = vand.u32 4294901760, %v9254_v19  ;;  %v9274_v29 = vsub.f32 %v472_v12, %v9251_v17  ;;  %v12595_v33 = vand.u32 4294901760, %v9257_v20  ;;  %v445_v12 = vld [vmem:[#allocation7] sm:$0xff]  ;;  %s9007_s29 = smov 48   ;;  %s9008_s25 = smov 32  }
  0x60   : > { %506 = vmatpush.msra.mxu0 %v9232_v5  ;;  %684 = vmatpush.msra.mxu2 %v9245_v15  ;;  %v569_v30 = vsub.f32 %v9242_v14, %v12601_v22  ;;  %v575_v31 = vsub.f32 %v9245_v15, %v12599_v23  ;;  %v9289_v34 = vand.u32 4294901760, %v463_v26  ;;  %v12593_v35 = vand.u32 4294901760, %v9260_v21  ;;  %v473_v22 = vld [vmem:[#allocation7 + $0xe0] sm:$0xff]  ;;  %s9009_s2 = smov 16   ;;  %s9010_s17 = smov 127  }
  0x61   : > { %v581_v32 = vsub.f32 %v9249_v16, %v12597_v24  ;;  %753 = vmatpush.msra.mxu3 %v9232_v5  ;;  %v587_v39 = vsub.f32 %v9254_v19, %v12596_v27  ;;  %v9298_v40 = vsub.f32 %v469_v13, %v9267_v25  ;;  %v12592_v42 = vand.u32 4294901760, %v9274_v29  ;;  %v476_v24 = vld [vmem:[#allocation7 + $0xf8] sm:$0xff]  ;;  %p432_p1 = scmp.lt.s32.totalorder %s9079_s9, 1 }
  0x62   : > { %508 = vmatpush.msra.mxu0 %v9234_v9  ;;  %v570_v37 = vand.u32 4294901760, %v569_v30  ;;  %687 = vmatpush.msra.mxu2 %v9249_v16  ;;  %v576_v38 = vand.u32 4294901760, %v575_v31  ;;  %v9303_v43 = vsub.f32 %v466_v18, %v9271_v28  ;;  %v593_v45 = vsub.f32 %v9257_v20, %v12595_v33  ;;  %v438_v31 = vld [vmem:[%s9206_s14 + $0x8] sm:$0xff] }
  0x63   : > { %755 = vmatpush.msra.mxu3 %v9234_v9  ;;  %v582_v44 = vand.u32 4294901760, %v581_v32  ;;  %v9309_v46 = vand.u32 4294901760, %v460_v36  ;;  %v599_v47 = vsub.f32 %v9260_v21, %v12593_v35  ;;  %v9316_v48 = vand.u32 4294901760, %v457_v41  ;;  %s433_s23 = scalar_select %p432_p1, %s9079_s9, 1 }
  0x64   : > { %510 = vmatpush.msra.mxu0 %v9236_v10  ;;  %571 = vmatpush.msra.mxu1 %v570_v37  ;;  %v588_v50 = vand.u32 4294901760, %v587_v39  ;;  %v12591_v51 = vand.u32 4294901760, %v9298_v40  ;;  %v9321_v52 = vsub.f32 %v463_v26, %v9289_v34  ;;  %v605_v53 = vsub.f32 %v9274_v29, %v12592_v42  ;;  %v479_v42 = vld [vmem:[#allocation7 + $0x110] sm:$0xff] }
  0x65   : > { %690 = vmatpush.msra.mxu2 %v9254_v19  ;;  %757 = vmatpush.msra.mxu3 %v9236_v10  ;;  %v12589_v54 = vand.u32 4294901760, %v9303_v43  ;;  %v594_v57 = vand.u32 4294901760, %v593_v45  ;;  %v9331_v58 = vand.u32 4294901760, %v454_v49  ;;  %v9334_v59 = vsub.f32 %v460_v36, %v9309_v46  ;;  %v488_v45 = vld [vmem:[#allocation7 + $0x158] sm:$0xff]  ;;  %s8490_s18 = sshll.u32 %s433_s23, 5 }
  0x66   : > { %512 = vmatpush.msra.mxu0 %v9238_v11  ;;  %577 = vmatpush.msra.mxu1 %v576_v38  ;;  %v600_v60 = vand.u32 4294901760, %v599_v47  ;;  %v9339_v61 = vsub.f32 %v457_v41, %v9316_v48  ;;  %v611_v63 = vsub.f32 %v9298_v40, %v12591_v51  ;;  %v9345_v0 = vand.u32 4294901760, %v451_v55  ;;  %s12486_s20 = scalar_lea.vmem %s12580_s8, %s8490_s18 }
  0x67   : > { %693 = vmatpush.msra.mxu2 %v9257_v20  ;;  %759 = vmatpush.msra.mxu3 %v9238_v11  ;;  %v12588_v1 = vand.u32 4294901760, %v9321_v52  ;;  %v9348_v2 = vand.u32 4294901760, %v437_v56  ;;  %v606_v7 = vand.u32 4294901760, %v605_v53  ;;  %v617_v8 = vsub.f32 %v9303_v43, %v12589_v54 }
  0x68   : > { %514 = vmatpush.msra.mxu0 %v9251_v17  ;;  %583 = vmatpush.msra.mxu1 %v582_v44  ;;  %v9356_v13 = vand.u32 4294901760, %v448_v62  ;;  %v12587_v18 = vand.u32 4294901760, %v9334_v59  ;;  %v9360_v26 = vsub.f32 %v454_v49, %v9331_v58  ;;  %v12586_v32 = vand.u32 4294901760, %v9339_v61 }
  0x69   : > { %696 = vmatpush.msra.mxu2 %v9260_v21  ;;  %761 = vmatpush.msra.mxu3 %v9251_v17  ;;  %v9363_v30 = vsub.f32 %v437_v56, %v9348_v2  ;;  %v9369_v36 = vand.u32 4294901760, %v491_v6  ;;  %v612_v37 = vand.u32 4294901760, %v611_v63  ;;  %v623_v38 = vsub.f32 %v9321_v52, %v12588_v1 }
  0x6a   : > { %516 = vmatpush.msra.mxu0 %v9267_v25  ;;  %589 = vmatpush.msra.mxu1 %v588_v50  ;;  %12664 = vst [vmem:[#allocation22_spill] sm:$0xff] %v9356_v13  ;;  %v9375_v39 = vand.u32 4294901760, %v445_v12  ;;  %v9378_v41 = vsub.f32 %v451_v55, %v9345_v0  ;;  %v9385_v47 = vand.u32 4294901760, %v438_v31  ;;  %v618_v49 = vand.u32 4294901760, %v617_v8 }
  0x6b   : > { %699 = vmatpush.msra.mxu2 %v9274_v29  ;;  %763 = vmatpush.msra.mxu3 %v9267_v25  ;;  %12665 = vst [vmem:[#allocation23_spill] sm:$0xff] %v9363_v30  ;;  %v9383_v44 = vand.u32 4294901760, %v9363_v30  ;;  %v629_v50 = vsub.f32 %v9334_v59, %v12587_v18  ;;  %v12590_v53 = vand.u32 4294901760, %v9360_v26  ;;  %v9393_v55 = vsub.f32 %v448_v62, %v9356_v13  ;;  %v482_v18 = vld [vmem:[#allocation7 + $0x128] sm:$0xff] }
  0x6c   : > { %518 = vmatpush.msra.mxu0 %v9271_v28  ;;  %595 = vmatpush.msra.mxu1 %v594_v57  ;;  %12666 = vst [vmem:[#allocation24_spill] sm:$0xff] %v9375_v39  ;;  %v635_v56 = vsub.f32 %v9339_v61, %v12586_v32  ;;  %v9401_v57 = vsub.f32 %v491_v6, %v9369_v36  ;;  %v624_v63 = vand.u32 4294901760, %v623_v38  ;;  %v9408_v8 = vand.u32 4294901760, %v488_v45 }
  0x6d   : > { %702 = vmatpush.msra.mxu2 %v9298_v40  ;;  %765 = vmatpush.msra.mxu3 %v9271_v28  ;;  %12667 = vst [vmem:[#allocation25_spill] sm:$0xff] %v9383_v44  ;;  %v9406_v62 = vsub.f32 %v445_v12, %v9375_v39  ;;  %v536_v6 = vsub.f32 %v9363_v30, %v9383_v44  ;;  %v12598_v38 = vand.u32 4294901760, %v9393_v55  ;;  %v9435_v51 = vand.u32 4294901760, %v482_v18 }
  0x6e   : > { %520 = vmatpush.msra.mxu0 %v9289_v34  ;;  %601 = vmatpush.msra.mxu1 %v600_v60  ;;  %v485_v60 = vld [vmem:[#allocation7 + $0x140] sm:$0xff]  ;;  %12668 = vst [vmem:[#allocation26_spill] sm:$0xff] %v9408_v8  ;;  %v9415_v32 = vsub.f32 %v438_v31, %v9385_v47  ;;  %v641_v12 = vsub.f32 %v9360_v26, %v12590_v53  ;;  %v636_v54 = vand.u32 4294901760, %v635_v56  ;;  %v12600_v31 = vand.u32 4294901760, %v9401_v57  ;;  %v439_v56 = vld [vmem:[%s9206_s14 + $0x10] sm:$0xff] }
  0x6f   : > { %705 = vmatpush.msra.mxu2 %v9303_v43  ;;  %767 = vmatpush.msra.mxu3 %v9289_v34  ;;  %v9422_v1 = vand.u32 4294901760, %v485_v60  ;;  %v9433_v53 = vsub.f32 %v488_v45, %v9408_v8  ;;  %v9439_v35 = vand.u32 4294901760, %v536_v6  ;;  %v653_v45 = vsub.f32 %v9393_v55, %v12598_v38 }
  0x70   : > { %522 = vmatpush.msra.mxu0 %v9309_v46  ;;  %607 = vmatpush.msra.mxu1 %v606_v7  ;;  %v12594_v7 = vand.u32 4294901760, %v9378_v41  ;;  %12669 = vst [vmem:[#allocation27_spill] sm:$0xff] %v9415_v32  ;;  %v1003_v6 = vsub.f32 %v9401_v57, %v12600_v31  ;;  %v9457_v27 = vand.u32 4294901760, %v479_v42  ;;  %v9467_v23 = vsub.f32 %v482_v18, %v9435_v51 }
  0x71   : > { %708 = vmatpush.msra.mxu2 %v9321_v52  ;;  %769 = vmatpush.msra.mxu3 %v9309_v46  ;;  %12670 = vst [vmem:[#allocation28_spill] sm:$0xff] %v9439_v35  ;;  %v9450_v33 = vsub.f32 %v485_v60, %v9422_v1 }
  0x72   : > { %524 = vmatpush.msra.mxu0 %v9316_v48  ;;  %613 = vmatpush.msra.mxu1 %v612_v37  ;;  %v630_v37 = vand.u32 4294901760, %v629_v50  ;;  %v12602_v50 = vand.u32 4294901760, %v9406_v62  ;;  %v1004_v18 = vand.u32 4294901760, %v1003_v6  ;;  %v9481_v38 = vsub.f32 %v479_v42, %v9457_v27 }
  0x73   : > { %711 = vmatpush.msra.mxu2 %v9334_v59  ;;  %771 = vmatpush.msra.mxu3 %v9316_v48  ;;  %v9492_v6 = vand.u32 4294901760, %v473_v22 }
  0x74   : > { %526 = vmatpush.msra.mxu0 %v9331_v58  ;;  %619 = vmatpush.msra.mxu1 %v618_v49  ;;  %v647_v49 = vsub.f32 %v9378_v41, %v12594_v7  ;;  %v642_v7 = vand.u32 4294901760, %v641_v12  ;;  %v659_v60 = vsub.f32 %v9406_v62, %v12602_v50 }
  0x75   : > { %714 = vmatpush.msra.mxu2 %v9339_v61  ;;  %773 = vmatpush.msra.mxu3 %v9331_v58 }
  0x76   : > { %528 = vmatpush.msra.mxu0 %v9345_v0  ;;  %625 = vmatpush.msra.mxu1 %v624_v63  ;;  %v9443_v63 = vand.u32 4294901760, %v9415_v32  ;;  %v648_v12 = vand.u32 4294901760, %v647_v49  ;;  %v654_v49 = vand.u32 4294901760, %v653_v45  ;;  %v660_v45 = vand.u32 4294901760, %v659_v60 }
  0x77   : > { %717 = vmatpush.msra.mxu2 %v9360_v26  ;;  %775 = vmatpush.msra.mxu3 %v9345_v0 }
  0x78   : > { %12671 = vst [vmem:[#allocation29_spill] sm:$0xff] %v9443_v63  ;;  %530 = vmatpush.msra.mxu0 %v9356_v13  ;;  %631 = vmatpush.msra.mxu1 %v630_v37  ;;  %v9459_v37 = vand.u32 4294901760, %v439_v56  ;;  %v544_v31 = vsub.f32 %v9415_v32, %v9443_v63 }
  0x79   : > { %720 = vmatpush.msra.mxu2 %v9378_v41  ;;  %777 = vmatpush.msra.mxu3 %v9356_v13  ;;  %v9476_v13 = vand.u32 4294901760, %v476_v24 }
  0x7a   : > { %532 = vmatpush.msra.mxu0 %v9375_v39  ;;  %637 = vmatpush.msra.mxu1 %v636_v54  ;;  %v12672_v54 = vand.u32 4294901760, %v9242_v14  ;;  %v12673_v14 = vand.u32 4294901760, %v9245_v15  ;;  %v9496_v42 = vand.u32 4294901760, %v544_v31  ;;  %v12677_v15 = vand.u32 4294901760, %v9450_v33  ;;  %v464_v31 = vld [vmem:[#allocation7 + $0x98] sm:$0xff] }
  0x7b   : > { %538 = vmatmul.f32.vlgmr.msra.gmra.mxu0 %v9439_v35  ;;  %723 = vmatpush.msra.mxu2 %v9393_v55  ;;  %v9484_v35 = vsub.f32 %v439_v56, %v9459_v37  ;;  %v12676_v56 = vand.u32 4294901760, %v9249_v16  ;;  %v9504_v60 = vsub.f32 %v476_v24, %v9476_v13  ;;  %v12678_v16 = vand.u32 4294901760, %v9254_v19 }
  0x7c   : > { %643 = vmatpush.msra.mxu1 %v642_v7  ;;  %808 = vmatpush.msrb.mxu0 %v12672_v54  ;;  %v470_v7 = vld [vmem:[#allocation7 + $0xc8] sm:$0xff]  ;;  %v12674_v54 = vand.u32 4294901760, %v9433_v53  ;;  %12675 = vst [vmem:[#allocation30_spill] sm:$0xff] %v9496_v42  ;;  %v12679_v24 = vand.u32 4294901760, %v9467_v23  ;;  %v12680_v19 = vand.u32 4294901760, %v9257_v20  ;;  %v12682_v20 = vand.u32 4294901760, %v9260_v21 }
  0x7d   : > { %726 = vmatpush.msra.mxu2 %v9406_v62  ;;  %779 = vmatpush.msra.mxu3 %v9375_v39  ;;  %v440_v39 = vld [vmem:[%s9206_s14 + $0x18] sm:$0xff]  ;;  %v12683_v21 = vand.u32 4294901760, %v9504_v60  ;;  %s424_s14 = scalar_lea.vmem [#allocation12], %s9199_s15 }
  0x7e   : > { %649 = vmatpush.msra.mxu1 %v648_v12  ;;  %812 = vmatpush.msrb.mxu0 %v12673_v14  ;;  %v1009_v50 = vsub.f32 %v9433_v53, %v12674_v54  ;;  %v1015_v12 = vsub.f32 %v9450_v33, %v12677_v15  ;;  %v9506_v14 = vand.u32 4294901760, %v470_v7  ;;  %v467_v54 = vld [vmem:[#allocation7 + $0xb0] sm:$0xff]  ;;  %v1021_v15 = vsub.f32 %v9467_v23, %v12679_v24 }
  0x7f   : > { %729 = vmatmul.f32.vlgmr.msra.gmra.mxu2 %v9363_v30  ;;  %783 = vmatmul.f32.vlgmr.msra.gmra.mxu3 %v9383_v44  ;;  %v9520_v44 = vsub.f32 %v473_v22, %v9492_v6  ;;  %v9526_v30 = vand.u32 4294901760, %v440_v39 }
  0x80   : > { %655 = vmatpush.msra.mxu1 %v654_v49  ;;  %816 = vmatpush.msrb.mxu0 %v12676_v56  ;;  %v9512_v49 = vand.u32 4294901760, %v9484_v35  ;;  %v1010_v56 = vand.u32 4294901760, %v1009_v50  ;;  %v1016_v50 = vand.u32 4294901760, %v1015_v12  ;;  %v9533_v22 = vsub.f32 %v470_v7, %v9506_v14 }
  0x81   : > { %936 = vmatpush.msrb.mxu2 %v9369_v36  ;;  %1005 = vmatpush.msrb.mxu3 %v1004_v18  ;;  %v9524_v18 = vand.u32 4294901760, %v467_v54  ;;  %v1022_v12 = vand.u32 4294901760, %v1021_v15  ;;  %v12617_v7 = vand.u32 4294901760, %v9520_v44 }
  0x82   : > { %661 = vmatpush.msra.mxu1 %v660_v45  ;;  %820 = vmatpush.msrb.mxu0 %v12678_v16  ;;  %v12681_v16 = vand.u32 4294901760, %v9481_v38  ;;  %v458_v45 = vld [vmem:[#allocation7 + $0x68] sm:$0xff] }
  0x83   : > { %938 = vmatpush.msrb.mxu2 %v9408_v8  ;;  %546 = vmatmul.f32.gmra.mxu0 %v9496_v42  ;;  %v552_v42 = vsub.f32 %v9484_v35, %v9512_v49  ;;  %v461_v8 = vld [vmem:[#allocation7 + $0x80] sm:$0xff]  ;;  %v9574_v15 = vand.u32 4294901760, %v458_v45 }
  0x84   : > { %663 = vmatmul.f32.vlgmr.msra.gmra.mxu1 %v9348_v2  ;;  %824 = vmatpush.msrb.mxu0 %v12680_v19  ;;  %v1027_v24 = vsub.f32 %v9481_v38, %v12681_v16  ;;  %v9545_v19 = vand.u32 4294901760, %v464_v31  ;;  %v9553_v16 = vsub.f32 %v440_v39, %v9526_v30 }
  0x85   : > { %887 = vmatpush.msrb.mxu1 %v9228_v3  ;;  %940 = vmatpush.msrb.mxu2 %v9422_v1  ;;  %v9550_v3 = vsub.f32 %v467_v54, %v9524_v18  ;;  %v9565_v39 = vand.u32 4294901760, %v552_v42 }
  0x86   : > { %1011 = vmatpush.msrb.mxu3 %v1010_v56  ;;  %828 = vmatpush.msrb.mxu0 %v12682_v20  ;;  %v1033_v56 = vsub.f32 %v9504_v60, %v12683_v21  ;;  %v9560_v20 = vand.u32 4294901760, %v461_v8  ;;  %v1028_v54 = vand.u32 4294901760, %v1027_v24  ;;  %v9572_v21 = vsub.f32 %v464_v31, %v9545_v19 }
  0x87   : > { %889 = vmatpush.msrb.mxu1 %v9230_v4  ;;  %942 = vmatpush.msrb.mxu2 %v9435_v51  ;;  %v12684_v4 = vand.u32 4294901760, %v9274_v29  ;;  %v9581_v42 = vand.u32 4294901760, %v9553_v16  ;;  %v12686_v31 = vand.u32 4294901760, %v9533_v22  ;;  %v9599_v29 = vsub.f32 %v458_v45, %v9574_v15 }
  0x88   : > { %1017 = vmatpush.msrb.mxu3 %v1016_v50  ;;  %734 = vmatmul.f32.gmra.mxu2 %v9415_v32  ;;  %v1039_v50 = vsub.f32 %v9520_v44, %v12617_v7  ;;  %v455_v32 = vld [vmem:[#allocation7 + $0x50] sm:$0xff]  ;;  %v1034_v24 = vand.u32 4294901760, %v1033_v56  ;;  %v452_v7 = vld [vmem:[#allocation7 + $0x38] sm:$0xff]  ;;  %v446_v56 = vld [vmem:[#allocation7 + $0x8] sm:$0xff] }
  0x89   : > { %832 = vmatpush.msrb.mxu0 %v12684_v4  ;;  %891 = vmatpush.msrb.mxu1 %v9232_v5  ;;  %v12685_v5 = vand.u32 4294901760, %v9298_v40  ;;  %v9589_v4 = vsub.f32 %v461_v8, %v9560_v20  ;;  %v9592_v40 = vand.u32 4294901760, %v455_v32  ;;  %v12688_v8 = vand.u32 4294901760, %v9550_v3 }
  0x8a   : > { %944 = vmatpush.msrb.mxu2 %v9457_v27  ;;  %1023 = vmatpush.msrb.mxu3 %v1022_v12  ;;  %v1045_v12 = vsub.f32 %v9533_v22, %v12686_v31  ;;  %v449_v31 = vld [vmem:[#allocation7 + $0x20] sm:$0xff] }
  0x8b   : > { %789 = vmatmul.f32.gmra.mxu3 %v9443_v63  ;;  %836 = vmatpush.msrb.mxu0 %v12685_v5  ;;  %v1040_v5 = vand.u32 4294901760, %v1039_v50  ;;  %v560_v63 = vsub.f32 %v9553_v16, %v9581_v42  ;;  %v12689_v50 = vand.u32 4294901760, %v9321_v52 }
  0x8c   : > { %893 = vmatpush.msrb.mxu1 %v9234_v9  ;;  %946 = vmatpush.msrb.mxu2 %v9476_v13  ;;  %v12687_v9 = vand.u32 4294901760, %v9303_v43  ;;  %v9608_v43 = vand.u32 4294901760, %v452_v7  ;;  %v1046_v45 = vand.u32 4294901760, %v1045_v12 }
  0x8d   : > { %1029 = vmatpush.msrb.mxu3 %v1028_v54  ;;  %554 = vmatmul.f32.gmra.mxu0 %v9565_v39  ;;  %v1051_v54 = vsub.f32 %v9550_v3, %v12688_v8  ;;  %v9618_v8 = vand.u32 4294901760, %v449_v31 }
  0x8e   : > { %667 = vmatmul.f32.gmra.mxu1 %v9385_v47  ;;  %840 = vmatpush.msrb.mxu0 %v12687_v9  ;;  %v9628_v9 = vand.u32 4294901760, %v560_v63 }
  0x8f   : > { %895 = vmatpush.msrb.mxu1 %v9236_v10  ;;  %948 = vmatpush.msrb.mxu2 %v9492_v6  ;;  %v9616_v10 = vsub.f32 %v455_v32, %v9592_v40  ;;  %v9631_v32 = vsub.f32 %v452_v7, %v9608_v43  ;;  %v9644_v63 = vsub.f32 %v449_v31, %v9618_v8  ;;  %v12695_v31 = vand.u32 4294901760, %v9360_v26 }
  0x90   : > { %1035 = vmatpush.msrb.mxu3 %v1034_v24  ;;  %844 = vmatpush.msrb.mxu0 %v12689_v50  ;;  %v12690_v24 = vand.u32 4294901760, %v9572_v21  ;;  %v12691_v50 = vand.u32 4294901760, %v9334_v59  ;;  %v12693_v59 = vand.u32 4294901760, %v9339_v61 }
  0x91   : > { %897 = vmatpush.msrb.mxu1 %v9238_v11  ;;  %950 = vmatpush.msrb.mxu2 %v9506_v14  ;;  %v1052_v11 = vand.u32 4294901760, %v1051_v54  ;;  %v12694_v54 = vand.u32 4294901760, %v9599_v29  ;;  %v1080_v61 = vand.u32 4294901760, %v9631_v32 }
  0x92   : > { %1041 = vmatpush.msrb.mxu3 %v1040_v5  ;;  %739 = vmatmul.f32.gmra.mxu2 %v9484_v35  ;;  %v1057_v52 = vsub.f32 %v9572_v21, %v12690_v24  ;;  %v9633_v5 = vand.u32 4294901760, %v446_v56  ;;  %v12692_v24 = vand.u32 4294901760, %v9589_v4 }
  0x93   : > { %848 = vmatpush.msrb.mxu0 %v12691_v50  ;;  %899 = vmatpush.msrb.mxu1 %v9251_v17  ;;  %v1074_v17 = vand.u32 4294901760, %v9616_v10 }
  0x94   : > { %952 = vmatpush.msrb.mxu2 %v9524_v18  ;;  %1047 = vmatpush.msrb.mxu3 %v1046_v45  ;;  %v1063_v12 = vsub.f32 %v9589_v4, %v12692_v24  ;;  %v1058_v7 = vand.u32 4294901760, %v1057_v52  ;;  %v1069_v45 = vsub.f32 %v9599_v29, %v12694_v54  ;;  %v9654_v50 = vsub.f32 %v446_v56, %v9633_v5  ;;  %v12700_v54 = vld [vmem:[#allocation22_spill] sm:$0xff] }
  0x95   : > { %795 = vmatmul.f32.gmra.mxu3 %v9512_v49  ;;  %852 = vmatpush.msrb.mxu0 %v12693_v59  ;;  %v1075_v52 = vsub.f32 %v9616_v10, %v1074_v17  ;;  %v12696_v56 = vand.u32 4294901760, %v9378_v41  ;;  %v12698_v59 = vand.u32 4294901760, %v9406_v62 }
  0x96   : > { %901 = vmatpush.msrb.mxu1 %v9267_v25  ;;  %954 = vmatpush.msrb.mxu2 %v9545_v19  ;;  %v1064_v25 = vand.u32 4294901760, %v1063_v12  ;;  %v1070_v24 = vand.u32 4294901760, %v1069_v45  ;;  %v1092_v26 = vand.u32 4294901760, %v9654_v50  ;;  %v12697_v12 = vand.u32 4294901760, %v9393_v55  ;;  %v12702_v45 = vld [vmem:[#allocation24_spill] sm:$0xff] }
  0x97   : > { %1053 = vmatpush.msrb.mxu3 %v1052_v11  ;;  %562 = vmatmul.f32.gmra.mxu0 %v9628_v9  ;;  %v1086_v11 = vand.u32 4294901760, %v9644_v63  ;;  %v1076_v41 = vand.u32 4294901760, %v1075_v52 }
  0x98   : > { %671 = vmatmul.f32.gmra.mxu1 %v9459_v37  ;;  %856 = vmatpush.msrb.mxu0 %v12695_v31  ;;  %v1093_v55 = vsub.f32 %v9654_v50, %v1092_v26  ;;  %v12705_v31 = vld [vmem:[#allocation26_spill] sm:$0xff] }
  0x99   : > { %903 = vmatpush.msrb.mxu1 %v9271_v28  ;;  %956 = vmatpush.msrb.mxu2 %v9560_v20  ;;  %v1081_v28 = vsub.f32 %v9631_v32, %v1080_v61 }
  0x9a   : > { %1059 = vmatpush.msrb.mxu3 %v1058_v7  ;;  %860 = vmatpush.msrb.mxu0 %v12696_v56  ;;  %v1094_v62 = vand.u32 4294901760, %v1093_v55 }
  0x9b   : > { %905 = vmatpush.msrb.mxu1 %v9289_v34  ;;  %958 = vmatpush.msrb.mxu2 %v9574_v15  ;;  %v1087_v34 = vsub.f32 %v9644_v63, %v1086_v11  ;;  %v1082_v7 = vand.u32 4294901760, %v1081_v28 }
  0x9c   : > { %1065 = vmatpush.msrb.mxu3 %v1064_v25  ;;  %744 = vmatmul.f32.gmra.mxu2 %v9553_v16  ;;  %v12707_v25 = vld [vmem:[#allocation30_spill] sm:$0xff] }
  0x9d   : > { %864 = vmatpush.msrb.mxu0 %v12697_v12  ;;  %907 = vmatpush.msrb.mxu1 %v9309_v46  ;;  %v1088_v46 = vand.u32 4294901760, %v1087_v34 }
  0x9e   : > { %960 = vmatpush.msrb.mxu2 %v9592_v40  ;;  %1071 = vmatpush.msrb.mxu3 %v1070_v24 }
  0x9f   : > { %801 = vmatmul.f32.gmra.mxu3 %v9581_v42  ;;  %868 = vmatpush.msrb.mxu0 %v12698_v59 }
  0xa0   : > { %909 = vmatpush.msrb.mxu1 %v9316_v48  ;;  %962 = vmatpush.msrb.mxu2 %v9608_v43  ;;  %v12699_v48 = vld [vmem:[#allocation28_spill] sm:$0xff] }
  0xa1   : > { %1077 = vmatpush.msrb.mxu3 %v1076_v41  ;;  %675 = vmatmul.f32.gmra.mxu1 %v9526_v30  ;;  %v474_v41 = vld [vmem:[#allocation7 + $0xe8] sm:$0xff] }
  0xa2   : > { %870 = vmatmul.f32.vlgmr.msrb.gmra.mxu0 %v9348_v2  ;;  %911 = vmatpush.msrb.mxu1 %v9331_v58  ;;  %v12701_v58 = vand.u32 4294901760, %v9401_v57 }
  0xa3   : > { %964 = vmatpush.msrb.mxu2 %v9618_v8  ;;  %1083 = vmatpush.msrb.mxu3 %v1082_v7  ;;  %v9863_v7 = vand.u32 4294901760, %v474_v41 }
  0xa4   : > { %1115 = vmatpush.msra.mxu0 %v9401_v57  ;;  %913 = vmatpush.msrb.mxu1 %v9345_v0  ;;  %v12703_v0 = vand.u32 4294901760, %v9433_v53  ;;  %v12704_v57 = vand.u32 4294901760, %v9450_v33 }
  0xa5   : > { %966 = vmatpush.msrb.mxu2 %v9633_v5  ;;  %1089 = vmatpush.msrb.mxu3 %v1088_v46 }
  0xa6   : > { %1118 = vmatpush.msra.mxu0 %v9433_v53  ;;  %972 = vmatmul.f32.vlgmr.msrb.gmra.mxu2 %v12699_v48  ;;  %v12706_v53 = vand.u32 4294901760, %v9467_v23 }
  0xa7   : > { %915 = vmatpush.msrb.mxu1 %v12700_v54  ;;  %1095 = vmatpush.msrb.mxu3 %v1094_v62  ;;  %v471_v62 = vld [vmem:[#allocation7 + $0xd0] sm:$0xff] }
  0xa8   : > { %1121 = vmatpush.msra.mxu0 %v9450_v33  ;;  %1242 = vmatpush.msra.mxu2 %v12701_v58  ;;  %v12708_v33 = vand.u32 4294901760, %v9481_v38 }
  0xa9   : > { %1097 = vmatmul.f32.vlgmr.msrb.gmra.mxu3 %v9348_v2  ;;  %917 = vmatpush.msrb.mxu1 %v12702_v45  ;;  %v9872_v45 = vand.u32 4294901760, %v471_v62 }
  0xaa   : > { %1124 = vmatpush.msra.mxu0 %v9467_v23  ;;  %1246 = vmatpush.msra.mxu2 %v12703_v0  ;;  %v12709_v23 = vand.u32 4294901760, %v9504_v60  ;;  %v9875_v0 = vsub.f32 %v474_v41, %v9863_v7 }
  0xab   : > { %1321 = vmatpush.msra.mxu3 %v9369_v36  ;;  %874 = vmatmul.f32.gmra.mxu0 %v9385_v47 }
  0xac   : > { %919 = vmatmul.f32.vlgmr.msrb.gmra.mxu1 %v9348_v2  ;;  %1127 = vmatpush.msra.mxu0 %v9481_v38  ;;  %v12716_v38 = vld [vmem:[#allocation23_spill] sm:$0xff] }
  0xad   : > { %1183 = vmatpush.msra.mxu1 %v9369_v36  ;;  %1250 = vmatpush.msra.mxu2 %v12704_v57  ;;  %v12714_v36 = vand.u32 4294901760, %v9589_v4 }
  0xae   : > { %1323 = vmatpush.msra.mxu3 %v12705_v31  ;;  %1130 = vmatpush.msra.mxu0 %v9504_v60  ;;  %v12718_v60 = vld [vmem:[#allocation27_spill] sm:$0xff] }
  0xaf   : > { %1185 = vmatpush.msra.mxu1 %v12705_v31  ;;  %1254 = vmatpush.msra.mxu2 %v12706_v53  ;;  %v468_v31 = vld [vmem:[#allocation7 + $0xb8] sm:$0xff] }
  0xb0   : > { %1325 = vmatpush.msra.mxu3 %v9422_v1  ;;  %980 = vmatmul.f32.gmra.mxu2 %v12707_v25 }
  0xb1   : > { %1133 = vmatpush.msra.mxu0 %v9520_v44  ;;  %1187 = vmatpush.msra.mxu1 %v9422_v1  ;;  %v12710_v1 = vand.u32 4294901760, %v9520_v44  ;;  %v12715_v44 = vand.u32 4294901760, %v9599_v29 }
  0xb2   : > { %1258 = vmatpush.msra.mxu2 %v12708_v33  ;;  %1327 = vmatpush.msra.mxu3 %v9435_v51  ;;  %v12626_v33 = vand.u32 4294901760, %v9875_v0 }
  0xb3   : > { %1101 = vmatmul.f32.gmra.mxu3 %v9385_v47  ;;  %1136 = vmatpush.msra.mxu0 %v9533_v22 }
  0xb4   : > { %1189 = vmatpush.msra.mxu1 %v9435_v51  ;;  %1262 = vmatpush.msra.mxu2 %v12709_v23  ;;  %v12711_v51 = vand.u32 4294901760, %v9533_v22  ;;  %v489_v22 = vld [vmem:[#allocation7 + $0x160] sm:$0xff]  ;;  %v9887_v23 = vand.u32 4294901760, %v468_v31 }
  0xb5   : > { %1329 = vmatpush.msra.mxu3 %v9457_v27  ;;  %878 = vmatmul.f32.gmra.mxu0 %v9459_v37 }
  0xb6   : > { %923 = vmatmul.f32.gmra.mxu1 %v9385_v47  ;;  %1139 = vmatpush.msra.mxu0 %v9550_v3 }
  0xb7   : > { %1191 = vmatpush.msra.mxu1 %v9457_v27  ;;  %1266 = vmatpush.msra.mxu2 %v12710_v1  ;;  %v12712_v27 = vand.u32 4294901760, %v9550_v3  ;;  %v9890_v1 = vsub.f32 %v471_v62, %v9872_v45  ;;  %v456_v62 = vld [vmem:[#allocation7 + $0x58] sm:$0xff] }
  0xb8   : > { %1331 = vmatpush.msra.mxu3 %v9476_v13  ;;  %1142 = vmatpush.msra.mxu0 %v9572_v21 }
  0xb9   : > { %1193 = vmatpush.msra.mxu1 %v9476_v13  ;;  %1270 = vmatpush.msra.mxu2 %v12711_v51  ;;  %v12713_v13 = vand.u32 4294901760, %v9572_v21  ;;  %v486_v21 = vld [vmem:[#allocation7 + $0x148] sm:$0xff] }
  0xba   : > { %1333 = vmatpush.msra.mxu3 %v9492_v6  ;;  %988 = vmatmul.f32.gmra.mxu2 %v9565_v39 }
  0xbb   : > { %1145 = vmatpush.msra.mxu0 %v9589_v4  ;;  %1195 = vmatpush.msra.mxu1 %v9492_v6  ;;  %v12717_v6 = vld [vmem:[#allocation25_spill] sm:$0xff]  ;;  %v9819_v4 = vand.u32 4294901760, %v486_v21 }
  0xbc   : > { %1274 = vmatpush.msra.mxu2 %v12712_v27  ;;  %1335 = vmatpush.msra.mxu3 %v9506_v14  ;;  %v465_v27 = vld [vmem:[#allocation7 + $0xa0] sm:$0xff] }
  0xbd   : > { %1105 = vmatmul.f32.gmra.mxu3 %v9459_v37  ;;  %1148 = vmatpush.msra.mxu0 %v9599_v29 }
  0xbe   : > { %1197 = vmatpush.msra.mxu1 %v9506_v14  ;;  %1278 = vmatpush.msra.mxu2 %v12713_v13  ;;  %v12719_v14 = vld [vmem:[#allocation29_spill] sm:$0xff] }
  0xbf   : > { %1337 = vmatpush.msra.mxu3 %v9524_v18  ;;  %882 = vmatmul.f32.gmra.mxu0 %v9526_v30 }
  0xc0   : > { %927 = vmatmul.f32.gmra.mxu1 %v9459_v37  ;;  %1151 = vmatpush.msra.mxu0 %v9616_v10 }
  0xc1   : > { %1199 = vmatpush.msra.mxu1 %v9524_v18  ;;  %1282 = vmatpush.msra.mxu2 %v12714_v36  ;;  %v492_v18 = vld [vmem:[#allocation7 + $0x178] sm:$0xff]  ;;  %v1473_v36 = vsub.f32 %v9875_v0, %v12626_v33 }
  0xc2   : > { %1339 = vmatpush.msra.mxu3 %v9545_v19  ;;  %1154 = vmatpush.msra.mxu0 %v9631_v32 }
  0xc3   : > { %1201 = vmatpush.msra.mxu1 %v9545_v19  ;;  %1286 = vmatpush.msra.mxu2 %v12715_v44  ;;  %v9801_v19 = vand.u32 4294901760, %v492_v18  ;;  %v12623_v44 = vand.u32 4294901760, %v9890_v1 }
  0xc4   : > { %1341 = vmatpush.msra.mxu3 %v9560_v20  ;;  %996 = vmatmul.f32.gmra.mxu2 %v9628_v9 }
  0xc5   : > { %1157 = vmatpush.msra.mxu0 %v9644_v63  ;;  %1203 = vmatpush.msra.mxu1 %v9560_v20  ;;  %v9805_v3 = vsub.f32 %v492_v18, %v9801_v19  ;;  %v9899_v18 = vand.u32 4294901760, %v465_v27 }
  0xc6   : > { %1290 = vmatpush.msra.mxu2 %v1074_v17  ;;  %1343 = vmatpush.msra.mxu3 %v9574_v15  ;;  %v480_v17 = vld [vmem:[#allocation7 + $0x118] sm:$0xff] }
  0xc7   : > { %1109 = vmatmul.f32.gmra.mxu3 %v9526_v30  ;;  %1160 = vmatpush.msra.mxu0 %v9654_v50  ;;  %v1436_v20 = vand.u32 4294901760, %v9805_v3  ;;  %v9839_v50 = vand.u32 4294901760, %v480_v17 }
  0xc8   : > { %1205 = vmatpush.msra.mxu1 %v9574_v15  ;;  %1294 = vmatpush.msra.mxu2 %v1080_v61  ;;  %v9807_v15 = vand.u32 4294901760, %v489_v22 }
  0xc9   : > { %1345 = vmatpush.msra.mxu3 %v9592_v40  ;;  %931 = vmatmul.f32.gmra.mxu1 %v9526_v30  ;;  %v1437_v29 = vsub.f32 %v9805_v3, %v1436_v20  ;;  %v9856_v12 = vsub.f32 %v480_v17, %v9839_v50  ;;  %v9912_v17 = vsub.f32 %v465_v27, %v9899_v18  ;;  %v453_v27 = vld [vmem:[#allocation7 + $0x40] sm:$0xff] }
  0xca   : > { %1163 = vmatmul.f32.vlgmr.msra.gmra.mxu0 %v12716_v38  ;;  %1207 = vmatpush.msra.mxu1 %v9592_v40  ;;  %v9822_v40 = vsub.f32 %v489_v22, %v9807_v15  ;;  %v9904_v22 = vsub.f32 %v468_v31, %v9887_v23  ;;  %v9934_v31 = vand.u32 4294901760, %v456_v62 }
  0xcb   : > { %1298 = vmatpush.msra.mxu2 %v1086_v11  ;;  %1347 = vmatpush.msra.mxu3 %v9608_v43  ;;  %v1438_v10 = vand.u32 4294901760, %v1437_v29  ;;  %v477_v11 = vld [vmem:[#allocation7 + $0x100] sm:$0xff]  ;;  %v1460_v46 = vand.u32 4294901760, %v9856_v12  ;;  %v1474_v29 = vand.u32 4294901760, %v1473_v36 }
  0xcc   : > { %1209 = vmatpush.msra.mxu1 %v9608_v43  ;;  %1370 = vmatpush.msrb.mxu0 %v9801_v19  ;;  %v483_v43 = vld [vmem:[#allocation7 + $0x130] sm:$0xff] }
  0xcd   : > { %1302 = vmatpush.msra.mxu2 %v1092_v26  ;;  %1349 = vmatpush.msra.mxu3 %v9618_v8  ;;  %v9827_v32 = vand.u32 4294901760, %v483_v43  ;;  %v9852_v26 = vand.u32 4294901760, %v477_v11  ;;  %v1461_v57 = vsub.f32 %v9856_v12, %v1460_v46 }
  0xce   : > { %1304 = vmatmul.f32.vlgmr.msra.gmra.mxu2 %v9348_v2  ;;  %1211 = vmatpush.msra.mxu1 %v9618_v8  ;;  %v1442_v8 = vand.u32 4294901760, %v9822_v40 }
  0xcf   : > { %1351 = vmatpush.msra.mxu3 %v9633_v5  ;;  %1372 = vmatpush.msrb.mxu0 %v9807_v15  ;;  %v9842_v52 = vsub.f32 %v483_v43, %v9827_v32  ;;  %v9866_v55 = vsub.f32 %v477_v11, %v9852_v26  ;;  %v1462_v51 = vand.u32 4294901760, %v1461_v57  ;;  %v1479_v43 = vsub.f32 %v9890_v1, %v12623_v44  ;;  %v459_v11 = vld [vmem:[#allocation7 + $0x70] sm:$0xff] }
  0xd0   : > { %1353 = vmatmul.f32.vlgmr.msra.gmra.mxu3 %v9348_v2  ;;  %1213 = vmatpush.msra.mxu1 %v9633_v5  ;;  %v9830_v5 = vsub.f32 %v486_v21, %v9819_v4  ;;  %v1443_v63 = vsub.f32 %v9822_v40, %v1442_v8  ;;  %v462_v21 = vld [vmem:[#allocation7 + $0x88] sm:$0xff]  ;;  %v9919_v41 = vand.u32 4294901760, %v459_v11 }
  0xd1   : > { %1217 = vmatmul.f32.vlgmr.msra.gmra.mxu1 %v12717_v6  ;;  %1617 = vmatpush.msrb.mxu3 %v9801_v19  ;;  %v1454_v28 = vand.u32 4294901760, %v9842_v52  ;;  %v1466_v58 = vand.u32 4294901760, %v9866_v55 }
  0xd2   : > { %1168 = vmatmul.f32.gmra.mxu0 %v12718_v60  ;;  %1549 = vmatpush.msrb.mxu2 %v9805_v3  ;;  %v1448_v61 = vand.u32 4294901760, %v9830_v5  ;;  %v1444_v56 = vand.u32 4294901760, %v1443_v63  ;;  %v12622_v63 = vand.u32 4294901760, %v9904_v22 }
  0xd3   : > { %1619 = vmatpush.msrb.mxu3 %v9807_v15  ;;  %1374 = vmatpush.msrb.mxu0 %v9819_v4  ;;  %v1455_v59 = vsub.f32 %v9842_v52, %v1454_v28  ;;  %v1467_v53 = vsub.f32 %v9866_v55, %v1466_v58 }
  0xd4   : > { %1552 = vmatpush.msrb.mxu2 %v9822_v40  ;;  %1439 = vmatpush.msrb.mxu1 %v1438_v10  ;;  %v1449_v24 = vsub.f32 %v9830_v5, %v1448_v61  ;;  %v9909_v10 = vand.u32 4294901760, %v462_v21 }
  0xd5   : > { %1621 = vmatpush.msrb.mxu3 %v9819_v4  ;;  %1376 = vmatpush.msrb.mxu0 %v9827_v32  ;;  %v1456_v54 = vand.u32 4294901760, %v1455_v59  ;;  %v1468_v13 = vand.u32 4294901760, %v1467_v53  ;;  %v1485_v59 = vsub.f32 %v9904_v22, %v12622_v63  ;;  %v9937_v53 = vsub.f32 %v459_v11, %v9919_v41  ;;  %v450_v11 = vld [vmem:[#allocation7 + $0x28] sm:$0xff] }
  0xd6   : > { %1308 = vmatmul.f32.gmra.mxu2 %v9385_v47  ;;  %1445 = vmatpush.msrb.mxu1 %v1444_v56  ;;  %v1450_v34 = vand.u32 4294901760, %v1449_v24  ;;  %v1480_v56 = vand.u32 4294901760, %v1479_v43  ;;  %v12621_v24 = vand.u32 4294901760, %v9912_v17  ;;  %v9952_v43 = vsub.f32 %v456_v62, %v9934_v31 }
  0xd7   : > { %1555 = vmatpush.msrb.mxu2 %v9830_v5  ;;  %1623 = vmatpush.msrb.mxu3 %v9827_v32 }
  0xd8   : > { %1357 = vmatmul.f32.gmra.mxu3 %v9385_v47  ;;  %1378 = vmatpush.msrb.mxu0 %v9839_v50  ;;  %v12625_v62 = vand.u32 4294901760, %v9952_v43 }
  0xd9   : > { %1223 = vmatmul.f32.gmra.mxu1 %v12719_v14  ;;  %1558 = vmatpush.msrb.mxu2 %v9842_v52 }
  0xda   : > { %1173 = vmatmul.f32.gmra.mxu0 %v9484_v35  ;;  %1451 = vmatpush.msrb.mxu1 %v1450_v34  ;;  %v9922_v34 = vsub.f32 %v462_v21, %v9909_v10  ;;  %v12624_v21 = vand.u32 4294901760, %v9937_v53 }
  0xdb   : > { %1380 = vmatpush.msrb.mxu0 %v9852_v26  ;;  %1561 = vmatpush.msrb.mxu2 %v9856_v12 }
  0xdc   : > { %1625 = vmatpush.msrb.mxu3 %v9839_v50  ;;  %1457 = vmatpush.msrb.mxu1 %v1456_v54  ;;  %v1491_v54 = vsub.f32 %v9912_v17, %v12621_v24  ;;  %v12620_v57 = vand.u32 4294901760, %v9922_v34 }
  0xdd   : > { %1382 = vmatpush.msrb.mxu0 %v9863_v7  ;;  %1564 = vmatpush.msrb.mxu2 %v9866_v55 }
  0xde   : > { %1312 = vmatmul.f32.gmra.mxu2 %v9459_v37  ;;  %1627 = vmatpush.msrb.mxu3 %v9852_v26  ;;  %v1497_v36 = vsub.f32 %v9922_v34, %v12620_v57  ;;  %v9959_v57 = vand.u32 4294901760, %v450_v11 }
  0xdf   : > { %1384 = vmatpush.msrb.mxu0 %v9872_v45  ;;  %1567 = vmatpush.msrb.mxu2 %v9875_v0 }
  0xe0   : > { %1361 = vmatmul.f32.gmra.mxu3 %v9459_v37  ;;  %1463 = vmatpush.msrb.mxu1 %v1462_v51  ;;  %v1486_v51 = vand.u32 4294901760, %v1485_v59  ;;  %v1498_v59 = vand.u32 4294901760, %v1497_v36 }
  0xe1   : > { %1229 = vmatmul.f32.gmra.mxu1 %v9512_v49  ;;  %1386 = vmatpush.msrb.mxu0 %v9887_v23 }
  0xe2   : > { %1178 = vmatmul.f32.gmra.mxu0 %v9553_v16  ;;  %1570 = vmatpush.msrb.mxu2 %v9890_v1 }
  0xe3   : > { %1629 = vmatpush.msrb.mxu3 %v9863_v7  ;;  %1469 = vmatpush.msrb.mxu1 %v1468_v13  ;;  %v1492_v13 = vand.u32 4294901760, %v1491_v54  ;;  %v1503_v54 = vsub.f32 %v9937_v53, %v12624_v21  ;;  %v9972_v21 = vsub.f32 %v450_v11, %v9959_v57 }
  0xe4   : > { %1388 = vmatpush.msrb.mxu0 %v9899_v18  ;;  %1573 = vmatpush.msrb.mxu2 %v9904_v22 }
  0xe5   : > { %1631 = vmatpush.msrb.mxu3 %v9872_v45  ;;  %1475 = vmatpush.msrb.mxu1 %v1474_v29  ;;  %v9946_v29 = vand.u32 4294901760, %v453_v27  ;;  %v1504_v36 = vand.u32 4294901760, %v1503_v54  ;;  %v1520_v54 = vand.u32 4294901760, %v9972_v21 }
  0xe6   : > { %1316 = vmatmul.f32.gmra.mxu2 %v9526_v30  ;;  %1390 = vmatpush.msrb.mxu0 %v9909_v10 }
  0xe7   : > { %1576 = vmatpush.msrb.mxu2 %v9912_v17  ;;  %1633 = vmatpush.msrb.mxu3 %v9887_v23  ;;  %v9962_v24 = vsub.f32 %v453_v27, %v9946_v29  ;;  %v1509_v27 = vsub.f32 %v9952_v43, %v12625_v62  ;;  %v1521_v33 = vsub.f32 %v9972_v21, %v1520_v54 }
  0xe8   : > { %1365 = vmatmul.f32.gmra.mxu3 %v9526_v30  ;;  %1481 = vmatpush.msrb.mxu1 %v1480_v56 }
  0xe9   : > { %1235 = vmatmul.f32.gmra.mxu1 %v9581_v42  ;;  %1392 = vmatpush.msrb.mxu0 %v9919_v41  ;;  %v12627_v63 = vand.u32 4294901760, %v9962_v24 }
  0xea   : > { %1579 = vmatpush.msrb.mxu2 %v9922_v34  ;;  %1635 = vmatpush.msrb.mxu3 %v9899_v18 }
  0xeb   : > { %1487 = vmatpush.msrb.mxu1 %v1486_v51  ;;  %1394 = vmatpush.msrb.mxu0 %v9934_v31  ;;  %v447_v51 = vld [vmem:[#allocation7 + $0x10] sm:$0xff] }
  0xec   : > { %1582 = vmatpush.msrb.mxu2 %v9937_v53  ;;  %1637 = vmatpush.msrb.mxu3 %v9909_v10  ;;  %v9969_v44 = vand.u32 4294901760, %v447_v51 }
  0xed   : > { %1493 = vmatpush.msrb.mxu1 %v1492_v13  ;;  %1396 = vmatpush.msrb.mxu0 %v9946_v29  ;;  %v1515_v13 = vsub.f32 %v9962_v24, %v12627_v63 }
  0xee   : > { %1585 = vmatpush.msrb.mxu2 %v9952_v43  ;;  %1639 = vmatpush.msrb.mxu3 %v9919_v41  ;;  %v9985_v11 = vsub.f32 %v447_v51, %v9969_v44 }
  0xef   : > { %1499 = vmatpush.msrb.mxu1 %v1498_v59  ;;  %1398 = vmatpush.msrb.mxu0 %v9959_v57  ;;  %v1510_v59 = vand.u32 4294901760, %v1509_v27  ;;  %v1516_v62 = vand.u32 4294901760, %v1515_v13 }
  0xf0   : > { %1588 = vmatpush.msrb.mxu2 %v9962_v24  ;;  %1641 = vmatpush.msrb.mxu3 %v9934_v31  ;;  %v1526_v63 = vand.u32 4294901760, %v9985_v11 }
  0xf1   : > { %1505 = vmatpush.msrb.mxu1 %v1504_v36  ;;  %1400 = vmatpush.msrb.mxu0 %v9969_v44  ;;  %v1522_v36 = vand.u32 4294901760, %v1521_v33 }
  0xf2   : > { %1406 = vmatmul.f32.vlgmr.msrb.gmra.mxu0 %v12699_v48  ;;  %1591 = vmatpush.msrb.mxu2 %v9972_v21  ;;  %v1527_v27 = vsub.f32 %v9985_v11, %v1526_v63 }
  0xf3   : > { %1511 = vmatpush.msrb.mxu1 %v1510_v59  ;;  %1676 = vmatpush.msra.mxu0 %v1436_v20 }
  0xf4   : > { %1643 = vmatpush.msrb.mxu3 %v9946_v29  ;;  %1594 = vmatpush.msrb.mxu2 %v9985_v11  ;;  %v1528_v3 = vand.u32 4294901760, %v1527_v27 }
  0xf5   : > { %1517 = vmatpush.msrb.mxu1 %v1516_v62  ;;  %1680 = vmatpush.msra.mxu0 %v1442_v8 }
  0xf6   : > { %1645 = vmatpush.msrb.mxu3 %v9959_v57  ;;  %1597 = vmatmul.f32.vlgmr.msrb.gmra.mxu2 %v12716_v38 }
  0xf7   : > { %1523 = vmatpush.msrb.mxu1 %v1522_v36  ;;  %1684 = vmatpush.msra.mxu0 %v1448_v61 }
  0xf8   : > { %v9954_v56 = vpop.f32.mrf.mxu0  ;;  %1647 = vmatpush.msrb.mxu3 %v9969_v44 }
  0xf9   : > { %1529 = vmatpush.msrb.mxu1 %v1528_v3  ;;  %1688 = vmatpush.msra.mxu0 %v1454_v28 }
  0xfa   : > { %1531 = vmatmul.f32.vlgmr.msrb.gmra.mxu1 %v9348_v2  ;;  %1414 = vmatmul.f32.gmra.mxu0 %v12707_v25  ;;  %v12720_v25 = vand.u32 4294901760, %v9875_v0 }
  0xfb   : > { %1755 = vmatpush.msra.mxu1 %v9801_v19  ;;  %1692 = vmatpush.msra.mxu0 %v1460_v46 }
  0xfc   : > { %1651 = vmatmul.f32.vlgmr.msrb.gmra.mxu3 %v12717_v6  ;;  %v12721_v6 = vand.u32 4294901760, %v9890_v1 }
  0xfd   : > { %1757 = vmatpush.msra.mxu1 %v9807_v15  ;;  %1696 = vmatpush.msra.mxu0 %v1466_v58  ;;  %v12723_v15 = vand.u32 4294901760, %v9912_v17 }
  0xfe   : > { %1602 = vmatmul.f32.gmra.mxu2 %v12718_v60  ;;  %v12722_v60 = vand.u32 4294901760, %v9904_v22 }
  0xff   : > { %1759 = vmatpush.msra.mxu1 %v9819_v4  ;;  %1700 = vmatpush.msra.mxu0 %v12720_v25  ;;  %v12724_v4 = vand.u32 4294901760, %v9922_v34 }
 0x100   : > { %v9998_v51 = vpop.f32.mrf.mxu0 }
 0x101   : > { %v10005_v48 = vpop.f32.mrf.mxu1  ;;  %1761 = vmatpush.msra.mxu1 %v9827_v32  ;;  %1704 = vmatpush.msra.mxu0 %v12721_v6 }
 0x102   : > { %v10009_v13 = vpop.f32.mrf.mxu2  ;;  %v10015_v20 = vpop.f32.mrf.mxu3  ;;  %1535 = vmatmul.f32.gmra.mxu1 %v9385_v47  ;;  %1422 = vmatmul.f32.gmra.mxu0 %v9565_v39 }
 0x103   : > { %1763 = vmatpush.msra.mxu1 %v9839_v50  ;;  %1708 = vmatpush.msra.mxu0 %v12722_v60  ;;  %v12727_v50 = vand.u32 4294901760, %v9962_v24 }
 0x104   : > { %1657 = vmatmul.f32.gmra.mxu3 %v12719_v14  ;;  %v12725_v14 = vand.u32 4294901760, %v9937_v53 }
 0x105   : > { %1765 = vmatpush.msra.mxu1 %v9852_v26  ;;  %1712 = vmatpush.msra.mxu0 %v12723_v15 }
 0x106   : > { %1607 = vmatmul.f32.gmra.mxu2 %v9484_v35  ;;  %v12726_v35 = vand.u32 4294901760, %v9952_v43 }
 0x107   : > { %1767 = vmatpush.msra.mxu1 %v9863_v7  ;;  %1716 = vmatpush.msra.mxu0 %v12724_v4 }
 0x109   : > { %1769 = vmatpush.msra.mxu1 %v9872_v45  ;;  %1720 = vmatpush.msra.mxu0 %v12725_v14 }
 0x10a   : > { %v10029_v38 = vpop.f32.mrf.mxu0  ;;  %1539 = vmatmul.f32.gmra.mxu1 %v9459_v37  ;;  %1430 = vmatmul.f32.gmra.mxu0 %v9628_v9 }
 0x10b   : > { %v10032_v40 = vpop.f32.mrf.mxu1  ;;  %v10034_v8 = vpop.f32.mrf.mxu2  ;;  %1771 = vmatpush.msra.mxu1 %v9887_v23  ;;  %1724 = vmatpush.msra.mxu0 %v12726_v35 }
 0x10c   : > { %1663 = vmatmul.f32.gmra.mxu3 %v9512_v49 }
 0x10d   : > { %1773 = vmatpush.msra.mxu1 %v9899_v18  ;;  %1728 = vmatpush.msra.mxu0 %v12727_v50 }
 0x10e   : > { %v10042_v19 = vpop.f32.mrf.mxu3  ;;  %1612 = vmatmul.f32.gmra.mxu2 %v9553_v16 }
 0x10f   : > { %1775 = vmatpush.msra.mxu1 %v9909_v10  ;;  %1732 = vmatpush.msra.mxu0 %v1520_v54  ;;  %v10120_v10 = vld [vmem:[#allocation8] sm:$0x7] }
 0x110   : > { %v495_v17 = vperm.slane %v10120_v10, 0  ;;  %v496_v24 = vperm.slane %v10120_v10, 1 }
 0x111   : > { %1777 = vmatpush.msra.mxu1 %v9919_v41  ;;  %1736 = vmatpush.msra.mxu0 %v1526_v63 }
 0x112   : > { %1543 = vmatmul.f32.gmra.mxu1 %v9526_v30  ;;  %1738 = vmatmul.f32.vlgmr.msra.gmra.mxu0 %v9348_v2  ;;  %v540_v34 = vadd.f32 %v9954_v56, %v495_v17  ;;  %v548_v59 = vadd.f32 %v9998_v51, %v495_v17 }
 0x113   : > { %1779 = vmatpush.msra.mxu1 %v9934_v31 }
 0x114   : > { %v10057_v39 = vpop.f32.mrf.mxu0  ;;  %1669 = vmatmul.f32.gmra.mxu3 %v9581_v42  ;;  %v665_v21 = vadd.f32 %v10005_v48, %v540_v34  ;;  %v669_v4 = vadd.f32 %v10032_v40, %v548_v59 }
 0x115   : > { %v10059_v32 = vpop.f32.mrf.mxu1  ;;  %v10061_v5 = vpop.f32.mrf.mxu2  ;;  %1781 = vmatpush.msra.mxu1 %v9946_v29 }
 0x116   : > { %v731_v3 = vadd.f32 %v10009_v13, %v665_v21 }
 0x117   : > { %1783 = vmatpush.msra.mxu1 %v9959_v57 }
 0x118   : > { %v10071_v61 = vpop.f32.mrf.mxu3  ;;  %v785_v50 = vadd.f32 %v10015_v20, %v731_v3 }
 0x119   : > { %1785 = vmatpush.msra.mxu1 %v9969_v44 }
 0x11a   : > { %1787 = vmatmul.f32.vlgmr.msra.gmra.mxu1 %v9348_v2  ;;  %1742 = vmatmul.f32.gmra.mxu0 %v9385_v47 }
 0x11e   : > { %v10084_v9 = vpop.f32.mrf.mxu1 }
 0x11f   : > { %v10088_v49 = vpop.f32.mrf.mxu0  ;;  %v10090_v52 = vpop.f32.mrf.mxu2 }
 0x120   : > { %v872_v13 = vadd.f32 %v10088_v49, %v785_v50 }
 0x122   : > { %v10095_v16 = vpop.f32.mrf.mxu3  ;;  %1791 = vmatmul.f32.gmra.mxu1 %v9385_v47  ;;  %1746 = vmatmul.f32.gmra.mxu0 %v9459_v37 }
 0x128   : > { %v10101_v28 = vpop.f32.mrf.mxu0 }
 0x129   : > { %v10103_v26 = vpop.f32.mrf.mxu1  ;;  %v973_v12 = vpop.f32.mrf.mxu2 }
 0x12a   : > { %1795 = vmatmul.f32.gmra.mxu1 %v9459_v37  ;;  %1750 = vmatmul.f32.gmra.mxu0 %v9526_v30  ;;  %v974_v62 = vadd.f32 %v973_v12, %v496_v24  ;;  %v10136_v40 = vadd.f32 %v10103_v26, %v872_v13 }
 0x12c   : > { %v1098_v7 = vpop.f32.mrf.mxu3  ;;  %v1805_v26 = vsel %vm1803_vm0, %v10136_v40, 0 }
 0x12d   : > { %v1099_v56 = vadd.f32 %v1098_v7, %v974_v62  ;;  %v556_v7 = vadd.f32 %v10029_v38, %v495_v17 }
 0x132   : > { %v10107_v42 = vpop.f32.mrf.mxu0  ;;  %1799 = vmatmul.f32.gmra.mxu1 %v9526_v30 }
 0x133   : > { %v10109_v55 = vpop.f32.mrf.mxu1  ;;  %v981_v46 = vpop.f32.mrf.mxu2 }
 0x134   : > { %v982_v57 = vadd.f32 %v981_v46, %v496_v24 }
 0x136   : > { %v1102_v58 = vpop.f32.mrf.mxu3 }
 0x137   : > { %v1103_v54 = vadd.f32 %v1102_v58, %v982_v57 }
 0x13c   : > { %v10113_v2 = vpop.f32.mrf.mxu0 }
 0x13d   : > { %v10115_v45 = vpop.f32.mrf.mxu1  ;;  %v989_v0 = vpop.f32.mrf.mxu2 }
 0x13e   : > { %v990_v30 = vadd.f32 %v989_v0, %v496_v24 }
 0x140   : > { %v1106_v47 = vpop.f32.mrf.mxu3 }
 0x141   : > { %v1107_v29 = vadd.f32 %v1106_v47, %v990_v30 }
 0x146   : > { %v10118_v33 = vpop.f32.mrf.mxu1 }
 0x147   : > { %v1164_v23 = vpop.f32.mrf.mxu0  ;;  %v997_v1 = vpop.f32.mrf.mxu2 }
 0x148   : > { %v998_v25 = vadd.f32 %v997_v1, %v496_v24  ;;  %v1165_v14 = vadd.f32 %v1164_v23, %v1099_v56  ;;  %v736_v1 = vadd.f32 %v10034_v8, %v669_v4 }
 0x14a   : > { %v1110_v44 = vpop.f32.mrf.mxu3  ;;  %v791_v49 = vadd.f32 %v10042_v19, %v736_v1  ;;  %v564_v19 = vadd.f32 %v10057_v39, %v495_v17 }
 0x14b   : > { %v1111_v12 = vadd.f32 %v1110_v44, %v998_v25 }
 0x14c   : > { %v876_v30 = vadd.f32 %v10101_v28, %v791_v49 }
 0x14e   : > { %v1218_v18 = vpop.f32.mrf.mxu1 }
 0x14f   : > { %v1169_v22 = vpop.f32.mrf.mxu0  ;;  %v1219_v58 = vadd.f32 %v1218_v18, %v1165_v14 }
 0x150   : > { %v1170_v36 = vadd.f32 %v1169_v22, %v1103_v54 }
 0x151   : > { %v1305_v37 = vpop.f32.mrf.mxu2 }
 0x152   : > { %v1306_v20 = vadd.f32 %v1305_v37, %v1219_v58 }
 0x153   : > { %v1354_v63 = vpop.f32.mrf.mxu3 }
 0x154   : > { %v10149_v37 = vadd.f32 %v1354_v63, %v1306_v20 }
 0x156   : > { %v1224_v41 = vpop.f32.mrf.mxu1  ;;  %v1817_v62 = vsel %vm1803_vm0, %v10149_v37, 0 }
 0x157   : > { %v1174_v31 = vpop.f32.mrf.mxu0  ;;  %v1225_v60 = vadd.f32 %v1224_v41, %v1170_v36  ;;  %v673_v41 = vadd.f32 %v10059_v32, %v556_v7  ;;  %v10180_v36 = vand.u32 4294901760, %v1817_v62 }
 0x158   : > { %v1175_v11 = vadd.f32 %v1174_v31, %v1107_v29  ;;  %v10162_v29 = vand.u32 4294901760, %v1805_v26 }
 0x159   : > { %v1309_v53 = vpop.f32.mrf.mxu2  ;;  %v741_v32 = vadd.f32 %v10061_v5, %v673_v41  ;;  %v1912_v4 = vsub.f32 %v1817_v62, %v10180_v36 }
 0x15a   : > { %v1310_v51 = vadd.f32 %v1309_v53, %v1225_v60  ;;  %v10158_v53 = vadd.f32 %v10109_v55, %v876_v30  ;;  %v677_v55 = vadd.f32 %v10084_v9, %v564_v19  ;;  %v1849_v17 = vsub.f32 %v1805_v26, %v10162_v29 }
 0x15b   : > { %v1358_v43 = vpop.f32.mrf.mxu3  ;;  %v797_v5 = vadd.f32 %v10071_v61, %v741_v32  ;;  %v1913_v50 = vand.u32 4294901760, %v1912_v4 }
 0x15c   : > { %v10138_v44 = vadd.f32 %v1358_v43, %v1310_v51  ;;  %v1808_v54 = vsel %vm1803_vm0, %v10158_v53, 0  ;;  %v746_v9 = vadd.f32 %v10090_v52, %v677_v55 }
 0x15d   : > { %v880_v3 = vadd.f32 %v10107_v42, %v797_v5  ;;  %v10189_v56 = vand.u32 4294901760, %v1808_v54  ;;  %v1914_v7 = vsub.f32 %v1912_v4, %v1913_v50 }
 0x15e   : > { %v1230_v27 = vpop.f32.mrf.mxu1  ;;  %v1820_v31 = vsel %vm1803_vm0, %v10138_v44, 0  ;;  %v803_v42 = vadd.f32 %v10095_v16, %v746_v9 }
 0x15f   : > { %v1231_v6 = vadd.f32 %v1230_v27, %v1175_v11  ;;  %v1179_v48 = vpop.f32.mrf.mxu0  ;;  %v10167_v43 = vand.u32 4294901760, %v1820_v31  ;;  %v10187_v25 = vadd.f32 %v10115_v45, %v880_v3  ;;  %v1857_v45 = vsub.f32 %v1808_v54, %v10189_v56 }
 0x160   : > { %v1180_v47 = vadd.f32 %v1179_v48, %v1111_v12 }
 0x161   : > { %v1313_v15 = vpop.f32.mrf.mxu2  ;;  %v1906_v59 = vsub.f32 %v1820_v31, %v10167_v43  ;;  %v1811_v12 = vsel %vm1803_vm0, %v10187_v25, 0  ;;  %v1858_v58 = vand.u32 4294901760, %v1857_v45 }
 0x162   : > { %v1314_v35 = vadd.f32 %v1313_v15, %v1231_v6  ;;  %v1850_v6 = vand.u32 4294901760, %v1849_v17  ;;  %v10201_v51 = vand.u32 4294901760, %v1811_v12 }
 0x163   : > { %v1362_v46 = vpop.f32.mrf.mxu3  ;;  %v1907_v14 = vand.u32 4294901760, %v1906_v59 }
 0x164   : > { %v10130_v0 = vadd.f32 %v1362_v46, %v1314_v35  ;;  %v1851_v52 = vsub.f32 %v1849_v17, %v1850_v6  ;;  %v884_v46 = vadd.f32 %v10113_v2, %v803_v42  ;;  %v1859_v2 = vsub.f32 %v1857_v45, %v1858_v58 }
 0x165   : > { %v1908_v35 = vsub.f32 %v1906_v59, %v1907_v14 }
 0x166   : > { %v1236_v22 = vpop.f32.mrf.mxu1  ;;  %v1823_v18 = vsel %vm1803_vm0, %v10130_v0, 0  ;;  %v1852_v16 = vand.u32 4294901760, %v1851_v52  ;;  %v10204_v13 = vadd.f32 %v10118_v33, %v884_v46  ;;  %v1860_v33 = vand.u32 4294901760, %v1859_v2 }
 0x167   : > { %v1237_v23 = vadd.f32 %v1236_v22, %v1180_v47  ;;  %v10144_v8 = vand.u32 4294901760, %v1823_v18  ;;  %v1909_v47 = vand.u32 4294901760, %v1908_v35  ;;  %v1865_v22 = vsub.f32 %v1811_v12, %v10201_v51 }
 0x168   : > { %v1814_v20 = vsel %vm1803_vm0, %v10204_v13, 0 }
 0x169   : > { %v1317_v24 = vpop.f32.mrf.mxu2  ;;  %v1900_v63 = vsub.f32 %v1823_v18, %v10144_v8  ;;  %v10210_v49 = vand.u32 4294901760, %v1814_v20 }
 0x16a   : > { %v1318_v38 = vadd.f32 %v1317_v24, %v1237_v23  ;;  %v1915_v23 = vand.u32 4294901760, %v1914_v7  ;;  %v1866_v24 = vand.u32 4294901760, %v1865_v22 }
 0x16b   : > { %v1366_v34 = vpop.f32.mrf.mxu3  ;;  %v1901_v27 = vand.u32 4294901760, %v1900_v63 }
 0x16c   : > { %v10151_v57 = vadd.f32 %v1366_v34, %v1318_v38  ;;  %v1867_v38 = vsub.f32 %v1865_v22, %v1866_v24  ;;  %v1873_v34 = vsub.f32 %v1814_v20, %v10210_v49 }
 0x16d   : > { %v1902_v15 = vsub.f32 %v1900_v63, %v1901_v27 }
 0x16e   : > { %v1826_v21 = vsel %vm1803_vm0, %v10151_v57, 0  ;;  %v1868_v30 = vand.u32 4294901760, %v1867_v38  ;;  %v1874_v31 = vand.u32 4294901760, %v1873_v34 }
 0x16f   : > { %v10164_v28 = vand.u32 4294901760, %v1826_v21  ;;  %v1903_v48 = vand.u32 4294901760, %v1902_v15  ;;  %v1407_v1 = vpop.f32.mrf.mxu0 }
 0x170   : > { %v1875_v32 = vsub.f32 %v1873_v34, %v1874_v31 }
 0x171   : > { %1841 = vmatpush.xpose.msra.mxu2 %v10164_v28  ;;  %1992 = vmatpush.xpose.msrb.mxu1 %v10164_v28  ;;  %v1894_v39 = vsub.f32 %v1826_v21, %v10164_v28 }
 0x173   : > { %1948 = vmatpush.xpose.msrb.mxu0 %v1894_v39  ;;  %v1895_v11 = vand.u32 4294901760, %v1894_v39 }
 0x175   : > { %1843 = vmatpush.xpose.msra.mxu2 %v10144_v8  ;;  %1994 = vmatpush.xpose.msrb.mxu1 %v10144_v8  ;;  %v1896_v61 = vsub.f32 %v1894_v39, %v1895_v11 }
 0x177   : > { %1951 = vmatpush.xpose.msrb.mxu0 %v1900_v63  ;;  %v1897_v60 = vand.u32 4294901760, %v1896_v61  ;;  %v1532_v18 = vpop.f32.mrf.mxu1  ;;  %v1415_v41 = vpop.f32.mrf.mxu0 }
 0x179   : > { %1845 = vmatpush.xpose.msra.mxu2 %v10167_v43  ;;  %1898 = vmatpush.xpose.msra.mxu3 %v1897_v60  ;;  %v1598_v62 = vpop.f32.mrf.mxu2 }
 0x17a   : > { %1996 = vmatpush.xpose.msrb.mxu1 %v10167_v43 }
 0x17b   : > { %1954 = vmatpush.xpose.msrb.mxu0 %v1906_v59 }
 0x17d   : > { %1847 = vmatpush.xpose.msra.mxu2 %v10180_v36  ;;  %1904 = vmatpush.xpose.msra.mxu3 %v1903_v48 }
 0x17e   : > { %1998 = vmatpush.xpose.msrb.mxu1 %v10180_v36 }
 0x17f   : > { %1957 = vmatpush.xpose.msrb.mxu0 %v1912_v4  ;;  %v1536_v26 = vpop.f32.mrf.mxu1  ;;  %v1423_v19 = vpop.f32.mrf.mxu0 }
 0x180   : > { %1853 = vmatmul.f32.vlgmr.msra.gmra.mxu2 %v1852_v16  ;;  %v1652_v39 = vpop.f32.mrf.mxu3 }
 0x181   : > { %2039 = vmatpush.xpose.msrb.mxu2 %v1895_v11  ;;  %2002 = vmatmul.f32.vlgmr.msrb.gmra.mxu1 %v1850_v6  ;;  %v1603_v59 = vpop.f32.mrf.mxu2 }
 0x182   : > { %1910 = vmatpush.xpose.msra.mxu3 %v1909_v47  ;;  %1960 = vmatmul.f32.vlgmr.msrb.gmra.mxu0 %v1849_v17 }
 0x185   : > { %2043 = vmatpush.xpose.msrb.mxu2 %v1901_v27 }
 0x186   : > { %1916 = vmatpush.xpose.msra.mxu3 %v1915_v23 }
 0x187   : > { %v1540_v21 = vpop.f32.mrf.mxu1 }
 0x188   : > { %1861 = vmatmul.f32.gmra.mxu2 %v1860_v33  ;;  %v1658_v3 = vpop.f32.mrf.mxu3 }
 0x189   : > { %2047 = vmatpush.xpose.msrb.mxu2 %v1907_v14  ;;  %1918 = vmatmul.f32.vlgmr.msra.gmra.mxu3 %v10162_v29  ;;  %v1608_v4 = vpop.f32.mrf.mxu2 }
 0x18a   : > { %2082 = vmatpush.xpose.msrb.mxu3 %v10164_v28  ;;  %2008 = vmatmul.f32.gmra.mxu1 %v1858_v58  ;;  %v1876_v28 = vand.u32 4294901760, %v1875_v32 }
 0x18b   : > { %1965 = vmatmul.f32.gmra.mxu0 %v1857_v45 }
 0x18d   : > { %2051 = vmatpush.xpose.msrb.mxu2 %v1913_v50 }
 0x18e   : > { %2084 = vmatpush.xpose.msrb.mxu3 %v10144_v8  ;;  %v1431_v8 = vpop.f32.mrf.mxu0 }
 0x18f   : > { %v1544_v63 = vpop.f32.mrf.mxu1 }
 0x190   : > { %1869 = vmatmul.f32.gmra.mxu2 %v1868_v30  ;;  %v1664_v45 = vpop.f32.mrf.mxu3 }
 0x191   : > { %1922 = vmatmul.f32.gmra.mxu3 %v10189_v56  ;;  %v1613_v7 = vpop.f32.mrf.mxu2 }
 0x192   : > { %2086 = vmatpush.xpose.msrb.mxu3 %v10167_v43  ;;  %2014 = vmatmul.f32.gmra.mxu1 %v1866_v24  ;;  %v497_v43 = vperm.slane %v10120_v10, 2 }
 0x193   : > { %1970 = vmatmul.f32.gmra.mxu0 %v1865_v22 }
 0x194   : > { %v1416_v5 = vadd.f32 %v1415_v41, %v497_v43  ;;  %v1408_v17 = vadd.f32 %v1407_v1, %v497_v43  ;;  %v1424_v27 = vadd.f32 %v1423_v19, %v497_v43  ;;  %v1432_v14 = vadd.f32 %v1431_v8, %v497_v43 }
 0x196   : > { %2088 = vmatpush.xpose.msrb.mxu3 %v10180_v36  ;;  %v1739_v55 = vpop.f32.mrf.mxu0  ;;  %v1537_v11 = vadd.f32 %v1536_v26, %v1416_v5  ;;  %v1533_v36 = vadd.f32 %v1532_v18, %v1408_v17  ;;  %v1541_v9 = vadd.f32 %v1540_v21, %v1424_v27  ;;  %v1545_v12 = vadd.f32 %v1544_v63, %v1432_v14 }
 0x197   : > { %v1788_v54 = vpop.f32.mrf.mxu1 }
 0x198   : > { %1877 = vmatmul.f32.gmra.mxu2 %v1876_v28  ;;  %v1604_v61 = vadd.f32 %v1603_v59, %v1537_v11  ;;  %v1599_v6 = vadd.f32 %v1598_v62, %v1533_v36  ;;  %v1609_v52 = vadd.f32 %v1608_v4, %v1541_v9  ;;  %v1614_v2 = vadd.f32 %v1613_v7, %v1545_v12  ;;  %v1670_v23 = vpop.f32.mrf.mxu3 }
 0x199   : > { %1926 = vmatmul.f32.gmra.mxu3 %v10201_v51 }
 0x19a   : > { %2020 = vmatmul.f32.gmra.mxu1 %v1874_v31  ;;  %v1659_v15 = vadd.f32 %v1658_v3, %v1604_v61  ;;  %v1653_v42 = vadd.f32 %v1652_v39, %v1599_v6  ;;  %v1665_v35 = vadd.f32 %v1664_v45, %v1609_v52 }
 0x19b   : > { %1975 = vmatmul.f32.gmra.mxu0 %v1873_v34 }
 0x19e   : > { %v1743_v10 = vpop.f32.mrf.mxu0 }
 0x19f   : > { %v1792_v60 = vpop.f32.mrf.mxu1  ;;  %v1744_v48 = vadd.f32 %v1743_v10, %v1659_v15 }
 0x1a0   : > { %2053 = vmatmul.f32.vlgmr.msrb.gmra.mxu2 %v10162_v29 }
 0x1a1   : > { %1930 = vmatmul.f32.gmra.mxu3 %v10210_v49  ;;  %v10226_v58 = vadd.f32 %v1792_v60, %v1744_v48 }
 0x1a3   : > { %v2247_v18 = vand.u32 4294901760, %v10226_v58 }
 0x1a5   : > { %v2309_v26 = vsub.f32 %v10226_v58, %v2247_v18 }
 0x1a6   : > { %v1747_v50 = vpop.f32.mrf.mxu0 }
 0x1a7   : > { %v1748_v46 = vadd.f32 %v1747_v50, %v1665_v35  ;;  %v1796_v16 = vpop.f32.mrf.mxu1  ;;  %v2310_v32 = vand.u32 4294901760, %v2309_v26 }
 0x1a8   : > { %2057 = vmatmul.f32.gmra.mxu2 %v10189_v56 }
 0x1a9   : > { %2090 = vmatmul.f32.vlgmr.msrb.gmra.mxu3 %v10162_v29  ;;  %v1740_v29 = vadd.f32 %v1739_v55, %v1653_v42  ;;  %v10228_v47 = vadd.f32 %v1796_v16, %v1748_v46  ;;  %v2311_v62 = vsub.f32 %v2309_v26, %v2310_v32 }
 0x1ab   : > { %v10230_v1 = vadd.f32 %v1788_v54, %v1740_v29  ;;  %v2245_v22 = vand.u32 4294901760, %v10228_v47 }
 0x1ad   : > { %v2303_v24 = vsub.f32 %v10228_v47, %v2245_v22  ;;  %v2249_v41 = vand.u32 4294901760, %v10230_v1 }
 0x1ae   : > { %v1751_v20 = vpop.f32.mrf.mxu0 }
 0x1af   : > { %v1800_v38 = vpop.f32.mrf.mxu1  ;;  %v2304_v31 = vand.u32 4294901760, %v2303_v24  ;;  %v2315_v19 = vsub.f32 %v10230_v1, %v2249_v41 }
 0x1b0   : > { %2061 = vmatmul.f32.gmra.mxu2 %v10201_v51 }
 0x1b1   : > { %2094 = vmatmul.f32.gmra.mxu3 %v10189_v56  ;;  %v1671_v56 = vadd.f32 %v1670_v23, %v1614_v2  ;;  %v2305_v28 = vsub.f32 %v2303_v24, %v2304_v31  ;;  %v2316_v8 = vand.u32 4294901760, %v2315_v19 }
 0x1b3   : > { %v1752_v33 = vadd.f32 %v1751_v20, %v1671_v56  ;;  %v2306_v39 = vand.u32 4294901760, %v2305_v28  ;;  %v2317_v5 = vsub.f32 %v2315_v19, %v2316_v8 }
 0x1b5   : > { %v10238_v34 = vadd.f32 %v1800_v38, %v1752_v33  ;;  %v2318_v55 = vand.u32 4294901760, %v2317_v5 }
 0x1b7   : > { %v2243_v30 = vand.u32 4294901760, %v10238_v34 }
 0x1b8   : > { %2065 = vmatmul.f32.gmra.mxu2 %v10210_v49 }
 0x1b9   : > { %2098 = vmatmul.f32.gmra.mxu3 %v10201_v51  ;;  %v2297_v51 = vsub.f32 %v10238_v34, %v2243_v30  ;;  %2244 = vmatpush.msra.mxu0 %v2243_v30 }
 0x1ba   : > { %2395 = vmatpush.msra.mxu3 %v2243_v30 }
 0x1bb   : > { %v2298_v21 = vand.u32 4294901760, %v2297_v51  ;;  %2246 = vmatpush.msra.mxu0 %v2245_v22  ;;  %2351 = vmatpush.msra.mxu2 %v2297_v51 }
 0x1bc   : > { %2397 = vmatpush.msra.mxu3 %v2245_v22 }
 0x1bd   : > { %v2299_v63 = vsub.f32 %v2297_v51, %v2298_v21  ;;  %2248 = vmatpush.msra.mxu0 %v2247_v18  ;;  %2354 = vmatpush.msra.mxu2 %v2303_v24 }
 0x1be   : > { %2399 = vmatpush.msra.mxu3 %v2247_v18 }
 0x1bf   : > { %v2300_v43 = vand.u32 4294901760, %v2299_v63  ;;  %2250 = vmatpush.msra.mxu0 %v2249_v41  ;;  %2357 = vmatpush.msra.mxu2 %v2309_v26 }
 0x1c0   : > { %2401 = vmatpush.msra.mxu3 %v2249_v41 }
 0x1c1   : > { %2102 = vmatmul.f32.gmra.mxu3 %v10210_v49  ;;  %2442 = vmatpush.msrb.mxu0 %v2298_v21  ;;  %v2312_v49 = vand.u32 4294901760, %v2311_v62 }
 0x1c2   : > { %2301 = vmatpush.msra.mxu1 %v2300_v43  ;;  %2360 = vmatpush.msra.mxu2 %v2315_v19 }
 0x1c3   : > { %2446 = vmatpush.msrb.mxu0 %v2304_v31 }
 0x1c4   : > { %2307 = vmatpush.msra.mxu1 %v2306_v39 }
 0x1c5   : > { %2450 = vmatpush.msrb.mxu0 %v2310_v32 }
 0x1c6   : > { %2313 = vmatpush.msra.mxu1 %v2312_v49 }
 0x1c7   : > { %2454 = vmatpush.msrb.mxu0 %v2316_v8 }
 0x1c8   : > { %2319 = vmatpush.msra.mxu1 %v2318_v55 }
 0x1ca   : > { %2485 = vmatpush.msrb.mxu1 %v2243_v30 }
 0x1cc   : > { %2487 = vmatpush.msrb.mxu1 %v2245_v22 }
 0x1ce   : > { %2489 = vmatpush.msrb.mxu1 %v2247_v18 }
 0x1d0   : > { %2491 = vmatpush.msrb.mxu1 %v2249_v41 }
 0x1fe   : > { %v2003_v10 = vpop.f32.mrf.mxu1 }
 0x1ff   : > { %v1961_v61 = vpop.f32.mrf.mxu0 }
 0x203   : > { %v1854_v17 = vpop.f32.mrf.mxu2 }
 0x207   : > { %v2009_v52 = vpop.f32.mrf.mxu1 }
 0x208   : > { %v1966_v4 = vpop.f32.mrf.mxu0 }
 0x20b   : > { %v1862_v54 = vpop.f32.mrf.mxu2 }
 0x20c   : > { %v1919_v11 = vpop.f32.mrf.mxu3 }
 0x20d   : > { %v1920_v9 = vadd.f32 %v1919_v11, %v1854_v17 }
 0x20f   : > { %v1962_v15 = vadd.f32 %v1961_v61, %v1920_v9  ;;  %v2015_v18 = vpop.f32.mrf.mxu1 }
 0x210   : > { %v1971_v2 = vpop.f32.mrf.mxu0 }
 0x211   : > { %v2004_v42 = vadd.f32 %v2003_v10, %v1962_v15  ;;  %v10257_v15 = vld [vmem:[%s9214_s24 + $0x8] sm:$0xff] }
 0x213   : > { %v1870_v59 = vpop.f32.mrf.mxu2 }
 0x214   : > { %v1923_v36 = vpop.f32.mrf.mxu3 }
 0x215   : > { %v1924_v14 = vadd.f32 %v1923_v36, %v1862_v54 }
 0x217   : > { %v1967_v50 = vadd.f32 %v1966_v4, %v1924_v14  ;;  %v2021_v28 = vpop.f32.mrf.mxu1 }
 0x218   : > { %v1976_v31 = vpop.f32.mrf.mxu0 }
 0x219   : > { %v2010_v16 = vadd.f32 %v2009_v52, %v1967_v50 }
 0x21b   : > { %v1878_v27 = vpop.f32.mrf.mxu2 }
 0x21c   : > { %v1927_v3 = vpop.f32.mrf.mxu3 }
 0x21d   : > { %v1928_v46 = vadd.f32 %v1927_v3, %v1870_v59 }
 0x21f   : > { %v1972_v56 = vadd.f32 %v1971_v2, %v1928_v46 }
 0x221   : > { %v2016_v38 = vadd.f32 %v2015_v18, %v1972_v56 }
 0x223   : > { %v2054_v60 = vpop.f32.mrf.mxu2 }
 0x224   : > { %v1931_v6 = vpop.f32.mrf.mxu3  ;;  %v2055_v45 = vadd.f32 %v2054_v60, %v2004_v42 }
 0x225   : > { %v1932_v41 = vadd.f32 %v1931_v6, %v1878_v27  ;;  %v10252_v27 = vld [vmem:[%s9214_s24] sm:$0xff] }
 0x227   : > { %v1977_v51 = vadd.f32 %v1976_v31, %v1932_v41 }
 0x229   : > { %v2022_v63 = vadd.f32 %v2021_v28, %v1977_v51 }
 0x22b   : > { %v2058_v48 = vpop.f32.mrf.mxu2 }
 0x22c   : > { %v2091_v35 = vpop.f32.mrf.mxu3  ;;  %v2059_v22 = vadd.f32 %v2058_v48, %v2010_v16  ;;  %v10273_v16 = vld [vmem:[%s9214_s24 + $0x18] sm:$0xff] }
 0x22d   : > { %v2092_v12 = vadd.f32 %v2091_v35, %v2055_v45  ;;  %v10265_v35 = vld [vmem:[%s9214_s24 + $0x10] sm:$0xff] }
 0x22f   : > { %v2106_v29 = vmul.f32 0.25, %v2092_v12 }
 0x231   : > { %v2111_v7 = vsel %vm2110_vm1, %v2106_v29, -inf }
 0x232   : > { %2112 = vmax.xlane.f32.xlu0 %v2111_v7 }
 0x233   : > { %v2062_v33 = vpop.f32.mrf.mxu2 }
 0x234   : > { %v2095_v23 = vpop.f32.mrf.mxu3  ;;  %v2063_v30 = vadd.f32 %v2062_v33, %v2016_v38 }
 0x235   : > { %v2096_v20 = vadd.f32 %v2095_v23, %v2059_v22 }
 0x237   : > { %v2107_v24 = vmul.f32 0.25, %v2096_v20 }
 0x239   : > { %v2114_v26 = vsel %vm2110_vm1, %v2107_v24, -inf }
 0x23a   : > { %2115 = vmax.xlane.f32.xlu0 %v2114_v26 }
 0x23b   : > { %v2066_v8 = vpop.f32.mrf.mxu2 }
 0x23c   : > { %v2099_v19 = vpop.f32.mrf.mxu3  ;;  %v2067_v43 = vadd.f32 %v2066_v8, %v2022_v63 }
 0x23d   : > { %v2100_v32 = vadd.f32 %v2099_v19, %v2063_v30 }
 0x23f   : > { %v2108_v21 = vmul.f32 0.25, %v2100_v32 }
 0x241   : > { %v2117_v62 = vsel %vm2110_vm1, %v2108_v21, -inf }
 0x242   : > { %2118 = vmax.xlane.f32.xlu1 %v2117_v62 }
 0x244   : > { %v2103_v39 = vpop.f32.mrf.mxu3 }
 0x245   : > { %v2104_v5 = vadd.f32 %v2103_v39, %v2067_v43 }
 0x247   : > { %v2109_v49 = vmul.f32 0.25, %v2104_v5 }
 0x249   : > { %v2120_v55 = vsel %vm2110_vm1, %v2109_v49, -inf }
 0x24a   : > { %2121 = vmax.xlane.f32.xlu1 %v2120_v55 }
 0x24e   : > { %2525 = vrot.lane.b32.xlu0 %v10130_v0, %s9003_s11 }
 0x2a5   : > { %v2113_v17 = vpop.xlane.xlu0 %2112 }
 0x2a6   : > { %v2123_v54 = vsub.f32 %v2106_v29, %v2113_v17 }
 0x2a8   : > { %v2127_v11 = vmul.f32 1.442695, %v2123_v54 }
 0x2aa   : > { %8594 = vpow2.f32 %v2127_v11 }
 0x2ad   : > { %v2116_v59 = vpop.xlane.xlu0 %2115 }
 0x2ae   : > { %v2124_v36 = vsub.f32 %v2107_v24, %v2116_v59 }
 0x2b0   : > { %v8595_v3 = vpop.eup %8594  ;;  %v2129_v61 = vmul.f32 1.442695, %v2124_v36 }
 0x2b1   : > { %v2135_v10 = vmul.f32 %v8595_v3, %v10252_v27 }
 0x2b2   : > { %8596 = vpow2.f32 %v2129_v61 }
 0x2b3   : > { %v2143_v9 = vsel %vm2110_vm1, %v2135_v10, 0.0  ;;  %v2139_v32 = vadd.f32 3.125e-08, %v2135_v10 }
 0x2b4   : > { %2144 = vadd.xlane.f32.xlu2 %v2143_v9 }
 0x2b5   : > { %v2119_v6 = vpop.xlane.xlu1 %2118 }
 0x2b6   : > { %v2125_v60 = vsub.f32 %v2108_v21, %v2119_v6 }
 0x2b8   : > { %v8597_v4 = vpop.eup %8596  ;;  %v2131_v14 = vmul.f32 1.442695, %v2125_v60 }
 0x2b9   : > { %v10260_v42 = vmul.f32 %v8597_v4, %v10257_v15 }
 0x2ba   : > { %8598 = vpow2.f32 %v2131_v14 }
 0x2bb   : > { %v2146_v52 = vsel %vm2110_vm1, %v10260_v42, 0.0 }
 0x2bc   : > { %2147 = vadd.xlane.f32.xlu2 %v2146_v52 }
 0x2bd   : > { %v2122_v45 = vpop.xlane.xlu1 %2121 }
 0x2be   : > { %v2126_v48 = vsub.f32 %v2109_v49, %v2122_v45 }
 0x2c0   : > { %v8599_v50 = vpop.eup %8598  ;;  %v2133_v12 = vmul.f32 1.442695, %v2126_v48  ;;  %v2526_v20 = vpop.permute.xlu0 %2525 }
 0x2c1   : > { %v10268_v29 = vmul.f32 %v8599_v50, %v10265_v35  ;;  %v2541_v41 = vsel %vm1803_vm0, %v2526_v20, 0  ;;  %v2140_v20 = vadd.f32 3.125e-08, %v10260_v42 }
 0x2c2   : > { %8600 = vpow2.f32 %v2133_v12  ;;  %v10295_v30 = vand.u32 4294901760, %v2541_v41 }
 0x2c3   : > { %v2149_v46 = vsel %vm2110_vm1, %v10268_v29, 0.0 }
 0x2c4   : > { %2150 = vadd.xlane.f32.xlu0 %v2149_v46  ;;  %v10298_v62 = vsub.f32 %v2541_v41, %v10295_v30 }
 0x2c6   : > { %v2618_v3 = vand.u32 4294901760, %v10298_v62 }
 0x2c8   : > { %v8601_v7 = vpop.eup %8600  ;;  %v2619_v46 = vsub.f32 %v10298_v62, %v2618_v3 }
 0x2c9   : > { %v10276_v2 = vmul.f32 %v8601_v7, %v10273_v16 }
 0x2ca   : > { %v2620_v41 = vand.u32 4294901760, %v2619_v46 }
 0x2cb   : > { %v2152_v22 = vsel %vm2110_vm1, %v10276_v2, 0.0 }
 0x2cc   : > { %2153 = vadd.xlane.f32.xlu1 %v2152_v22 }
 0x2d4   : > { %2527 = vrot.lane.b32.xlu2 %v10151_v57, %s9003_s11 }
 0x2d8   : > { %2513 = vrot.lane.b32.xlu0 %v10136_v40, %s9003_s11 }
 0x2dc   : > { %2521 = vrot.lane.b32.xlu2 %v10149_v37, %s9003_s11 }
 0x2e0   : > { %2519 = vrot.lane.b32.xlu0 %v10204_v13, %s9003_s11 }
 0x2e4   : > { %2515 = vrot.lane.b32.xlu2 %v10158_v53, %s9003_s11 }
 0x2e5   : > { %2523 = vrot.lane.b32.xlu1 %v10138_v44, %s9003_s11 }
 0x2ed   : > { %2517 = vrot.lane.b32.xlu1 %v10187_v25, %s9003_s11 }
 0x327   : > { %v2145_v23 = vpop.xlane.xlu2 %2144 }
 0x328   : > { %v2155_v56 = vadd.f32 1e-06, %v2145_v23 }
 0x32a   : > { %8602 = vrcp.f32 %v2155_v56  ;;  %v2170_v31 = vand.u32 2147483648, %v2155_v56  ;;  %v2168_v51 = vand.u32 2147483647, %v2155_v56  ;;  %vm2164_vm3 = vweird.f32 %v2155_v56 }
 0x32c   : > { %v2171_v43 = vor.u32 1.1754944e-38, %v2170_v31  ;;  %vm2169_vm5 = vcmp.eq.f32.partialorder %v2168_v51, 8.507059e+37 }
 0x32f   : > { %v2148_v18 = vpop.xlane.xlu2 %2147 }
 0x330   : > { %v8603_v33 = vpop.eup %8602  ;;  %v2156_v24 = vadd.f32 1e-06, %v2148_v18 }
 0x331   : > { %v2160_v38 = vmul.f32 %v8603_v33, %v2155_v56  ;;  %vm2165_vm2 = vweird.f32 %v8603_v33 }
 0x332   : > { %8604 = vrcp.f32 %v2156_v24  ;;  %vm2166_vm4 = vmor %vm2164_vm3, %vm2165_vm2  ;;  %v2185_v6 = vand.u32 2147483648, %v2156_v24  ;;  %v2183_v45 = vand.u32 2147483647, %v2156_v24  ;;  %vm2179_vm7 = vweird.f32 %v2156_v24 }
 0x333   : > { %v2161_v26 = vsub.f32 1.0, %v2160_v38 }
 0x334   : > { %v2186_v23 = vor.u32 1.1754944e-38, %v2185_v6  ;;  %vm2184_vm9 = vcmp.eq.f32.partialorder %v2183_v45, 8.507059e+37 }
 0x335   : > { %v2162_v19 = vmul.f32 %v8603_v33, %v2161_v26 }
 0x337   : > { %v2163_v21 = vadd.f32 %v8603_v33, %v2162_v19  ;;  %v2528_v28 = vpop.permute.xlu2 %2527  ;;  %v2151_v8 = vpop.xlane.xlu0 %2150 }
 0x338   : > { %v8605_v63 = vpop.eup %8604  ;;  %v2543_v39 = vsel %vm1803_vm0, %v2528_v28, 0  ;;  %v10301_v5 = vadd.f32 1e-06, %v2151_v8 }
 0x339   : > { %v2167_v49 = vsel %vm2166_vm4, %v8603_v33, %v2163_v21  ;;  %v2175_v55 = vmul.f32 %v8605_v63, %v2156_v24  ;;  %v10303_v17 = vand.u32 4294901760, %v2543_v39  ;;  %vm2180_vm6 = vweird.f32 %v8605_v63 }
 0x33a   : > { %8606 = vrcp.f32 %v10301_v5  ;;  %v2172_v54 = vsel %vm2169_vm5, %v2171_v43, %v2167_v49  ;;  %vm2181_vm8 = vmor %vm2179_vm7, %vm2180_vm6  ;;  %v2200_v24 = vand.u32 2147483648, %v10301_v5  ;;  %v2198_v51 = vand.u32 2147483647, %v10301_v5 }
 0x33b   : > { %v2176_v11 = vsub.f32 1.0, %v2175_v55  ;;  %v10307_v59 = vsub.f32 %v2543_v39, %v10303_v17  ;;  %2558 = vmatpush.xpose.msrb.mxu2 %v10303_v17  ;;  %v10310_v36 = vmul.f32 %v2172_v54, %v2139_v32  ;;  %vm2194_vm11 = vweird.f32 %v10301_v5 }
 0x33c   : > { %v2201_v8 = vor.u32 1.1754944e-38, %v2200_v24  ;;  %v2141_v43 = vadd.f32 3.125e-08, %v10268_v29  ;;  %vm2199_vm13 = vcmp.eq.f32.partialorder %v2198_v51, 8.507059e+37 }
 0x33d   : > { %v2177_v61 = vmul.f32 %v8605_v63, %v2176_v11  ;;  %v2612_v10 = vand.u32 4294901760, %v10307_v59  ;;  %v2220_v9 = vsel %vm2110_vm1, %v10310_v36, 0 }
 0x33e   : > { %v10316_v60 = vand.u32 4294901760, %v2220_v9 }
 0x33f   : > { %v2613_v4 = vsub.f32 %v10307_v59, %v2612_v10  ;;  %2560 = vmatpush.xpose.msrb.mxu2 %v10295_v30  ;;  %v2154_v14 = vpop.xlane.xlu1 %2153  ;;  %v2178_v52 = vadd.f32 %v8605_v63, %v2177_v61 }
 0x340   : > { %v8607_v48 = vpop.eup %8606  ;;  %v10322_v50 = vadd.f32 1e-06, %v2154_v14  ;;  %2321 = vmatmul.f32.vlgmr.msra.gmra.mxu1 %v10316_v60  ;;  %v2252_v12 = vsub.f32 %v2220_v9, %v10316_v60 }
 0x341   : > { %v2190_v7 = vmul.f32 %v8607_v48, %v10301_v5  ;;  %2709 = vmatpush.xpose.msra.mxu1 %v10303_v17  ;;  %v2614_v22 = vand.u32 4294901760, %v2613_v4  ;;  %v2182_v33 = vsel %vm2181_vm8, %v8605_v63, %v2178_v52  ;;  %vm2195_vm10 = vweird.f32 %v8607_v48  ;;  %v2522_v5 = vpop.permute.xlu2 %2521 }
 0x342   : > { %8608 = vrcp.f32 %v10322_v50  ;;  %2363 = vmatmul.f32.vlgmr.msra.gmra.mxu2 %v2252_v12  ;;  %v2253_v56 = vand.u32 4294901760, %v2252_v12  ;;  %v2187_v26 = vsel %vm2184_vm9, %v2186_v23, %v2182_v33  ;;  %vm2196_vm12 = vmor %vm2194_vm11, %vm2195_vm10  ;;  %v2215_v9 = vand.u32 2147483648, %v10322_v50 }
 0x343   : > { %v2191_v18 = vsub.f32 1.0, %v2190_v7  ;;  %2615 = vmatpush.xpose.msrb.mxu3 %v2614_v22  ;;  %v10336_v19 = vmul.f32 %v2187_v26, %v2140_v20  ;;  %v2213_v52 = vand.u32 2147483647, %v10322_v50  ;;  %vm2209_vm15 = vweird.f32 %v10322_v50 }
 0x344   : > { %2405 = vmatmul.f32.vlgmr.msra.gmra.mxu3 %v2253_v56  ;;  %v2254_v38 = vsub.f32 %v2252_v12, %v2253_v56  ;;  %v2216_v7 = vor.u32 1.1754944e-38, %v2215_v9  ;;  %v2142_v56 = vadd.f32 3.125e-08, %v10276_v2 }
 0x345   : > { %v2192_v31 = vmul.f32 %v8607_v48, %v2191_v18  ;;  %2711 = vmatpush.xpose.msra.mxu1 %v10295_v30  ;;  %v2223_v42 = vsel %vm2110_vm1, %v10336_v19, 0  ;;  %vm2214_vm3 = vcmp.eq.f32.partialorder %v2213_v52, 8.507059e+37  ;;  %v2537_v18 = vsel %vm1803_vm0, %v2522_v5, 0 }
 0x346   : > { %v2255_v32 = vand.u32 4294901760, %v2254_v38  ;;  %v10342_v63 = vand.u32 4294901760, %v2223_v42 }
 0x347   : > { %2621 = vmatpush.xpose.msrb.mxu3 %v2620_v41  ;;  %v2193_v21 = vadd.f32 %v8607_v48, %v2192_v31  ;;  %v10368_v31 = vand.u32 4294901760, %v2537_v18 }
 0x348   : > { %v8609_v28 = vpop.eup %8608  ;;  %2256 = vmatmul.f32.vlgmr.msra.gmra.mxu0 %v2255_v32  ;;  %2325 = vmatmul.f32.gmra.mxu1 %v10342_v63  ;;  %v2260_v55 = vsub.f32 %v2223_v42, %v10342_v63 }
 0x349   : > { %v2205_v39 = vmul.f32 %v8609_v28, %v10322_v50  ;;  %2665 = vmatpush.xpose.msra.mxu0 %v10307_v59  ;;  %v2197_v49 = vsel %vm2196_vm12, %v8607_v48, %v2193_v21  ;;  %vm2210_vm14 = vweird.f32 %v8609_v28  ;;  %v2516_v38 = vpop.permute.xlu2 %2515 }
 0x34a   : > { %v2202_v54 = vsel %vm2199_vm13, %v2201_v8, %v2197_v49  ;;  %2368 = vmatmul.f32.gmra.mxu2 %v2260_v55  ;;  %v2514_v6 = vpop.permute.xlu0 %2513  ;;  %v2261_v29 = vand.u32 4294901760, %v2260_v55  ;;  %vm2211_vm2 = vmor %vm2209_vm15, %vm2210_vm14  ;;  %v2531_v21 = vsel %vm1803_vm0, %v2516_v38, 0 }
 0x34b   : > { %v2206_v11 = vsub.f32 1.0, %v2205_v39  ;;  %v10349_v61 = vmul.f32 %v2202_v54, %v2141_v43  ;;  %v2529_v12 = vsel %vm1803_vm0, %v2514_v6, 0  ;;  %v2629_v39 = vsub.f32 %v2537_v18, %v10368_v31 }
 0x34c   : > { %2411 = vmatmul.f32.gmra.mxu3 %v2261_v29  ;;  %v2262_v45 = vsub.f32 %v2260_v55, %v2261_v29  ;;  %v10363_v33 = vand.u32 4294901760, %v2529_v12  ;;  %v10381_v5 = vand.u32 4294901760, %v2531_v21 }
 0x34d   : > { %v2207_v4 = vmul.f32 %v8609_v28, %v2206_v11  ;;  %2668 = vmatpush.xpose.msra.mxu0 %v10298_v62  ;;  %v2226_v14 = vsel %vm2110_vm1, %v10349_v61, 0  ;;  %v2630_v29 = vand.u32 4294901760, %v2629_v39 }
 0x34e   : > { %v10356_v48 = vand.u32 4294901760, %v2226_v14  ;;  %v2263_v22 = vand.u32 4294901760, %v2262_v45  ;;  %v10373_v51 = vsub.f32 %v2529_v12, %v10363_v33 }
 0x34f   : > { %v2208_v46 = vadd.f32 %v8609_v28, %v2207_v4  ;;  %v2574_v4 = vsub.f32 %v2531_v21, %v10381_v5 }
 0x350   : > { %v2268_v23 = vsub.f32 %v2226_v14, %v10356_v48  ;;  %2264 = vmatmul.f32.gmra.mxu0 %v2263_v22  ;;  %2329 = vmatmul.f32.gmra.mxu1 %v10356_v48  ;;  %v2567_v55 = vand.u32 4294901760, %v10373_v51  ;;  %v2631_v22 = vsub.f32 %v2629_v39, %v2630_v29 }
 0x351   : > { %v2212_v20 = vsel %vm2211_vm2, %v8609_v28, %v2208_v46 }
 0x352   : > { %v2269_v50 = vand.u32 4294901760, %v2268_v23  ;;  %v2217_v24 = vsel %vm2214_vm3, %v2216_v7, %v2212_v20  ;;  %2373 = vmatmul.f32.gmra.mxu2 %v2268_v23  ;;  %v2568_v14 = vsub.f32 %v10373_v51, %v2567_v55  ;;  %v2575_v20 = vand.u32 4294901760, %v2574_v4  ;;  %v2520_v18 = vpop.permute.xlu0 %2519 }
 0x353   : > { %v10366_v41 = vmul.f32 %v2217_v24, %v2142_v56  ;;  %v2535_v59 = vsel %vm1803_vm0, %v2520_v18, 0 }
 0x354   : > { %v2270_v26 = vsub.f32 %v2268_v23, %v2269_v50  ;;  %2417 = vmatmul.f32.gmra.mxu3 %v2269_v50  ;;  %v2569_v23 = vand.u32 4294901760, %v2568_v14  ;;  %v2632_v50 = vand.u32 4294901760, %v2631_v22  ;;  %v2576_v38 = vsub.f32 %v2574_v4, %v2575_v20 }
 0x355   : > { %v2229_v2 = vsel %vm2110_vm1, %v10366_v41, 0 }
 0x356   : > { %v2271_v32 = vand.u32 4294901760, %v2270_v26  ;;  %v10375_v42 = vand.u32 4294901760, %v2229_v2  ;;  %v2577_v26 = vand.u32 4294901760, %v2576_v38 }
 0x357   : > { %v2524_v28 = vpop.permute.xlu1 %2523 }
 0x358   : > { %v2539_v8 = vsel %vm1803_vm0, %v2524_v28, 0  ;;  %v2276_v43 = vsub.f32 %v2229_v2, %v10375_v42  ;;  %2272 = vmatmul.f32.gmra.mxu0 %v2271_v32  ;;  %2333 = vmatmul.f32.gmra.mxu1 %v10375_v42 }
 0x359   : > { %v2561_v49 = vand.u32 4294901760, %v2539_v8 }
 0x35a   : > { %v2277_v54 = vand.u32 4294901760, %v2276_v43  ;;  %2378 = vmatmul.f32.gmra.mxu2 %v2276_v43 }
 0x35b   : > { %v2623_v11 = vsub.f32 %v2539_v8, %v2561_v49  ;;  %2562 = vmatpush.xpose.msrb.mxu2 %v2561_v49  ;;  %2713 = vmatpush.xpose.msra.mxu1 %v2561_v49 }
 0x35c   : > { %v2278_v9 = vsub.f32 %v2276_v43, %v2277_v54  ;;  %2423 = vmatmul.f32.gmra.mxu3 %v2277_v54 }
 0x35d   : > { %2671 = vmatpush.xpose.msra.mxu0 %v2623_v11  ;;  %v2624_v6 = vand.u32 4294901760, %v2623_v11 }
 0x35e   : > { %v2279_v52 = vand.u32 4294901760, %v2278_v9 }
 0x35f   : > { %2564 = vmatpush.xpose.msrb.mxu2 %v10368_v31  ;;  %2715 = vmatpush.xpose.msra.mxu1 %v10368_v31  ;;  %v2518_v45 = vpop.permute.xlu1 %2517  ;;  %v2625_v12 = vsub.f32 %v2623_v11, %v2624_v6 }
 0x360   : > { %v2533_v46 = vsel %vm1803_vm0, %v2518_v45, 0  ;;  %2280 = vmatmul.f32.gmra.mxu0 %v2279_v52  ;;  %2493 = vmatmul.f32.vlgmr.msrb.gmra.mxu1 %v10316_v60 }
 0x361   : > { %2674 = vmatpush.xpose.msra.mxu0 %v2629_v39  ;;  %v2626_v7 = vand.u32 4294901760, %v2625_v12  ;;  %v2581_v56 = vand.u32 4294901760, %v2533_v46 }
 0x362   : > { %2570 = vmatmul.f32.vlgmr.msrb.gmra.mxu2 %v2569_v23 }
 0x363   : > { %2756 = vmatpush.xpose.msra.mxu2 %v2612_v10  ;;  %2627 = vmatpush.xpose.msrb.mxu3 %v2626_v7  ;;  %v2582_v24 = vsub.f32 %v2533_v46, %v2581_v56  ;;  %v2589_v10 = vand.u32 4294901760, %v2535_v59 }
 0x365   : > { %v2583_v2 = vand.u32 4294901760, %v2582_v24  ;;  %v2590_v62 = vsub.f32 %v2535_v59, %v2589_v10 }
 0x367   : > { %2760 = vmatpush.xpose.msra.mxu2 %v2618_v3  ;;  %2633 = vmatpush.xpose.msrb.mxu3 %v2632_v50  ;;  %v2584_v3 = vsub.f32 %v2582_v24, %v2583_v2  ;;  %v2591_v32 = vand.u32 4294901760, %v2590_v62 }
 0x368   : > { %2456 = vmatmul.f32.vlgmr.msrb.gmra.mxu0 %v10316_v60  ;;  %2497 = vmatmul.f32.gmra.mxu1 %v10342_v63 }
 0x369   : > { %v2592_v60 = vsub.f32 %v2590_v62, %v2591_v32 }
 0x36a   : > { %2635 = vmatmul.f32.vlgmr.msrb.gmra.mxu3 %v10363_v33  ;;  %2578 = vmatmul.f32.gmra.mxu2 %v2577_v26 }
 0x36b   : > { %2799 = vmatpush.xpose.msra.mxu3 %v10303_v17  ;;  %2764 = vmatpush.xpose.msra.mxu2 %v2624_v6  ;;  %v2585_v17 = vand.u32 4294901760, %v2584_v3 }
 0x36f   : > { %2801 = vmatpush.xpose.msra.mxu3 %v10295_v30  ;;  %2768 = vmatpush.xpose.msra.mxu2 %v2630_v29  ;;  %v2593_v30 = vand.u32 4294901760, %v2592_v60 }
 0x370   : > { %2460 = vmatmul.f32.gmra.mxu0 %v10342_v63  ;;  %2501 = vmatmul.f32.gmra.mxu1 %v10356_v48 }
 0x372   : > { %2639 = vmatmul.f32.gmra.mxu3 %v10381_v5  ;;  %2586 = vmatmul.f32.gmra.mxu2 %v2585_v17 }
 0x373   : > { %2803 = vmatpush.xpose.msra.mxu3 %v2561_v49 }
 0x377   : > { %2805 = vmatpush.xpose.msra.mxu3 %v10368_v31 }
 0x378   : > { %2464 = vmatmul.f32.gmra.mxu0 %v10356_v48  ;;  %2505 = vmatmul.f32.gmra.mxu1 %v10375_v42 }
 0x37a   : > { %2643 = vmatmul.f32.gmra.mxu3 %v2581_v56  ;;  %2594 = vmatmul.f32.gmra.mxu2 %v2593_v30 }
 0x380   : > { %2468 = vmatmul.f32.gmra.mxu0 %v10375_v42  ;;  %2719 = vmatmul.f32.vlgmr.msra.gmra.mxu1 %v2567_v55 }
 0x382   : > { %2647 = vmatmul.f32.gmra.mxu3 %v2589_v10  ;;  %2770 = vmatmul.f32.vlgmr.msra.gmra.mxu2 %v10363_v33 }
 0x388   : > { %2677 = vmatmul.f32.vlgmr.msra.gmra.mxu0 %v10373_v51  ;;  %2725 = vmatmul.f32.gmra.mxu1 %v2575_v20 }
 0x38a   : > { %2807 = vmatmul.f32.vlgmr.msra.gmra.mxu3 %v10363_v33  ;;  %2774 = vmatmul.f32.gmra.mxu2 %v10381_v5 }
 0x390   : > { %2682 = vmatmul.f32.gmra.mxu0 %v2574_v4  ;;  %2731 = vmatmul.f32.gmra.mxu1 %v2583_v2 }
 0x392   : > { %2811 = vmatmul.f32.gmra.mxu3 %v10381_v5  ;;  %2778 = vmatmul.f32.gmra.mxu2 %v2581_v56 }
 0x398   : > { %2687 = vmatmul.f32.gmra.mxu0 %v2582_v24  ;;  %2737 = vmatmul.f32.gmra.mxu1 %v2591_v32 }
 0x39a   : > { %2815 = vmatmul.f32.gmra.mxu3 %v2581_v56  ;;  %2782 = vmatmul.f32.gmra.mxu2 %v2589_v10 }
 0x3a0   : > { %2692 = vmatmul.f32.gmra.mxu0 %v2590_v62 }
 0x3a2   : > { %2819 = vmatmul.f32.gmra.mxu3 %v2589_v10 }
 0x3bd   : > { %v10417_v63 = vpop.f32.mrf.mxu1 }
 0x3be   : > { %12728 = vst [vmem:[#allocation28_spill] sm:$0xff] %v10417_v63 }
 0x3c5   : > { %v10419_v48 = vpop.f32.mrf.mxu0  ;;  %v10421_v31 = vpop.f32.mrf.mxu2 }
 0x3c6   : > { %12729 = vst [vmem:[#allocation22_spill] sm:$0xff] %v10419_v48  ;;  %v10423_v33 = vpop.f32.mrf.mxu1 }
 0x3c7   : > { %12730 = vst [vmem:[#allocation24_spill] sm:$0xff] %v10421_v31  ;;  %v10425_v51 = vpop.f32.mrf.mxu3 }
 0x3c8   : > { %12731 = vst [vmem:[#allocation26_spill] sm:$0xff] %v10423_v33 }
 0x3c9   : > { %12732 = vst [vmem:[#allocation30_spill] sm:$0xff] %v10425_v51 }
 0x3cd   : > { %v10427_v42 = vpop.f32.mrf.mxu0  ;;  %v10431_v28 = vpop.f32.mrf.mxu2 }
 0x3ce   : > { %12733 = vst [vmem:[#allocation23_spill] sm:$0xff] %v10427_v42  ;;  %v10429_v21 = vpop.f32.mrf.mxu1 }
 0x3cf   : > { %12734 = vst [vmem:[#allocation25_spill] sm:$0xff] %v10429_v21  ;;  %v10433_v8 = vpop.f32.mrf.mxu3 }
 0x3d0   : > { %12735 = vst [vmem:[#allocation27_spill] sm:$0xff] %v10431_v28 }
 0x3d1   : > { %12736 = vst [vmem:[#allocation29_spill] sm:$0xff] %v10433_v8 }
 0x3d5   : > { %v10435_v43 = vpop.f32.mrf.mxu0  ;;  %v10439_v49 = vpop.f32.mrf.mxu2 }
 0x3d6   : > { %12737 = vst [vmem:[#allocation31_spill] sm:$0xff] %v10435_v43  ;;  %v10437_v39 = vpop.f32.mrf.mxu1 }
 0x3d7   : > { %12738 = vst [vmem:[#allocation32_spill] sm:$0xff] %v10437_v39  ;;  %v10441_v5 = vpop.f32.mrf.mxu3 }
 0x3d8   : > { %12739 = vst [vmem:[#allocation33_spill] sm:$0xff] %v10439_v49 }
 0x3d9   : > { %12740 = vst [vmem:[#allocation34_spill] sm:$0xff] %v10441_v5 }
 0x3dd   : > { %v10443_v55 = vpop.f32.mrf.mxu0  ;;  %v10447_v11 = vpop.f32.mrf.mxu2 }
 0x3de   : > { %12741 = vst [vmem:[#allocation35_spill] sm:$0xff] %v10443_v55  ;;  %v10445_v54 = vpop.f32.mrf.mxu1 }
 0x3df   : > { %12742 = vst [vmem:[#allocation36_spill] sm:$0xff] %v10445_v54  ;;  %v10449_v9 = vpop.f32.mrf.mxu3 }
 0x3e0   : > { %12743 = vst [vmem:[#allocation37_spill] sm:$0xff] %v10447_v11 }
 0x3e1   : > { %12744 = vst [vmem:[#allocation38_spill] sm:$0xff] %v10449_v9 }
 0x3e5   : > { %v10451_v6 = vpop.f32.mrf.mxu0  ;;  %v2571_v4 = vpop.f32.mrf.mxu2 }
 0x3e6   : > { %12745 = vst [vmem:[#allocation39_spill] sm:$0xff] %v10451_v6  ;;  %v10453_v29 = vpop.f32.mrf.mxu1 }
 0x3e7   : > { %12746 = vst [vmem:[#allocation40_spill] sm:$0xff] %v10453_v29 }
 0x3ed   : > { %v2636_v14 = vpop.f32.mrf.mxu3  ;;  %v10455_v52 = vpop.f32.mrf.mxu0 }
 0x3ee   : > { %12747 = vst [vmem:[#allocation41_spill] sm:$0xff] %v10455_v52  ;;  %v10457_v45 = vpop.f32.mrf.mxu1  ;;  %v2579_v12 = vpop.f32.mrf.mxu2  ;;  %v2637_v24 = vadd.f32 %v2636_v14, %v2571_v4 }
 0x3ef   : > { %12748 = vst [vmem:[#allocation42_spill] sm:$0xff] %v10457_v45 }
 0x3f5   : > { %v2640_v46 = vpop.f32.mrf.mxu3  ;;  %v10459_v7 = vpop.f32.mrf.mxu0 }
 0x3f6   : > { %12749 = vst [vmem:[#allocation43_spill] sm:$0xff] %v10459_v7  ;;  %v2587_v22 = vpop.f32.mrf.mxu2  ;;  %v10461_v23 = vpop.f32.mrf.mxu1  ;;  %v2641_v17 = vadd.f32 %v2640_v46, %v2579_v12 }
 0x3f7   : > { %12750 = vst [vmem:[#allocation44_spill] sm:$0xff] %v10461_v23 }
 0x3fd   : > { %v2644_v56 = vpop.f32.mrf.mxu3  ;;  %v10463_v20 = vpop.f32.mrf.mxu0 }
 0x3fe   : > { %12751 = vst [vmem:[#allocation45_spill] sm:$0xff] %v10463_v20  ;;  %v2595_v18 = vpop.f32.mrf.mxu2  ;;  %v2720_v50 = vpop.f32.mrf.mxu1  ;;  %v2645_v4 = vadd.f32 %v2644_v56, %v2587_v22 }
 0x405   : > { %v2648_v38 = vpop.f32.mrf.mxu3  ;;  %v2678_v59 = vpop.f32.mrf.mxu0 }
 0x406   : > { %v2679_v10 = vadd.f32 %v2678_v59, %v2637_v24  ;;  %v2771_v26 = vpop.f32.mrf.mxu2  ;;  %v2726_v62 = vpop.f32.mrf.mxu1 }
 0x408   : > { %v2721_v2 = vadd.f32 %v2720_v50, %v2679_v10 }
 0x40a   : > { %v2772_v3 = vadd.f32 %v2771_v26, %v2721_v2 }
 0x40d   : > { %v2808_v32 = vpop.f32.mrf.mxu3  ;;  %v2683_v60 = vpop.f32.mrf.mxu0 }
 0x40e   : > { %v2809_v30 = vadd.f32 %v2808_v32, %v2772_v3  ;;  %v2684_v9 = vadd.f32 %v2683_v60, %v2641_v17  ;;  %v2775_v11 = vpop.f32.mrf.mxu2  ;;  %v2732_v29 = vpop.f32.mrf.mxu1  ;;  %v2649_v3 = vadd.f32 %v2648_v38, %v2595_v18 }
 0x410   : > { %v2823_v23 = vmul.f32 0.25, %v2809_v30  ;;  %v2727_v39 = vadd.f32 %v2726_v62, %v2684_v9 }
 0x412   : > { %v2827_v20 = vsel %vm2110_vm1, %v2823_v23, -inf  ;;  %v2776_v55 = vadd.f32 %v2775_v11, %v2727_v39 }
 0x413   : > { %2828 = vmax.xlane.f32.xlu2 %v2827_v20 }
 0x415   : > { %v2812_v14 = vpop.f32.mrf.mxu3  ;;  %v2688_v24 = vpop.f32.mrf.mxu0 }
 0x416   : > { %v2813_v59 = vadd.f32 %v2812_v14, %v2776_v55  ;;  %v2689_v50 = vadd.f32 %v2688_v24, %v2645_v4  ;;  %v2779_v12 = vpop.f32.mrf.mxu2  ;;  %v2738_v20 = vpop.f32.mrf.mxu1 }
 0x418   : > { %v2824_v10 = vmul.f32 0.25, %v2813_v59  ;;  %v2733_v26 = vadd.f32 %v2732_v29, %v2689_v50 }
 0x41a   : > { %v2830_v46 = vsel %vm2110_vm1, %v2824_v10, -inf  ;;  %v2780_v2 = vadd.f32 %v2779_v12, %v2733_v26 }
 0x41b   : > { %2831 = vmax.xlane.f32.xlu1 %v2830_v46 }
 0x41d   : > { %v2816_v17 = vpop.f32.mrf.mxu3  ;;  %v2693_v9 = vpop.f32.mrf.mxu0 }
 0x41e   : > { %v2817_v62 = vadd.f32 %v2816_v17, %v2780_v2  ;;  %v2694_v32 = vadd.f32 %v2693_v9, %v2649_v3  ;;  %v2783_v56 = vpop.f32.mrf.mxu2 }
 0x420   : > { %v2825_v39 = vmul.f32 0.25, %v2817_v62  ;;  %v2739_v11 = vadd.f32 %v2738_v20, %v2694_v32 }
 0x422   : > { %v2833_v22 = vsel %vm2110_vm1, %v2825_v39, -inf  ;;  %v2784_v55 = vadd.f32 %v2783_v56, %v2739_v11 }
 0x423   : > { %2834 = vmax.xlane.f32.xlu0 %v2833_v22 }
 0x425   : > { %v2820_v60 = vpop.f32.mrf.mxu3 }
 0x426   : > { %v2821_v29 = vadd.f32 %v2820_v60, %v2784_v55 }
 0x428   : > { %v2826_v30 = vmul.f32 0.25, %v2821_v29 }
 0x42a   : > { %v2836_v4 = vsel %vm2110_vm1, %v2826_v30, -inf }
 0x42b   : > { %2837 = vmax.xlane.f32.xlu2 %v2836_v4 }
 0x434   : > { %2945 = vrot.lane.b32.xlu1 %v10238_v34, %s9003_s11 }
 0x443   : > { %2941 = vrot.lane.b32.xlu2 %v10226_v58, %s9003_s11 }
 0x486   : > { %v2829_v18 = vpop.xlane.xlu2 %2828 }
 0x487   : > { %v2839_v38 = vsub.f32 %v2823_v23, %v2829_v18 }
 0x489   : > { %v2843_v14 = vmul.f32 1.442695, %v2839_v38 }
 0x48b   : > { %8610 = vpow2.f32 %v2843_v14 }
 0x48e   : > { %v2832_v24 = vpop.xlane.xlu1 %2831 }
 0x48f   : > { %v2840_v59 = vsub.f32 %v2824_v10, %v2832_v24 }
 0x491   : > { %v8611_v50 = vpop.eup %8610  ;;  %v2845_v26 = vmul.f32 1.442695, %v2840_v59 }
 0x492   : > { %v10474_v12 = vmul.f32 %v8611_v50, %v10252_v27 }
 0x493   : > { %8612 = vpow2.f32 %v2845_v26 }
 0x494   : > { %v2859_v46 = vsel %vm2110_vm1, %v10474_v12, 0.0 }
 0x495   : > { %2860 = vadd.xlane.f32.xlu1 %v2859_v46 }
 0x496   : > { %v2835_v2 = vpop.xlane.xlu0 %2834 }
 0x497   : > { %v2841_v3 = vsub.f32 %v2825_v39, %v2835_v2 }
 0x499   : > { %v8613_v17 = vpop.eup %8612  ;;  %v2847_v9 = vmul.f32 1.442695, %v2841_v3 }
 0x49a   : > { %v10479_v23 = vmul.f32 %v8613_v17, %v10257_v15 }
 0x49b   : > { %8614 = vpow2.f32 %v2847_v9 }
 0x49c   : > { %v2862_v10 = vsel %vm2110_vm1, %v10479_v23, 0.0 }
 0x49d   : > { %2863 = vadd.xlane.f32.xlu0 %v2862_v10 }
 0x49e   : > { %v2838_v56 = vpop.xlane.xlu2 %2837 }
 0x49f   : > { %v2842_v55 = vsub.f32 %v2826_v30, %v2838_v56 }
 0x4a1   : > { %v8615_v62 = vpop.eup %8614  ;;  %v2849_v60 = vmul.f32 1.442695, %v2842_v55 }
 0x4a2   : > { %v10484_v27 = vmul.f32 %v8615_v62, %v10265_v35 }
 0x4a3   : > { %8616 = vpow2.f32 %v2849_v60 }
 0x4a4   : > { %v2865_v32 = vsel %vm2110_vm1, %v10484_v27, 0.0 }
 0x4a5   : > { %2866 = vadd.xlane.f32.xlu2 %v2865_v32 }
 0x4a6   : > { %v2946_v20 = vpop.permute.xlu1 %2945  ;;  %v2942_v14 = vpop.permute.xlu2 %2941 }
 0x4a7   : > { %v10488_v39 = vand.u32 4294901760, %v2946_v20  ;;  %v10529_v55 = vand.u32 4294901760, %v2942_v14 }
 0x4a9   : > { %v10491_v11 = vsub.f32 %v2946_v20, %v10488_v39  ;;  %2976 = vmatpush.msrb.mxu0 %v10488_v39  ;;  %3127 = vmatpush.msrb.mxu3 %v10488_v39  ;;  %v8617_v29 = vpop.eup %8616  ;;  %v2855_v20 = vadd.f32 3.125e-08, %v10474_v12  ;;  %v2856_v12 = vadd.f32 3.125e-08, %v10479_v23 }
 0x4aa   : > { %v10521_v30 = vmul.f32 %v8617_v29, %v10273_v16 }
 0x4ab   : > { %v12628_v15 = vand.u32 4294901760, %v10491_v11  ;;  %3083 = vmatpush.msrb.mxu2 %v10491_v11 }
 0x4ac   : > { %v2868_v4 = vsel %vm2110_vm1, %v10521_v30, 0.0 }
 0x4ad   : > { %v3031_v35 = vsub.f32 %v10491_v11, %v12628_v15  ;;  %v2857_v15 = vadd.f32 3.125e-08, %v10484_v27 }
 0x4ae   : > { %2939 = vrot.lane.b32.xlu1 %v10230_v1, %s9003_s11 }
 0x4af   : > { %v3032_v22 = vand.u32 4294901760, %v3031_v35 }
 0x4b1   : > { %2943 = vrot.lane.b32.xlu0 %v10228_v47, %s9003_s11  ;;  %3033 = vmatpush.msrb.mxu1 %v3032_v22 }
 0x4b6   : > { %3257 = vrot.lane.b32.xlu1 %v10130_v0, %s9004_s13 }
 0x4bd   : > { %3259 = vrot.lane.b32.xlu2 %v10151_v57, %s9004_s13 }
 0x4be   : > { %3253 = vrot.lane.b32.xlu1 %v10149_v37, %s9004_s13 }
 0x4c5   : > { %3255 = vrot.lane.b32.xlu2 %v10138_v44, %s9004_s13 }
 0x4c6   : > { %3247 = vrot.lane.b32.xlu1 %v10158_v53, %s9004_s13 }
 0x4cd   : > { %3245 = vrot.lane.b32.xlu2 %v10136_v40, %s9004_s13 }
 0x4ce   : > { %3251 = vrot.lane.b32.xlu1 %v10204_v13, %s9004_s13 }
 0x4d5   : > { %3249 = vrot.lane.b32.xlu2 %v10187_v25, %s9004_s13 }
 0x4db   : > { %2869 = vadd.xlane.f32.xlu0 %v2868_v4 }
 0x508   : > { %v2861_v18 = vpop.xlane.xlu1 %2860 }
 0x509   : > { %v2871_v38 = vadd.f32 1e-06, %v2861_v18 }
 0x50b   : > { %8618 = vrcp.f32 %v2871_v38  ;;  %v2886_v2 = vand.u32 2147483648, %v2871_v38  ;;  %v2884_v17 = vand.u32 2147483647, %v2871_v38  ;;  %vm2880_vm5 = vweird.f32 %v2871_v38 }
 0x50d   : > { %v2887_v62 = vor.u32 1.1754944e-38, %v2886_v2  ;;  %vm2885_vm7 = vcmp.eq.f32.partialorder %v2884_v17, 8.507059e+37 }
 0x510   : > { %v2864_v24 = vpop.xlane.xlu0 %2863 }
 0x511   : > { %v8619_v59 = vpop.eup %8618  ;;  %v2872_v50 = vadd.f32 1e-06, %v2864_v24 }
 0x512   : > { %v2876_v26 = vmul.f32 %v8619_v59, %v2871_v38  ;;  %vm2881_vm4 = vweird.f32 %v8619_v59 }
 0x513   : > { %8620 = vrcp.f32 %v2872_v50  ;;  %vm2882_vm6 = vmor %vm2880_vm5, %vm2881_vm4  ;;  %v2901_v4 = vand.u32 2147483648, %v2872_v50  ;;  %v2899_v38 = vand.u32 2147483647, %v2872_v50  ;;  %vm2895_vm9 = vweird.f32 %v2872_v50 }
 0x514   : > { %v2877_v46 = vsub.f32 1.0, %v2876_v26 }
 0x515   : > { %vm2900_vm11 = vcmp.eq.f32.partialorder %v2899_v38, 8.507059e+37 }
 0x516   : > { %v2878_v3 = vmul.f32 %v8619_v59, %v2877_v46 }
 0x518   : > { %v2879_v16 = vadd.f32 %v8619_v59, %v2878_v3  ;;  %v2867_v9 = vpop.xlane.xlu2 %2866 }
 0x519   : > { %v8621_v10 = vpop.eup %8620  ;;  %v10525_v32 = vadd.f32 1e-06, %v2867_v9 }
 0x51a   : > { %v2883_v35 = vsel %vm2882_vm6, %v8619_v59, %v2879_v16  ;;  %v2891_v22 = vmul.f32 %v8621_v10, %v2872_v50  ;;  %vm2896_vm8 = vweird.f32 %v8621_v10  ;;  %v10539_v59 = vsub.f32 %v2942_v14, %v10529_v55 }
 0x51b   : > { %v2888_v56 = vsel %vm2885_vm7, %v2887_v62, %v2883_v35  ;;  %8622 = vrcp.f32 %v10525_v32  ;;  %vm2897_vm10 = vmor %vm2895_vm9, %vm2896_vm8  ;;  %v2902_v16 = vor.u32 1.1754944e-38, %v2901_v4  ;;  %v2916_v35 = vand.u32 2147483648, %v10525_v32 }
 0x51c   : > { %v10531_v60 = vmul.f32 %v2888_v56, %v2855_v20  ;;  %v2892_v29 = vsub.f32 1.0, %v2891_v22  ;;  %vm2910_vm12 = vweird.f32 %v10525_v32  ;;  %v2914_v27 = vand.u32 2147483647, %v10525_v32 }
 0x51e   : > { %v2893_v18 = vmul.f32 %v8621_v10, %v2892_v29  ;;  %v2952_v24 = vsel %vm2110_vm1, %v10531_v60, 0  ;;  %vm2915_vm15 = vcmp.eq.f32.partialorder %v2914_v27, 8.507059e+37 }
 0x51f   : > { %v10535_v26 = vand.u32 4294901760, %v2952_v24 }
 0x520   : > { %v2894_v46 = vadd.f32 %v8621_v10, %v2893_v18  ;;  %v2940_v2 = vpop.permute.xlu1 %2939  ;;  %v3260_v3 = vpop.permute.xlu2 %3259 }
 0x521   : > { %v10541_v17 = vpop.eup %8622  ;;  %v10543_v9 = vand.u32 4294901760, %v2940_v2  ;;  %v3275_v62 = vsel %vm1803_vm0, %v3260_v3, 0  ;;  %v10547_v20 = vsub.f32 %v2952_v24, %v10535_v26 }
 0x522   : > { %v2906_v23 = vmul.f32 %v10541_v17, %v10525_v32  ;;  %v10551_v14 = vand.u32 4294901760, %v3275_v62  ;;  %v2898_v50 = vsel %vm2897_vm10, %v8621_v10, %v2894_v46  ;;  %v3042_v46 = vand.u32 4294901760, %v10539_v59 }
 0x523   : > { %v10555_v22 = vsub.f32 %v2940_v2, %v10543_v9  ;;  %v2944_v56 = vpop.permute.xlu0 %2943  ;;  %v2985_v29 = vand.u32 4294901760, %v10547_v20  ;;  %v2903_v4 = vsel %vm2900_vm11, %v2902_v16, %v2898_v50  ;;  %vm2911_vm13 = vweird.f32 %v10541_v17 }
 0x524   : > { %v2907_v18 = vsub.f32 1.0, %v2906_v23  ;;  %v10559_v24 = vsub.f32 %v3275_v62, %v10551_v14  ;;  %v10561_v38 = vand.u32 4294901760, %v2944_v56  ;;  %v10563_v3 = vmul.f32 %v2903_v4, %v2856_v12  ;;  %vm10594_vm14 = vmor %vm2910_vm12, %vm2911_vm13 }
 0x525   : > { %v2986_v10 = vsub.f32 %v10547_v20, %v2985_v29  ;;  %v2917_v62 = vor.u32 1.1754944e-38, %v2916_v35  ;;  %v3048_v7 = vand.u32 4294901760, %v10555_v22  ;;  %v3043_v32 = vsub.f32 %v10539_v59, %v3042_v46 }
 0x526   : > { %v2908_v2 = vmul.f32 %v10541_v17, %v2907_v18  ;;  %v12629_v16 = vand.u32 4294901760, %v10559_v24  ;;  %v3035_v23 = vsub.f32 %v2944_v56, %v10561_v38  ;;  %2978 = vmatpush.msrb.mxu0 %v10561_v38  ;;  %3129 = vmatpush.msrb.mxu3 %v10561_v38  ;;  %v2955_v12 = vsel %vm2110_vm1, %v10563_v3, 0 }
 0x527   : > { %v10578_v50 = vand.u32 4294901760, %v2955_v12  ;;  %v2987_v5 = vand.u32 4294901760, %v2986_v10 }
 0x528   : > { %v2909_v4 = vadd.f32 %v10541_v17, %v2908_v2  ;;  %v3345_v56 = vsub.f32 %v10559_v24, %v12629_v16  ;;  %3086 = vmatpush.msrb.mxu2 %v3035_v23  ;;  %v3258_v18 = vpop.permute.xlu1 %3257  ;;  %2980 = vmatpush.msrb.mxu0 %v10529_v55  ;;  %v3256_v45 = vpop.permute.xlu2 %3255  ;;  %v3036_v52 = vand.u32 4294901760, %v3035_v23 }
 0x529   : > { %v3273_v8 = vsel %vm1803_vm0, %v3258_v18, 0  ;;  %3131 = vmatpush.msrb.mxu3 %v10529_v55  ;;  %v3271_v35 = vsel %vm1803_vm0, %v3256_v45, 0  ;;  %v2992_v2 = vsub.f32 %v2955_v12, %v10578_v50 }
 0x52a   : > { %v10598_v28 = vand.u32 4294901760, %v3273_v8  ;;  %v10600_v49 = vand.u32 4294901760, %v3271_v35  ;;  %2982 = vmatpush.msrb.mxu0 %v10543_v9  ;;  %3089 = vmatpush.msrb.mxu2 %v10539_v59  ;;  %v3346_v45 = vand.u32 4294901760, %v3345_v56  ;;  %v3037_v10 = vsub.f32 %v3035_v23, %v3036_v52 }
 0x52b   : > { %3133 = vmatpush.msrb.mxu3 %v10543_v9  ;;  %2988 = vmatmul.f32.vlgmr.msrb.gmra.mxu0 %v2987_v5  ;;  %v2993_v12 = vand.u32 4294901760, %v2992_v2  ;;  %v2913_v18 = vsel %vm10594_vm14, %v10541_v17, %v2909_v4  ;;  %v12754_v23 = vand.u32 4294901760, %v10491_v11  ;;  %v3049_v5 = vsub.f32 %v10555_v22, %v3048_v7 }
 0x52c   : > { %v10610_v33 = vsub.f32 %v3273_v8, %v10598_v28  ;;  %v10613_v42 = vsub.f32 %v3271_v35, %v10600_v49  ;;  %3137 = vmatmul.f32.vlgmr.msrb.gmra.mxu3 %v2985_v29  ;;  %v3038_v27 = vand.u32 4294901760, %v3037_v10  ;;  %v2918_v56 = vsel %vm2915_vm15, %v2917_v62, %v2913_v18  ;;  %3092 = vmatpush.msrb.mxu2 %v10555_v22 }
 0x52d   : > { %3174 = vmatpush.msra.mxu0 %v12754_v23  ;;  %3347 = vmatpush.xpose.msra.mxu3 %v3346_v45  ;;  %v10619_v59 = vmul.f32 %v2918_v56, %v2857_v15  ;;  %v3044_v17 = vand.u32 4294901760, %v3043_v32  ;;  %v2994_v11 = vsub.f32 %v2992_v2, %v2993_v12 }
 0x52e   : > { %3095 = vmatmul.f32.vlgmr.msrb.gmra.mxu2 %v10547_v20  ;;  %v3350_v8 = vand.u32 4294901760, %v10610_v33  ;;  %3039 = vmatpush.msrb.mxu1 %v3038_v27  ;;  %v3356_v15 = vand.u32 4294901760, %v10613_v42  ;;  %v3050_v20 = vand.u32 4294901760, %v3049_v5 }
 0x52f   : > { %3178 = vmatpush.msra.mxu0 %v3036_v52  ;;  %3290 = vmatpush.xpose.msra.mxu2 %v10551_v14  ;;  %v2958_v29 = vsel %vm2110_vm1, %v10619_v59, 0  ;;  %v2995_v45 = vand.u32 4294901760, %v2994_v11 }
 0x530   : > { %v3254_v16 = vpop.permute.xlu1 %3253  ;;  %v3351_v62 = vsub.f32 %v10610_v33, %v3350_v8  ;;  %v10628_v22 = vand.u32 4294901760, %v2958_v29  ;;  %3045 = vmatpush.msrb.mxu1 %v3044_v17  ;;  %v3357_v32 = vsub.f32 %v10613_v42, %v3356_v15 }
 0x531   : > { %3182 = vmatpush.msra.mxu0 %v3042_v46  ;;  %v3269_v52 = vsel %vm1803_vm0, %v3254_v16, 0 }
 0x532   : > { %v3295_v4 = vand.u32 4294901760, %v3269_v52  ;;  %v3352_v35 = vand.u32 4294901760, %v3351_v62  ;;  %3051 = vmatpush.msrb.mxu1 %v3050_v20  ;;  %v3000_v46 = vsub.f32 %v2958_v29, %v10628_v22  ;;  %v3358_v23 = vand.u32 4294901760, %v3357_v32 }
 0x533   : > { %3186 = vmatpush.msra.mxu0 %v3048_v7  ;;  %3292 = vmatpush.xpose.msra.mxu2 %v10598_v28  ;;  %v2858_v29 = vadd.f32 3.125e-08, %v10521_v30 }
 0x534   : > { %v3361_v10 = vsub.f32 %v3269_v52, %v3295_v4  ;;  %3053 = vmatmul.f32.vlgmr.msrb.gmra.mxu1 %v10535_v26  ;;  %2996 = vmatmul.f32.gmra.mxu0 %v2995_v45  ;;  %v3001_v18 = vand.u32 4294901760, %v3000_v46 }
 0x535   : > { %3397 = vmatpush.xpose.msrb.mxu0 %v10559_v24  ;;  %3143 = vmatmul.f32.gmra.mxu3 %v2993_v12 }
 0x536   : > { %3217 = vmatpush.msra.mxu1 %v10488_v39  ;;  %3353 = vmatpush.xpose.msra.mxu3 %v3352_v35  ;;  %v3362_v7 = vand.u32 4294901760, %v3361_v10  ;;  %v3002_v27 = vsub.f32 %v3000_v46, %v3001_v18 }
 0x537   : > { %3100 = vmatmul.f32.gmra.mxu2 %v2992_v2 }
 0x538   : > { %3219 = vmatpush.msra.mxu1 %v10561_v38  ;;  %3294 = vmatpush.xpose.msra.mxu2 %v10600_v49  ;;  %v3363_v56 = vsub.f32 %v3361_v10, %v3362_v7  ;;  %v3003_v12 = vand.u32 4294901760, %v3002_v27  ;;  %v12755_v38 = vand.u32 4294901760, %v10559_v24  ;;  %v3248_v62 = vpop.permute.xlu1 %3247 }
 0x539   : > { %3400 = vmatpush.xpose.msrb.mxu0 %v10610_v33 }
 0x53a   : > { %3221 = vmatpush.msra.mxu1 %v10529_v55  ;;  %3359 = vmatpush.xpose.msra.mxu3 %v3358_v23  ;;  %v3364_v39 = vand.u32 4294901760, %v3363_v56 }
 0x53c   : > { %3223 = vmatpush.msra.mxu1 %v10543_v9  ;;  %3296 = vmatpush.xpose.msra.mxu2 %v3295_v4 }
 0x53d   : > { %3403 = vmatpush.xpose.msrb.mxu0 %v10613_v42  ;;  %3057 = vmatmul.f32.gmra.mxu1 %v10578_v50 }
 0x53e   : > { %3441 = vmatpush.xpose.msrb.mxu1 %v10551_v14  ;;  %3004 = vmatmul.f32.gmra.mxu0 %v3003_v12 }
 0x53f   : > { %3149 = vmatmul.f32.gmra.mxu3 %v3001_v18  ;;  %3105 = vmatmul.f32.gmra.mxu2 %v3000_v46 }
 0x540   : > { %3488 = vmatpush.xpose.msrb.mxu2 %v12755_v38  ;;  %3365 = vmatpush.xpose.msra.mxu3 %v3364_v39 }
 0x541   : > { %3406 = vmatpush.xpose.msrb.mxu0 %v3361_v10 }
 0x542   : > { %3443 = vmatpush.xpose.msrb.mxu1 %v10598_v28 }
 0x544   : > { %3531 = vmatpush.xpose.msrb.mxu3 %v10551_v14  ;;  %3492 = vmatpush.xpose.msrb.mxu2 %v3350_v8  ;;  %v3246_v14 = vpop.permute.xlu2 %3245 }
 0x545   : > { %3061 = vmatmul.f32.gmra.mxu1 %v10628_v22 }
 0x546   : > { %3445 = vmatpush.xpose.msrb.mxu1 %v10600_v49 }
 0x548   : > { %3533 = vmatpush.xpose.msrb.mxu3 %v10598_v28  ;;  %3496 = vmatpush.xpose.msrb.mxu2 %v3356_v15  ;;  %v3261_v28 = vsel %vm1803_vm0, %v3246_v14, 0 }
 0x549   : > { %v3297_v11 = vand.u32 4294901760, %v3261_v28 }
 0x54a   : > { %3447 = vmatpush.xpose.msrb.mxu1 %v3295_v4 }
 0x54b   : > { %v3298_v20 = vsub.f32 %v3261_v28, %v3297_v11 }
 0x54c   : > { %3535 = vmatpush.xpose.msrb.mxu3 %v10600_v49  ;;  %3500 = vmatpush.xpose.msrb.mxu2 %v3362_v7  ;;  %v3250_v18 = vpop.permute.xlu2 %3249 }
 0x54d   : > { %v3299_v46 = vand.u32 4294901760, %v3298_v20  ;;  %v3265_v56 = vsel %vm1803_vm0, %v3250_v18, 0 }
 0x54e   : > { %v2870_v33 = vpop.xlane.xlu0 %2869 }
 0x54f   : > { %v2874_v42 = vadd.f32 1e-06, %v2870_v33  ;;  %v3300_v7 = vsub.f32 %v3298_v20, %v3299_v46  ;;  %v3313_v33 = vand.u32 4294901760, %v3265_v56 }
 0x550   : > { %3537 = vmatpush.xpose.msrb.mxu3 %v3295_v4  ;;  %v3263_v4 = vsel %vm1803_vm0, %v3248_v62, 0 }
 0x551   : > { %8624 = vrcp.f32 %v2874_v42  ;;  %v2931_v2 = vand.u32 2147483648, %v2874_v42  ;;  %v2929_v8 = vand.u32 2147483647, %v2874_v42  ;;  %vm2925_vm3 = vweird.f32 %v2874_v42 }
 0x552   : > { %v3305_v10 = vand.u32 4294901760, %v3263_v4  ;;  %v3301_v39 = vand.u32 4294901760, %v3300_v7 }
 0x553   : > { %v2932_v49 = vor.u32 1.1754944e-38, %v2931_v2  ;;  %vm2930_vm5 = vcmp.eq.f32.partialorder %v2929_v8, 8.507059e+37 }
 0x554   : > { %v3306_v23 = vsub.f32 %v3263_v4, %v3305_v10 }
 0x556   : > { %v3307_v38 = vand.u32 4294901760, %v3306_v23 }
 0x557   : > { %v8625_v55 = vpop.eup %8624 }
 0x558   : > { %v2921_v9 = vmul.f32 %v8625_v55, %v2874_v42  ;;  %vm2926_vm2 = vweird.f32 %v8625_v55  ;;  %v3252_v42 = vpop.permute.xlu1 %3251 }
 0x559   : > { %vm2927_vm4 = vmor %vm2925_vm3, %vm2926_vm2  ;;  %v3267_v14 = vsel %vm1803_vm0, %v3252_v42, 0 }
 0x55a   : > { %v2922_v24 = vsub.f32 1.0, %v2921_v9  ;;  %v3308_v9 = vsub.f32 %v3306_v23, %v3307_v38  ;;  %v3321_v2 = vand.u32 4294901760, %v3267_v14 }
 0x55c   : > { %v2923_v5 = vmul.f32 %v8625_v55, %v2922_v24  ;;  %v3309_v28 = vand.u32 4294901760, %v3308_v9 }
 0x55e   : > { %v2924_v17 = vadd.f32 %v8625_v55, %v2923_v5  ;;  %v3322_v5 = vsub.f32 %v3267_v14, %v3321_v2 }
 0x560   : > { %v2928_v16 = vsel %vm2927_vm4, %v8625_v55, %v2924_v17  ;;  %v3314_v55 = vsub.f32 %v3265_v56, %v3313_v33  ;;  %v3323_v17 = vand.u32 4294901760, %v3322_v5 }
 0x561   : > { %v2933_v15 = vsel %vm2930_vm5, %v2932_v49, %v2928_v16 }
 0x562   : > { %v10655_v52 = vmul.f32 %v2933_v15, %v2858_v29  ;;  %v3315_v24 = vand.u32 4294901760, %v3314_v55  ;;  %v3324_v29 = vsub.f32 %v3322_v5, %v3323_v17 }
 0x564   : > { %v2961_v35 = vsel %vm2110_vm1, %v10655_v52, 0  ;;  %v3316_v8 = vsub.f32 %v3314_v55, %v3315_v24 }
 0x565   : > { %v3007_v45 = vand.u32 4294901760, %v2961_v35 }
 0x566   : > { %v3317_v49 = vand.u32 4294901760, %v3316_v8 }
 0x567   : > { %3065 = vmatmul.f32.gmra.mxu1 %v3007_v45  ;;  %v3008_v32 = vsub.f32 %v2961_v35, %v3007_v45 }
 0x569   : > { %3110 = vmatmul.f32.gmra.mxu2 %v3008_v32  ;;  %v3009_v30 = vand.u32 4294901760, %v3008_v32 }
 0x56b   : > { %3155 = vmatmul.f32.gmra.mxu3 %v3009_v30  ;;  %v3010_v27 = vsub.f32 %v3008_v32, %v3009_v30 }
 0x56d   : > { %v3011_v12 = vand.u32 4294901760, %v3010_v27 }
 0x56f   : > { %3012 = vmatmul.f32.gmra.mxu0 %v3011_v12  ;;  %3225 = vmatmul.f32.vlgmr.msra.gmra.mxu1 %v10535_v26 }
 0x571   : > { %3302 = vmatmul.f32.vlgmr.msra.gmra.mxu2 %v3301_v39 }
 0x573   : > { %3367 = vmatmul.f32.vlgmr.msra.gmra.mxu3 %v3297_v11 }
 0x577   : > { %3188 = vmatmul.f32.vlgmr.msra.gmra.mxu0 %v10535_v26  ;;  %3229 = vmatmul.f32.gmra.mxu1 %v10578_v50  ;;  %v3325_v26 = vand.u32 4294901760, %v3324_v29 }
 0x579   : > { %3310 = vmatmul.f32.gmra.mxu2 %v3309_v28 }
 0x57b   : > { %3371 = vmatmul.f32.gmra.mxu3 %v3305_v10 }
 0x57f   : > { %3192 = vmatmul.f32.gmra.mxu0 %v10578_v50  ;;  %3233 = vmatmul.f32.gmra.mxu1 %v10628_v22 }
 0x581   : > { %3318 = vmatmul.f32.gmra.mxu2 %v3317_v49 }
 0x583   : > { %3375 = vmatmul.f32.gmra.mxu3 %v3313_v33 }
 0x587   : > { %3196 = vmatmul.f32.gmra.mxu0 %v10628_v22  ;;  %3237 = vmatmul.f32.gmra.mxu1 %v3007_v45 }
 0x589   : > { %3326 = vmatmul.f32.gmra.mxu2 %v3325_v26 }
 0x58b   : > { %3379 = vmatmul.f32.gmra.mxu3 %v3321_v2 }
 0x58f   : > { %3200 = vmatmul.f32.gmra.mxu0 %v3007_v45  ;;  %3451 = vmatmul.f32.vlgmr.msrb.gmra.mxu1 %v3299_v46 }
 0x591   : > { %3502 = vmatmul.f32.vlgmr.msrb.gmra.mxu2 %v3297_v11 }
 0x593   : > { %3539 = vmatmul.f32.vlgmr.msrb.gmra.mxu3 %v3297_v11 }
 0x597   : > { %3409 = vmatmul.f32.vlgmr.msrb.gmra.mxu0 %v3298_v20  ;;  %3457 = vmatmul.f32.gmra.mxu1 %v3307_v38 }
 0x599   : > { %3506 = vmatmul.f32.gmra.mxu2 %v3305_v10 }
 0x59b   : > { %3543 = vmatmul.f32.gmra.mxu3 %v3305_v10 }
 0x59f   : > { %3414 = vmatmul.f32.gmra.mxu0 %v3306_v23  ;;  %3463 = vmatmul.f32.gmra.mxu1 %v3315_v24 }
 0x5a1   : > { %3510 = vmatmul.f32.gmra.mxu2 %v3313_v33 }
 0x5a3   : > { %3547 = vmatmul.f32.gmra.mxu3 %v3313_v33 }
 0x5a7   : > { %3419 = vmatmul.f32.gmra.mxu0 %v3314_v55  ;;  %3469 = vmatmul.f32.gmra.mxu1 %v3323_v17 }
 0x5a8   : > { %v10670_v22 = vpop.f32.mrf.mxu0 }
 0x5a9   : > { %3514 = vmatmul.f32.gmra.mxu2 %v3321_v2 }
 0x5ab   : > { %3551 = vmatmul.f32.gmra.mxu3 %v3321_v2 }
 0x5af   : > { %3424 = vmatmul.f32.gmra.mxu0 %v3322_v5  ;;  %v10674_v11 = vpop.f32.mrf.mxu3 }
 0x5b1   : > { %v10668_v50 = vpop.f32.mrf.mxu1  ;;  %v10672_v16 = vpop.f32.mrf.mxu2 }
 0x5b2   : > { %v10678_v15 = vpop.f32.mrf.mxu0 }
 0x5b3   : > { %12757 = vst [vmem:[#allocation47_spill] sm:$0xff] %v10678_v15 }
 0x5b8   : > { %v10682_v4 = vpop.f32.mrf.mxu3 }
 0x5b9   : > { %12759 = vst [vmem:[#allocation49_spill] sm:$0xff] %v10682_v4 }
 0x5ba   : > { %v10676_v62 = vpop.f32.mrf.mxu1  ;;  %v10680_v20 = vpop.f32.mrf.mxu2 }
 0x5bb   : > { %12756 = vst [vmem:[#allocation46_spill] sm:$0xff] %v10676_v62  ;;  %v10686_v45 = vpop.f32.mrf.mxu0 }
 0x5bc   : > { %12758 = vst [vmem:[#allocation48_spill] sm:$0xff] %v10680_v20 }
 0x5bd   : > { %12761 = vst [vmem:[#allocation51_spill] sm:$0xff] %v10686_v45 }
 0x5c2   : > { %v10684_v35 = vpop.f32.mrf.mxu1  ;;  %v10688_v46 = vpop.f32.mrf.mxu2 }
 0x5c3   : > { %12760 = vst [vmem:[#allocation50_spill] sm:$0xff] %v10684_v35  ;;  %v10692_v32 = vpop.f32.mrf.mxu3 }
 0x5c4   : > { %12762 = vst [vmem:[#allocation52_spill] sm:$0xff] %v10688_v46 }
 0x5c5   : > { %12764 = vst [vmem:[#allocation54_spill] sm:$0xff] %v10692_v32 }
 0x5e4   : > { %v10690_v10 = vpop.f32.mrf.mxu1 }
 0x5e5   : > { %12763 = vst [vmem:[#allocation53_spill] sm:$0xff] %v10690_v10 }
 0x5ec   : > { %v10694_v18 = vpop.f32.mrf.mxu0  ;;  %v10696_v30 = vpop.f32.mrf.mxu2 }
 0x5ed   : > { %12765 = vst [vmem:[#allocation55_spill] sm:$0xff] %v10694_v18  ;;  %v10698_v7 = vpop.f32.mrf.mxu1 }
 0x5ee   : > { %12766 = vst [vmem:[#allocation56_spill] sm:$0xff] %v10696_v30  ;;  %v10700_v23 = vpop.f32.mrf.mxu3 }
 0x5ef   : > { %12767 = vst [vmem:[#allocation57_spill] sm:$0xff] %v10698_v7 }
 0x5f0   : > { %12768 = vst [vmem:[#allocation58_spill] sm:$0xff] %v10700_v23 }
 0x5f4   : > { %v10702_v27 = vpop.f32.mrf.mxu0  ;;  %v3303_v56 = vpop.f32.mrf.mxu2 }
 0x5f5   : > { %12769 = vst [vmem:[#allocation59_spill] sm:$0xff] %v10702_v27  ;;  %v10704_v12 = vpop.f32.mrf.mxu1 }
 0x5f6   : > { %12770 = vst [vmem:[#allocation60_spill] sm:$0xff] %v10704_v12  ;;  %v3368_v39 = vpop.f32.mrf.mxu3 }
 0x5f7   : > { %v3369_v49 = vadd.f32 %v3368_v39, %v3303_v56 }
 0x5fc   : > { %v10706_v38 = vpop.f32.mrf.mxu0  ;;  %v3311_v33 = vpop.f32.mrf.mxu2 }
 0x5fd   : > { %12771 = vst [vmem:[#allocation61_spill] sm:$0xff] %v10706_v38  ;;  %v10708_v42 = vpop.f32.mrf.mxu1 }
 0x5fe   : > { %12772 = vst [vmem:[#allocation62_spill] sm:$0xff] %v10708_v42  ;;  %v3372_v55 = vpop.f32.mrf.mxu3 }
 0x5ff   : > { %v3373_v18 = vadd.f32 %v3372_v55, %v3311_v33 }
 0x604   : > { %v10710_v9 = vpop.f32.mrf.mxu0  ;;  %v3319_v14 = vpop.f32.mrf.mxu2 }
 0x605   : > { %12773 = vst [vmem:[#allocation63_spill] sm:$0xff] %v10710_v9  ;;  %v10712_v24 = vpop.f32.mrf.mxu1 }
 0x606   : > { %12774 = vst [vmem:[#allocation64_spill] sm:$0xff] %v10712_v24  ;;  %v3376_v2 = vpop.f32.mrf.mxu3 }
 0x607   : > { %v3377_v56 = vadd.f32 %v3376_v2, %v3319_v14 }
 0x60c   : > { %v10714_v28 = vpop.f32.mrf.mxu0  ;;  %v3327_v5 = vpop.f32.mrf.mxu2 }
 0x60d   : > { %12775 = vst [vmem:[#allocation65_spill] sm:$0xff] %v10714_v28  ;;  %v3452_v17 = vpop.f32.mrf.mxu1 }
 0x60e   : > { %v3380_v8 = vpop.f32.mrf.mxu3 }
 0x614   : > { %v3410_v29 = vpop.f32.mrf.mxu0  ;;  %v3503_v26 = vpop.f32.mrf.mxu2 }
 0x615   : > { %v3411_v21 = vadd.f32 %v3410_v29, %v3369_v49  ;;  %v3458_v10 = vpop.f32.mrf.mxu1 }
 0x616   : > { %v3540_v43 = vpop.f32.mrf.mxu3 }
 0x617   : > { %v3453_v23 = vadd.f32 %v3452_v17, %v3411_v21 }
 0x619   : > { %v3504_v30 = vadd.f32 %v3503_v26, %v3453_v23 }
 0x61b   : > { %v3541_v54 = vadd.f32 %v3540_v43, %v3504_v30 }
 0x61c   : > { %v3415_v6 = vpop.f32.mrf.mxu0  ;;  %v3507_v51 = vpop.f32.mrf.mxu2 }
 0x61d   : > { %v3555_v31 = vmul.f32 0.25, %v3541_v54  ;;  %v3416_v24 = vadd.f32 %v3415_v6, %v3373_v18  ;;  %v3464_v9 = vpop.f32.mrf.mxu1  ;;  %v3381_v6 = vadd.f32 %v3380_v8, %v3327_v5 }
 0x61e   : > { %v3544_v63 = vpop.f32.mrf.mxu3 }
 0x61f   : > { %v3459_v48 = vadd.f32 %v3458_v10, %v3416_v24  ;;  %v3559_v28 = vsel %vm2110_vm1, %v3555_v31, -inf }
 0x620   : > { %3560 = vmax.xlane.f32.xlu2 %v3559_v28 }
 0x621   : > { %v3508_v42 = vadd.f32 %v3507_v51, %v3459_v48 }
 0x623   : > { %v3545_v39 = vadd.f32 %v3544_v63, %v3508_v42 }
 0x624   : > { %v3420_v49 = vpop.f32.mrf.mxu0  ;;  %v3511_v23 = vpop.f32.mrf.mxu2 }
 0x625   : > { %v3556_v29 = vmul.f32 0.25, %v3545_v39  ;;  %v3421_v21 = vadd.f32 %v3420_v49, %v3377_v56  ;;  %v3470_v24 = vpop.f32.mrf.mxu1 }
 0x626   : > { %v3548_v30 = vpop.f32.mrf.mxu3 }
 0x627   : > { %v3465_v17 = vadd.f32 %v3464_v9, %v3421_v21  ;;  %v3562_v43 = vsel %vm2110_vm1, %v3556_v29, -inf }
 0x628   : > { %3563 = vmax.xlane.f32.xlu0 %v3562_v43 }
 0x629   : > { %v3512_v54 = vadd.f32 %v3511_v23, %v3465_v17 }
 0x62b   : > { %v3549_v18 = vadd.f32 %v3548_v30, %v3512_v54  ;;  %v10752_v30 = vld [vmem:[%s9214_s24] sm:$0xff] }
 0x62c   : > { %v3425_v10 = vpop.f32.mrf.mxu0  ;;  %v3515_v51 = vpop.f32.mrf.mxu2 }
 0x62d   : > { %v3557_v33 = vmul.f32 0.25, %v3549_v18  ;;  %v3426_v55 = vadd.f32 %v3425_v10, %v3381_v6 }
 0x62e   : > { %v3552_v14 = vpop.f32.mrf.mxu3 }
 0x62f   : > { %v3471_v48 = vadd.f32 %v3470_v24, %v3426_v55  ;;  %v3565_v63 = vsel %vm2110_vm1, %v3557_v33, -inf }
 0x630   : > { %3566 = vmax.xlane.f32.xlu1 %v3565_v63  ;;  %v10763_v63 = vld [vmem:[%s9214_s24 + $0x8] sm:$0xff] }
 0x631   : > { %v3516_v42 = vadd.f32 %v3515_v51, %v3471_v48 }
 0x633   : > { %v3553_v2 = vadd.f32 %v3552_v14, %v3516_v42 }
 0x635   : > { %v3558_v9 = vmul.f32 0.25, %v3553_v2 }
 0x637   : > { %v3568_v28 = vsel %vm2110_vm1, %v3558_v9, -inf }
 0x638   : > { %3673 = vrot.lane.b32.xlu2 %v10238_v34, %s9004_s13  ;;  %3569 = vmax.xlane.f32.xlu0 %v3568_v28 }
 0x640   : > { %3667 = vrot.lane.b32.xlu2 %v10230_v1, %s9004_s13 }
 0x648   : > { %3985 = vrot.lane.b32.xlu2 %v10130_v0, %s9005_s3 }
 0x649   : > { %3669 = vrot.lane.b32.xlu1 %v10226_v58, %s9004_s13 }
 0x64c   : > { %3671 = vrot.lane.b32.xlu0 %v10228_v47, %s9004_s13 }
 0x650   : > { %3981 = vrot.lane.b32.xlu2 %v10149_v37, %s9005_s3 }
 0x651   : > { %3987 = vrot.lane.b32.xlu1 %v10151_v57, %s9005_s3 }
 0x658   : > { %3975 = vrot.lane.b32.xlu2 %v10158_v53, %s9005_s3 }
 0x659   : > { %3983 = vrot.lane.b32.xlu1 %v10138_v44, %s9005_s3 }
 0x660   : > { %3979 = vrot.lane.b32.xlu2 %v10204_v13, %s9005_s3 }
 0x661   : > { %3973 = vrot.lane.b32.xlu1 %v10136_v40, %s9005_s3 }
 0x669   : > { %3977 = vrot.lane.b32.xlu1 %v10187_v25, %s9005_s3 }
 0x693   : > { %v3561_v5 = vpop.xlane.xlu2 %3560 }
 0x694   : > { %v3571_v8 = vsub.f32 %v3555_v31, %v3561_v5 }
 0x696   : > { %v3575_v26 = vmul.f32 1.442695, %v3571_v8 }
 0x698   : > { %8626 = vpow2.f32 %v3575_v26 }
 0x69b   : > { %v3564_v56 = vpop.xlane.xlu0 %3563  ;;  %v3674_v39 = vpop.permute.xlu2 %3673 }
 0x69c   : > { %v3572_v49 = vsub.f32 %v3556_v29, %v3564_v56  ;;  %v10744_v21 = vand.u32 4294901760, %v3674_v39 }
 0x69e   : > { %v8627_v23 = vpop.eup %8626  ;;  %v3577_v17 = vmul.f32 1.442695, %v3572_v49  ;;  %v10747_v43 = vsub.f32 %v3674_v39, %v10744_v21  ;;  %3704 = vmatpush.msra.mxu0 %v10744_v21  ;;  %3855 = vmatpush.msra.mxu3 %v10744_v21  ;;  %v10779_v49 = vld [vmem:[%s9214_s24 + $0x18] sm:$0xff] }
 0x69f   : > { %v10755_v31 = vmul.f32 %v10752_v30, %v8627_v23 }
 0x6a0   : > { %8628 = vpow2.f32 %v3577_v17  ;;  %v3758_v29 = vand.u32 4294901760, %v10747_v43  ;;  %3811 = vmatpush.msra.mxu2 %v10747_v43 }
 0x6a1   : > { %v3591_v54 = vsel %vm2110_vm1, %v10755_v31, 0.0 }
 0x6a2   : > { %v3759_v6 = vsub.f32 %v10747_v43, %v3758_v29  ;;  %3592 = vadd.xlane.f32.xlu0 %v3591_v54 }
 0x6a3   : > { %v3567_v18 = vpop.xlane.xlu1 %3566  ;;  %v3668_v8 = vpop.permute.xlu2 %3667 }
 0x6a4   : > { %v3760_v10 = vand.u32 4294901760, %v3759_v6  ;;  %v3573_v55 = vsub.f32 %v3557_v33, %v3567_v18  ;;  %v10771_v33 = vld [vmem:[%s9214_s24 + $0x10] sm:$0xff]  ;;  %v10786_v43 = vand.u32 4294901760, %v3668_v8 }
 0x6a6   : > { %v8629_v24 = vpop.eup %8628  ;;  %v3579_v48 = vmul.f32 1.442695, %v3573_v55  ;;  %3761 = vmatpush.msra.mxu1 %v3760_v10 }
 0x6a7   : > { %v10766_v51 = vmul.f32 %v10763_v63, %v8629_v24  ;;  %v3775_v24 = vsub.f32 %v3668_v8, %v10786_v43 }
 0x6a8   : > { %8630 = vpow2.f32 %v3579_v48 }
 0x6a9   : > { %v3594_v42 = vsel %vm2110_vm1, %v10766_v51, 0.0 }
 0x6aa   : > { %3595 = vadd.xlane.f32.xlu0 %v3594_v42 }
 0x6ab   : > { %v3570_v14 = vpop.xlane.xlu0 %3569 }
 0x6ac   : > { %v3574_v2 = vsub.f32 %v3558_v9, %v3570_v14  ;;  %v3986_v9 = vpop.permute.xlu2 %3985 }
 0x6ad   : > { %v4001_v18 = vsel %vm1803_vm0, %v3986_v9, 0 }
 0x6ae   : > { %v8631_v28 = vpop.eup %8630  ;;  %v3581_v5 = vmul.f32 1.442695, %v3574_v2  ;;  %v10790_v42 = vand.u32 4294901760, %v4001_v18 }
 0x6af   : > { %v10774_v26 = vmul.f32 %v10771_v33, %v8631_v28 }
 0x6b0   : > { %8632 = vpow2.f32 %v3581_v5  ;;  %v10794_v9 = vsub.f32 %v4001_v18, %v10790_v42 }
 0x6b1   : > { %v3597_v56 = vsel %vm2110_vm1, %v10774_v26, 0.0 }
 0x6b2   : > { %3598 = vadd.xlane.f32.xlu0 %v3597_v56 }
 0x6b4   : > { %v3982_v28 = vpop.permute.xlu2 %3981 }
 0x6b5   : > { %v3997_v32 = vsel %vm1803_vm0, %v3982_v28, 0 }
 0x6b6   : > { %v8633_v39 = vpop.eup %8632  ;;  %v10806_v45 = vand.u32 4294901760, %v3997_v32 }
 0x6b7   : > { %v10782_v23 = vmul.f32 %v10779_v49, %v8633_v39  ;;  %v3776_v39 = vand.u32 4294901760, %v3775_v24 }
 0x6b9   : > { %v3600_v17 = vsel %vm2110_vm1, %v10782_v23, 0.0  ;;  %v3777_v35 = vsub.f32 %v3775_v24, %v3776_v39 }
 0x6ba   : > { %3601 = vadd.xlane.f32.xlu0 %v3600_v17 }
 0x6bb   : > { %v3670_v54 = vpop.permute.xlu1 %3669 }
 0x6bc   : > { %v3707_v6 = vand.u32 4294901760, %v3670_v54 }
 0x6be   : > { %v3769_v10 = vsub.f32 %v3670_v54, %v3707_v6  ;;  %v3672_v55 = vpop.permute.xlu0 %3671 }
 0x6bf   : > { %v3705_v48 = vand.u32 4294901760, %v3672_v55 }
 0x6c0   : > { %v3770_v2 = vand.u32 4294901760, %v3769_v10 }
 0x6c1   : > { %v3763_v14 = vsub.f32 %v3672_v55, %v3705_v48  ;;  %3706 = vmatpush.msra.mxu0 %v3705_v48  ;;  %3857 = vmatpush.msra.mxu3 %v3705_v48 }
 0x6c2   : > { %v3771_v55 = vsub.f32 %v3769_v10, %v3770_v2 }
 0x6c3   : > { %v3988_v5 = vpop.permute.xlu1 %3987  ;;  %3708 = vmatpush.msra.mxu0 %v3707_v6  ;;  %3814 = vmatpush.msra.mxu2 %v3763_v14  ;;  %v3764_v56 = vand.u32 4294901760, %v3763_v14 }
 0x6c4   : > { %v4003_v17 = vsel %vm1803_vm0, %v3988_v5, 0  ;;  %3859 = vmatpush.msra.mxu3 %v3707_v6 }
 0x6c5   : > { %v10796_v8 = vand.u32 4294901760, %v4003_v17  ;;  %3710 = vmatpush.msra.mxu0 %v10786_v43  ;;  %3817 = vmatpush.msra.mxu2 %v3769_v10  ;;  %v3765_v54 = vsub.f32 %v3763_v14, %v3764_v56  ;;  %v3772_v14 = vand.u32 4294901760, %v3771_v55 }
 0x6c6   : > { %3861 = vmatpush.msra.mxu3 %v10786_v43 }
 0x6c7   : > { %3902 = vmatpush.msrb.mxu0 %v3758_v29  ;;  %v10802_v46 = vsub.f32 %v4003_v17, %v10796_v8  ;;  %3820 = vmatpush.msra.mxu2 %v3775_v24  ;;  %v3766_v5 = vand.u32 4294901760, %v3765_v54  ;;  %v3778_v17 = vand.u32 4294901760, %v3777_v35 }
 0x6c9   : > { %3906 = vmatpush.msrb.mxu0 %v3764_v56  ;;  %4018 = vmatpush.xpose.msrb.mxu2 %v10796_v8  ;;  %v12631_v10 = vand.u32 4294901760, %v10802_v46  ;;  %v10815_v56 = vsub.f32 %v3997_v32, %v10806_v45 }
 0x6ca   : > { %3767 = vmatpush.msra.mxu1 %v3766_v5 }
 0x6cb   : > { %3910 = vmatpush.msrb.mxu0 %v3770_v2  ;;  %v4073_v29 = vsub.f32 %v10802_v46, %v12631_v10  ;;  %v3984_v28 = vpop.permute.xlu1 %3983  ;;  %v12776_v2 = vand.u32 4294901760, %v10794_v9  ;;  %v12632_v32 = vand.u32 4294901760, %v10815_v56 }
 0x6cc   : > { %3773 = vmatpush.msra.mxu1 %v3772_v14  ;;  %v3999_v24 = vsel %vm1803_vm0, %v3984_v28, 0 }
 0x6cd   : > { %3914 = vmatpush.msrb.mxu0 %v3776_v39  ;;  %4020 = vmatpush.xpose.msrb.mxu2 %v10790_v42  ;;  %v4074_v54 = vand.u32 4294901760, %v4073_v29  ;;  %v10817_v18 = vand.u32 4294901760, %v3999_v24  ;;  %v4079_v55 = vsub.f32 %v10794_v9, %v12776_v2 }
 0x6ce   : > { %3779 = vmatpush.msra.mxu1 %v3778_v17 }
 0x6cf   : > { %v10824_v35 = vsub.f32 %v3999_v24, %v10817_v18  ;;  %4075 = vmatpush.xpose.msrb.mxu3 %v4074_v54  ;;  %v4080_v5 = vand.u32 4294901760, %v4079_v55 }
 0x6d0   : > { %3945 = vmatpush.msrb.mxu1 %v10744_v21 }
 0x6d1   : > { %4022 = vmatpush.xpose.msrb.mxu2 %v10817_v18  ;;  %v12630_v39 = vand.u32 4294901760, %v10824_v35 }
 0x6d2   : > { %3947 = vmatpush.msrb.mxu1 %v3705_v48  ;;  %v4091_v48 = vsub.f32 %v10815_v56, %v12632_v32 }
 0x6d3   : > { %4081 = vmatpush.xpose.msrb.mxu3 %v4080_v5  ;;  %v4085_v14 = vsub.f32 %v10824_v35, %v12630_v39 }
 0x6d4   : > { %3949 = vmatpush.msrb.mxu1 %v3707_v6  ;;  %v4092_v29 = vand.u32 4294901760, %v4091_v48 }
 0x6d5   : > { %4024 = vmatpush.xpose.msrb.mxu2 %v10806_v45  ;;  %v4086_v21 = vand.u32 4294901760, %v4085_v14 }
 0x6d6   : > { %3951 = vmatpush.msrb.mxu1 %v10786_v43 }
 0x6d7   : > { %4087 = vmatpush.xpose.msrb.mxu3 %v4086_v21 }
 0x6db   : > { %4093 = vmatpush.xpose.msrb.mxu3 %v4092_v29  ;;  %v3587_v29 = vadd.f32 3.125e-08, %v10755_v31 }
 0x715   : > { %v3593_v28 = vpop.xlane.xlu0 %3592 }
 0x716   : > { %v3603_v17 = vadd.f32 1e-06, %v3593_v28 }
 0x718   : > { %8634 = vrcp.f32 %v3603_v17  ;;  %v3618_v43 = vand.u32 2147483648, %v3603_v17  ;;  %v3616_v14 = vand.u32 2147483647, %v3603_v17  ;;  %vm3612_vm7 = vweird.f32 %v3603_v17 }
 0x71a   : > { %v3619_v21 = vor.u32 1.1754944e-38, %v3618_v43  ;;  %vm3617_vm9 = vcmp.eq.f32.partialorder %v3616_v14, 8.507059e+37 }
 0x71d   : > { %v3596_v6 = vpop.xlane.xlu0 %3595 }
 0x71e   : > { %v8635_v24 = vpop.eup %8634  ;;  %v3604_v54 = vadd.f32 1e-06, %v3596_v6 }
 0x71f   : > { %v3608_v2 = vmul.f32 %v8635_v24, %v3603_v17  ;;  %vm3613_vm6 = vweird.f32 %v8635_v24 }
 0x720   : > { %8636 = vrcp.f32 %v3604_v54  ;;  %vm3614_vm8 = vmor %vm3612_vm7, %vm3613_vm6  ;;  %v3633_v4 = vand.u32 2147483648, %v3604_v54  ;;  %vm3627_vm11 = vweird.f32 %v3604_v54 }
 0x721   : > { %v3609_v55 = vsub.f32 1.0, %v3608_v2  ;;  %v3241_v2 = vadd.f32 %v10531_v60, %v10310_v36 }
 0x723   : > { %v3610_v5 = vmul.f32 %v8635_v24, %v3609_v55 }
 0x725   : > { %v3611_v39 = vadd.f32 %v8635_v24, %v3610_v5  ;;  %v3599_v10 = vpop.xlane.xlu0 %3598 }
 0x726   : > { %v8637_v32 = vpop.eup %8636  ;;  %v3605_v48 = vadd.f32 1e-06, %v3599_v10  ;;  %v3631_v10 = vand.u32 2147483647, %v3604_v54 }
 0x727   : > { %v3615_v28 = vsel %vm3614_vm8, %v8635_v24, %v3611_v39  ;;  %v3623_v12 = vmul.f32 %v8637_v32, %v3604_v54  ;;  %vm3628_vm10 = vweird.f32 %v8637_v32  ;;  %v3588_v54 = vadd.f32 3.125e-08, %v10766_v51 }
 0x728   : > { %v3620_v6 = vsel %vm3617_vm9, %v3619_v21, %v3615_v28  ;;  %8638 = vrcp.f32 %v3605_v48  ;;  %vm10845_vm12 = vmor %vm3627_vm11, %vm3628_vm10  ;;  %vm3632_vm13 = vcmp.eq.f32.partialorder %v3631_v10, 8.507059e+37  ;;  %v12779_v28 = vand.u32 4294901760, %v10802_v46 }
 0x729   : > { %v3624_v38 = vsub.f32 1.0, %v3623_v12  ;;  %v3621_v55 = vmul.f32 %v3620_v6, %v3587_v29  ;;  %vm3642_vm15 = vweird.f32 %v3605_v48  ;;  %v12780_v12 = vand.u32 4294901760, %v10794_v9 }
 0x72b   : > { %v3625_v5 = vmul.f32 %v8637_v32, %v3624_v38  ;;  %v3680_v17 = vsel %vm2110_vm1, %v3621_v55, 0  ;;  %v10841_v20 = vadd.f32 %v3621_v55, %v3241_v2  ;;  %v3634_v38 = vor.u32 1.1754944e-38, %v3633_v4 }
 0x72c   : > { %v10843_v43 = vand.u32 4294901760, %v3680_v17  ;;  %v3242_v4 = vadd.f32 %v10563_v3, %v10336_v19  ;;  %v3648_v55 = vand.u32 2147483648, %v3605_v48 }
 0x72d   : > { %v3626_v31 = vadd.f32 %v8637_v32, %v3625_v5  ;;  %v3602_v39 = vpop.xlane.xlu0 %3601 }
 0x72e   : > { %v8639_v24 = vpop.eup %8638  ;;  %v10849_v36 = vadd.f32 1e-06, %v3602_v39  ;;  %3781 = vmatmul.f32.vlgmr.msra.gmra.mxu1 %v10843_v43  ;;  %v3712_v60 = vsub.f32 %v3680_v17, %v10843_v43 }
 0x72f   : > { %v3638_v14 = vmul.f32 %v8639_v24, %v3605_v48  ;;  %4169 = vmatpush.xpose.msra.mxu1 %v10796_v8  ;;  %v3630_v21 = vsel %vm10845_vm12, %v8637_v32, %v3626_v31  ;;  %vm3643_vm14 = vweird.f32 %v8639_v24  ;;  %v3646_v32 = vand.u32 2147483647, %v3605_v48 }
 0x730   : > { %8640 = vrcp.f32 %v10849_v36  ;;  %3823 = vmatmul.f32.vlgmr.msra.gmra.mxu2 %v3712_v60  ;;  %v3713_v6 = vand.u32 4294901760, %v3712_v60  ;;  %v3635_v2 = vsel %vm3632_vm13, %v3634_v38, %v3630_v21  ;;  %vm3644_vm2 = vmor %vm3642_vm15, %vm3643_vm14  ;;  %vm3657_vm5 = vweird.f32 %v10849_v36 }
 0x731   : > { %v3639_v29 = vsub.f32 1.0, %v3638_v14  ;;  %4216 = vmatpush.xpose.msra.mxu2 %v12779_v28  ;;  %v3636_v5 = vmul.f32 %v3635_v2, %v3588_v54  ;;  %v3589_v14 = vadd.f32 3.125e-08, %v10774_v26  ;;  %vm3647_vm3 = vcmp.eq.f32.partialorder %v3646_v32, 8.507059e+37 }
 0x732   : > { %3865 = vmatmul.f32.vlgmr.msra.gmra.mxu3 %v3713_v6  ;;  %v3714_v51 = vsub.f32 %v3712_v60, %v3713_v6  ;;  %v3649_v60 = vor.u32 1.1754944e-38, %v3648_v55  ;;  %v3243_v26 = vadd.f32 %v10619_v59, %v10349_v61 }
 0x733   : > { %v3640_v17 = vmul.f32 %v8639_v24, %v3639_v29  ;;  %4171 = vmatpush.xpose.msra.mxu1 %v10790_v42  ;;  %4259 = vmatpush.xpose.msra.mxu3 %v10796_v8  ;;  %v3683_v10 = vsel %vm2110_vm1, %v3636_v5, 0  ;;  %v10865_v31 = vadd.f32 %v3636_v5, %v3242_v4  ;;  %v3974_v29 = vpop.permute.xlu1 %3973  ;;  %v3661_v4 = vand.u32 2147483647, %v10849_v36 }
 0x734   : > { %v3715_v19 = vand.u32 4294901760, %v3714_v51  ;;  %v10869_v3 = vand.u32 4294901760, %v3683_v10 }
 0x735   : > { %v3641_v39 = vadd.f32 %v8639_v24, %v3640_v17  ;;  %4220 = vmatpush.xpose.msra.mxu2 %v12780_v12  ;;  %vm3662_vm7 = vcmp.eq.f32.partialorder %v3661_v4, 8.507059e+37 }
 0x736   : > { %v8641_v38 = vpop.eup %8640  ;;  %3716 = vmatmul.f32.vlgmr.msra.gmra.mxu0 %v3715_v19  ;;  %3785 = vmatmul.f32.gmra.mxu1 %v10869_v3  ;;  %v3720_v48 = vsub.f32 %v3683_v10, %v10869_v3 }
 0x737   : > { %v3653_v8 = vmul.f32 %v8641_v38, %v10849_v36  ;;  %v3645_v21 = vsel %vm3644_vm2, %v8639_v24, %v3641_v39  ;;  %4125 = vmatpush.xpose.msra.mxu0 %v10802_v46  ;;  %4173 = vmatpush.xpose.msra.mxu1 %v10817_v18  ;;  %vm3658_vm4 = vweird.f32 %v8641_v38  ;;  %v3663_v24 = vand.u32 2147483648, %v10849_v36 }
 0x738   : > { %v3650_v54 = vsel %vm3647_vm3, %v3649_v60, %v3645_v21  ;;  %4261 = vmatpush.xpose.msra.mxu3 %v10790_v42  ;;  %3828 = vmatmul.f32.gmra.mxu2 %v3720_v48  ;;  %v3721_v6 = vand.u32 4294901760, %v3720_v48  ;;  %v12781_v46 = vand.u32 4294901760, %v10824_v35  ;;  %v3989_v42 = vsel %vm1803_vm0, %v3974_v29, 0  ;;  %vm3659_vm6 = vmor %vm3657_vm5, %vm3658_vm4 }
 0x739   : > { %v3654_v28 = vsub.f32 1.0, %v3653_v8  ;;  %v3651_v2 = vmul.f32 %v3650_v54, %v3589_v14  ;;  %v3664_v10 = vor.u32 1.1754944e-38, %v3663_v24  ;;  %v12782_v39 = vand.u32 4294901760, %v10815_v56  ;;  %v3976_v8 = vpop.permute.xlu2 %3975 }
 0x73a   : > { %4224 = vmatpush.xpose.msra.mxu2 %v12781_v46  ;;  %3871 = vmatmul.f32.gmra.mxu3 %v3721_v6  ;;  %v3722_v5 = vsub.f32 %v3720_v48, %v3721_v6  ;;  %v10900_v19 = vand.u32 4294901760, %v3989_v42  ;;  %v3244_v60 = vadd.f32 %v10655_v52, %v10366_v41 }
 0x73b   : > { %v3655_v55 = vmul.f32 %v8641_v38, %v3654_v28  ;;  %v3686_v61 = vsel %vm2110_vm1, %v3651_v2, 0  ;;  %v10886_v59 = vadd.f32 %v3651_v2, %v3243_v26  ;;  %4128 = vmatpush.xpose.msra.mxu0 %v10794_v9  ;;  %4175 = vmatpush.xpose.msra.mxu1 %v10806_v45  ;;  %v3590_v9 = vadd.f32 3.125e-08, %v10782_v23  ;;  %v3978_v6 = vpop.permute.xlu1 %3977 }
 0x73c   : > { %v10891_v17 = vand.u32 4294901760, %v3686_v61  ;;  %4263 = vmatpush.xpose.msra.mxu3 %v10817_v18  ;;  %v3723_v51 = vand.u32 4294901760, %v3722_v5  ;;  %v4026_v21 = vsub.f32 %v3989_v42, %v10900_v19  ;;  %v3993_v46 = vsel %vm1803_vm0, %v3978_v6, 0 }
 0x73d   : > { %v3656_v32 = vadd.f32 %v8641_v38, %v3655_v55 }
 0x73e   : > { %4228 = vmatpush.xpose.msra.mxu2 %v12782_v39  ;;  %v3728_v12 = vsub.f32 %v3686_v61, %v10891_v17  ;;  %3724 = vmatmul.f32.gmra.mxu0 %v3723_v51  ;;  %v4027_v28 = vand.u32 4294901760, %v4026_v21 }
 0x73f   : > { %3789 = vmatmul.f32.gmra.mxu1 %v10891_v17  ;;  %v3660_v36 = vsel %vm3659_vm6, %v8641_v38, %v3656_v32  ;;  %4131 = vmatpush.xpose.msra.mxu0 %v10824_v35  ;;  %v3991_v35 = vsel %vm1803_vm0, %v3976_v8, 0 }
 0x740   : > { %v3729_v18 = vand.u32 4294901760, %v3728_v12  ;;  %v3665_v14 = vsel %vm3662_vm7, %v3664_v10, %v3660_v36  ;;  %4265 = vmatpush.xpose.msra.mxu3 %v10806_v45  ;;  %3833 = vmatmul.f32.gmra.mxu2 %v3728_v12  ;;  %v4033_v52 = vand.u32 4294901760, %v3991_v35  ;;  %v4028_v24 = vsub.f32 %v4026_v21, %v4027_v28 }
 0x741   : > { %v3666_v48 = vmul.f32 %v3665_v14, %v3590_v9  ;;  %v3980_v42 = vpop.permute.xlu2 %3979 }
 0x742   : > { %v3730_v23 = vsub.f32 %v3728_v12, %v3729_v18  ;;  %3877 = vmatmul.f32.gmra.mxu3 %v3729_v18  ;;  %v4034_v4 = vsub.f32 %v3991_v35, %v4033_v52  ;;  %v4029_v61 = vand.u32 4294901760, %v4028_v24  ;;  %v3995_v10 = vsel %vm1803_vm0, %v3980_v42, 0 }
 0x743   : > { %v3689_v54 = vsel %vm2110_vm1, %v3666_v48, 0  ;;  %v10909_v26 = vadd.f32 %v3666_v48, %v3244_v60  ;;  %4134 = vmatpush.xpose.msra.mxu0 %v10815_v56  ;;  %v4041_v56 = vand.u32 4294901760, %v3993_v46  ;;  %v4049_v39 = vand.u32 4294901760, %v3995_v10 }
 0x744   : > { %v3731_v38 = vand.u32 4294901760, %v3730_v23  ;;  %v3735_v29 = vand.u32 4294901760, %v3689_v54  ;;  %v4035_v5 = vand.u32 4294901760, %v4034_v4 }
 0x745   : > { %v4042_v32 = vsub.f32 %v3993_v46, %v4041_v56  ;;  %v4050_v36 = vsub.f32 %v3995_v10, %v4049_v39 }
 0x746   : > { %v3736_v41 = vsub.f32 %v3689_v54, %v3735_v29  ;;  %3732 = vmatmul.f32.gmra.mxu0 %v3731_v38  ;;  %v4036_v51 = vsub.f32 %v4034_v4, %v4035_v5 }
 0x747   : > { %3793 = vmatmul.f32.gmra.mxu1 %v3735_v29  ;;  %v4043_v12 = vand.u32 4294901760, %v4042_v32  ;;  %v4051_v14 = vand.u32 4294901760, %v4050_v36 }
 0x748   : > { %v3737_v45 = vand.u32 4294901760, %v3736_v41  ;;  %3838 = vmatmul.f32.gmra.mxu2 %v3736_v41  ;;  %v4037_v9 = vand.u32 4294901760, %v4036_v51 }
 0x749   : > { %v4044_v18 = vsub.f32 %v4042_v32, %v4043_v12  ;;  %v4052_v8 = vsub.f32 %v4050_v36, %v4051_v14 }
 0x74a   : > { %v3738_v2 = vsub.f32 %v3736_v41, %v3737_v45  ;;  %3883 = vmatmul.f32.gmra.mxu3 %v3737_v45 }
 0x74b   : > { %v4045_v60 = vand.u32 4294901760, %v4044_v18 }
 0x74c   : > { %v3739_v55 = vand.u32 4294901760, %v3738_v2 }
 0x74e   : > { %3740 = vmatmul.f32.gmra.mxu0 %v3739_v55 }
 0x74f   : > { %3953 = vmatmul.f32.vlgmr.msrb.gmra.mxu1 %v10843_v43 }
 0x750   : > { %4030 = vmatmul.f32.vlgmr.msrb.gmra.mxu2 %v4029_v61 }
 0x752   : > { %4095 = vmatmul.f32.vlgmr.msrb.gmra.mxu3 %v10900_v19 }
 0x756   : > { %3916 = vmatmul.f32.vlgmr.msrb.gmra.mxu0 %v10843_v43  ;;  %v4053_v43 = vand.u32 4294901760, %v4052_v8 }
 0x757   : > { %3957 = vmatmul.f32.gmra.mxu1 %v10869_v3 }
 0x758   : > { %4038 = vmatmul.f32.gmra.mxu2 %v4037_v9 }
 0x75a   : > { %4099 = vmatmul.f32.gmra.mxu3 %v4033_v52 }
 0x75e   : > { %3920 = vmatmul.f32.gmra.mxu0 %v10869_v3 }
 0x75f   : > { %3961 = vmatmul.f32.gmra.mxu1 %v10891_v17 }
 0x760   : > { %4046 = vmatmul.f32.gmra.mxu2 %v4045_v60 }
 0x762   : > { %4103 = vmatmul.f32.gmra.mxu3 %v4041_v56 }
 0x766   : > { %3924 = vmatmul.f32.gmra.mxu0 %v10891_v17 }
 0x767   : > { %3965 = vmatmul.f32.gmra.mxu1 %v3735_v29 }
 0x768   : > { %4054 = vmatmul.f32.gmra.mxu2 %v4053_v43 }
 0x76a   : > { %4107 = vmatmul.f32.gmra.mxu3 %v4049_v39 }
 0x76e   : > { %3928 = vmatmul.f32.gmra.mxu0 %v3735_v29 }
 0x76f   : > { %4179 = vmatmul.f32.vlgmr.msra.gmra.mxu1 %v4027_v28 }
 0x770   : > { %4230 = vmatmul.f32.vlgmr.msra.gmra.mxu2 %v10900_v19 }
 0x772   : > { %4267 = vmatmul.f32.vlgmr.msra.gmra.mxu3 %v10900_v19 }
 0x776   : > { %4137 = vmatmul.f32.vlgmr.msra.gmra.mxu0 %v4026_v21 }
 0x777   : > { %4185 = vmatmul.f32.gmra.mxu1 %v4035_v5 }
 0x778   : > { %4234 = vmatmul.f32.gmra.mxu2 %v4033_v52 }
 0x77a   : > { %4271 = vmatmul.f32.gmra.mxu3 %v4033_v52 }
 0x77e   : > { %4142 = vmatmul.f32.gmra.mxu0 %v4034_v4 }
 0x77f   : > { %4191 = vmatmul.f32.gmra.mxu1 %v4043_v12 }
 0x780   : > { %4238 = vmatmul.f32.gmra.mxu2 %v4041_v56 }
 0x782   : > { %4275 = vmatmul.f32.gmra.mxu3 %v4041_v56 }
 0x786   : > { %4147 = vmatmul.f32.gmra.mxu0 %v4042_v32 }
 0x787   : > { %4197 = vmatmul.f32.gmra.mxu1 %v4051_v14 }
 0x788   : > { %4242 = vmatmul.f32.gmra.mxu2 %v4049_v39 }
 0x78a   : > { %4279 = vmatmul.f32.gmra.mxu3 %v4049_v39 }
 0x78e   : > { %4152 = vmatmul.f32.gmra.mxu0 %v4050_v36 }
 0x7ab   : > { %v10924_v3 = vpop.f32.mrf.mxu1 }
 0x7b3   : > { %v10926_v17 = vpop.f32.mrf.mxu2  ;;  %v10928_v48 = vpop.f32.mrf.mxu0 }
 0x7b4   : > { %v10930_v19 = vpop.f32.mrf.mxu1 }
 0x7b5   : > { %12783 = vst [vmem:[#allocation66_spill] sm:$0xff] %v10930_v19  ;;  %v10932_v23 = vpop.f32.mrf.mxu3 }
 0x7bb   : > { %v10934_v21 = vpop.f32.mrf.mxu0  ;;  %v10938_v35 = vpop.f32.mrf.mxu2 }
 0x7bc   : > { %12784 = vst [vmem:[#allocation67_spill] sm:$0xff] %v10934_v21  ;;  %v10936_v54 = vpop.f32.mrf.mxu1 }
 0x7bd   : > { %12785 = vst [vmem:[#allocation68_spill] sm:$0xff] %v10936_v54  ;;  %v10940_v38 = vpop.f32.mrf.mxu3 }
 0x7be   : > { %12786 = vst [vmem:[#allocation69_spill] sm:$0xff] %v10938_v35 }
 0x7bf   : > { %12787 = vst [vmem:[#allocation70_spill] sm:$0xff] %v10940_v38 }
 0x7c3   : > { %v10942_v29 = vpop.f32.mrf.mxu0  ;;  %v10946_v52 = vpop.f32.mrf.mxu2 }
 0x7c4   : > { %12788 = vst [vmem:[#allocation71_spill] sm:$0xff] %v10942_v29  ;;  %v10944_v41 = vpop.f32.mrf.mxu1 }
 0x7c5   : > { %12789 = vst [vmem:[#allocation72_spill] sm:$0xff] %v10944_v41  ;;  %v10948_v28 = vpop.f32.mrf.mxu3 }
 0x7c6   : > { %12790 = vst [vmem:[#allocation73_spill] sm:$0xff] %v10946_v52 }
 0x7c7   : > { %12791 = vst [vmem:[#allocation74_spill] sm:$0xff] %v10948_v28 }
 0x7cb   : > { %v10950_v45 = vpop.f32.mrf.mxu0  ;;  %v10954_v2 = vpop.f32.mrf.mxu2 }
 0x7cc   : > { %12792 = vst [vmem:[#allocation75_spill] sm:$0xff] %v10950_v45  ;;  %v10952_v6 = vpop.f32.mrf.mxu1 }
 0x7cd   : > { %12793 = vst [vmem:[#allocation76_spill] sm:$0xff] %v10954_v2  ;;  %v10956_v4 = vpop.f32.mrf.mxu3 }
 0x7ce   : > { %12794 = vst [vmem:[#allocation77_spill] sm:$0xff] %v10956_v4 }
 0x7d3   : > { %v10958_v24 = vpop.f32.mrf.mxu0  ;;  %v4031_v55 = vpop.f32.mrf.mxu2 }
 0x7d4   : > { %v10960_v46 = vpop.f32.mrf.mxu1 }
 0x7d5   : > { %12795 = vst [vmem:[#allocation78_spill] sm:$0xff] %v10960_v46  ;;  %v4096_v5 = vpop.f32.mrf.mxu3 }
 0x7d6   : > { %v4097_v60 = vadd.f32 %v4096_v5, %v4031_v55 }
 0x7db   : > { %v10962_v61 = vpop.f32.mrf.mxu0  ;;  %v4039_v42 = vpop.f32.mrf.mxu2 }
 0x7dc   : > { %12796 = vst [vmem:[#allocation79_spill] sm:$0xff] %v10962_v61  ;;  %v10964_v56 = vpop.f32.mrf.mxu1 }
 0x7dd   : > { %12797 = vst [vmem:[#allocation80_spill] sm:$0xff] %v10964_v56  ;;  %v4100_v32 = vpop.f32.mrf.mxu3 }
 0x7de   : > { %v4101_v28 = vadd.f32 %v4100_v32, %v4039_v42 }
 0x7e3   : > { %v10966_v51 = vpop.f32.mrf.mxu0  ;;  %v4047_v10 = vpop.f32.mrf.mxu2 }
 0x7e4   : > { %12798 = vst [vmem:[#allocation81_spill] sm:$0xff] %v10966_v51  ;;  %v10968_v39 = vpop.f32.mrf.mxu1 }
 0x7e5   : > { %12799 = vst [vmem:[#allocation82_spill] sm:$0xff] %v10968_v39  ;;  %v4104_v12 = vpop.f32.mrf.mxu3 }
 0x7e6   : > { %v4105_v55 = vadd.f32 %v4104_v12, %v4047_v10 }
 0x7eb   : > { %v10970_v9 = vpop.f32.mrf.mxu0  ;;  %v4055_v36 = vpop.f32.mrf.mxu2 }
 0x7ec   : > { %12800 = vst [vmem:[#allocation83_spill] sm:$0xff] %v10970_v9  ;;  %v4180_v14 = vpop.f32.mrf.mxu1 }
 0x7ed   : > { %v4108_v18 = vpop.f32.mrf.mxu3 }
 0x7f3   : > { %v4138_v8 = vpop.f32.mrf.mxu0  ;;  %v4231_v4 = vpop.f32.mrf.mxu2 }
 0x7f4   : > { %v4139_v43 = vadd.f32 %v4138_v8, %v4097_v60  ;;  %v4186_v56 = vpop.f32.mrf.mxu1 }
 0x7f5   : > { %v4268_v2 = vpop.f32.mrf.mxu3 }
 0x7f6   : > { %v4181_v41 = vadd.f32 %v4180_v14, %v4139_v43 }
 0x7f8   : > { %v4232_v45 = vadd.f32 %v4231_v4, %v4181_v41 }
 0x7fa   : > { %v4269_v52 = vadd.f32 %v4268_v2, %v4232_v45 }
 0x7fb   : > { %v4143_v51 = vpop.f32.mrf.mxu0  ;;  %v4235_v39 = vpop.f32.mrf.mxu2 }
 0x7fc   : > { %v4283_v54 = vmul.f32 0.25, %v4269_v52  ;;  %v4144_v29 = vadd.f32 %v4143_v51, %v4101_v28  ;;  %v4192_v60 = vpop.f32.mrf.mxu1  ;;  %v4109_v28 = vadd.f32 %v4108_v18, %v4055_v36 }
 0x7fd   : > { %v4272_v46 = vpop.f32.mrf.mxu3 }
 0x7fe   : > { %v4187_v61 = vadd.f32 %v4186_v56, %v4144_v29  ;;  %v4287_v9 = vsel %vm2110_vm1, %v4283_v54, -inf }
 0x7ff   : > { %4288 = vmax.xlane.f32.xlu1 %v4287_v9 }
 0x800   : > { %v4236_v38 = vadd.f32 %v4235_v39, %v4187_v61 }
 0x802   : > { %v4273_v5 = vadd.f32 %v4272_v46, %v4236_v38 }
 0x803   : > { %v4148_v8 = vpop.f32.mrf.mxu0  ;;  %v4239_v41 = vpop.f32.mrf.mxu2 }
 0x804   : > { %v4284_v35 = vmul.f32 0.25, %v4273_v5  ;;  %v4149_v14 = vadd.f32 %v4148_v8, %v4105_v55  ;;  %v4198_v51 = vpop.f32.mrf.mxu1 }
 0x805   : > { %v4276_v2 = vpop.f32.mrf.mxu3 }
 0x806   : > { %v4193_v4 = vadd.f32 %v4192_v60, %v4149_v14  ;;  %v4290_v45 = vsel %vm2110_vm1, %v4284_v35, -inf }
 0x807   : > { %4291 = vmax.xlane.f32.xlu0 %v4290_v45 }
 0x808   : > { %v4240_v52 = vadd.f32 %v4239_v41, %v4193_v4 }
 0x80a   : > { %v4277_v42 = vadd.f32 %v4276_v2, %v4240_v52 }
 0x80b   : > { %v4153_v29 = vpop.f32.mrf.mxu0  ;;  %v4243_v46 = vpop.f32.mrf.mxu2 }
 0x80c   : > { %v4285_v56 = vmul.f32 0.25, %v4277_v42  ;;  %v4154_v32 = vadd.f32 %v4153_v29, %v4109_v28 }
 0x80d   : > { %v4280_v39 = vpop.f32.mrf.mxu3 }
 0x80e   : > { %v4199_v61 = vadd.f32 %v4198_v51, %v4154_v32  ;;  %v4293_v38 = vsel %vm2110_vm1, %v4285_v56, -inf }
 0x80f   : > { %4294 = vmax.xlane.f32.xlu2 %v4293_v38 }
 0x810   : > { %v4244_v10 = vadd.f32 %v4243_v46, %v4199_v61 }
 0x812   : > { %v4281_v12 = vadd.f32 %v4280_v39, %v4244_v10 }
 0x814   : > { %v4286_v9 = vmul.f32 0.25, %v4281_v12 }
 0x816   : > { %v4296_v43 = vsel %vm2110_vm1, %v4286_v9, -inf }
 0x817   : > { %4297 = vmax.xlane.f32.xlu0 %v4296_v43 }
 0x818   : > { %4401 = vrot.lane.b32.xlu1 %v10238_v34, %s9005_s3 }
 0x820   : > { %4395 = vrot.lane.b32.xlu1 %v10230_v1, %s9005_s3 }
 0x827   : > { %4397 = vrot.lane.b32.xlu2 %v10226_v58, %s9005_s3 }
 0x828   : > { %4713 = vrot.lane.b32.xlu1 %v10130_v0, %s9006_s4 }
 0x82b   : > { %4399 = vrot.lane.b32.xlu0 %v10228_v47, %s9005_s3 }
 0x82f   : > { %4715 = vrot.lane.b32.xlu2 %v10151_v57, %s9006_s4 }
 0x830   : > { %4709 = vrot.lane.b32.xlu1 %v10149_v37, %s9006_s4 }
 0x837   : > { %4711 = vrot.lane.b32.xlu2 %v10138_v44, %s9006_s4 }
 0x838   : > { %4703 = vrot.lane.b32.xlu1 %v10158_v53, %s9006_s4 }
 0x83f   : > { %4701 = vrot.lane.b32.xlu2 %v10136_v40, %s9006_s4 }
 0x840   : > { %4707 = vrot.lane.b32.xlu1 %v10204_v13, %s9006_s4 }
 0x847   : > { %4705 = vrot.lane.b32.xlu2 %v10187_v25, %s9006_s4 }
 0x872   : > { %v4289_v36 = vpop.xlane.xlu1 %4288 }
 0x873   : > { %v4299_v18 = vsub.f32 %v4283_v54, %v4289_v36 }
 0x875   : > { %v4303_v55 = vmul.f32 1.442695, %v4299_v18 }
 0x877   : > { %8642 = vpow2.f32 %v4303_v55 }
 0x87a   : > { %v4292_v5 = vpop.xlane.xlu0 %4291 }
 0x87b   : > { %v4300_v60 = vsub.f32 %v4284_v35, %v4292_v5 }
 0x87d   : > { %v8643_v8 = vpop.eup %8642  ;;  %v4305_v14 = vmul.f32 1.442695, %v4300_v60 }
 0x87e   : > { %v11001_v41 = vmul.f32 %v10752_v30, %v8643_v8 }
 0x87f   : > { %8644 = vpow2.f32 %v4305_v14 }
 0x880   : > { %v4319_v4 = vsel %vm2110_vm1, %v11001_v41, 0.0 }
 0x881   : > { %4320 = vadd.xlane.f32.xlu0 %v4319_v4 }
 0x882   : > { %v4295_v45 = vpop.xlane.xlu2 %4294 }
 0x883   : > { %v4301_v2 = vsub.f32 %v4285_v56, %v4295_v45 }
 0x885   : > { %v8645_v52 = vpop.eup %8644  ;;  %v4307_v28 = vmul.f32 1.442695, %v4301_v2 }
 0x886   : > { %v11006_v54 = vmul.f32 %v10763_v63, %v8645_v52 }
 0x887   : > { %8646 = vpow2.f32 %v4307_v28 }
 0x888   : > { %v4322_v35 = vsel %vm2110_vm1, %v11006_v54, 0.0 }
 0x889   : > { %4323 = vadd.xlane.f32.xlu0 %v4322_v35 }
 0x88a   : > { %v4398_v42 = vpop.permute.xlu2 %4397  ;;  %v4298_v30 = vpop.xlane.xlu0 %4297 }
 0x88b   : > { %v4302_v29 = vsub.f32 %v4286_v9, %v4298_v30  ;;  %v4402_v32 = vpop.permute.xlu1 %4401  ;;  %v11026_v5 = vand.u32 4294901760, %v4398_v42 }
 0x88c   : > { %v11010_v51 = vand.u32 4294901760, %v4402_v32 }
 0x88d   : > { %v8647_v61 = vpop.eup %8646  ;;  %v4309_v38 = vmul.f32 1.442695, %v4302_v29  ;;  %v4497_v45 = vsub.f32 %v4398_v42, %v11026_v5 }
 0x88e   : > { %v4485_v56 = vsub.f32 %v4402_v32, %v11010_v51  ;;  %4432 = vmatpush.msrb.mxu0 %v11010_v51  ;;  %4583 = vmatpush.msrb.mxu3 %v11010_v51  ;;  %v11016_v63 = vmul.f32 %v10771_v33, %v8647_v61 }
 0x88f   : > { %8648 = vpow2.f32 %v4309_v38 }
 0x890   : > { %v4486_v46 = vand.u32 4294901760, %v4485_v56  ;;  %4539 = vmatpush.msrb.mxu2 %v4485_v56  ;;  %v4325_v10 = vsel %vm2110_vm1, %v11016_v63, 0.0 }
 0x891   : > { %4326 = vadd.xlane.f32.xlu0 %v4325_v10 }
 0x892   : > { %v4487_v39 = vsub.f32 %v4485_v56, %v4486_v46  ;;  %v4716_v12 = vpop.permute.xlu2 %4715  ;;  %v4498_v56 = vand.u32 4294901760, %v4497_v45 }
 0x893   : > { %v4731_v9 = vsel %vm1803_vm0, %v4716_v12, 0  ;;  %v4396_v43 = vpop.permute.xlu1 %4395 }
 0x894   : > { %v4488_v36 = vand.u32 4294901760, %v4487_v39  ;;  %v11021_v18 = vand.u32 4294901760, %v4731_v9  ;;  %v11033_v14 = vand.u32 4294901760, %v4396_v43 }
 0x895   : > { %v8649_v55 = vpop.eup %8648 }
 0x896   : > { %4489 = vmatpush.msrb.mxu1 %v4488_v36  ;;  %v11024_v33 = vmul.f32 %v10779_v49, %v8649_v55  ;;  %v11029_v60 = vsub.f32 %v4731_v9, %v11021_v18  ;;  %v4503_v32 = vsub.f32 %v4396_v43, %v11033_v14 }
 0x898   : > { %v4328_v8 = vsel %vm2110_vm1, %v11024_v33, 0.0  ;;  %v12633_v2 = vand.u32 4294901760, %v11029_v60  ;;  %v4504_v43 = vand.u32 4294901760, %v4503_v32 }
 0x899   : > { %4329 = vadd.xlane.f32.xlu0 %v4328_v8  ;;  %v4499_v8 = vsub.f32 %v4497_v45, %v4498_v56 }
 0x89a   : > { %v4712_v4 = vpop.permute.xlu2 %4711  ;;  %v4801_v38 = vsub.f32 %v11029_v60, %v12633_v2  ;;  %v4505_v2 = vsub.f32 %v4503_v32, %v4504_v43 }
 0x89b   : > { %v4727_v52 = vsel %vm1803_vm0, %v4712_v4, 0  ;;  %v4714_v49 = vpop.permute.xlu1 %4713 }
 0x89c   : > { %v11038_v28 = vand.u32 4294901760, %v4727_v52  ;;  %v4729_v35 = vsel %vm1803_vm0, %v4714_v49, 0  ;;  %v4802_v36 = vand.u32 4294901760, %v4801_v38 }
 0x89d   : > { %v11041_v30 = vand.u32 4294901760, %v4729_v35  ;;  %v4400_v29 = vpop.permute.xlu0 %4399 }
 0x89e   : > { %v4433_v61 = vand.u32 4294901760, %v4400_v29  ;;  %v11051_v10 = vsub.f32 %v4727_v52, %v11038_v28 }
 0x89f   : > { %v11048_v42 = vsub.f32 %v4729_v35, %v11041_v30 }
 0x8a0   : > { %v4491_v39 = vsub.f32 %v4400_v29, %v4433_v61  ;;  %4434 = vmatpush.msrb.mxu0 %v4433_v61  ;;  %4585 = vmatpush.msrb.mxu3 %v4433_v61 }
 0x8a1   : > { %v12634_v12 = vand.u32 4294901760, %v11048_v42 }
 0x8a2   : > { %4436 = vmatpush.msrb.mxu0 %v11026_v5  ;;  %4542 = vmatpush.msrb.mxu2 %v4491_v39  ;;  %v4492_v9 = vand.u32 4294901760, %v4491_v39 }
 0x8a3   : > { %4587 = vmatpush.msrb.mxu3 %v11026_v5  ;;  %v4710_v55 = vpop.permute.xlu1 %4709  ;;  %v4807_v35 = vsub.f32 %v11048_v42, %v12634_v12 }
 0x8a4   : > { %v4725_v52 = vsel %vm1803_vm0, %v4710_v55, 0  ;;  %4438 = vmatpush.msrb.mxu0 %v11033_v14  ;;  %4545 = vmatpush.msrb.mxu2 %v4497_v45  ;;  %v4493_v49 = vsub.f32 %v4491_v39, %v4492_v9  ;;  %v4500_v39 = vand.u32 4294901760, %v4499_v8  ;;  %v12801_v55 = vand.u32 4294901760, %v11051_v10 }
 0x8a5   : > { %v11062_v29 = vand.u32 4294901760, %v4725_v52  ;;  %4589 = vmatpush.msrb.mxu3 %v11033_v14  ;;  %v4808_v45 = vand.u32 4294901760, %v4807_v35 }
 0x8a6   : > { %4630 = vmatpush.msra.mxu0 %v4486_v46  ;;  %4548 = vmatpush.msrb.mxu2 %v4503_v32  ;;  %v4494_v38 = vand.u32 4294901760, %v4493_v49  ;;  %v4813_v12 = vsub.f32 %v11051_v10, %v12801_v55  ;;  %v4506_v46 = vand.u32 4294901760, %v4505_v2  ;;  %v4315_v55 = vadd.f32 3.125e-08, %v11001_v41 }
 0x8a7   : > { %4803 = vmatpush.xpose.msra.mxu3 %v4802_v36  ;;  %v11066_v4 = vsub.f32 %v4725_v52, %v11062_v29 }
 0x8a8   : > { %4634 = vmatpush.msra.mxu0 %v4492_v9  ;;  %4746 = vmatpush.xpose.msra.mxu2 %v11021_v18  ;;  %v4814_v32 = vand.u32 4294901760, %v4813_v12 }
 0x8a9   : > { %4495 = vmatpush.msrb.mxu1 %v4494_v38  ;;  %v4818_v19 = vand.u32 4294901760, %v11066_v4 }
 0x8aa   : > { %4638 = vmatpush.msra.mxu0 %v4498_v56 }
 0x8ab   : > { %4809 = vmatpush.xpose.msra.mxu3 %v4808_v45  ;;  %4501 = vmatpush.msrb.mxu1 %v4500_v39  ;;  %v4819_v9 = vsub.f32 %v11066_v4, %v4818_v19 }
 0x8ac   : > { %4642 = vmatpush.msra.mxu0 %v4504_v43  ;;  %4748 = vmatpush.xpose.msra.mxu2 %v11041_v30 }
 0x8ad   : > { %4507 = vmatpush.msrb.mxu1 %v4506_v46  ;;  %v4820_v36 = vand.u32 4294901760, %v4819_v9 }
 0x8af   : > { %4673 = vmatpush.msra.mxu1 %v11010_v51  ;;  %4815 = vmatpush.xpose.msra.mxu3 %v4814_v32 }
 0x8b0   : > { %4750 = vmatpush.xpose.msra.mxu2 %v11038_v28 }
 0x8b1   : > { %4675 = vmatpush.msra.mxu1 %v4433_v61 }
 0x8b3   : > { %4677 = vmatpush.msra.mxu1 %v11026_v5  ;;  %4821 = vmatpush.xpose.msra.mxu3 %v4820_v36 }
 0x8b4   : > { %4752 = vmatpush.xpose.msra.mxu2 %v11062_v29 }
 0x8b5   : > { %4679 = vmatpush.msra.mxu1 %v11033_v14 }
 0x8f4   : > { %v4321_v2 = vpop.xlane.xlu0 %4320 }
 0x8f5   : > { %v4331_v56 = vadd.f32 1e-06, %v4321_v2 }
 0x8f7   : > { %8650 = vrcp.f32 %v4331_v56  ;;  %v4346_v61 = vand.u32 2147483648, %v4331_v56  ;;  %v4344_v35 = vand.u32 2147483647, %v4331_v56  ;;  %vm4340_vm9 = vweird.f32 %v4331_v56 }
 0x8f9   : > { %v4347_v14 = vor.u32 1.1754944e-38, %v4346_v61  ;;  %vm4345_vm11 = vcmp.eq.f32.partialorder %v4344_v35, 8.507059e+37  ;;  %v12805_v35 = vand.u32 4294901760, %v11048_v42 }
 0x8fc   : > { %v4324_v12 = vpop.xlane.xlu0 %4323 }
 0x8fd   : > { %v8651_v43 = vpop.eup %8650  ;;  %v4332_v8 = vadd.f32 1e-06, %v4324_v12 }
 0x8fe   : > { %v4336_v52 = vmul.f32 %v8651_v43, %v4331_v56  ;;  %vm4341_vm8 = vweird.f32 %v8651_v43 }
 0x8ff   : > { %8652 = vrcp.f32 %v4332_v8  ;;  %vm4342_vm10 = vmor %vm4340_vm9, %vm4341_vm8  ;;  %v4361_v12 = vand.u32 2147483648, %v4332_v8  ;;  %vm4355_vm13 = vweird.f32 %v4332_v8 }
 0x900   : > { %v4337_v51 = vsub.f32 1.0, %v4336_v52 }
 0x902   : > { %v4338_v49 = vmul.f32 %v8651_v43, %v4337_v51 }
 0x904   : > { %v4339_v38 = vadd.f32 %v8651_v43, %v4338_v49  ;;  %v4327_v5 = vpop.xlane.xlu0 %4326  ;;  %v4359_v49 = vand.u32 2147483647, %v4332_v8 }
 0x905   : > { %v8653_v45 = vpop.eup %8652  ;;  %v4333_v39 = vadd.f32 1e-06, %v4327_v5 }
 0x906   : > { %v4343_v46 = vsel %vm4342_vm10, %v8651_v43, %v4339_v38  ;;  %v4351_v32 = vmul.f32 %v8653_v45, %v4332_v8  ;;  %vm4356_vm12 = vweird.f32 %v8653_v45  ;;  %v4316_v8 = vadd.f32 3.125e-08, %v11006_v54 }
 0x907   : > { %v4348_v9 = vsel %vm4345_vm11, %v4347_v14, %v4343_v46  ;;  %8654 = vrcp.f32 %v4333_v39  ;;  %vm11089_vm14 = vmor %vm4355_vm13, %vm4356_vm12  ;;  %vm4360_vm15 = vcmp.eq.f32.partialorder %v4359_v49, 8.507059e+37  ;;  %vm4370_vm3 = vweird.f32 %v4333_v39 }
 0x908   : > { %v4352_v36 = vsub.f32 1.0, %v4351_v32  ;;  %v4349_v2 = vmul.f32 %v4348_v9, %v4315_v55  ;;  %v4362_v55 = vor.u32 1.1754944e-38, %v4361_v12  ;;  %v12804_v9 = vand.u32 4294901760, %v11029_v60 }
 0x90a   : > { %v4353_v52 = vmul.f32 %v8653_v45, %v4352_v36  ;;  %v4408_v51 = vsel %vm2110_vm1, %v4349_v2, 0  ;;  %v11085_v56 = vadd.f32 %v4349_v2, %v10841_v20 }
 0x90b   : > { %v11087_v61 = vand.u32 4294901760, %v4408_v51 }
 0x90c   : > { %v4354_v5 = vadd.f32 %v8653_v45, %v4353_v52  ;;  %v4330_v41 = vpop.xlane.xlu0 %4329  ;;  %v4376_v52 = vand.u32 2147483648, %v4333_v39 }
 0x90d   : > { %v8655_v43 = vpop.eup %8654  ;;  %v11093_v38 = vadd.f32 1e-06, %v4330_v41  ;;  %4509 = vmatmul.f32.vlgmr.msrb.gmra.mxu1 %v11087_v61  ;;  %v4440_v14 = vsub.f32 %v4408_v51, %v11087_v61  ;;  %v4374_v41 = vand.u32 2147483647, %v4333_v39 }
 0x90e   : > { %v4366_v20 = vmul.f32 %v8655_v43, %v4333_v39  ;;  %4897 = vmatpush.xpose.msrb.mxu1 %v11021_v18  ;;  %v4358_v46 = vsel %vm11089_vm14, %v8653_v45, %v4354_v5  ;;  %vm4371_vm2 = vweird.f32 %v8655_v43 }
 0x90f   : > { %8656 = vrcp.f32 %v11093_v38  ;;  %4551 = vmatmul.f32.vlgmr.msrb.gmra.mxu2 %v4440_v14  ;;  %v4441_v36 = vand.u32 4294901760, %v4440_v14  ;;  %v4363_v2 = vsel %vm4360_vm15, %v4362_v55, %v4358_v46  ;;  %vm4372_vm4 = vmor %vm4370_vm3, %vm4371_vm2  ;;  %vm4375_vm5 = vcmp.eq.f32.partialorder %v4374_v41, 8.507059e+37 }
 0x910   : > { %v4367_v32 = vsub.f32 1.0, %v4366_v20  ;;  %4944 = vmatpush.xpose.msrb.mxu2 %v12804_v9  ;;  %v4364_v12 = vmul.f32 %v4363_v2, %v4316_v8  ;;  %v4317_v8 = vadd.f32 3.125e-08, %v11016_v63  ;;  %v4702_v9 = vpop.permute.xlu2 %4701  ;;  %vm4385_vm7 = vweird.f32 %v11093_v38 }
 0x911   : > { %4593 = vmatmul.f32.vlgmr.msrb.gmra.mxu3 %v4441_v36  ;;  %v4442_v45 = vsub.f32 %v4440_v14, %v4441_v36  ;;  %v4377_v14 = vor.u32 1.1754944e-38, %v4376_v52  ;;  %v4389_v52 = vand.u32 2147483647, %v11093_v38 }
 0x912   : > { %v4368_v51 = vmul.f32 %v8655_v43, %v4367_v32  ;;  %4899 = vmatpush.xpose.msrb.mxu1 %v11041_v30  ;;  %4987 = vmatpush.xpose.msrb.mxu3 %v11021_v18  ;;  %v4411_v54 = vsel %vm2110_vm1, %v4364_v12, 0  ;;  %v11108_v49 = vadd.f32 %v4364_v12, %v10865_v31  ;;  %v4391_v12 = vand.u32 2147483648, %v11093_v38 }
 0x913   : > { %v4443_v55 = vand.u32 4294901760, %v4442_v45  ;;  %v11112_v20 = vand.u32 4294901760, %v4411_v54  ;;  %vm4390_vm9 = vcmp.eq.f32.partialorder %v4389_v52, 8.507059e+37 }
 0x914   : > { %v4369_v5 = vadd.f32 %v8655_v43, %v4368_v51  ;;  %4948 = vmatpush.xpose.msrb.mxu2 %v12805_v35  ;;  %v12806_v51 = vand.u32 4294901760, %v11051_v10 }
 0x915   : > { %v8657_v46 = vpop.eup %8656  ;;  %4444 = vmatmul.f32.vlgmr.msrb.gmra.mxu0 %v4443_v55  ;;  %4513 = vmatmul.f32.gmra.mxu1 %v11112_v20  ;;  %v4448_v31 = vsub.f32 %v4411_v54, %v11112_v20  ;;  %v4392_v55 = vor.u32 1.1754944e-38, %v4391_v12 }
 0x916   : > { %v4381_v18 = vmul.f32 %v8657_v46, %v11093_v38  ;;  %v4373_v39 = vsel %vm4372_vm4, %v8655_v43, %v4369_v5  ;;  %4853 = vmatpush.xpose.msrb.mxu0 %v11029_v60  ;;  %4901 = vmatpush.xpose.msrb.mxu1 %v11038_v28  ;;  %vm4386_vm6 = vweird.f32 %v8657_v46 }
 0x917   : > { %v4378_v32 = vsel %vm4375_vm5, %v4377_v14, %v4373_v39  ;;  %4989 = vmatpush.xpose.msrb.mxu3 %v11041_v30  ;;  %4556 = vmatmul.f32.gmra.mxu2 %v4448_v31  ;;  %v4449_v63 = vand.u32 4294901760, %v4448_v31  ;;  %v4717_v30 = vsel %vm1803_vm0, %v4702_v9, 0  ;;  %vm4387_vm8 = vmor %vm4385_vm7, %vm4386_vm6 }
 0x918   : > { %v4382_v36 = vsub.f32 1.0, %v4381_v18  ;;  %v4379_v2 = vmul.f32 %v4378_v32, %v4317_v8  ;;  %4952 = vmatpush.xpose.msrb.mxu2 %v12806_v51  ;;  %v11142_v8 = vand.u32 4294901760, %v4717_v30  ;;  %v4704_v18 = vpop.permute.xlu1 %4703  ;;  %v4706_v52 = vpop.permute.xlu2 %4705 }
 0x919   : > { %4599 = vmatmul.f32.gmra.mxu3 %v4449_v63  ;;  %v4450_v60 = vsub.f32 %v4448_v31, %v4449_v63 }
 0x91a   : > { %v4383_v43 = vmul.f32 %v8657_v46, %v4382_v36  ;;  %v4414_v41 = vsel %vm2110_vm1, %v4379_v2, 0  ;;  %v11128_v45 = vadd.f32 %v4379_v2, %v10886_v59  ;;  %4856 = vmatpush.xpose.msrb.mxu0 %v11048_v42  ;;  %4903 = vmatpush.xpose.msrb.mxu1 %v11062_v29  ;;  %v4318_v42 = vadd.f32 3.125e-08, %v11024_v33 }
 0x91b   : > { %v11133_v54 = vand.u32 4294901760, %v4414_v41  ;;  %4991 = vmatpush.xpose.msrb.mxu3 %v11038_v28  ;;  %v4451_v35 = vand.u32 4294901760, %v4450_v60  ;;  %v4754_v39 = vsub.f32 %v4717_v30, %v11142_v8 }
 0x91c   : > { %v4384_v5 = vadd.f32 %v8657_v46, %v4383_v43  ;;  %4956 = vmatpush.xpose.msrb.mxu2 %v4818_v19 }
 0x91d   : > { %v4456_v59 = vsub.f32 %v4414_v41, %v11133_v54  ;;  %4452 = vmatmul.f32.gmra.mxu0 %v4451_v35  ;;  %4517 = vmatmul.f32.gmra.mxu1 %v11133_v54  ;;  %v4755_v63 = vand.u32 4294901760, %v4754_v39 }
 0x91e   : > { %v4388_v38 = vsel %vm4387_vm8, %v8657_v46, %v4384_v5  ;;  %4859 = vmatpush.xpose.msrb.mxu0 %v11051_v10  ;;  %v4719_v46 = vsel %vm1803_vm0, %v4704_v18, 0 }
 0x91f   : > { %v4457_v28 = vand.u32 4294901760, %v4456_v59  ;;  %v4393_v14 = vsel %vm4390_vm9, %v4392_v55, %v4388_v38  ;;  %4993 = vmatpush.xpose.msrb.mxu3 %v11062_v29  ;;  %4561 = vmatmul.f32.gmra.mxu2 %v4456_v59  ;;  %v4761_v29 = vand.u32 4294901760, %v4719_v46  ;;  %v4756_v51 = vsub.f32 %v4754_v39, %v4755_v63 }
 0x920   : > { %v4394_v19 = vmul.f32 %v4393_v14, %v4318_v42  ;;  %v4708_v5 = vpop.permute.xlu1 %4707 }
 0x921   : > { %v4458_v31 = vsub.f32 %v4456_v59, %v4457_v28  ;;  %4605 = vmatmul.f32.gmra.mxu3 %v4457_v28  ;;  %v4762_v43 = vsub.f32 %v4719_v46, %v4761_v29  ;;  %v4757_v41 = vand.u32 4294901760, %v4756_v51  ;;  %v4723_v59 = vsel %vm1803_vm0, %v4708_v5, 0 }
 0x922   : > { %v4417_v33 = vsel %vm2110_vm1, %v4394_v19, 0  ;;  %v11150_v32 = vadd.f32 %v4394_v19, %v10909_v26  ;;  %4862 = vmatpush.xpose.msrb.mxu0 %v11066_v4  ;;  %v4721_v26 = vsel %vm1803_vm0, %v4706_v52, 0  ;;  %v4777_v38 = vand.u32 4294901760, %v4723_v59 }
 0x923   : > { %v4459_v10 = vand.u32 4294901760, %v4458_v31  ;;  %v4463_v9 = vand.u32 4294901760, %v4417_v33  ;;  %v4769_v30 = vand.u32 4294901760, %v4721_v26  ;;  %v4763_v4 = vand.u32 4294901760, %v4762_v43 }
 0x924   : > { %v4778_v14 = vsub.f32 %v4723_v59, %v4777_v38 }
 0x925   : > { %v4464_v36 = vsub.f32 %v4417_v33, %v4463_v9  ;;  %4460 = vmatmul.f32.gmra.mxu0 %v4459_v10  ;;  %4521 = vmatmul.f32.gmra.mxu1 %v4463_v9  ;;  %v4770_v35 = vsub.f32 %v4721_v26, %v4769_v30  ;;  %v4764_v55 = vsub.f32 %v4762_v43, %v4763_v4 }
 0x926   : > { %v4779_v19 = vand.u32 4294901760, %v4778_v14 }
 0x927   : > { %v4465_v2 = vand.u32 4294901760, %v4464_v36  ;;  %4566 = vmatmul.f32.gmra.mxu2 %v4464_v36  ;;  %v4771_v42 = vand.u32 4294901760, %v4770_v35  ;;  %v4765_v28 = vand.u32 4294901760, %v4764_v55 }
 0x928   : > { %v4780_v33 = vsub.f32 %v4778_v14, %v4779_v19 }
 0x929   : > { %v4466_v12 = vsub.f32 %v4464_v36, %v4465_v2  ;;  %4611 = vmatmul.f32.gmra.mxu3 %v4465_v2  ;;  %v4772_v18 = vsub.f32 %v4770_v35, %v4771_v42 }
 0x92b   : > { %v4467_v60 = vand.u32 4294901760, %v4466_v12  ;;  %v4773_v31 = vand.u32 4294901760, %v4772_v18 }
 0x92d   : > { %4468 = vmatmul.f32.gmra.mxu0 %v4467_v60  ;;  %4681 = vmatmul.f32.vlgmr.msra.gmra.mxu1 %v11087_v61 }
 0x92f   : > { %4758 = vmatmul.f32.vlgmr.msra.gmra.mxu2 %v4757_v41 }
 0x931   : > { %4823 = vmatmul.f32.vlgmr.msra.gmra.mxu3 %v11142_v8 }
 0x935   : > { %4644 = vmatmul.f32.vlgmr.msra.gmra.mxu0 %v11087_v61  ;;  %4685 = vmatmul.f32.gmra.mxu1 %v11112_v20  ;;  %v4781_v61 = vand.u32 4294901760, %v4780_v33 }
 0x937   : > { %4766 = vmatmul.f32.gmra.mxu2 %v4765_v28 }
 0x939   : > { %4827 = vmatmul.f32.gmra.mxu3 %v4761_v29 }
 0x93d   : > { %4648 = vmatmul.f32.gmra.mxu0 %v11112_v20  ;;  %4689 = vmatmul.f32.gmra.mxu1 %v11133_v54 }
 0x93f   : > { %4774 = vmatmul.f32.gmra.mxu2 %v4773_v31 }
 0x941   : > { %4831 = vmatmul.f32.gmra.mxu3 %v4769_v30 }
 0x945   : > { %4652 = vmatmul.f32.gmra.mxu0 %v11133_v54  ;;  %4693 = vmatmul.f32.gmra.mxu1 %v4463_v9 }
 0x947   : > { %4782 = vmatmul.f32.gmra.mxu2 %v4781_v61 }
 0x949   : > { %4835 = vmatmul.f32.gmra.mxu3 %v4777_v38 }
 0x94d   : > { %4656 = vmatmul.f32.gmra.mxu0 %v4463_v9  ;;  %4907 = vmatmul.f32.vlgmr.msrb.gmra.mxu1 %v4755_v63 }
 0x94f   : > { %4958 = vmatmul.f32.vlgmr.msrb.gmra.mxu2 %v11142_v8 }
 0x951   : > { %4995 = vmatmul.f32.vlgmr.msrb.gmra.mxu3 %v11142_v8 }
 0x955   : > { %4865 = vmatmul.f32.vlgmr.msrb.gmra.mxu0 %v4754_v39  ;;  %4913 = vmatmul.f32.gmra.mxu1 %v4763_v4 }
 0x957   : > { %4962 = vmatmul.f32.gmra.mxu2 %v4761_v29 }
 0x959   : > { %4999 = vmatmul.f32.gmra.mxu3 %v4761_v29 }
 0x95d   : > { %4870 = vmatmul.f32.gmra.mxu0 %v4762_v43  ;;  %4919 = vmatmul.f32.gmra.mxu1 %v4771_v42 }
 0x95f   : > { %4966 = vmatmul.f32.gmra.mxu2 %v4769_v30 }
 0x961   : > { %5003 = vmatmul.f32.gmra.mxu3 %v4769_v30 }
 0x965   : > { %4875 = vmatmul.f32.gmra.mxu0 %v4770_v35  ;;  %4925 = vmatmul.f32.gmra.mxu1 %v4779_v19 }
 0x967   : > { %4970 = vmatmul.f32.gmra.mxu2 %v4777_v38 }
 0x969   : > { %5007 = vmatmul.f32.gmra.mxu3 %v4777_v38 }
 0x96d   : > { %4880 = vmatmul.f32.gmra.mxu0 %v4778_v14 }
 0x98a   : > { %v11165_v20 = vpop.f32.mrf.mxu1 }
 0x98b   : > { %12807 = vst [vmem:[#allocation84_spill] sm:$0xff] %v11165_v20 }
 0x992   : > { %v11167_v54 = vpop.f32.mrf.mxu2  ;;  %v11169_v46 = vpop.f32.mrf.mxu0 }
 0x993   : > { %12808 = vst [vmem:[#allocation85_spill] sm:$0xff] %v11167_v54  ;;  %v11171_v8 = vpop.f32.mrf.mxu1 }
 0x994   : > { %12809 = vst [vmem:[#allocation86_spill] sm:$0xff] %v11171_v8  ;;  %v11173_v39 = vpop.f32.mrf.mxu3 }
 0x995   : > { %12810 = vst [vmem:[#allocation87_spill] sm:$0xff] %v11173_v39 }
 0x99a   : > { %v11175_v10 = vpop.f32.mrf.mxu0  ;;  %v11179_v36 = vpop.f32.mrf.mxu2 }
 0x99b   : > { %12811 = vst [vmem:[#allocation88_spill] sm:$0xff] %v11175_v10  ;;  %v11177_v9 = vpop.f32.mrf.mxu1 }
 0x99c   : > { %12812 = vst [vmem:[#allocation89_spill] sm:$0xff] %v11177_v9  ;;  %v11181_v63 = vpop.f32.mrf.mxu3 }
 0x99d   : > { %12813 = vst [vmem:[#allocation90_spill] sm:$0xff] %v11179_v36 }
 0x99e   : > { %12814 = vst [vmem:[#allocation91_spill] sm:$0xff] %v11181_v63 }
 0x9a2   : > { %v11183_v29 = vpop.f32.mrf.mxu0  ;;  %v11187_v52 = vpop.f32.mrf.mxu2 }
 0x9a3   : > { %12815 = vst [vmem:[#allocation92_spill] sm:$0xff] %v11183_v29  ;;  %v11185_v2 = vpop.f32.mrf.mxu1 }
 0x9a4   : > { %12816 = vst [vmem:[#allocation93_spill] sm:$0xff] %v11185_v2  ;;  %v11189_v12 = vpop.f32.mrf.mxu3 }
 0x9a5   : > { %12817 = vst [vmem:[#allocation94_spill] sm:$0xff] %v11187_v52 }
 0x9a6   : > { %12818 = vst [vmem:[#allocation95_spill] sm:$0xff] %v11189_v12 }
 0x9aa   : > { %v11191_v51 = vpop.f32.mrf.mxu0  ;;  %v11195_v26 = vpop.f32.mrf.mxu2 }
 0x9ab   : > { %12819 = vst [vmem:[#allocation96_spill] sm:$0xff] %v11191_v51  ;;  %v11193_v43 = vpop.f32.mrf.mxu1 }
 0x9ac   : > { %12820 = vst [vmem:[#allocation97_spill] sm:$0xff] %v11193_v43  ;;  %v11197_v60 = vpop.f32.mrf.mxu3 }
 0x9ad   : > { %12821 = vst [vmem:[#allocation98_spill] sm:$0xff] %v11195_v26 }
 0x9ae   : > { %12822 = vst [vmem:[#allocation99_spill] sm:$0xff] %v11197_v60 }
 0x9b2   : > { %v11199_v41 = vpop.f32.mrf.mxu0  ;;  %v4759_v4 = vpop.f32.mrf.mxu2 }
 0x9b3   : > { %12823 = vst [vmem:[#allocation100_spill] sm:$0xff] %v11199_v41  ;;  %v11201_v30 = vpop.f32.mrf.mxu1 }
 0x9b4   : > { %12824 = vst [vmem:[#allocation101_spill] sm:$0xff] %v11201_v30  ;;  %v4824_v5 = vpop.f32.mrf.mxu3 }
 0x9b5   : > { %v4825_v60 = vadd.f32 %v4824_v5, %v4759_v4 }
 0x9ba   : > { %v11203_v35 = vpop.f32.mrf.mxu0  ;;  %v4767_v59 = vpop.f32.mrf.mxu2 }
 0x9bb   : > { %12825 = vst [vmem:[#allocation102_spill] sm:$0xff] %v11203_v35  ;;  %v11205_v55 = vpop.f32.mrf.mxu1 }
 0x9bc   : > { %12826 = vst [vmem:[#allocation103_spill] sm:$0xff] %v11205_v55  ;;  %v4828_v42 = vpop.f32.mrf.mxu3 }
 0x9bd   : > { %v4829_v29 = vadd.f32 %v4828_v42, %v4767_v59 }
 0x9c2   : > { %v11207_v38 = vpop.f32.mrf.mxu0  ;;  %v4775_v28 = vpop.f32.mrf.mxu2 }
 0x9c3   : > { %12827 = vst [vmem:[#allocation104_spill] sm:$0xff] %v11207_v38  ;;  %v11209_v14 = vpop.f32.mrf.mxu1 }
 0x9c4   : > { %12828 = vst [vmem:[#allocation105_spill] sm:$0xff] %v11209_v14  ;;  %v4832_v18 = vpop.f32.mrf.mxu3 }
 0x9c5   : > { %v4833_v4 = vadd.f32 %v4832_v18, %v4775_v28 }
 0x9ca   : > { %v11211_v19 = vpop.f32.mrf.mxu0  ;;  %v4783_v31 = vpop.f32.mrf.mxu2 }
 0x9cb   : > { %12829 = vst [vmem:[#allocation106_spill] sm:$0xff] %v11211_v19  ;;  %v4908_v61 = vpop.f32.mrf.mxu1 }
 0x9cc   : > { %v4836_v33 = vpop.f32.mrf.mxu3 }
 0x9d2   : > { %v4866_v26 = vpop.f32.mrf.mxu0  ;;  %v4959_v51 = vpop.f32.mrf.mxu2 }
 0x9d3   : > { %v4867_v2 = vadd.f32 %v4866_v26, %v4825_v60  ;;  %v4914_v9 = vpop.f32.mrf.mxu1 }
 0x9d4   : > { %v4996_v12 = vpop.f32.mrf.mxu3 }
 0x9d5   : > { %v4909_v52 = vadd.f32 %v4908_v61, %v4867_v2 }
 0x9d7   : > { %v4960_v55 = vadd.f32 %v4959_v51, %v4909_v52 }
 0x9d9   : > { %v4997_v30 = vadd.f32 %v4996_v12, %v4960_v55 }
 0x9da   : > { %v4871_v38 = vpop.f32.mrf.mxu0  ;;  %v4963_v14 = vpop.f32.mrf.mxu2 }
 0x9db   : > { %v5011_v35 = vmul.f32 0.25, %v4997_v30  ;;  %v4872_v63 = vadd.f32 %v4871_v38, %v4829_v29  ;;  %v4920_v26 = vpop.f32.mrf.mxu1  ;;  %v4837_v30 = vadd.f32 %v4836_v33, %v4783_v31 }
 0x9dc   : > { %v5000_v36 = vpop.f32.mrf.mxu3 }
 0x9dd   : > { %v4915_v21 = vadd.f32 %v4914_v9, %v4872_v63  ;;  %v5015_v19 = vsel %vm2110_vm1, %v5011_v35, -inf }
 0x9de   : > { %5016 = vmax.xlane.f32.xlu2 %v5015_v19 }
 0x9df   : > { %v4964_v8 = vadd.f32 %v4963_v14, %v4915_v21 }
 0x9e1   : > { %v5001_v5 = vadd.f32 %v5000_v36, %v4964_v8 }
 0x9e2   : > { %v4876_v60 = vpop.f32.mrf.mxu0  ;;  %v4967_v52 = vpop.f32.mrf.mxu2 }
 0x9e3   : > { %v5012_v10 = vmul.f32 0.25, %v5001_v5  ;;  %v4877_v2 = vadd.f32 %v4876_v60, %v4833_v4  ;;  %v4926_v38 = vpop.f32.mrf.mxu1 }
 0x9e4   : > { %v5004_v55 = vpop.f32.mrf.mxu3 }
 0x9e5   : > { %v4921_v51 = vadd.f32 %v4920_v26, %v4877_v2  ;;  %v5018_v12 = vsel %vm2110_vm1, %v5012_v10, -inf }
 0x9e6   : > { %5019 = vmax.xlane.f32.xlu0 %v5018_v12 }
 0x9e7   : > { %v4968_v29 = vadd.f32 %v4967_v52, %v4921_v51 }
 0x9e9   : > { %v5005_v59 = vadd.f32 %v5004_v55, %v4968_v29  ;;  %v11249_v55 = vld [vmem:[%s9214_s24] sm:$0xff] }
 0x9ea   : > { %v4881_v9 = vpop.f32.mrf.mxu0  ;;  %v4971_v36 = vpop.f32.mrf.mxu2 }
 0x9eb   : > { %v5013_v63 = vmul.f32 0.25, %v5005_v59  ;;  %v4882_v42 = vadd.f32 %v4881_v9, %v4837_v30 }
 0x9ec   : > { %v5008_v14 = vpop.f32.mrf.mxu3 }
 0x9ed   : > { %v4927_v21 = vadd.f32 %v4926_v38, %v4882_v42  ;;  %v5021_v8 = vsel %vm2110_vm1, %v5013_v63, -inf }
 0x9ee   : > { %5022 = vmax.xlane.f32.xlu1 %v5021_v8 }
 0x9ef   : > { %v4972_v28 = vadd.f32 %v4971_v36, %v4927_v21  ;;  %v11262_v36 = vld [vmem:[%s9214_s24 + $0x8] sm:$0xff] }
 0x9f1   : > { %v5009_v18 = vadd.f32 %v5008_v14, %v4972_v28 }
 0x9f3   : > { %v5014_v19 = vmul.f32 0.25, %v5009_v18 }
 0x9f5   : > { %v5024_v61 = vsel %vm2110_vm1, %v5014_v19, -inf }
 0x9f6   : > { %5129 = vrot.lane.b32.xlu2 %v10238_v34, %s9006_s4  ;;  %5025 = vmax.xlane.f32.xlu0 %v5024_v61 }
 0x9fe   : > { %5123 = vrot.lane.b32.xlu2 %v10230_v1, %s9006_s4 }
 0xa06   : > { %5443 = vrot.lane.b32.xlu2 %v10151_v57, %s9007_s29 }
 0xa07   : > { %5125 = vrot.lane.b32.xlu1 %v10226_v58, %s9006_s4 }
 0xa0a   : > { %5127 = vrot.lane.b32.xlu0 %v10228_v47, %s9006_s4 }
 0xa0e   : > { %5439 = vrot.lane.b32.xlu2 %v10138_v44, %s9007_s29 }
 0xa0f   : > { %5441 = vrot.lane.b32.xlu1 %v10130_v0, %s9007_s29 }
 0xa16   : > { %5429 = vrot.lane.b32.xlu2 %v10136_v40, %s9007_s29 }
 0xa17   : > { %5437 = vrot.lane.b32.xlu1 %v10149_v37, %s9007_s29 }
 0xa1e   : > { %5433 = vrot.lane.b32.xlu2 %v10187_v25, %s9007_s29 }
 0xa1f   : > { %5431 = vrot.lane.b32.xlu1 %v10158_v53, %s9007_s29 }
 0xa27   : > { %5435 = vrot.lane.b32.xlu1 %v10204_v13, %s9007_s29 }
 0xa51   : > { %v5017_v31 = vpop.xlane.xlu2 %5016 }
 0xa52   : > { %v5027_v33 = vsub.f32 %v5011_v35, %v5017_v31 }
 0xa54   : > { %v5031_v4 = vmul.f32 1.442695, %v5027_v33 }
 0xa56   : > { %8658 = vpow2.f32 %v5031_v4  ;;  %v11270_v4 = vld [vmem:[%s9214_s24 + $0x10] sm:$0xff] }
 0xa59   : > { %v5020_v5 = vpop.xlane.xlu0 %5019  ;;  %v5130_v26 = vpop.permute.xlu2 %5129 }
 0xa5a   : > { %v5028_v60 = vsub.f32 %v5012_v10, %v5020_v5  ;;  %v11241_v2 = vand.u32 4294901760, %v5130_v26 }
 0xa5c   : > { %v8659_v52 = vpop.eup %8658  ;;  %v5033_v51 = vmul.f32 1.442695, %v5028_v60  ;;  %v11244_v12 = vsub.f32 %v5130_v26, %v11241_v2  ;;  %5160 = vmatpush.msra.mxu0 %v11241_v2  ;;  %5311 = vmatpush.msra.mxu3 %v11241_v2 }
 0xa5d   : > { %v11252_v35 = vmul.f32 %v11249_v55, %v8659_v52 }
 0xa5e   : > { %8660 = vpow2.f32 %v5033_v51  ;;  %v12635_v10 = vand.u32 4294901760, %v11244_v12  ;;  %5267 = vmatpush.msra.mxu2 %v11244_v12  ;;  %v12830_v62 = vand.u32 4294901760, %v11244_v12 }
 0xa5f   : > { %v5047_v29 = vsel %vm2110_vm1, %v11252_v35, 0.0 }
 0xa60   : > { %v5215_v30 = vsub.f32 %v11244_v12, %v12635_v10  ;;  %5048 = vadd.xlane.f32.xlu0 %v5047_v29  ;;  %v11281_v29 = vld [vmem:[%s9214_s24 + $0x18] sm:$0xff] }
 0xa61   : > { %v5023_v59 = vpop.xlane.xlu1 %5022  ;;  %v5124_v38 = vpop.permute.xlu2 %5123 }
 0xa62   : > { %v5216_v9 = vand.u32 4294901760, %v5215_v30  ;;  %v5029_v42 = vsub.f32 %v5013_v63, %v5023_v59 }
 0xa64   : > { %v8661_v21 = vpop.eup %8660  ;;  %v5035_v8 = vmul.f32 1.442695, %v5029_v42  ;;  %5217 = vmatpush.msra.mxu1 %v5216_v9  ;;  %v11291_v9 = vand.u32 4294901760, %v5124_v38 }
 0xa65   : > { %v11265_v28 = vmul.f32 %v11262_v36, %v8661_v21 }
 0xa66   : > { %8662 = vpow2.f32 %v5035_v8 }
 0xa67   : > { %v5050_v14 = vsel %vm2110_vm1, %v11265_v28, 0.0 }
 0xa68   : > { %5051 = vadd.xlane.f32.xlu0 %v5050_v14 }
 0xa69   : > { %v5026_v18 = vpop.xlane.xlu0 %5025  ;;  %v5444_v33 = vpop.permute.xlu2 %5443 }
 0xa6a   : > { %v5030_v61 = vsub.f32 %v5014_v19, %v5026_v18  ;;  %v5459_v26 = vsel %vm1803_vm0, %v5444_v33, 0  ;;  %v5231_v33 = vsub.f32 %v5124_v38, %v11291_v9 }
 0xa6b   : > { %v11278_v52 = vand.u32 4294901760, %v5459_v26 }
 0xa6c   : > { %v8663_v31 = vpop.eup %8662  ;;  %v5037_v63 = vmul.f32 1.442695, %v5030_v61 }
 0xa6d   : > { %v11273_v5 = vmul.f32 %v11270_v4, %v8663_v31  ;;  %v11287_v30 = vsub.f32 %v5459_v26, %v11278_v52 }
 0xa6e   : > { %8664 = vpow2.f32 %v5037_v63 }
 0xa6f   : > { %v5053_v60 = vsel %vm2110_vm1, %v11273_v5, 0.0  ;;  %v12636_v8 = vand.u32 4294901760, %v11287_v30 }
 0xa70   : > { %5054 = vadd.xlane.f32.xlu0 %v5053_v60 }
 0xa71   : > { %v5440_v42 = vpop.permute.xlu2 %5439  ;;  %v5529_v26 = vsub.f32 %v11287_v30, %v12636_v8 }
 0xa72   : > { %v5455_v18 = vsel %vm1803_vm0, %v5440_v42, 0  ;;  %v5232_v42 = vand.u32 4294901760, %v5231_v33 }
 0xa73   : > { %v11299_v60 = vand.u32 4294901760, %v5455_v18 }
 0xa74   : > { %v8665_v51 = vpop.eup %8664 }
 0xa75   : > { %v11284_v19 = vmul.f32 %v11281_v29, %v8665_v51  ;;  %v11303_v38 = vsub.f32 %v5455_v18, %v11299_v60  ;;  %v5233_v18 = vsub.f32 %v5231_v33, %v5232_v42 }
 0xa77   : > { %v5056_v59 = vsel %vm2110_vm1, %v11284_v19, 0.0  ;;  %v12638_v15 = vand.u32 4294901760, %v11303_v38 }
 0xa78   : > { %5057 = vadd.xlane.f32.xlu0 %v5056_v59 }
 0xa79   : > { %v5126_v21 = vpop.permute.xlu1 %5125 }
 0xa7a   : > { %v5163_v14 = vand.u32 4294901760, %v5126_v21 }
 0xa7c   : > { %v5225_v61 = vsub.f32 %v5126_v21, %v5163_v14  ;;  %v5128_v31 = vpop.permute.xlu0 %5127  ;;  %v5530_v21 = vand.u32 4294901760, %v5529_v26 }
 0xa7d   : > { %v5161_v63 = vand.u32 4294901760, %v5128_v31 }
 0xa7e   : > { %v5226_v59 = vand.u32 4294901760, %v5225_v61 }
 0xa7f   : > { %v5219_v51 = vsub.f32 %v5128_v31, %v5161_v63  ;;  %5162 = vmatpush.msra.mxu0 %v5161_v63  ;;  %5313 = vmatpush.msra.mxu3 %v5161_v63 }
 0xa80   : > { %v5227_v8 = vsub.f32 %v5225_v61, %v5226_v59 }
 0xa81   : > { %v5442_v10 = vpop.permute.xlu1 %5441  ;;  %5164 = vmatpush.msra.mxu0 %v5163_v14  ;;  %5270 = vmatpush.msra.mxu2 %v5219_v51  ;;  %v5220_v43 = vand.u32 4294901760, %v5219_v51 }
 0xa82   : > { %v5457_v41 = vsel %vm1803_vm0, %v5442_v10, 0  ;;  %5315 = vmatpush.msra.mxu3 %v5163_v14 }
 0xa83   : > { %v11305_v39 = vand.u32 4294901760, %v5457_v41  ;;  %5166 = vmatpush.msra.mxu0 %v11291_v9  ;;  %5273 = vmatpush.msra.mxu2 %v5225_v61  ;;  %v5221_v31 = vsub.f32 %v5219_v51, %v5220_v43  ;;  %v5228_v61 = vand.u32 4294901760, %v5227_v8  ;;  %v5541_v8 = vsub.f32 %v11303_v38, %v12638_v15 }
 0xa84   : > { %5317 = vmatpush.msra.mxu3 %v11291_v9 }
 0xa85   : > { %5358 = vmatpush.msrb.mxu0 %v12830_v62  ;;  %v11312_v26 = vsub.f32 %v5457_v41, %v11305_v39  ;;  %5276 = vmatpush.msra.mxu2 %v5231_v33  ;;  %v5222_v10 = vand.u32 4294901760, %v5221_v31  ;;  %v5234_v62 = vand.u32 4294901760, %v5233_v18 }
 0xa86   : > { %5531 = vmatpush.xpose.msrb.mxu3 %v5530_v21 }
 0xa87   : > { %5362 = vmatpush.msrb.mxu0 %v5220_v43  ;;  %5474 = vmatpush.xpose.msrb.mxu2 %v11278_v52  ;;  %v12639_v51 = vand.u32 4294901760, %v11312_v26 }
 0xa88   : > { %5223 = vmatpush.msra.mxu1 %v5222_v10 }
 0xa89   : > { %5366 = vmatpush.msrb.mxu0 %v5226_v59  ;;  %v5438_v7 = vpop.permute.xlu1 %5437  ;;  %v5535_v41 = vsub.f32 %v11312_v26, %v12639_v51 }
 0xa8a   : > { %5229 = vmatpush.msra.mxu1 %v5228_v61  ;;  %v5453_v12 = vsel %vm1803_vm0, %v5438_v7, 0 }
 0xa8b   : > { %5370 = vmatpush.msrb.mxu0 %v5232_v42  ;;  %5476 = vmatpush.xpose.msrb.mxu2 %v11305_v39  ;;  %v11322_v43 = vand.u32 4294901760, %v5453_v12  ;;  %v5536_v33 = vand.u32 4294901760, %v5535_v41  ;;  %v5542_v42 = vand.u32 4294901760, %v5541_v8 }
 0xa8c   : > { %5235 = vmatpush.msra.mxu1 %v5234_v62 }
 0xa8d   : > { %v11329_v59 = vsub.f32 %v5453_v12, %v11322_v43  ;;  %5537 = vmatpush.xpose.msrb.mxu3 %v5536_v33 }
 0xa8e   : > { %5401 = vmatpush.msrb.mxu1 %v11241_v2 }
 0xa8f   : > { %5478 = vmatpush.xpose.msrb.mxu2 %v11299_v60  ;;  %v12637_v7 = vand.u32 4294901760, %v11329_v59 }
 0xa90   : > { %5403 = vmatpush.msrb.mxu1 %v5161_v63 }
 0xa91   : > { %5543 = vmatpush.xpose.msrb.mxu3 %v5542_v42  ;;  %v5547_v21 = vsub.f32 %v11329_v59, %v12637_v7 }
 0xa92   : > { %5405 = vmatpush.msrb.mxu1 %v5163_v14 }
 0xa93   : > { %5480 = vmatpush.xpose.msrb.mxu2 %v11322_v43  ;;  %v5548_v2 = vand.u32 4294901760, %v5547_v21 }
 0xa94   : > { %5407 = vmatpush.msrb.mxu1 %v11291_v9 }
 0xa95   : > { %5549 = vmatpush.xpose.msrb.mxu3 %v5548_v2 }
 0xad3   : > { %v5049_v31 = vpop.xlane.xlu0 %5048 }
 0xad4   : > { %v5059_v10 = vadd.f32 1e-06, %v5049_v31  ;;  %v5043_v31 = vadd.f32 3.125e-08, %v11252_v35 }
 0xad6   : > { %8666 = vrcp.f32 %v5059_v10  ;;  %v5074_v41 = vand.u32 2147483648, %v5059_v10  ;;  %v5072_v33 = vand.u32 2147483647, %v5059_v10  ;;  %vm5068_vm11 = vweird.f32 %v5059_v10 }
 0xad8   : > { %v5075_v21 = vor.u32 1.1754944e-38, %v5074_v41  ;;  %vm5073_vm13 = vcmp.eq.f32.partialorder %v5072_v33, 8.507059e+37 }
 0xadb   : > { %v5052_v63 = vpop.xlane.xlu0 %5051 }
 0xadc   : > { %v8667_v18 = vpop.eup %8666  ;;  %v5060_v61 = vadd.f32 1e-06, %v5052_v63 }
 0xadd   : > { %v5064_v62 = vmul.f32 %v8667_v18, %v5059_v10  ;;  %vm5069_vm10 = vweird.f32 %v8667_v18 }
 0xade   : > { %8668 = vrcp.f32 %v5060_v61  ;;  %vm5070_vm12 = vmor %vm5068_vm11, %vm5069_vm10  ;;  %v5089_v54 = vand.u32 2147483648, %v5060_v61  ;;  %v5087_v27 = vand.u32 2147483647, %v5060_v61  ;;  %vm5083_vm15 = vweird.f32 %v5060_v61 }
 0xadf   : > { %v5065_v14 = vsub.f32 1.0, %v5064_v62 }
 0xae0   : > { %v5090_v33 = vor.u32 1.1754944e-38, %v5089_v54  ;;  %vm5088_vm3 = vcmp.eq.f32.partialorder %v5087_v27, 8.507059e+37 }
 0xae1   : > { %v5066_v12 = vmul.f32 %v8667_v18, %v5065_v14 }
 0xae3   : > { %v5067_v8 = vadd.f32 %v8667_v18, %v5066_v12  ;;  %v5055_v9 = vpop.xlane.xlu0 %5054 }
 0xae4   : > { %v8669_v42 = vpop.eup %8668  ;;  %v5061_v2 = vadd.f32 1e-06, %v5055_v9 }
 0xae5   : > { %v5071_v7 = vsel %vm5070_vm12, %v8667_v18, %v5067_v8  ;;  %v5079_v15 = vmul.f32 %v8669_v42, %v5060_v61  ;;  %vm5084_vm14 = vweird.f32 %v8669_v42  ;;  %v5044_v61 = vadd.f32 3.125e-08, %v11265_v28 }
 0xae6   : > { %v5076_v63 = vsel %vm5073_vm13, %v5075_v21, %v5071_v7  ;;  %8670 = vrcp.f32 %v5061_v2  ;;  %vm11345_vm2 = vmor %vm5083_vm15, %vm5084_vm14  ;;  %vm5098_vm5 = vweird.f32 %v5061_v2  ;;  %v12834_v7 = vand.u32 4294901760, %v11312_v26 }
 0xae7   : > { %v5080_v51 = vsub.f32 1.0, %v5079_v15  ;;  %v5077_v62 = vmul.f32 %v5076_v63, %v5043_v31  ;;  %v12833_v31 = vand.u32 4294901760, %v11287_v30 }
 0xae9   : > { %v5081_v14 = vmul.f32 %v8669_v42, %v5080_v51  ;;  %v5136_v12 = vsel %vm2110_vm1, %v5077_v62, 0  ;;  %v11341_v10 = vadd.f32 %v5077_v62, %v11085_v56 }
 0xaea   : > { %v11343_v41 = vand.u32 4294901760, %v5136_v12 }
 0xaeb   : > { %v5082_v9 = vadd.f32 %v8669_v42, %v5081_v14  ;;  %v5058_v35 = vpop.xlane.xlu0 %5057  ;;  %v5104_v14 = vand.u32 2147483648, %v5061_v2 }
 0xaec   : > { %v8671_v18 = vpop.eup %8670  ;;  %v11349_v15 = vadd.f32 1e-06, %v5058_v35  ;;  %5237 = vmatmul.f32.vlgmr.msra.gmra.mxu1 %v11343_v41  ;;  %v5168_v51 = vsub.f32 %v5136_v12, %v11343_v41  ;;  %v5102_v35 = vand.u32 2147483647, %v5061_v2 }
 0xaed   : > { %v5094_v56 = vmul.f32 %v8671_v18, %v5061_v2  ;;  %5625 = vmatpush.xpose.msra.mxu1 %v11278_v52  ;;  %v5086_v8 = vsel %vm11345_vm2, %v8669_v42, %v5082_v9  ;;  %vm5099_vm4 = vweird.f32 %v8671_v18 }
 0xaee   : > { %8672 = vrcp.f32 %v11349_v15  ;;  %5279 = vmatmul.f32.vlgmr.msra.gmra.mxu2 %v5168_v51  ;;  %v5169_v63 = vand.u32 4294901760, %v5168_v51  ;;  %v5091_v62 = vsel %vm5088_vm3, %v5090_v33, %v5086_v8  ;;  %vm5100_vm6 = vmor %vm5098_vm5, %vm5099_vm4  ;;  %vm5103_vm7 = vcmp.eq.f32.partialorder %v5102_v35, 8.507059e+37 }
 0xaef   : > { %v5095_v21 = vsub.f32 1.0, %v5094_v56  ;;  %5672 = vmatpush.xpose.msra.mxu2 %v12833_v31  ;;  %v5092_v54 = vmul.f32 %v5091_v62, %v5044_v61  ;;  %v5045_v61 = vadd.f32 3.125e-08, %v11273_v5  ;;  %v5430_v31 = vpop.permute.xlu2 %5429  ;;  %vm5113_vm9 = vweird.f32 %v11349_v15 }
 0xaf0   : > { %5321 = vmatmul.f32.vlgmr.msra.gmra.mxu3 %v5169_v63  ;;  %v5170_v42 = vsub.f32 %v5168_v51, %v5169_v63  ;;  %v5105_v51 = vor.u32 1.1754944e-38, %v5104_v14  ;;  %v5117_v14 = vand.u32 2147483647, %v11349_v15 }
 0xaf1   : > { %v5096_v12 = vmul.f32 %v8671_v18, %v5095_v21  ;;  %5627 = vmatpush.xpose.msra.mxu1 %v11305_v39  ;;  %5715 = vmatpush.xpose.msra.mxu3 %v11278_v52  ;;  %v5139_v27 = vsel %vm2110_vm1, %v5092_v54, 0  ;;  %v11364_v28 = vadd.f32 %v5092_v54, %v11108_v49  ;;  %v5119_v54 = vand.u32 2147483648, %v11349_v15 }
 0xaf2   : > { %v5171_v33 = vand.u32 4294901760, %v5170_v42  ;;  %v11368_v56 = vand.u32 4294901760, %v5139_v27  ;;  %vm5118_vm11 = vcmp.eq.f32.partialorder %v5117_v14, 8.507059e+37 }
 0xaf3   : > { %v5097_v9 = vadd.f32 %v8671_v18, %v5096_v12  ;;  %5676 = vmatpush.xpose.msra.mxu2 %v12834_v7  ;;  %v12835_v12 = vand.u32 4294901760, %v11303_v38 }
 0xaf4   : > { %v8673_v8 = vpop.eup %8672  ;;  %5172 = vmatmul.f32.vlgmr.msra.gmra.mxu0 %v5171_v33  ;;  %5241 = vmatmul.f32.gmra.mxu1 %v11368_v56  ;;  %v5176_v49 = vsub.f32 %v5139_v27, %v11368_v56  ;;  %v5120_v33 = vor.u32 1.1754944e-38, %v5119_v54 }
 0xaf5   : > { %v5109_v52 = vmul.f32 %v8673_v8, %v11349_v15  ;;  %v5101_v2 = vsel %vm5100_vm6, %v8671_v18, %v5097_v9  ;;  %5581 = vmatpush.xpose.msra.mxu0 %v11287_v30  ;;  %5629 = vmatpush.xpose.msra.mxu1 %v11299_v60  ;;  %vm5114_vm8 = vweird.f32 %v8673_v8 }
 0xaf6   : > { %v5106_v21 = vsel %vm5103_vm7, %v5105_v51, %v5101_v2  ;;  %5717 = vmatpush.xpose.msra.mxu3 %v11305_v39  ;;  %5284 = vmatmul.f32.gmra.mxu2 %v5176_v49  ;;  %v5177_v5 = vand.u32 4294901760, %v5176_v49  ;;  %v5445_v39 = vsel %vm1803_vm0, %v5430_v31, 0  ;;  %vm5115_vm10 = vmor %vm5113_vm9, %vm5114_vm8 }
 0xaf7   : > { %v5110_v63 = vsub.f32 1.0, %v5109_v52  ;;  %v5107_v62 = vmul.f32 %v5106_v21, %v5045_v61  ;;  %5680 = vmatpush.xpose.msra.mxu2 %v12835_v12  ;;  %v11398_v51 = vand.u32 4294901760, %v5445_v39  ;;  %v5434_v12 = vpop.permute.xlu2 %5433 }
 0xaf8   : > { %5327 = vmatmul.f32.gmra.mxu3 %v5177_v5  ;;  %v5178_v30 = vsub.f32 %v5176_v49, %v5177_v5  ;;  %v5432_v49 = vpop.permute.xlu1 %5431 }
 0xaf9   : > { %v5111_v18 = vmul.f32 %v8673_v8, %v5110_v63  ;;  %v5142_v35 = vsel %vm2110_vm1, %v5107_v62, 0  ;;  %v11384_v42 = vadd.f32 %v5107_v62, %v11128_v45  ;;  %5584 = vmatpush.xpose.msra.mxu0 %v11312_v26  ;;  %5631 = vmatpush.xpose.msra.mxu1 %v11322_v43  ;;  %v12836_v45 = vand.u32 4294901760, %v11329_v59 }
 0xafa   : > { %v11389_v27 = vand.u32 4294901760, %v5142_v35  ;;  %5719 = vmatpush.xpose.msra.mxu3 %v11299_v60  ;;  %v5179_v7 = vand.u32 4294901760, %v5178_v30  ;;  %v5046_v26 = vadd.f32 3.125e-08, %v11284_v19  ;;  %v5482_v31 = vsub.f32 %v5445_v39, %v11398_v51 }
 0xafb   : > { %v5112_v9 = vadd.f32 %v8673_v8, %v5111_v18  ;;  %5684 = vmatpush.xpose.msra.mxu2 %v12836_v45 }
 0xafc   : > { %v5184_v61 = vsub.f32 %v5142_v35, %v11389_v27  ;;  %5180 = vmatmul.f32.gmra.mxu0 %v5179_v7  ;;  %5245 = vmatmul.f32.gmra.mxu1 %v11389_v27  ;;  %v5483_v14 = vand.u32 4294901760, %v5482_v31 }
 0xafd   : > { %v5116_v15 = vsel %vm5115_vm10, %v8673_v8, %v5112_v9  ;;  %5587 = vmatpush.xpose.msra.mxu0 %v11303_v38  ;;  %v5447_v8 = vsel %vm1803_vm0, %v5432_v49, 0 }
 0xafe   : > { %v5185_v60 = vand.u32 4294901760, %v5184_v61  ;;  %v5121_v52 = vsel %vm5118_vm11, %v5120_v33, %v5116_v15  ;;  %5721 = vmatpush.xpose.msra.mxu3 %v11322_v43  ;;  %5289 = vmatmul.f32.gmra.mxu2 %v5184_v61  ;;  %v5489_v43 = vand.u32 4294901760, %v5447_v8  ;;  %v5484_v30 = vsub.f32 %v5482_v31, %v5483_v14 }
 0xaff   : > { %v5122_v2 = vmul.f32 %v5121_v52, %v5046_v26 }
 0xb00   : > { %v5186_v21 = vsub.f32 %v5184_v61, %v5185_v60  ;;  %5333 = vmatmul.f32.gmra.mxu3 %v5185_v60  ;;  %v5490_v35 = vsub.f32 %v5447_v8, %v5489_v43  ;;  %v5485_v9 = vand.u32 4294901760, %v5484_v30  ;;  %v5436_v33 = vpop.permute.xlu1 %5435 }
 0xb01   : > { %v5145_v19 = vsel %vm2110_vm1, %v5122_v2, 0  ;;  %v11406_v63 = vadd.f32 %v5122_v2, %v11150_v32  ;;  %5590 = vmatpush.xpose.msra.mxu0 %v11329_v59  ;;  %v5449_v32 = vsel %vm1803_vm0, %v5434_v12, 0  ;;  %v5451_v26 = vsel %vm1803_vm0, %v5436_v33, 0 }
 0xb02   : > { %v5187_v38 = vand.u32 4294901760, %v5186_v21  ;;  %v5191_v5 = vand.u32 4294901760, %v5145_v19  ;;  %v5497_v7 = vand.u32 4294901760, %v5449_v32  ;;  %v5491_v59 = vand.u32 4294901760, %v5490_v35 }
 0xb03   : > { %v5505_v60 = vand.u32 4294901760, %v5451_v26 }
 0xb04   : > { %v5192_v62 = vsub.f32 %v5145_v19, %v5191_v5  ;;  %5188 = vmatmul.f32.gmra.mxu0 %v5187_v38  ;;  %5249 = vmatmul.f32.gmra.mxu1 %v5191_v5  ;;  %v5498_v45 = vsub.f32 %v5449_v32, %v5497_v7  ;;  %v5492_v61 = vsub.f32 %v5490_v35, %v5491_v59 }
 0xb05   : > { %v5506_v49 = vsub.f32 %v5451_v26, %v5505_v60 }
 0xb06   : > { %v5193_v54 = vand.u32 4294901760, %v5192_v62  ;;  %5294 = vmatmul.f32.gmra.mxu2 %v5192_v62  ;;  %v5499_v15 = vand.u32 4294901760, %v5498_v45  ;;  %v5493_v52 = vand.u32 4294901760, %v5492_v61 }
 0xb07   : > { %v5507_v21 = vand.u32 4294901760, %v5506_v49 }
 0xb08   : > { %v5194_v18 = vsub.f32 %v5192_v62, %v5193_v54  ;;  %5339 = vmatmul.f32.gmra.mxu3 %v5193_v54  ;;  %v5500_v2 = vsub.f32 %v5498_v45, %v5499_v15 }
 0xb09   : > { %v5508_v8 = vsub.f32 %v5506_v49, %v5507_v21 }
 0xb0a   : > { %v5195_v39 = vand.u32 4294901760, %v5194_v18  ;;  %v5501_v19 = vand.u32 4294901760, %v5500_v2 }
 0xb0c   : > { %5196 = vmatmul.f32.gmra.mxu0 %v5195_v39  ;;  %5409 = vmatmul.f32.vlgmr.msrb.gmra.mxu1 %v11343_v41 }
 0xb0e   : > { %5486 = vmatmul.f32.vlgmr.msrb.gmra.mxu2 %v5485_v9 }
 0xb10   : > { %5551 = vmatmul.f32.vlgmr.msrb.gmra.mxu3 %v11398_v51 }
 0xb14   : > { %5372 = vmatmul.f32.vlgmr.msrb.gmra.mxu0 %v11343_v41  ;;  %5413 = vmatmul.f32.gmra.mxu1 %v11368_v56  ;;  %v5509_v41 = vand.u32 4294901760, %v5508_v8 }
 0xb16   : > { %5494 = vmatmul.f32.gmra.mxu2 %v5493_v52 }
 0xb18   : > { %5555 = vmatmul.f32.gmra.mxu3 %v5489_v43 }
 0xb1c   : > { %5376 = vmatmul.f32.gmra.mxu0 %v11368_v56  ;;  %5417 = vmatmul.f32.gmra.mxu1 %v11389_v27 }
 0xb1e   : > { %5502 = vmatmul.f32.gmra.mxu2 %v5501_v19 }
 0xb20   : > { %5559 = vmatmul.f32.gmra.mxu3 %v5497_v7 }
 0xb24   : > { %5380 = vmatmul.f32.gmra.mxu0 %v11389_v27  ;;  %5421 = vmatmul.f32.gmra.mxu1 %v5191_v5 }
 0xb26   : > { %5510 = vmatmul.f32.gmra.mxu2 %v5509_v41 }
 0xb28   : > { %5563 = vmatmul.f32.gmra.mxu3 %v5505_v60 }
 0xb2c   : > { %5384 = vmatmul.f32.gmra.mxu0 %v5191_v5  ;;  %5635 = vmatmul.f32.vlgmr.msra.gmra.mxu1 %v5483_v14 }
 0xb2e   : > { %5686 = vmatmul.f32.vlgmr.msra.gmra.mxu2 %v11398_v51 }
 0xb30   : > { %5723 = vmatmul.f32.vlgmr.msra.gmra.mxu3 %v11398_v51 }
 0xb34   : > { %5593 = vmatmul.f32.vlgmr.msra.gmra.mxu0 %v5482_v31  ;;  %5641 = vmatmul.f32.gmra.mxu1 %v5491_v59 }
 0xb36   : > { %5690 = vmatmul.f32.gmra.mxu2 %v5489_v43 }
 0xb38   : > { %5727 = vmatmul.f32.gmra.mxu3 %v5489_v43 }
 0xb3c   : > { %5598 = vmatmul.f32.gmra.mxu0 %v5490_v35  ;;  %5647 = vmatmul.f32.gmra.mxu1 %v5499_v15 }
 0xb3e   : > { %5694 = vmatmul.f32.gmra.mxu2 %v5497_v7 }
 0xb40   : > { %5731 = vmatmul.f32.gmra.mxu3 %v5497_v7 }
 0xb44   : > { %5603 = vmatmul.f32.gmra.mxu0 %v5498_v45  ;;  %5653 = vmatmul.f32.gmra.mxu1 %v5507_v21 }
 0xb46   : > { %5698 = vmatmul.f32.gmra.mxu2 %v5505_v60 }
 0xb48   : > { %5735 = vmatmul.f32.gmra.mxu3 %v5505_v60 }
 0xb4c   : > { %5608 = vmatmul.f32.gmra.mxu0 %v5506_v49 }
 0xb69   : > { %v11421_v56 = vpop.f32.mrf.mxu1 }
 0xb71   : > { %v11423_v27 = vpop.f32.mrf.mxu2  ;;  %v11425_v38 = vpop.f32.mrf.mxu0 }
 0xb72   : > { %v11427_v51 = vpop.f32.mrf.mxu1 }
 0xb73   : > { %12837 = vst [vmem:[#allocation107_spill] sm:$0xff] %v11427_v51  ;;  %v11429_v31 = vpop.f32.mrf.mxu3 }
 0xb79   : > { %v11431_v5 = vpop.f32.mrf.mxu0  ;;  %v11435_v14 = vpop.f32.mrf.mxu2 }
 0xb7a   : > { %12838 = vst [vmem:[#allocation108_spill] sm:$0xff] %v11431_v5  ;;  %v11433_v62 = vpop.f32.mrf.mxu1 }
 0xb7b   : > { %12839 = vst [vmem:[#allocation109_spill] sm:$0xff] %v11433_v62  ;;  %v11437_v43 = vpop.f32.mrf.mxu3 }
 0xb7c   : > { %12840 = vst [vmem:[#allocation110_spill] sm:$0xff] %v11435_v14 }
 0xb7d   : > { %12841 = vst [vmem:[#allocation111_spill] sm:$0xff] %v11437_v43 }
 0xb81   : > { %v11439_v54 = vpop.f32.mrf.mxu0  ;;  %v11443_v18 = vpop.f32.mrf.mxu2 }
 0xb82   : > { %12842 = vst [vmem:[#allocation112_spill] sm:$0xff] %v11439_v54  ;;  %v11441_v12 = vpop.f32.mrf.mxu1 }
 0xb83   : > { %12843 = vst [vmem:[#allocation113_spill] sm:$0xff] %v11441_v12  ;;  %v11445_v30 = vpop.f32.mrf.mxu3 }
 0xb84   : > { %12844 = vst [vmem:[#allocation114_spill] sm:$0xff] %v11443_v18 }
 0xb85   : > { %12845 = vst [vmem:[#allocation115_spill] sm:$0xff] %v11445_v30 }
 0xb89   : > { %v11447_v35 = vpop.f32.mrf.mxu0  ;;  %v11451_v39 = vpop.f32.mrf.mxu2 }
 0xb8a   : > { %12846 = vst [vmem:[#allocation116_spill] sm:$0xff] %v11447_v35  ;;  %v11449_v32 = vpop.f32.mrf.mxu1 }
 0xb8b   : > { %12847 = vst [vmem:[#allocation117_spill] sm:$0xff] %v11449_v32  ;;  %v11453_v9 = vpop.f32.mrf.mxu3 }
 0xb8c   : > { %12848 = vst [vmem:[#allocation118_spill] sm:$0xff] %v11451_v39 }
 0xb8d   : > { %12849 = vst [vmem:[#allocation119_spill] sm:$0xff] %v11453_v9 }
 0xb91   : > { %v11455_v7 = vpop.f32.mrf.mxu0  ;;  %v5487_v33 = vpop.f32.mrf.mxu2 }
 0xb92   : > { %12850 = vst [vmem:[#allocation120_spill] sm:$0xff] %v11455_v7  ;;  %v11457_v59 = vpop.f32.mrf.mxu1 }
 0xb93   : > { %12851 = vst [vmem:[#allocation121_spill] sm:$0xff] %v11457_v59  ;;  %v5552_v45 = vpop.f32.mrf.mxu3 }
 0xb94   : > { %v5553_v39 = vadd.f32 %v5552_v45, %v5487_v33 }
 0xb99   : > { %v11459_v61 = vpop.f32.mrf.mxu0  ;;  %v5495_v15 = vpop.f32.mrf.mxu2 }
 0xb9a   : > { %12852 = vst [vmem:[#allocation122_spill] sm:$0xff] %v11459_v61  ;;  %v11461_v26 = vpop.f32.mrf.mxu1 }
 0xb9b   : > { %12853 = vst [vmem:[#allocation123_spill] sm:$0xff] %v11461_v26  ;;  %v5556_v60 = vpop.f32.mrf.mxu3 }
 0xb9c   : > { %v5557_v5 = vadd.f32 %v5556_v60, %v5495_v15 }
 0xba1   : > { %v11463_v52 = vpop.f32.mrf.mxu0  ;;  %v5503_v49 = vpop.f32.mrf.mxu2 }
 0xba2   : > { %12854 = vst [vmem:[#allocation124_spill] sm:$0xff] %v11463_v52  ;;  %v11465_v2 = vpop.f32.mrf.mxu1 }
 0xba3   : > { %12855 = vst [vmem:[#allocation125_spill] sm:$0xff] %v11465_v2  ;;  %v5560_v21 = vpop.f32.mrf.mxu3 }
 0xba4   : > { %v5561_v33 = vadd.f32 %v5560_v21, %v5503_v49 }
 0xba9   : > { %v11467_v19 = vpop.f32.mrf.mxu0  ;;  %v5511_v8 = vpop.f32.mrf.mxu2 }
 0xbaa   : > { %12856 = vst [vmem:[#allocation126_spill] sm:$0xff] %v11467_v19  ;;  %v5636_v9 = vpop.f32.mrf.mxu1 }
 0xbab   : > { %v5564_v41 = vpop.f32.mrf.mxu3 }
 0xbb1   : > { %v5594_v12 = vpop.f32.mrf.mxu0  ;;  %v5687_v59 = vpop.f32.mrf.mxu2 }
 0xbb2   : > { %v5595_v35 = vadd.f32 %v5594_v12, %v5553_v39  ;;  %v5642_v51 = vpop.f32.mrf.mxu1 }
 0xbb3   : > { %v5724_v61 = vpop.f32.mrf.mxu3 }
 0xbb4   : > { %v5637_v43 = vadd.f32 %v5636_v9, %v5595_v35 }
 0xbb6   : > { %v5688_v14 = vadd.f32 %v5687_v59, %v5637_v43 }
 0xbb8   : > { %v5725_v26 = vadd.f32 %v5724_v61, %v5688_v14  ;;  %v5565_v61 = vadd.f32 %v5564_v41, %v5511_v8 }
 0xbb9   : > { %v5599_v52 = vpop.f32.mrf.mxu0  ;;  %v5691_v2 = vpop.f32.mrf.mxu2 }
 0xbba   : > { %v5739_v30 = vmul.f32 0.25, %v5725_v26  ;;  %v5600_v18 = vadd.f32 %v5599_v52, %v5557_v5  ;;  %v5648_v12 = vpop.f32.mrf.mxu1 }
 0xbbb   : > { %v5728_v62 = vpop.f32.mrf.mxu3 }
 0xbbc   : > { %v5643_v54 = vadd.f32 %v5642_v51, %v5600_v18  ;;  %v5743_v19 = vsel %vm2110_vm1, %v5739_v30, -inf }
 0xbbd   : > { %5744 = vmax.xlane.f32.xlu2 %v5743_v19 }
 0xbbe   : > { %v5692_v32 = vadd.f32 %v5691_v2, %v5643_v54 }
 0xbc0   : > { %v5729_v45 = vadd.f32 %v5728_v62, %v5692_v32 }
 0xbc1   : > { %v5604_v39 = vpop.f32.mrf.mxu0  ;;  %v5695_v43 = vpop.f32.mrf.mxu2 }
 0xbc2   : > { %v5740_v7 = vmul.f32 0.25, %v5729_v45  ;;  %v5605_v35 = vadd.f32 %v5604_v39, %v5561_v33  ;;  %v5654_v60 = vpop.f32.mrf.mxu1 }
 0xbc3   : > { %v5732_v59 = vpop.f32.mrf.mxu3 }
 0xbc4   : > { %v5649_v9 = vadd.f32 %v5648_v12, %v5605_v35  ;;  %v5746_v14 = vsel %vm2110_vm1, %v5740_v7, -inf }
 0xbc5   : > { %5747 = vmax.xlane.f32.xlu1 %v5746_v14 }
 0xbc6   : > { %v5696_v5 = vadd.f32 %v5695_v43, %v5649_v9 }
 0xbc8   : > { %v5733_v26 = vadd.f32 %v5732_v59, %v5696_v5 }
 0xbc9   : > { %v5609_v51 = vpop.f32.mrf.mxu0  ;;  %v5699_v32 = vpop.f32.mrf.mxu2 }
 0xbca   : > { %v5741_v18 = vmul.f32 0.25, %v5733_v26  ;;  %v5610_v15 = vadd.f32 %v5609_v51, %v5565_v61 }
 0xbcb   : > { %v5736_v49 = vpop.f32.mrf.mxu3 }
 0xbcc   : > { %v5655_v54 = vadd.f32 %v5654_v60, %v5610_v15  ;;  %v5749_v62 = vsel %vm2110_vm1, %v5741_v18, -inf }
 0xbcd   : > { %5750 = vmax.xlane.f32.xlu0 %v5749_v62 }
 0xbce   : > { %v5700_v52 = vadd.f32 %v5699_v32, %v5655_v54 }
 0xbd0   : > { %v5737_v2 = vadd.f32 %v5736_v49, %v5700_v52 }
 0xbd2   : > { %v5742_v21 = vmul.f32 0.25, %v5737_v2 }
 0xbd4   : > { %v5752_v19 = vsel %vm2110_vm1, %v5742_v21, -inf }
 0xbd5   : > { %5753 = vmax.xlane.f32.xlu0 %v5752_v19  ;;  %5857 = vrot.lane.b32.xlu2 %v10238_v34, %s9007_s29 }
 0xbdd   : > { %5851 = vrot.lane.b32.xlu2 %v10230_v1, %s9007_s29 }
 0xbde   : > { %5853 = vrot.lane.b32.xlu1 %v10226_v58, %s9007_s29 }
 0xbe5   : > { %6169 = vrot.lane.b32.xlu2 %v10130_v0, %s9008_s25 }
 0xbe6   : > { %6171 = vrot.lane.b32.xlu1 %v10151_v57, %s9008_s25 }
 0xbe9   : > { %5855 = vrot.lane.b32.xlu0 %v10228_v47, %s9007_s29 }
 0xbed   : > { %6165 = vrot.lane.b32.xlu2 %v10149_v37, %s9008_s25 }
 0xbee   : > { %6167 = vrot.lane.b32.xlu1 %v10138_v44, %s9008_s25 }
 0xbf5   : > { %6159 = vrot.lane.b32.xlu2 %v10158_v53, %s9008_s25 }
 0xbf6   : > { %6157 = vrot.lane.b32.xlu1 %v10136_v40, %s9008_s25 }
 0xbfd   : > { %6163 = vrot.lane.b32.xlu2 %v10204_v13, %s9008_s25 }
 0xbfe   : > { %6161 = vrot.lane.b32.xlu1 %v10187_v25, %s9008_s25 }
 0xc30   : > { %v5745_v8 = vpop.xlane.xlu2 %5744 }
 0xc31   : > { %v5755_v41 = vsub.f32 %v5739_v30, %v5745_v8 }
 0xc33   : > { %v5759_v33 = vmul.f32 1.442695, %v5755_v41 }
 0xc35   : > { %8674 = vpow2.f32 %v5759_v33 }
 0xc38   : > { %v5748_v45 = vpop.xlane.xlu1 %5747  ;;  %v5858_v12 = vpop.permute.xlu2 %5857 }
 0xc39   : > { %v5756_v39 = vsub.f32 %v5740_v7, %v5748_v45  ;;  %v11497_v35 = vand.u32 4294901760, %v5858_v12 }
 0xc3b   : > { %v8675_v43 = vpop.eup %8674  ;;  %v5761_v9 = vmul.f32 1.442695, %v5756_v39  ;;  %v11500_v14 = vsub.f32 %v5858_v12, %v11497_v35  ;;  %5888 = vmatpush.msrb.mxu0 %v11497_v35  ;;  %6039 = vmatpush.msrb.mxu3 %v11497_v35 }
 0xc3c   : > { %v11505_v59 = vmul.f32 %v11249_v55, %v8675_v43 }
 0xc3d   : > { %8676 = vpow2.f32 %v5761_v9  ;;  %v5942_v30 = vand.u32 4294901760, %v11500_v14  ;;  %5995 = vmatpush.msrb.mxu2 %v11500_v14 }
 0xc3e   : > { %v5775_v7 = vsel %vm2110_vm1, %v11505_v59, 0.0 }
 0xc3f   : > { %v5943_v5 = vsub.f32 %v11500_v14, %v5942_v30  ;;  %5776 = vadd.xlane.f32.xlu0 %v5775_v7 }
 0xc40   : > { %v5751_v61 = vpop.xlane.xlu0 %5750  ;;  %v5852_v55 = vpop.permute.xlu2 %5851 }
 0xc41   : > { %v5944_v26 = vand.u32 4294901760, %v5943_v5  ;;  %v5757_v51 = vsub.f32 %v5741_v18, %v5751_v61  ;;  %v11534_v43 = vand.u32 4294901760, %v5852_v55 }
 0xc43   : > { %v8677_v15 = vpop.eup %8676  ;;  %v5763_v60 = vmul.f32 1.442695, %v5757_v51  ;;  %5945 = vmatpush.msrb.mxu1 %v5944_v26 }
 0xc44   : > { %v11515_v54 = vmul.f32 %v11262_v36, %v8677_v15  ;;  %v5959_v15 = vsub.f32 %v5852_v55, %v11534_v43 }
 0xc45   : > { %8678 = vpow2.f32 %v5763_v60 }
 0xc46   : > { %v5778_v62 = vsel %vm2110_vm1, %v11515_v54, 0.0 }
 0xc47   : > { %5779 = vadd.xlane.f32.xlu0 %v5778_v62 }
 0xc48   : > { %v5754_v32 = vpop.xlane.xlu0 %5753  ;;  %v6170_v18 = vpop.permute.xlu2 %6169 }
 0xc49   : > { %v5758_v52 = vsub.f32 %v5742_v21, %v5754_v32  ;;  %v6185_v41 = vsel %vm1803_vm0, %v6170_v18, 0 }
 0xc4a   : > { %v11528_v12 = vand.u32 4294901760, %v6185_v41 }
 0xc4b   : > { %v8679_v49 = vpop.eup %8678  ;;  %v5765_v2 = vmul.f32 1.442695, %v5758_v52 }
 0xc4c   : > { %v11520_v19 = vmul.f32 %v11270_v4, %v8679_v49  ;;  %v11537_v7 = vsub.f32 %v6185_v41, %v11528_v12  ;;  %v5960_v41 = vand.u32 4294901760, %v5959_v15 }
 0xc4d   : > { %8680 = vpow2.f32 %v5765_v2 }
 0xc4e   : > { %v5781_v8 = vsel %vm2110_vm1, %v11520_v19, 0.0  ;;  %v12641_v32 = vand.u32 4294901760, %v11537_v7 }
 0xc4f   : > { %5782 = vadd.xlane.f32.xlu0 %v5781_v8 }
 0xc50   : > { %v5854_v36 = vpop.permute.xlu1 %5853  ;;  %v6166_v39 = vpop.permute.xlu2 %6165 }
 0xc51   : > { %v11530_v21 = vand.u32 4294901760, %v5854_v36  ;;  %v6181_v61 = vsel %vm1803_vm0, %v6166_v39, 0  ;;  %v6263_v39 = vsub.f32 %v11537_v7, %v12641_v32  ;;  %v5961_v32 = vsub.f32 %v5959_v15, %v5960_v41 }
 0xc52   : > { %v11549_v52 = vand.u32 4294901760, %v6181_v61 }
 0xc53   : > { %v8681_v33 = vpop.eup %8680  ;;  %v6264_v20 = vand.u32 4294901760, %v6263_v39  ;;  %v5962_v14 = vand.u32 4294901760, %v5961_v32 }
 0xc54   : > { %v11526_v45 = vmul.f32 %v11281_v29, %v8681_v33  ;;  %v5953_v29 = vsub.f32 %v5854_v36, %v11530_v21  ;;  %v11557_v33 = vsub.f32 %v6181_v61, %v11549_v52 }
 0xc56   : > { %v5784_v4 = vsel %vm2110_vm1, %v11526_v45, 0.0  ;;  %v5954_v18 = vand.u32 4294901760, %v5953_v29 }
 0xc57   : > { %5785 = vadd.xlane.f32.xlu0 %v5784_v4 }
 0xc58   : > { %v6172_v9 = vpop.permute.xlu1 %6171 }
 0xc59   : > { %v6187_v5 = vsel %vm1803_vm0, %v6172_v9, 0 }
 0xc5a   : > { %v11542_v26 = vand.u32 4294901760, %v6187_v5 }
 0xc5b   : > { %v5856_v51 = vpop.permute.xlu0 %5855 }
 0xc5c   : > { %v11546_v60 = vsub.f32 %v6187_v5, %v11542_v26  ;;  %v5889_v62 = vand.u32 4294901760, %v5856_v51 }
 0xc5e   : > { %v12640_v49 = vand.u32 4294901760, %v11546_v60  ;;  %v5947_v2 = vsub.f32 %v5856_v51, %v5889_v62  ;;  %5890 = vmatpush.msrb.mxu0 %v5889_v62  ;;  %6041 = vmatpush.msrb.mxu3 %v5889_v62 }
 0xc60   : > { %v6257_v8 = vsub.f32 %v11546_v60, %v12640_v49  ;;  %v6168_v36 = vpop.permute.xlu1 %6167  ;;  %5892 = vmatpush.msrb.mxu0 %v11530_v21  ;;  %5998 = vmatpush.msrb.mxu2 %v5947_v2  ;;  %v5948_v55 = vand.u32 4294901760, %v5947_v2  ;;  %v5955_v49 = vsub.f32 %v5953_v29, %v5954_v18 }
 0xc61   : > { %v6183_v4 = vsel %vm1803_vm0, %v6168_v36, 0  ;;  %6043 = vmatpush.msrb.mxu3 %v11530_v21 }
 0xc62   : > { %v6258_v9 = vand.u32 4294901760, %v6257_v8  ;;  %v11564_v5 = vand.u32 4294901760, %v6183_v4  ;;  %5894 = vmatpush.msrb.mxu0 %v11534_v43  ;;  %6001 = vmatpush.msrb.mxu2 %v5953_v29  ;;  %v5949_v51 = vsub.f32 %v5947_v2, %v5948_v55  ;;  %v12642_v8 = vand.u32 4294901760, %v11557_v33 }
 0xc63   : > { %6045 = vmatpush.msrb.mxu3 %v11534_v43  ;;  %v5956_v29 = vand.u32 4294901760, %v5955_v49 }
 0xc64   : > { %6086 = vmatpush.msra.mxu0 %v5942_v30  ;;  %v11571_v61 = vsub.f32 %v6183_v4, %v11564_v5  ;;  %6004 = vmatpush.msrb.mxu2 %v5959_v15  ;;  %v5950_v36 = vand.u32 4294901760, %v5949_v51 }
 0xc65   : > { %6259 = vmatpush.xpose.msra.mxu3 %v6258_v9 }
 0xc66   : > { %6090 = vmatpush.msra.mxu0 %v5948_v55  ;;  %6202 = vmatpush.xpose.msra.mxu2 %v11542_v26  ;;  %v6268_v2 = vand.u32 4294901760, %v11571_v61  ;;  %v6275_v55 = vsub.f32 %v11557_v33, %v12642_v8 }
 0xc67   : > { %5951 = vmatpush.msrb.mxu1 %v5950_v36 }
 0xc68   : > { %6094 = vmatpush.msra.mxu0 %v5954_v18  ;;  %v6269_v30 = vsub.f32 %v11571_v61, %v6268_v2 }
 0xc69   : > { %5957 = vmatpush.msrb.mxu1 %v5956_v29  ;;  %6265 = vmatpush.xpose.msra.mxu3 %v6264_v20  ;;  %v6276_v20 = vand.u32 4294901760, %v6275_v55 }
 0xc6a   : > { %6098 = vmatpush.msra.mxu0 %v5960_v41  ;;  %6204 = vmatpush.xpose.msra.mxu2 %v11528_v12  ;;  %v6270_v15 = vand.u32 4294901760, %v6269_v30  ;;  %v5771_v30 = vadd.f32 3.125e-08, %v11505_v59 }
 0xc6b   : > { %5963 = vmatpush.msrb.mxu1 %v5962_v14 }
 0xc6d   : > { %6129 = vmatpush.msra.mxu1 %v11497_v35  ;;  %6271 = vmatpush.xpose.msra.mxu3 %v6270_v15 }
 0xc6e   : > { %6206 = vmatpush.xpose.msra.mxu2 %v11564_v5 }
 0xc6f   : > { %6131 = vmatpush.msra.mxu1 %v5889_v62 }
 0xc71   : > { %6133 = vmatpush.msra.mxu1 %v11530_v21  ;;  %6277 = vmatpush.xpose.msra.mxu3 %v6276_v20 }
 0xc72   : > { %6208 = vmatpush.xpose.msra.mxu2 %v11549_v52 }
 0xc73   : > { %6135 = vmatpush.msra.mxu1 %v11534_v43 }
 0xcb2   : > { %v5777_v32 = vpop.xlane.xlu0 %5776 }
 0xcb3   : > { %v5787_v49 = vadd.f32 1e-06, %v5777_v32 }
 0xcb5   : > { %8682 = vrcp.f32 %v5787_v49  ;;  %v5802_v62 = vand.u32 2147483648, %v5787_v49  ;;  %v5800_v51 = vand.u32 2147483647, %v5787_v49  ;;  %vm5796_vm13 = vweird.f32 %v5787_v49 }
 0xcb7   : > { %v5803_v43 = vor.u32 1.1754944e-38, %v5802_v62  ;;  %vm5801_vm15 = vcmp.eq.f32.partialorder %v5800_v51, 8.507059e+37  ;;  %v12860_v51 = vand.u32 4294901760, %v11537_v7 }
 0xcba   : > { %v5780_v18 = vpop.xlane.xlu0 %5779 }
 0xcbb   : > { %v8683_v41 = vpop.eup %8682  ;;  %v5788_v4 = vadd.f32 1e-06, %v5780_v18 }
 0xcbc   : > { %v5792_v39 = vmul.f32 %v8683_v41, %v5787_v49  ;;  %vm5797_vm12 = vweird.f32 %v8683_v41 }
 0xcbd   : > { %8684 = vrcp.f32 %v5788_v4  ;;  %vm5798_vm14 = vmor %vm5796_vm13, %vm5797_vm12  ;;  %v5815_v8 = vand.u32 2147483647, %v5788_v4  ;;  %vm5811_vm3 = vweird.f32 %v5788_v4 }
 0xcbe   : > { %v5793_v35 = vsub.f32 1.0, %v5792_v39  ;;  %v5817_v39 = vand.u32 2147483648, %v5788_v4 }
 0xcbf   : > { %vm5816_vm5 = vcmp.eq.f32.partialorder %v5815_v8, 8.507059e+37 }
 0xcc0   : > { %v5794_v9 = vmul.f32 %v8683_v41, %v5793_v35 }
 0xcc2   : > { %v5795_v36 = vadd.f32 %v8683_v41, %v5794_v9  ;;  %v5783_v21 = vpop.xlane.xlu0 %5782 }
 0xcc3   : > { %v8685_v29 = vpop.eup %8684  ;;  %v5789_v14 = vadd.f32 1e-06, %v5783_v21 }
 0xcc4   : > { %v5799_v15 = vsel %vm5798_vm14, %v8683_v41, %v5795_v36  ;;  %v5807_v55 = vmul.f32 %v8685_v29, %v5788_v4  ;;  %vm5812_vm2 = vweird.f32 %v8685_v29  ;;  %v5772_v4 = vadd.f32 3.125e-08, %v11515_v54 }
 0xcc5   : > { %v5804_v20 = vsel %vm5801_vm15, %v5803_v43, %v5799_v15  ;;  %8686 = vrcp.f32 %v5789_v14  ;;  %vm11595_vm4 = vmor %vm5811_vm3, %vm5812_vm2  ;;  %vm5826_vm7 = vweird.f32 %v5789_v14 }
 0xcc6   : > { %v5808_v32 = vsub.f32 1.0, %v5807_v55  ;;  %v5805_v18 = vmul.f32 %v5804_v20, %v5771_v30  ;;  %v5818_v30 = vor.u32 1.1754944e-38, %v5817_v39  ;;  %v12859_v20 = vand.u32 4294901760, %v11546_v60 }
 0xcc8   : > { %v5809_v35 = vmul.f32 %v8685_v29, %v5808_v32  ;;  %v5864_v9 = vsel %vm2110_vm1, %v5805_v18, 0  ;;  %v11591_v49 = vadd.f32 %v5805_v18, %v11341_v10 }
 0xcc9   : > { %v11593_v62 = vand.u32 4294901760, %v5864_v9 }
 0xcca   : > { %v5810_v21 = vadd.f32 %v8685_v29, %v5809_v35  ;;  %v5786_v59 = vpop.xlane.xlu0 %5785  ;;  %v5832_v35 = vand.u32 2147483648, %v5789_v14 }
 0xccb   : > { %v8687_v41 = vpop.eup %8686  ;;  %v11599_v36 = vadd.f32 1e-06, %v5786_v59  ;;  %5965 = vmatmul.f32.vlgmr.msrb.gmra.mxu1 %v11593_v62  ;;  %v5896_v43 = vsub.f32 %v5864_v9, %v11593_v62  ;;  %v5830_v59 = vand.u32 2147483647, %v5789_v14 }
 0xccc   : > { %v5822_v10 = vmul.f32 %v8687_v41, %v5789_v14  ;;  %6353 = vmatpush.xpose.msrb.mxu1 %v11542_v26  ;;  %v5814_v15 = vsel %vm11595_vm4, %v8685_v29, %v5810_v21  ;;  %vm5827_vm6 = vweird.f32 %v8687_v41 }
 0xccd   : > { %8688 = vrcp.f32 %v11599_v36  ;;  %6007 = vmatmul.f32.vlgmr.msrb.gmra.mxu2 %v5896_v43  ;;  %v5897_v32 = vand.u32 4294901760, %v5896_v43  ;;  %v5819_v18 = vsel %vm5816_vm5, %v5818_v30, %v5814_v15  ;;  %vm5828_vm8 = vmor %vm5826_vm7, %vm5827_vm6  ;;  %vm5831_vm9 = vcmp.eq.f32.partialorder %v5830_v59, 8.507059e+37 }
 0xcce   : > { %v5823_v55 = vsub.f32 1.0, %v5822_v10  ;;  %6400 = vmatpush.xpose.msrb.mxu2 %v12859_v20  ;;  %v5820_v39 = vmul.f32 %v5819_v18, %v5772_v4  ;;  %v5773_v4 = vadd.f32 3.125e-08, %v11520_v19  ;;  %v6158_v20 = vpop.permute.xlu1 %6157  ;;  %vm5841_vm11 = vweird.f32 %v11599_v36 }
 0xccf   : > { %6049 = vmatmul.f32.vlgmr.msrb.gmra.mxu3 %v5897_v32  ;;  %v5898_v29 = vsub.f32 %v5896_v43, %v5897_v32  ;;  %v5833_v43 = vor.u32 1.1754944e-38, %v5832_v35  ;;  %v5845_v35 = vand.u32 2147483647, %v11599_v36 }
 0xcd0   : > { %v5824_v9 = vmul.f32 %v8687_v41, %v5823_v55  ;;  %6355 = vmatpush.xpose.msrb.mxu1 %v11528_v12  ;;  %6443 = vmatpush.xpose.msrb.mxu3 %v11542_v26  ;;  %v5867_v54 = vsel %vm2110_vm1, %v5820_v39, 0  ;;  %v11614_v8 = vadd.f32 %v5820_v39, %v11364_v28  ;;  %v5847_v39 = vand.u32 2147483648, %v11599_v36 }
 0xcd1   : > { %v5899_v30 = vand.u32 4294901760, %v5898_v29  ;;  %v11618_v10 = vand.u32 4294901760, %v5867_v54  ;;  %vm5846_vm13 = vcmp.eq.f32.partialorder %v5845_v35, 8.507059e+37 }
 0xcd2   : > { %v5825_v21 = vadd.f32 %v8687_v41, %v5824_v9  ;;  %6404 = vmatpush.xpose.msrb.mxu2 %v12860_v51 }
 0xcd3   : > { %v8689_v15 = vpop.eup %8688  ;;  %5900 = vmatmul.f32.vlgmr.msrb.gmra.mxu0 %v5899_v30  ;;  %5969 = vmatmul.f32.gmra.mxu1 %v11618_v10  ;;  %v5904_v28 = vsub.f32 %v5867_v54, %v11618_v10 }
 0xcd4   : > { %v5837_v26 = vmul.f32 %v8689_v15, %v11599_v36  ;;  %v5829_v14 = vsel %vm5828_vm8, %v8687_v41, %v5825_v21  ;;  %6309 = vmatpush.xpose.msrb.mxu0 %v11546_v60  ;;  %6357 = vmatpush.xpose.msrb.mxu1 %v11564_v5  ;;  %vm5842_vm10 = vweird.f32 %v8689_v15  ;;  %v5848_v21 = vor.u32 1.1754944e-38, %v5847_v39 }
 0xcd5   : > { %v5834_v55 = vsel %vm5831_vm9, %v5833_v43, %v5829_v14  ;;  %6445 = vmatpush.xpose.msrb.mxu3 %v11528_v12  ;;  %6012 = vmatmul.f32.gmra.mxu2 %v5904_v28  ;;  %v5905_v19 = vand.u32 4294901760, %v5904_v28  ;;  %v6173_v12 = vsel %vm1803_vm0, %v6158_v20, 0  ;;  %vm5843_vm12 = vmor %vm5841_vm11, %vm5842_vm10  ;;  %v6160_v43 = vpop.permute.xlu2 %6159 }
 0xcd6   : > { %v5838_v32 = vsub.f32 1.0, %v5837_v26  ;;  %v5835_v18 = vmul.f32 %v5834_v55, %v5773_v4  ;;  %6408 = vmatpush.xpose.msrb.mxu2 %v6268_v2  ;;  %v11648_v30 = vand.u32 4294901760, %v6173_v12  ;;  %v6162_v35 = vpop.permute.xlu1 %6161 }
 0xcd7   : > { %6055 = vmatmul.f32.gmra.mxu3 %v5905_v19  ;;  %v5906_v60 = vsub.f32 %v5904_v28, %v5905_v19 }
 0xcd8   : > { %v5839_v41 = vmul.f32 %v8689_v15, %v5838_v32  ;;  %v5870_v9 = vsel %vm2110_vm1, %v5835_v18, 0  ;;  %v11634_v59 = vadd.f32 %v5835_v18, %v11384_v42  ;;  %6312 = vmatpush.xpose.msrb.mxu0 %v11537_v7  ;;  %6359 = vmatpush.xpose.msrb.mxu1 %v11549_v52  ;;  %v12861_v42 = vand.u32 4294901760, %v11557_v33 }
 0xcd9   : > { %v11639_v29 = vand.u32 4294901760, %v5870_v9  ;;  %6447 = vmatpush.xpose.msrb.mxu3 %v11564_v5  ;;  %v5907_v2 = vand.u32 4294901760, %v5906_v60  ;;  %v5774_v7 = vadd.f32 3.125e-08, %v11526_v45  ;;  %v6210_v14 = vsub.f32 %v6173_v12, %v11648_v30 }
 0xcda   : > { %v5840_v54 = vadd.f32 %v8689_v15, %v5839_v41  ;;  %6412 = vmatpush.xpose.msrb.mxu2 %v12861_v42 }
 0xcdb   : > { %v5912_v51 = vsub.f32 %v5870_v9, %v11639_v29  ;;  %5908 = vmatmul.f32.gmra.mxu0 %v5907_v2  ;;  %5973 = vmatmul.f32.gmra.mxu1 %v11639_v29 }
 0xcdc   : > { %v5844_v36 = vsel %vm5843_vm12, %v8689_v15, %v5840_v54  ;;  %6315 = vmatpush.xpose.msrb.mxu0 %v11571_v61  ;;  %v6175_v15 = vsel %vm1803_vm0, %v6160_v43, 0 }
 0xcdd   : > { %v5913_v5 = vand.u32 4294901760, %v5912_v51  ;;  %v5849_v4 = vsel %vm5846_vm13, %v5848_v21, %v5844_v36  ;;  %6449 = vmatpush.xpose.msrb.mxu3 %v11549_v52  ;;  %6017 = vmatmul.f32.gmra.mxu2 %v5912_v51  ;;  %v6217_v19 = vand.u32 4294901760, %v6175_v15  ;;  %v6211_v52 = vand.u32 4294901760, %v6210_v14  ;;  %v6164_v2 = vpop.permute.xlu2 %6163 }
 0xcde   : > { %v5850_v26 = vmul.f32 %v5849_v4, %v5774_v7 }
 0xcdf   : > { %v5914_v28 = vsub.f32 %v5912_v51, %v5913_v5  ;;  %6061 = vmatmul.f32.gmra.mxu3 %v5913_v5  ;;  %v6218_v41 = vsub.f32 %v6175_v15, %v6217_v19  ;;  %v6212_v60 = vsub.f32 %v6210_v14, %v6211_v52  ;;  %v6179_v51 = vsel %vm1803_vm0, %v6164_v2, 0 }
 0xce0   : > { %v5873_v45 = vsel %vm2110_vm1, %v5850_v26, 0  ;;  %v11656_v55 = vadd.f32 %v5850_v26, %v11406_v63  ;;  %6318 = vmatpush.xpose.msrb.mxu0 %v11557_v33  ;;  %v6177_v63 = vsel %vm1803_vm0, %v6162_v35, 0  ;;  %v6233_v7 = vand.u32 4294901760, %v6179_v51 }
 0xce1   : > { %v5915_v61 = vand.u32 4294901760, %v5914_v28  ;;  %v5919_v20 = vand.u32 4294901760, %v5873_v45  ;;  %v6219_v12 = vand.u32 4294901760, %v6218_v41  ;;  %v6213_v54 = vand.u32 4294901760, %v6212_v60 }
 0xce2   : > { %v6225_v33 = vand.u32 4294901760, %v6177_v63  ;;  %v6234_v4 = vsub.f32 %v6179_v51, %v6233_v7 }
 0xce3   : > { %v5920_v32 = vsub.f32 %v5873_v45, %v5919_v20  ;;  %5916 = vmatmul.f32.gmra.mxu0 %v5915_v61  ;;  %5977 = vmatmul.f32.gmra.mxu1 %v5919_v20  ;;  %v6220_v42 = vsub.f32 %v6218_v41, %v6219_v12 }
 0xce4   : > { %v6226_v21 = vsub.f32 %v6177_v63, %v6225_v33  ;;  %v6235_v26 = vand.u32 4294901760, %v6234_v4 }
 0xce5   : > { %v5921_v18 = vand.u32 4294901760, %v5920_v32  ;;  %6022 = vmatmul.f32.gmra.mxu2 %v5920_v32  ;;  %v6221_v5 = vand.u32 4294901760, %v6220_v42 }
 0xce6   : > { %v6227_v36 = vand.u32 4294901760, %v6226_v21  ;;  %v6236_v45 = vsub.f32 %v6234_v4, %v6235_v26 }
 0xce7   : > { %v5922_v39 = vsub.f32 %v5920_v32, %v5921_v18  ;;  %6067 = vmatmul.f32.gmra.mxu3 %v5921_v18 }
 0xce8   : > { %v6228_v43 = vsub.f32 %v6226_v21, %v6227_v36 }
 0xce9   : > { %v5923_v9 = vand.u32 4294901760, %v5922_v39 }
 0xcea   : > { %v6229_v28 = vand.u32 4294901760, %v6228_v43 }
 0xceb   : > { %5924 = vmatmul.f32.gmra.mxu0 %v5923_v9  ;;  %6137 = vmatmul.f32.vlgmr.msra.gmra.mxu1 %v11593_v62 }
 0xced   : > { %6214 = vmatmul.f32.vlgmr.msra.gmra.mxu2 %v6213_v54 }
 0xcef   : > { %6279 = vmatmul.f32.vlgmr.msra.gmra.mxu3 %v11648_v30 }
 0xcf3   : > { %6100 = vmatmul.f32.vlgmr.msra.gmra.mxu0 %v11593_v62  ;;  %6141 = vmatmul.f32.gmra.mxu1 %v11618_v10  ;;  %v6237_v62 = vand.u32 4294901760, %v6236_v45 }
 0xcf5   : > { %6222 = vmatmul.f32.gmra.mxu2 %v6221_v5 }
 0xcf7   : > { %6283 = vmatmul.f32.gmra.mxu3 %v6217_v19 }
 0xcfb   : > { %6104 = vmatmul.f32.gmra.mxu0 %v11618_v10  ;;  %6145 = vmatmul.f32.gmra.mxu1 %v11639_v29 }
 0xcfd   : > { %6230 = vmatmul.f32.gmra.mxu2 %v6229_v28 }
 0xcff   : > { %6287 = vmatmul.f32.gmra.mxu3 %v6225_v33 }
 0xd03   : > { %6108 = vmatmul.f32.gmra.mxu0 %v11639_v29  ;;  %6149 = vmatmul.f32.gmra.mxu1 %v5919_v20 }
 0xd05   : > { %6238 = vmatmul.f32.gmra.mxu2 %v6237_v62 }
 0xd07   : > { %6291 = vmatmul.f32.gmra.mxu3 %v6233_v7 }
 0xd0b   : > { %6112 = vmatmul.f32.gmra.mxu0 %v5919_v20  ;;  %6363 = vmatmul.f32.vlgmr.msrb.gmra.mxu1 %v6211_v52 }
 0xd0d   : > { %6414 = vmatmul.f32.vlgmr.msrb.gmra.mxu2 %v11648_v30 }
 0xd0f   : > { %6451 = vmatmul.f32.vlgmr.msrb.gmra.mxu3 %v11648_v30 }
 0xd13   : > { %6321 = vmatmul.f32.vlgmr.msrb.gmra.mxu0 %v6210_v14  ;;  %6369 = vmatmul.f32.gmra.mxu1 %v6219_v12 }
 0xd15   : > { %6418 = vmatmul.f32.gmra.mxu2 %v6217_v19 }
 0xd17   : > { %6455 = vmatmul.f32.gmra.mxu3 %v6217_v19 }
 0xd1b   : > { %6326 = vmatmul.f32.gmra.mxu0 %v6218_v41  ;;  %6375 = vmatmul.f32.gmra.mxu1 %v6227_v36 }
 0xd1d   : > { %6422 = vmatmul.f32.gmra.mxu2 %v6225_v33 }
 0xd1f   : > { %6459 = vmatmul.f32.gmra.mxu3 %v6225_v33 }
 0xd23   : > { %6331 = vmatmul.f32.gmra.mxu0 %v6226_v21  ;;  %6381 = vmatmul.f32.gmra.mxu1 %v6235_v26 }
 0xd25   : > { %6426 = vmatmul.f32.gmra.mxu2 %v6233_v7 }
 0xd27   : > { %6463 = vmatmul.f32.gmra.mxu3 %v6233_v7 }
 0xd2b   : > { %6336 = vmatmul.f32.gmra.mxu0 %v6234_v4 }
 0xd48   : > { %v11671_v10 = vpop.f32.mrf.mxu1 }
 0xd50   : > { %v11673_v29 = vpop.f32.mrf.mxu2  ;;  %v11675_v15 = vpop.f32.mrf.mxu0 }
 0xd51   : > { %v11677_v30 = vpop.f32.mrf.mxu1 }
 0xd52   : > { %12862 = vst [vmem:[#allocation127_spill] sm:$0xff] %v11677_v30  ;;  %v11679_v14 = vpop.f32.mrf.mxu3 }
 0xd58   : > { %v11681_v61 = vpop.f32.mrf.mxu0  ;;  %v11685_v32 = vpop.f32.mrf.mxu2 }
 0xd59   : > { %12863 = vst [vmem:[#allocation128_spill] sm:$0xff] %v11681_v61  ;;  %v11683_v20 = vpop.f32.mrf.mxu1 }
 0xd5a   : > { %12864 = vst [vmem:[#allocation129_spill] sm:$0xff] %v11683_v20  ;;  %v11687_v19 = vpop.f32.mrf.mxu3 }
 0xd5b   : > { %12865 = vst [vmem:[#allocation130_spill] sm:$0xff] %v11685_v32 }
 0xd5c   : > { %12866 = vst [vmem:[#allocation131_spill] sm:$0xff] %v11687_v19 }
 0xd60   : > { %v11689_v52 = vpop.f32.mrf.mxu0  ;;  %v11693_v35 = vpop.f32.mrf.mxu2 }
 0xd61   : > { %12867 = vst [vmem:[#allocation132_spill] sm:$0xff] %v11689_v52  ;;  %v11691_v18 = vpop.f32.mrf.mxu1 }
 0xd62   : > { %12868 = vst [vmem:[#allocation133_spill] sm:$0xff] %v11691_v18  ;;  %v11695_v39 = vpop.f32.mrf.mxu3 }
 0xd63   : > { %12869 = vst [vmem:[#allocation134_spill] sm:$0xff] %v11693_v35 }
 0xd64   : > { %12870 = vst [vmem:[#allocation135_spill] sm:$0xff] %v11695_v39 }
 0xd68   : > { %v11697_v41 = vpop.f32.mrf.mxu0  ;;  %v11701_v63 = vpop.f32.mrf.mxu2 }
 0xd69   : > { %12871 = vst [vmem:[#allocation136_spill] sm:$0xff] %v11697_v41  ;;  %v11699_v60 = vpop.f32.mrf.mxu1 }
 0xd6a   : > { %12872 = vst [vmem:[#allocation137_spill] sm:$0xff] %v11699_v60  ;;  %v11703_v9 = vpop.f32.mrf.mxu3 }
 0xd6b   : > { %12873 = vst [vmem:[#allocation138_spill] sm:$0xff] %v11701_v63 }
 0xd6c   : > { %12874 = vst [vmem:[#allocation139_spill] sm:$0xff] %v11703_v9 }
 0xd70   : > { %v11705_v12 = vpop.f32.mrf.mxu0  ;;  %v6215_v33 = vpop.f32.mrf.mxu2 }
 0xd71   : > { %v11707_v54 = vpop.f32.mrf.mxu1 }
 0xd72   : > { %12875 = vst [vmem:[#allocation140_spill] sm:$0xff] %v11707_v54  ;;  %v6280_v2 = vpop.f32.mrf.mxu3 }
 0xd73   : > { %v6281_v9 = vadd.f32 %v6280_v2, %v6215_v33 }
 0xd78   : > { %v11709_v21 = vpop.f32.mrf.mxu0  ;;  %v6223_v51 = vpop.f32.mrf.mxu2 }
 0xd79   : > { %12876 = vst [vmem:[#allocation141_spill] sm:$0xff] %v11709_v21  ;;  %v11711_v42 = vpop.f32.mrf.mxu1 }
 0xd7a   : > { %12877 = vst [vmem:[#allocation142_spill] sm:$0xff] %v11711_v42  ;;  %v6284_v7 = vpop.f32.mrf.mxu3 }
 0xd7b   : > { %v6285_v52 = vadd.f32 %v6284_v7, %v6223_v51 }
 0xd80   : > { %v11713_v36 = vpop.f32.mrf.mxu0  ;;  %v6231_v5 = vpop.f32.mrf.mxu2 }
 0xd81   : > { %12878 = vst [vmem:[#allocation143_spill] sm:$0xff] %v11713_v36  ;;  %v11715_v4 = vpop.f32.mrf.mxu1 }
 0xd82   : > { %12879 = vst [vmem:[#allocation144_spill] sm:$0xff] %v11715_v4  ;;  %v6288_v43 = vpop.f32.mrf.mxu3 }
 0xd83   : > { %v6289_v33 = vadd.f32 %v6288_v43, %v6231_v5 }
 0xd88   : > { %v11717_v26 = vpop.f32.mrf.mxu0  ;;  %v6239_v28 = vpop.f32.mrf.mxu2 }
 0xd89   : > { %12880 = vst [vmem:[#allocation145_spill] sm:$0xff] %v11717_v26  ;;  %v6364_v62 = vpop.f32.mrf.mxu1 }
 0xd8a   : > { %v6292_v45 = vpop.f32.mrf.mxu3 }
 0xd90   : > { %v6322_v63 = vpop.f32.mrf.mxu0  ;;  %v6415_v41 = vpop.f32.mrf.mxu2 }
 0xd91   : > { %v6323_v18 = vadd.f32 %v6322_v63, %v6281_v9  ;;  %v6370_v20 = vpop.f32.mrf.mxu1 }
 0xd92   : > { %v6452_v39 = vpop.f32.mrf.mxu3 }
 0xd93   : > { %v6365_v35 = vadd.f32 %v6364_v62, %v6323_v18 }
 0xd95   : > { %v6416_v42 = vadd.f32 %v6415_v41, %v6365_v35 }
 0xd97   : > { %v6453_v54 = vadd.f32 %v6452_v39, %v6416_v42 }
 0xd98   : > { %v6327_v36 = vpop.f32.mrf.mxu0  ;;  %v6419_v4 = vpop.f32.mrf.mxu2 }
 0xd99   : > { %v6467_v21 = vmul.f32 0.25, %v6453_v54  ;;  %v6328_v19 = vadd.f32 %v6327_v36, %v6285_v52  ;;  %v6376_v63 = vpop.f32.mrf.mxu1  ;;  %v6293_v54 = vadd.f32 %v6292_v45, %v6239_v28 }
 0xd9a   : > { %v6456_v32 = vpop.f32.mrf.mxu3 }
 0xd9b   : > { %v6371_v30 = vadd.f32 %v6370_v20, %v6328_v19  ;;  %v6471_v26 = vsel %vm2110_vm1, %v6467_v21, -inf }
 0xd9c   : > { %6472 = vmax.xlane.f32.xlu1 %v6471_v26 }
 0xd9d   : > { %v6420_v61 = vadd.f32 %v6419_v4, %v6371_v30 }
 0xd9f   : > { %v6457_v2 = vadd.f32 %v6456_v32, %v6420_v61 }
 0xda0   : > { %v6332_v9 = vpop.f32.mrf.mxu0  ;;  %v6423_v35 = vpop.f32.mrf.mxu2 }
 0xda1   : > { %v6468_v60 = vmul.f32 0.25, %v6457_v2  ;;  %v6333_v18 = vadd.f32 %v6332_v9, %v6289_v33  ;;  %v6382_v36 = vpop.f32.mrf.mxu1  ;;  %v11748_v2 = vld [vmem:[%s9214_s24] sm:$0xff]  ;;  %v11756_v9 = vld [vmem:[%s9214_s24 + $0x8] sm:$0xff] }
 0xda2   : > { %v6460_v42 = vpop.f32.mrf.mxu3 }
 0xda3   : > { %v6377_v41 = vadd.f32 %v6376_v63, %v6333_v18  ;;  %v6474_v39 = vsel %vm2110_vm1, %v6468_v60, -inf }
 0xda4   : > { %6475 = vmax.xlane.f32.xlu0 %v6474_v39 }
 0xda5   : > { %v6424_v52 = vadd.f32 %v6423_v35, %v6377_v41 }
 0xda7   : > { %v6461_v51 = vadd.f32 %v6460_v42, %v6424_v52 }
 0xda8   : > { %v6337_v20 = vpop.f32.mrf.mxu0  ;;  %v6427_v32 = vpop.f32.mrf.mxu2 }
 0xda9   : > { %v6469_v19 = vmul.f32 0.25, %v6461_v51  ;;  %v6338_v7 = vadd.f32 %v6337_v20, %v6293_v54 }
 0xdaa   : > { %v6464_v4 = vpop.f32.mrf.mxu3 }
 0xdab   : > { %v6383_v30 = vadd.f32 %v6382_v36, %v6338_v7  ;;  %v6477_v61 = vsel %vm2110_vm1, %v6469_v19, -inf }
 0xdac   : > { %6478 = vmax.xlane.f32.xlu2 %v6477_v61 }
 0xdad   : > { %v6428_v5 = vadd.f32 %v6427_v32, %v6383_v30 }
 0xdaf   : > { %v6465_v43 = vadd.f32 %v6464_v4, %v6428_v5 }
 0xdb1   : > { %v6470_v26 = vmul.f32 0.25, %v6465_v43 }
 0xdb3   : > { %v6480_v62 = vsel %vm2110_vm1, %v6470_v26, -inf }
 0xdb4   : > { %6481 = vmax.xlane.f32.xlu0 %v6480_v62 }
 0xdb5   : > { %6585 = vrot.lane.b32.xlu1 %v10238_v34, %s9008_s25 }
 0xdbd   : > { %6579 = vrot.lane.b32.xlu1 %v10230_v1, %s9008_s25 }
 0xdc4   : > { %6581 = vrot.lane.b32.xlu2 %v10226_v58, %s9008_s25 }
 0xdc5   : > { %6897 = vrot.lane.b32.xlu1 %v10130_v0, %s9009_s2 }
 0xdc8   : > { %6583 = vrot.lane.b32.xlu0 %v10228_v47, %s9008_s25 }
 0xdcc   : > { %6899 = vrot.lane.b32.xlu2 %v10151_v57, %s9009_s2 }
 0xdcd   : > { %6893 = vrot.lane.b32.xlu1 %v10149_v37, %s9009_s2 }
 0xdd4   : > { %6895 = vrot.lane.b32.xlu2 %v10138_v44, %s9009_s2 }
 0xdd5   : > { %6887 = vrot.lane.b32.xlu1 %v10158_v53, %s9009_s2 }
 0xddc   : > { %6885 = vrot.lane.b32.xlu2 %v10136_v40, %s9009_s2 }
 0xddd   : > { %6891 = vrot.lane.b32.xlu1 %v10204_v13, %s9009_s2 }
 0xde4   : > { %6889 = vrot.lane.b32.xlu2 %v10187_v25, %s9009_s2 }
 0xe0f   : > { %v6473_v0 = vpop.xlane.xlu1 %6472 }
 0xe10   : > { %v6483_v57 = vsub.f32 %v6467_v21, %v6473_v0 }
 0xe12   : > { %v6487_v28 = vmul.f32 1.442695, %v6483_v57 }
 0xe14   : > { %8690 = vpow2.f32 %v6487_v28  ;;  %v11785_v28 = vld [vmem:[%s9214_s24 + $0x18] sm:$0xff] }
 0xe15   : > { %12881 = vst [vmem:[#allocation146_spill] sm:$0xff] %v11785_v28 }
 0xe17   : > { %v6476_v37 = vpop.xlane.xlu0 %6475 }
 0xe18   : > { %v6484_v45 = vsub.f32 %v6468_v60, %v6476_v37 }
 0xe1a   : > { %v8691_v44 = vpop.eup %8690  ;;  %v6489_v33 = vmul.f32 1.442695, %v6484_v45 }
 0xe1b   : > { %v11751_v53 = vmul.f32 %v11748_v2, %v8691_v44 }
 0xe1c   : > { %8692 = vpow2.f32 %v6489_v33 }
 0xe1d   : > { %v6503_v40 = vsel %vm2110_vm1, %v11751_v53, 0.0 }
 0xe1e   : > { %6504 = vadd.xlane.f32.xlu0 %v6503_v40 }
 0xe1f   : > { %v6479_v25 = vpop.xlane.xlu2 %6478 }
 0xe20   : > { %v6485_v13 = vsub.f32 %v6469_v19, %v6479_v25  ;;  %v11769_v19 = vld [vmem:[%s9214_s24 + $0x10] sm:$0xff]  ;;  %s8280_s24 = scalar_lea.hbm %s12579_s7, %s9079_s9 }
 0xe22   : > { %v8693_v21 = vpop.eup %8692  ;;  %v6491_v63 = vmul.f32 1.442695, %v6485_v13 }
 0xe23   : > { %v11759_v60 = vmul.f32 %v11756_v9, %v8693_v21 }
 0xe24   : > { %8694 = vpow2.f32 %v6491_v63 }
 0xe25   : > { %v6506_v18 = vsel %vm2110_vm1, %v11759_v60, 0.0 }
 0xe26   : > { %6507 = vadd.xlane.f32.xlu0 %v6506_v18 }
 0xe27   : > { %v6582_v35 = vpop.permute.xlu2 %6581  ;;  %v6586_v41 = vpop.permute.xlu1 %6585 }
 0xe28   : > { %v11763_v39 = vand.u32 4294901760, %v6586_v41  ;;  %v6482_v42 = vpop.xlane.xlu0 %6481  ;;  %v11779_v0 = vand.u32 4294901760, %v6582_v35 }
 0xe29   : > { %v6486_v52 = vsub.f32 %v6470_v26, %v6482_v42 }
 0xe2a   : > { %v8695_v54 = vpop.eup %8694  ;;  %v6669_v51 = vsub.f32 %v6586_v41, %v11763_v39  ;;  %6616 = vmatpush.msra.mxu0 %v11763_v39  ;;  %6767 = vmatpush.msra.mxu3 %v11763_v39  ;;  %v6681_v25 = vsub.f32 %v6582_v35, %v11779_v0 }
 0xe2b   : > { %v6493_v20 = vmul.f32 1.442695, %v6486_v52  ;;  %v11772_v7 = vmul.f32 %v11769_v19, %v8695_v54 }
 0xe2c   : > { %v6670_v36 = vand.u32 4294901760, %v6669_v51  ;;  %6723 = vmatpush.msra.mxu2 %v6669_v51 }
 0xe2d   : > { %8696 = vpow2.f32 %v6493_v20  ;;  %v6509_v30 = vsel %vm2110_vm1, %v11772_v7, 0.0  ;;  %v6682_v20 = vand.u32 4294901760, %v6681_v25 }
 0xe2e   : > { %v6671_v61 = vsub.f32 %v6669_v51, %v6670_v36  ;;  %6510 = vadd.xlane.f32.xlu0 %v6509_v30 }
 0xe2f   : > { %v6900_v32 = vpop.permute.xlu2 %6899  ;;  %v6580_v5 = vpop.permute.xlu1 %6579 }
 0xe30   : > { %v6672_v4 = vand.u32 4294901760, %v6671_v61  ;;  %v6915_v43 = vsel %vm1803_vm0, %v6900_v32, 0  ;;  %v11792_v44 = vand.u32 4294901760, %v6580_v5 }
 0xe31   : > { %v11777_v26 = vand.u32 4294901760, %v6915_v43 }
 0xe32   : > { %6673 = vmatpush.msra.mxu1 %v6672_v4  ;;  %v6687_v52 = vsub.f32 %v6580_v5, %v11792_v44 }
 0xe33   : > { %v8697_v62 = vpop.eup %8696  ;;  %v11782_v57 = vsub.f32 %v6915_v43, %v11777_v26 }
 0xe34   : > { %v11788_v37 = vmul.f32 %v11785_v28, %v8697_v62  ;;  %v6688_v43 = vand.u32 4294901760, %v6687_v52 }
 0xe35   : > { %v12643_v13 = vand.u32 4294901760, %v11782_v57 }
 0xe36   : > { %v6512_v45 = vsel %vm2110_vm1, %v11788_v37, 0.0 }
 0xe37   : > { %6513 = vadd.xlane.f32.xlu0 %v6512_v45  ;;  %v6896_v33 = vpop.permute.xlu2 %6895  ;;  %v6898_v40 = vpop.permute.xlu1 %6897  ;;  %v6985_v35 = vsub.f32 %v11782_v57, %v12643_v13  ;;  %v6689_v13 = vsub.f32 %v6687_v52, %v6688_v43 }
 0xe38   : > { %v6911_v21 = vsel %vm1803_vm0, %v6896_v33, 0  ;;  %v6913_v63 = vsel %vm1803_vm0, %v6898_v40, 0  ;;  %v6683_v33 = vsub.f32 %v6681_v25, %v6682_v20 }
 0xe39   : > { %v11798_v18 = vand.u32 4294901760, %v6911_v21  ;;  %v11800_v41 = vand.u32 4294901760, %v6913_v63  ;;  %v6986_v62 = vand.u32 4294901760, %v6985_v35 }
 0xe3a   : > { %v6584_v42 = vpop.permute.xlu0 %6583  ;;  %v6684_v40 = vand.u32 4294901760, %v6683_v33 }
 0xe3b   : > { %v11804_v54 = vsub.f32 %v6913_v63, %v11800_v41  ;;  %v6617_v51 = vand.u32 4294901760, %v6584_v42  ;;  %v11810_v30 = vsub.f32 %v6911_v21, %v11798_v18 }
 0xe3d   : > { %v12644_v61 = vand.u32 4294901760, %v11804_v54  ;;  %v6675_v32 = vsub.f32 %v6584_v42, %v6617_v51  ;;  %6618 = vmatpush.msra.mxu0 %v6617_v51  ;;  %6769 = vmatpush.msra.mxu3 %v6617_v51 }
 0xe3f   : > { %v6894_v4 = vpop.permute.xlu1 %6893  ;;  %6620 = vmatpush.msra.mxu0 %v11779_v0  ;;  %6726 = vmatpush.msra.mxu2 %v6675_v32  ;;  %v6676_v5 = vand.u32 4294901760, %v6675_v32  ;;  %v6991_v42 = vsub.f32 %v11804_v54, %v12644_v61  ;;  %v12882_v61 = vand.u32 4294901760, %v11810_v30 }
 0xe40   : > { %v6909_v45 = vsel %vm1803_vm0, %v6894_v4, 0  ;;  %6771 = vmatpush.msra.mxu3 %v11779_v0 }
 0xe41   : > { %v11817_v21 = vand.u32 4294901760, %v6909_v45  ;;  %6622 = vmatpush.msra.mxu0 %v11792_v44  ;;  %6729 = vmatpush.msra.mxu2 %v6681_v25  ;;  %v6677_v63 = vsub.f32 %v6675_v32, %v6676_v5  ;;  %v6992_v32 = vand.u32 4294901760, %v6991_v42  ;;  %v6997_v28 = vsub.f32 %v11810_v30, %v12882_v61 }
 0xe42   : > { %6773 = vmatpush.msra.mxu3 %v11792_v44 }
 0xe43   : > { %6814 = vmatpush.msrb.mxu0 %v6670_v36  ;;  %v11825_v35 = vsub.f32 %v6909_v45, %v11817_v21  ;;  %6732 = vmatpush.msra.mxu2 %v6687_v52  ;;  %v6678_v4 = vand.u32 4294901760, %v6677_v63  ;;  %v6690_v36 = vand.u32 4294901760, %v6689_v13  ;;  %v6998_v52 = vand.u32 4294901760, %v6997_v28 }
 0xe44   : > { %6987 = vmatpush.xpose.msrb.mxu3 %v6986_v62 }
 0xe45   : > { %6818 = vmatpush.msrb.mxu0 %v6676_v5  ;;  %6930 = vmatpush.xpose.msrb.mxu2 %v11777_v26  ;;  %v7002_v25 = vand.u32 4294901760, %v11825_v35 }
 0xe46   : > { %6679 = vmatpush.msra.mxu1 %v6678_v4 }
 0xe47   : > { %6822 = vmatpush.msrb.mxu0 %v6682_v20  ;;  %v7003_v5 = vsub.f32 %v11825_v35, %v7002_v25 }
 0xe48   : > { %6993 = vmatpush.xpose.msrb.mxu3 %v6992_v32  ;;  %6685 = vmatpush.msra.mxu1 %v6684_v40  ;;  %v6499_v32 = vadd.f32 3.125e-08, %v11751_v53 }
 0xe49   : > { %6826 = vmatpush.msrb.mxu0 %v6688_v43  ;;  %6932 = vmatpush.xpose.msrb.mxu2 %v11800_v41  ;;  %v7004_v61 = vand.u32 4294901760, %v7003_v5 }
 0xe4a   : > { %6691 = vmatpush.msra.mxu1 %v6690_v36 }
 0xe4c   : > { %6857 = vmatpush.msrb.mxu1 %v11763_v39  ;;  %6999 = vmatpush.xpose.msrb.mxu3 %v6998_v52 }
 0xe4d   : > { %6934 = vmatpush.xpose.msrb.mxu2 %v11798_v18 }
 0xe4e   : > { %6859 = vmatpush.msrb.mxu1 %v6617_v51 }
 0xe50   : > { %6861 = vmatpush.msrb.mxu1 %v11779_v0  ;;  %7005 = vmatpush.xpose.msrb.mxu3 %v7004_v61 }
 0xe51   : > { %6936 = vmatpush.xpose.msrb.mxu2 %v11817_v21 }
 0xe52   : > { %6863 = vmatpush.msrb.mxu1 %v11792_v44 }
 0xe91   : > { %v6505_v13 = vpop.xlane.xlu0 %6504 }
 0xe92   : > { %v6515_v28 = vadd.f32 1e-06, %v6505_v13 }
 0xe94   : > { %8698 = vrcp.f32 %v6515_v28  ;;  %v6530_v51 = vand.u32 2147483648, %v6515_v28  ;;  %v6528_v40 = vand.u32 2147483647, %v6515_v28  ;;  %vm6524_vm15 = vweird.f32 %v6515_v28 }
 0xe96   : > { %v6531_v44 = vor.u32 1.1754944e-38, %v6530_v51  ;;  %vm6529_vm3 = vcmp.eq.f32.partialorder %v6528_v40, 8.507059e+37 }
 0xe99   : > { %v6508_v20 = vpop.xlane.xlu0 %6507 }
 0xe9a   : > { %v8699_v43 = vpop.eup %8698  ;;  %v6516_v62 = vadd.f32 1e-06, %v6508_v20 }
 0xe9b   : > { %v6520_v45 = vmul.f32 %v8699_v43, %v6515_v28  ;;  %vm6525_vm14 = vweird.f32 %v8699_v43 }
 0xe9c   : > { %8700 = vrcp.f32 %v6516_v62  ;;  %vm6526_vm2 = vmor %vm6524_vm15, %vm6525_vm14  ;;  %v6543_v20 = vand.u32 2147483647, %v6516_v62  ;;  %vm6539_vm5 = vweird.f32 %v6516_v62 }
 0xe9d   : > { %v6521_v39 = vsub.f32 1.0, %v6520_v45  ;;  %v6545_v45 = vand.u32 2147483648, %v6516_v62 }
 0xe9e   : > { %vm6544_vm7 = vcmp.eq.f32.partialorder %v6543_v20, 8.507059e+37 }
 0xe9f   : > { %v6522_v33 = vmul.f32 %v8699_v43, %v6521_v39 }
 0xea1   : > { %v6523_v63 = vadd.f32 %v8699_v43, %v6522_v33  ;;  %v6511_v0 = vpop.xlane.xlu0 %6510 }
 0xea2   : > { %v8701_v42 = vpop.eup %8700  ;;  %v6517_v4 = vadd.f32 1e-06, %v6511_v0 }
 0xea3   : > { %v6527_v36 = vsel %vm6526_vm2, %v8699_v43, %v6523_v63  ;;  %v6535_v52 = vmul.f32 %v8701_v42, %v6516_v62  ;;  %vm6540_vm4 = vweird.f32 %v8701_v42  ;;  %v6546_v43 = vor.u32 1.1754944e-38, %v6545_v45 }
 0xea4   : > { %v6532_v5 = vsel %vm6529_vm3, %v6531_v44, %v6527_v36  ;;  %8702 = vrcp.f32 %v6517_v4  ;;  %vm6541_vm6 = vmor %vm6539_vm5, %vm6540_vm4  ;;  %v6500_v36 = vadd.f32 3.125e-08, %v11759_v60  ;;  %vm6554_vm9 = vweird.f32 %v6517_v4 }
 0xea5   : > { %v6536_v61 = vsub.f32 1.0, %v6535_v52  ;;  %v6533_v13 = vmul.f32 %v6532_v5, %v6499_v32  ;;  %vm7733_vm2 = vcmask 392192   ;;  %vm7738_vm3 = vcmask 523264  }
 0xea7   : > { %v6537_v39 = vmul.f32 %v8701_v42, %v6536_v61  ;;  %v6592_v28 = vsel %vm2110_vm1, %v6533_v13, 0  ;;  %v11844_v33 = vadd.f32 %v6533_v13, %v11591_v49  ;;  %v12883_v61 = vand.u32 4294901760, %v11782_v57 }
 0xea8   : > { %v11846_v51 = vand.u32 4294901760, %v6592_v28  ;;  %v6560_v13 = vand.u32 2147483648, %v6517_v4 }
 0xea9   : > { %v6538_v0 = vadd.f32 %v8701_v42, %v6537_v39 }
 0xeaa   : > { %v8703_v53 = vpop.eup %8702  ;;  %v6514_v40 = vpop.xlane.xlu0 %6513  ;;  %6693 = vmatmul.f32.vlgmr.msra.gmra.mxu1 %v11846_v51  ;;  %v6624_v63 = vsub.f32 %v6592_v28, %v11846_v51  ;;  %v6558_v28 = vand.u32 2147483647, %v6517_v4 }
 0xeab   : > { %v6550_v44 = vmul.f32 %v8703_v53, %v6517_v4  ;;  %v11850_v32 = vadd.f32 1e-06, %v6514_v40  ;;  %7081 = vmatpush.xpose.msra.mxu1 %v11777_v26  ;;  %v6542_v49 = vsel %vm6541_vm6, %v8701_v42, %v6538_v0  ;;  %vm6555_vm8 = vweird.f32 %v8703_v53 }
 0xeac   : > { %6735 = vmatmul.f32.vlgmr.msra.gmra.mxu2 %v6624_v63  ;;  %v6625_v52 = vand.u32 4294901760, %v6624_v63  ;;  %v6547_v62 = vsel %vm6544_vm7, %v6546_v43, %v6542_v49  ;;  %v12884_v40 = vand.u32 4294901760, %v11804_v54  ;;  %vm6556_vm10 = vmor %vm6554_vm9, %vm6555_vm8  ;;  %vm6559_vm11 = vcmp.eq.f32.partialorder %v6558_v28, 8.507059e+37 }
 0xead   : > { %v6551_v5 = vsub.f32 1.0, %v6550_v44  ;;  %8704 = vrcp.f32 %v11850_v32  ;;  %7128 = vmatpush.xpose.msra.mxu2 %v12883_v61  ;;  %v6548_v45 = vmul.f32 %v6547_v62, %v6500_v36  ;;  %v6561_v44 = vor.u32 1.1754944e-38, %v6560_v13 }
 0xeae   : > { %6777 = vmatmul.f32.vlgmr.msra.gmra.mxu3 %v6625_v52  ;;  %v6626_v20 = vsub.f32 %v6624_v63, %v6625_v52  ;;  %v6501_v36 = vadd.f32 3.125e-08, %v11772_v7  ;;  %v6573_v28 = vand.u32 2147483647, %v11850_v32  ;;  %vm6569_vm13 = vweird.f32 %v11850_v32 }
 0xeaf   : > { %v6552_v39 = vmul.f32 %v8703_v53, %v6551_v5  ;;  %7083 = vmatpush.xpose.msra.mxu1 %v11800_v41  ;;  %7171 = vmatpush.xpose.msra.mxu3 %v11777_v26  ;;  %v6595_v42 = vsel %vm2110_vm1, %v6548_v45, 0  ;;  %v11861_v0 = vadd.f32 %v6548_v45, %v11614_v8  ;;  %v6886_v26 = vpop.permute.xlu2 %6885 }
 0xeb0   : > { %v6627_v60 = vand.u32 4294901760, %v6626_v20  ;;  %v11865_v63 = vand.u32 4294901760, %v6595_v42  ;;  %v6901_v7 = vsel %vm1803_vm0, %v6886_v26, 0  ;;  %v12885_v20 = vand.u32 4294901760, %v11810_v30 }
 0xeb1   : > { %v6553_v43 = vadd.f32 %v8703_v53, %v6552_v39  ;;  %7132 = vmatpush.xpose.msra.mxu2 %v12884_v40  ;;  %vm6574_vm15 = vcmp.eq.f32.partialorder %v6573_v28, 8.507059e+37 }
 0xeb2   : > { %6628 = vmatmul.f32.vlgmr.msra.gmra.mxu0 %v6627_v60  ;;  %6697 = vmatmul.f32.gmra.mxu1 %v11865_v63  ;;  %v6632_v8 = vsub.f32 %v6595_v42, %v11865_v63 }
 0xeb3   : > { %v8705_v49 = vpop.eup %8704  ;;  %7037 = vmatpush.xpose.msra.mxu0 %v11782_v57  ;;  %v6557_v4 = vsel %vm6556_vm10, %v8703_v53, %v6553_v43  ;;  %7085 = vmatpush.xpose.msra.mxu1 %v11798_v18  ;;  %v6575_v57 = vand.u32 2147483648, %v11850_v32 }
 0xeb4   : > { %v6565_v52 = vmul.f32 %v8705_v49, %v11850_v32  ;;  %7173 = vmatpush.xpose.msra.mxu3 %v11800_v41  ;;  %v6562_v62 = vsel %vm6559_vm11, %v6561_v44, %v6557_v4  ;;  %6740 = vmatmul.f32.gmra.mxu2 %v6632_v8  ;;  %v6633_v5 = vand.u32 4294901760, %v6632_v8  ;;  %vm6570_vm12 = vweird.f32 %v8705_v49 }
 0xeb5   : > { %v6563_v61 = vmul.f32 %v6562_v62, %v6501_v36  ;;  %7136 = vmatpush.xpose.msra.mxu2 %v12885_v20  ;;  %vm6571_vm14 = vmor %vm6569_vm13, %vm6570_vm12  ;;  %v6576_v40 = vor.u32 1.1754944e-38, %v6575_v57  ;;  %v6888_v36 = vpop.permute.xlu1 %6887 }
 0xeb6   : > { %v6566_v13 = vsub.f32 1.0, %v6565_v52  ;;  %6783 = vmatmul.f32.gmra.mxu3 %v6633_v5  ;;  %v6634_v53 = vsub.f32 %v6632_v8, %v6633_v5  ;;  %v6903_v52 = vsel %vm1803_vm0, %v6888_v36, 0 }
 0xeb7   : > { %7040 = vmatpush.xpose.msra.mxu0 %v11804_v54  ;;  %v6598_v45 = vsel %vm2110_vm1, %v6563_v61, 0  ;;  %v11881_v41 = vadd.f32 %v6563_v61, %v11634_v59  ;;  %7087 = vmatpush.xpose.msra.mxu1 %v11817_v21  ;;  %v11892_v54 = vand.u32 4294901760, %v6901_v7  ;;  %v6945_v5 = vand.u32 4294901760, %v6903_v52 }
 0xeb8   : > { %v6567_v39 = vmul.f32 %v8705_v49, %v6566_v13  ;;  %7175 = vmatpush.xpose.msra.mxu3 %v11798_v18  ;;  %v11886_v60 = vand.u32 4294901760, %v6598_v45  ;;  %v6635_v42 = vand.u32 4294901760, %v6634_v53  ;;  %v6502_v18 = vadd.f32 3.125e-08, %v11788_v37  ;;  %v6890_v13 = vpop.permute.xlu2 %6889 }
 0xeb9   : > { %7140 = vmatpush.xpose.msra.mxu2 %v7002_v25  ;;  %v6938_v4 = vsub.f32 %v6901_v7, %v11892_v54  ;;  %v6946_v57 = vsub.f32 %v6903_v52, %v6945_v5 }
 0xeba   : > { %v6568_v43 = vadd.f32 %v8705_v49, %v6567_v39  ;;  %v6640_v59 = vsub.f32 %v6598_v45, %v11886_v60  ;;  %6636 = vmatmul.f32.gmra.mxu0 %v6635_v42  ;;  %6701 = vmatmul.f32.gmra.mxu1 %v11886_v60 }
 0xebb   : > { %7043 = vmatpush.xpose.msra.mxu0 %v11810_v30 }
 0xebc   : > { %7177 = vmatpush.xpose.msra.mxu3 %v11817_v21  ;;  %v6641_v32 = vand.u32 4294901760, %v6640_v59  ;;  %v6572_v44 = vsel %vm6571_vm14, %v8705_v49, %v6568_v43  ;;  %6745 = vmatmul.f32.gmra.mxu2 %v6640_v59  ;;  %v6939_v49 = vand.u32 4294901760, %v6938_v4 }
 0xebd   : > { %v6577_v25 = vsel %vm6574_vm15, %v6576_v40, %v6572_v44  ;;  %v6892_v42 = vpop.permute.xlu1 %6891 }
 0xebe   : > { %v6642_v26 = vsub.f32 %v6640_v59, %v6641_v32  ;;  %v6578_v8 = vmul.f32 %v6577_v25, %v6502_v18  ;;  %6789 = vmatmul.f32.gmra.mxu3 %v6641_v32  ;;  %v6940_v20 = vsub.f32 %v6938_v4, %v6939_v49  ;;  %v6907_v40 = vsel %vm1803_vm0, %v6892_v42, 0 }
 0xebf   : > { %7046 = vmatpush.xpose.msra.mxu0 %v11825_v35  ;;  %v6905_v35 = vsel %vm1803_vm0, %v6890_v13, 0  ;;  %v6961_v32 = vand.u32 4294901760, %v6907_v40 }
 0xec0   : > { %v6643_v37 = vand.u32 4294901760, %v6642_v26  ;;  %v6601_v62 = vsel %vm2110_vm1, %v6578_v8, 0  ;;  %v11903_v30 = vadd.f32 %v6578_v8, %v11656_v55  ;;  %v6941_v39 = vand.u32 4294901760, %v6940_v20 }
 0xec1   : > { %v6647_v21 = vand.u32 4294901760, %v6601_v62  ;;  %v6953_v28 = vand.u32 4294901760, %v6905_v35  ;;  %v6947_v55 = vand.u32 4294901760, %v6946_v57  ;;  %v6962_v36 = vsub.f32 %v6907_v40, %v6961_v32 }
 0xec2   : > { %6644 = vmatmul.f32.gmra.mxu0 %v6643_v37 }
 0xec3   : > { %6705 = vmatmul.f32.gmra.mxu1 %v6647_v21  ;;  %v6648_v61 = vsub.f32 %v6601_v62, %v6647_v21  ;;  %v6954_v43 = vsub.f32 %v6905_v35, %v6953_v28  ;;  %v6948_v59 = vsub.f32 %v6946_v57, %v6947_v55  ;;  %v6963_v26 = vand.u32 4294901760, %v6962_v36 }
 0xec5   : > { %6750 = vmatmul.f32.gmra.mxu2 %v6648_v61  ;;  %v6649_v7 = vand.u32 4294901760, %v6648_v61  ;;  %v6955_v18 = vand.u32 4294901760, %v6954_v43  ;;  %v6949_v44 = vand.u32 4294901760, %v6948_v59  ;;  %v6964_v52 = vsub.f32 %v6962_v36, %v6963_v26 }
 0xec7   : > { %6795 = vmatmul.f32.gmra.mxu3 %v6649_v7  ;;  %v6650_v53 = vsub.f32 %v6648_v61, %v6649_v7  ;;  %v6956_v25 = vsub.f32 %v6954_v43, %v6955_v18 }
 0xec9   : > { %v6651_v45 = vand.u32 4294901760, %v6650_v53  ;;  %v6957_v8 = vand.u32 4294901760, %v6956_v25 }
 0xecb   : > { %6652 = vmatmul.f32.gmra.mxu0 %v6651_v45  ;;  %6865 = vmatmul.f32.vlgmr.msrb.gmra.mxu1 %v11846_v51 }
 0xecd   : > { %6942 = vmatmul.f32.vlgmr.msrb.gmra.mxu2 %v6941_v39 }
 0xecf   : > { %7007 = vmatmul.f32.vlgmr.msrb.gmra.mxu3 %v11892_v54 }
 0xed3   : > { %6828 = vmatmul.f32.vlgmr.msrb.gmra.mxu0 %v11846_v51  ;;  %6869 = vmatmul.f32.gmra.mxu1 %v11865_v63  ;;  %v6965_v51 = vand.u32 4294901760, %v6964_v52 }
 0xed5   : > { %6950 = vmatmul.f32.gmra.mxu2 %v6949_v44 }
 0xed7   : > { %7011 = vmatmul.f32.gmra.mxu3 %v6945_v5 }
 0xedb   : > { %6832 = vmatmul.f32.gmra.mxu0 %v11865_v63  ;;  %6873 = vmatmul.f32.gmra.mxu1 %v11886_v60 }
 0xedd   : > { %6958 = vmatmul.f32.gmra.mxu2 %v6957_v8 }
 0xedf   : > { %7015 = vmatmul.f32.gmra.mxu3 %v6953_v28 }
 0xee3   : > { %6836 = vmatmul.f32.gmra.mxu0 %v11886_v60  ;;  %6877 = vmatmul.f32.gmra.mxu1 %v6647_v21 }
 0xee5   : > { %6966 = vmatmul.f32.gmra.mxu2 %v6965_v51 }
 0xee7   : > { %7019 = vmatmul.f32.gmra.mxu3 %v6961_v32 }
 0xeeb   : > { %6840 = vmatmul.f32.gmra.mxu0 %v6647_v21  ;;  %7091 = vmatmul.f32.vlgmr.msra.gmra.mxu1 %v6939_v49 }
 0xeed   : > { %7142 = vmatmul.f32.vlgmr.msra.gmra.mxu2 %v11892_v54 }
 0xeef   : > { %7179 = vmatmul.f32.vlgmr.msra.gmra.mxu3 %v11892_v54 }
 0xef3   : > { %7049 = vmatmul.f32.vlgmr.msra.gmra.mxu0 %v6938_v4  ;;  %7097 = vmatmul.f32.gmra.mxu1 %v6947_v55 }
 0xef5   : > { %7146 = vmatmul.f32.gmra.mxu2 %v6945_v5 }
 0xef7   : > { %7183 = vmatmul.f32.gmra.mxu3 %v6945_v5 }
 0xefb   : > { %7054 = vmatmul.f32.gmra.mxu0 %v6946_v57  ;;  %7103 = vmatmul.f32.gmra.mxu1 %v6955_v18 }
 0xefd   : > { %7150 = vmatmul.f32.gmra.mxu2 %v6953_v28 }
 0xeff   : > { %7187 = vmatmul.f32.gmra.mxu3 %v6953_v28 }
 0xf03   : > { %7059 = vmatmul.f32.gmra.mxu0 %v6954_v43  ;;  %7109 = vmatmul.f32.gmra.mxu1 %v6963_v26 }
 0xf05   : > { %7154 = vmatmul.f32.gmra.mxu2 %v6961_v32 }
 0xf07   : > { %7191 = vmatmul.f32.gmra.mxu3 %v6961_v32 }
 0xf0b   : > { %7064 = vmatmul.f32.gmra.mxu0 %v6962_v36 }
 0xf27   : > { %v6694_v63 = vpop.f32.mrf.mxu1 }
 0xf2f   : > { %v6629_v60 = vpop.f32.mrf.mxu0  ;;  %v6736_v37 = vpop.f32.mrf.mxu2 }
 0xf30   : > { %v6695_v62 = vadd.f32 %v6694_v63, %v6629_v60  ;;  %v6698_v21 = vpop.f32.mrf.mxu1 }
 0xf31   : > { %v6778_v49 = vpop.f32.mrf.mxu3 }
 0xf32   : > { %v6737_v54 = vadd.f32 %v6736_v37, %v6695_v62 }
 0xf34   : > { %v6779_v4 = vadd.f32 %v6778_v49, %v6737_v54 }
 0xf37   : > { %v6637_v61 = vpop.f32.mrf.mxu0  ;;  %v6741_v7 = vpop.f32.mrf.mxu2 }
 0xf38   : > { %v6702_v13 = vpop.f32.mrf.mxu1  ;;  %v6699_v5 = vadd.f32 %v6698_v21, %v6637_v61 }
 0xf39   : > { %v6784_v20 = vpop.f32.mrf.mxu3 }
 0xf3a   : > { %v6742_v57 = vadd.f32 %v6741_v7, %v6699_v5 }
 0xf3c   : > { %v6785_v53 = vadd.f32 %v6784_v20, %v6742_v57 }
 0xf3f   : > { %v6645_v35 = vpop.f32.mrf.mxu0  ;;  %v6746_v28 = vpop.f32.mrf.mxu2 }
 0xf40   : > { %v6706_v45 = vpop.f32.mrf.mxu1  ;;  %v6703_v39 = vadd.f32 %v6702_v13, %v6645_v35 }
 0xf41   : > { %v6790_v55 = vpop.f32.mrf.mxu3 }
 0xf42   : > { %v6747_v42 = vadd.f32 %v6746_v28, %v6703_v39 }
 0xf44   : > { %v6791_v43 = vadd.f32 %v6790_v55, %v6747_v42 }
 0xf48   : > { %v6653_v59 = vpop.f32.mrf.mxu0  ;;  %v6866_v40 = vpop.f32.mrf.mxu1 }
 0xf49   : > { %v6707_v18 = vadd.f32 %v6706_v45, %v6653_v59  ;;  %v6751_v32 = vpop.f32.mrf.mxu2 }
 0xf4a   : > { %v6796_v44 = vpop.f32.mrf.mxu3 }
 0xf4b   : > { %v6752_v36 = vadd.f32 %v6751_v32, %v6707_v18 }
 0xf4d   : > { %v6797_v25 = vadd.f32 %v6796_v44, %v6752_v36 }
 0xf50   : > { %v6829_v26 = vpop.f32.mrf.mxu0  ;;  %v6870_v8 = vpop.f32.mrf.mxu1 }
 0xf51   : > { %v6830_v52 = vadd.f32 %v6829_v26, %v6779_v4  ;;  %v6943_v51 = vpop.f32.mrf.mxu2 }
 0xf52   : > { %v7008_v63 = vpop.f32.mrf.mxu3 }
 0xf53   : > { %v11916_v60 = vadd.f32 %v6866_v40, %v6830_v52  ;;  %v7009_v59 = vadd.f32 %v7008_v63, %v6943_v51 }
 0xf58   : > { %v6833_v37 = vpop.f32.mrf.mxu0  ;;  %v6874_v62 = vpop.f32.mrf.mxu1 }
 0xf59   : > { %v6834_v21 = vadd.f32 %v6833_v37, %v6785_v53  ;;  %v6951_v49 = vpop.f32.mrf.mxu2 }
 0xf5a   : > { %v7012_v54 = vpop.f32.mrf.mxu3 }
 0xf5b   : > { %v11918_v61 = vadd.f32 %v6870_v8, %v6834_v21  ;;  %v7013_v26 = vadd.f32 %v7012_v54, %v6951_v49 }
 0xf60   : > { %v6837_v13 = vpop.f32.mrf.mxu0  ;;  %v6878_v20 = vpop.f32.mrf.mxu1 }
 0xf61   : > { %v6838_v5 = vadd.f32 %v6837_v13, %v6791_v43  ;;  %v6959_v7 = vpop.f32.mrf.mxu2 }
 0xf62   : > { %v7016_v57 = vpop.f32.mrf.mxu3 }
 0xf63   : > { %v11920_v35 = vadd.f32 %v6874_v62, %v6838_v5  ;;  %v7017_v63 = vadd.f32 %v7016_v57, %v6959_v7 }
 0xf68   : > { %v6841_v45 = vpop.f32.mrf.mxu0  ;;  %v7092_v42 = vpop.f32.mrf.mxu1 }
 0xf69   : > { %v6842_v4 = vadd.f32 %v6841_v45, %v6797_v25  ;;  %v6967_v39 = vpop.f32.mrf.mxu2 }
 0xf6a   : > { %v7020_v28 = vpop.f32.mrf.mxu3 }
 0xf6b   : > { %v11922_v55 = vadd.f32 %v6878_v20, %v6842_v4 }
 0xf70   : > { %v7050_v53 = vpop.f32.mrf.mxu0  ;;  %v7098_v43 = vpop.f32.mrf.mxu1 }
 0xf71   : > { %v7051_v40 = vadd.f32 %v7050_v53, %v7009_v59  ;;  %v7143_v18 = vpop.f32.mrf.mxu2 }
 0xf72   : > { %v7180_v32 = vpop.f32.mrf.mxu3 }
 0xf73   : > { %v7093_v44 = vadd.f32 %v7092_v42, %v7051_v40 }
 0xf75   : > { %v7144_v36 = vadd.f32 %v7143_v18, %v7093_v44 }
 0xf77   : > { %v7181_v8 = vadd.f32 %v7180_v32, %v7144_v36  ;;  %v7021_v32 = vadd.f32 %v7020_v28, %v6967_v39  ;;  %v3783_v28 = vadd.f32 %v10924_v3, %v10928_v48 }
 0xf78   : > { %v7055_v52 = vpop.f32.mrf.mxu0  ;;  %v7104_v45 = vpop.f32.mrf.mxu1 }
 0xf79   : > { %v11924_v37 = vmul.f32 0.25, %v7181_v8  ;;  %v7056_v62 = vadd.f32 %v7055_v52, %v7013_v26  ;;  %v7147_v25 = vpop.f32.mrf.mxu2 }
 0xf7a   : > { %v7184_v21 = vpop.f32.mrf.mxu3 }
 0xf7b   : > { %v7099_v13 = vadd.f32 %v7098_v43, %v7056_v62  ;;  %v7199_v5 = vsel %vm2110_vm1, %v11924_v37, -inf }
 0xf7c   : > { %7200 = vmax.xlane.f32.xlu2 %v7199_v5  ;;  %v3825_v5 = vadd.f32 %v10926_v17, %v3783_v28 }
 0xf7d   : > { %v7148_v51 = vadd.f32 %v7147_v25, %v7099_v13 }
 0xf7f   : > { %v7185_v20 = vadd.f32 %v7184_v21, %v7148_v51  ;;  %v3867_v51 = vadd.f32 %v10932_v23, %v3825_v5  ;;  %v12904_v5 = vld [vmem:[#allocation90_spill] sm:$0xff] }
 0xf80   : > { %v7060_v4 = vpop.f32.mrf.mxu0  ;;  %v7110_v57 = vpop.f32.mrf.mxu1 }
 0xf81   : > { %v11928_v42 = vmul.f32 0.25, %v7185_v20  ;;  %v7061_v49 = vadd.f32 %v7060_v4, %v7017_v63  ;;  %v7151_v54 = vpop.f32.mrf.mxu2  ;;  %v5239_v63 = vadd.f32 %v11421_v56, %v11425_v38  ;;  %v3055_v20 = vadd.f32 %v10668_v50, %v10670_v22  ;;  %v12886_v56 = vld [vmem:[#allocation84_spill] sm:$0xff]  ;;  %v12890_v38 = vld [vmem:[#allocation117_spill] sm:$0xff] }
 0xf82   : > { %v7188_v40 = vpop.f32.mrf.mxu3  ;;  %v12887_v50 = vld [vmem:[#allocation120_spill] sm:$0xff]  ;;  %v12891_v4 = vld [vmem:[#allocation57_spill] sm:$0xff] }
 0xf83   : > { %v7105_v59 = vadd.f32 %v7104_v45, %v7061_v49  ;;  %v7202_v53 = vsel %vm2110_vm1, %v11928_v42, -inf  ;;  %v3918_v45 = vadd.f32 %v10958_v24, %v3867_v51  ;;  %v5281_v3 = vadd.f32 %v11423_v27, %v5239_v63  ;;  %v12888_v24 = vld [vmem:[#allocation59_spill] sm:$0xff]  ;;  %v12905_v63 = vld [vmem:[#allocation69_spill] sm:$0xff] }
 0xf84   : > { %7203 = vmax.xlane.f32.xlu0 %v7202_v53  ;;  %v3097_v48 = vadd.f32 %v10672_v16, %v3055_v20  ;;  %v12889_v16 = vld [vmem:[#allocation85_spill] sm:$0xff]  ;;  %v5967_v53 = vadd.f32 %v11671_v10, %v11675_v15  ;;  %v12902_v10 = vld [vmem:[#allocation66_spill] sm:$0xff] }
 0xf85   : > { %v7152_v18 = vadd.f32 %v7151_v54, %v7105_v59  ;;  %v5323_v17 = vadd.f32 %v11429_v31, %v5281_v3  ;;  %v12893_v54 = vld [vmem:[#allocation46_spill] sm:$0xff] }
 0xf86   : > { %v3139_v23 = vadd.f32 %v10674_v11, %v3097_v48  ;;  %v12892_v11 = vld [vmem:[#allocation47_spill] sm:$0xff]  ;;  %v12907_v48 = vld [vmem:[#allocation137_spill] sm:$0xff] }
 0xf87   : > { %v7189_v44 = vadd.f32 %v7188_v40, %v7152_v18  ;;  %v5374_v22 = vadd.f32 %v12887_v50, %v5323_v17  ;;  %v3059_v59 = vadd.f32 %v12893_v54, %v12892_v11  ;;  %v12895_v40 = vld [vmem:[#allocation100_spill] sm:$0xff]  ;;  %v12917_v11 = vld [vmem:[#allocation51_spill] sm:$0xff]  ;;  %v12918_v54 = vld [vmem:[#allocation50_spill] sm:$0xff] }
 0xf88   : > { %v7065_v36 = vpop.f32.mrf.mxu0  ;;  %v3190_v27 = vadd.f32 %v12888_v24, %v3139_v23  ;;  %v12896_v18 = vld [vmem:[#allocation48_spill] sm:$0xff]  ;;  %v12909_v23 = vld [vmem:[#allocation70_spill] sm:$0xff]  ;;  %v12913_v24 = vld [vmem:[#allocation79_spill] sm:$0xff] }
 0xf89   : > { %v11932_v43 = vmul.f32 0.25, %v7189_v44  ;;  %v7066_v7 = vadd.f32 %v7065_v36, %v7021_v32  ;;  %v7155_v52 = vpop.f32.mrf.mxu2  ;;  %v5411_v31 = vadd.f32 %v12890_v38, %v5374_v22  ;;  %v3102_v32 = vadd.f32 %v12896_v18, %v3059_v59  ;;  %v12897_v36 = vld [vmem:[#allocation97_spill] sm:$0xff] }
 0xf8a   : > { %v7192_v25 = vpop.f32.mrf.mxu3  ;;  %v3227_v49 = vadd.f32 %v12891_v4, %v3190_v27  ;;  %v6009_v44 = vadd.f32 %v11673_v29, %v5967_v53  ;;  %v12915_v38 = vld [vmem:[#allocation101_spill] sm:$0xff]  ;;  %v12916_v4 = vld [vmem:[#allocation78_spill] sm:$0xff]  ;;  %v3063_v59 = vadd.f32 %v12918_v54, %v12917_v11 }
 0xf8b   : > { %v7111_v26 = vadd.f32 %v7110_v57, %v7066_v7  ;;  %v7205_v8 = vsel %vm2110_vm1, %v11932_v43, -inf  ;;  %v12898_v57 = vld [vmem:[#allocation49_spill] sm:$0xff] }
 0xf8c   : > { %7206 = vmax.xlane.f32.xlu1 %v7205_v8  ;;  %v12899_v8 = vld [vmem:[#allocation88_spill] sm:$0xff]  ;;  %v12922_v18 = vld [vmem:[#allocation141_spill] sm:$0xff] }
 0xf8d   : > { %v7156_v62 = vadd.f32 %v7155_v52, %v7111_v26  ;;  %v3145_v26 = vadd.f32 %v12898_v57, %v3102_v32  ;;  %v12900_v52 = vld [vmem:[#allocation86_spill] sm:$0xff] }
 0xf8f   : > { %v7193_v21 = vadd.f32 %v7192_v25, %v7156_v62  ;;  %v4515_v62 = vadd.f32 %v12900_v52, %v12899_v8  ;;  %v12901_v25 = vld [vmem:[#allocation67_spill] sm:$0xff]  ;;  %v12926_v52 = vld [vmem:[#allocation54_spill] sm:$0xff] }
 0xf90   : > { %v3787_v15 = vadd.f32 %v12902_v10, %v12901_v25  ;;  %v12927_v25 = vld [vmem:[#allocation112_spill] sm:$0xff]  ;;  %v12928_v10 = vld [vmem:[#allocation109_spill] sm:$0xff] }
 0xf91   : > { %v11936_v13 = vmul.f32 0.25, %v7193_v21  ;;  %v6051_v21 = vadd.f32 %v11679_v14, %v6009_v44  ;;  %v4558_v51 = vadd.f32 %v12904_v5, %v4515_v62  ;;  %v12923_v44 = vld [vmem:[#allocation52_spill] sm:$0xff] }
 0xf92   : > { %v3830_v20 = vadd.f32 %v12905_v63, %v3787_v15  ;;  %v5247_v15 = vadd.f32 %v12928_v10, %v12927_v25  ;;  %v12931_v5 = vld [vmem:[#allocation104_spill] sm:$0xff]  ;;  %v12932_v63 = vld [vmem:[#allocation114_spill] sm:$0xff] }
 0xf93   : > { %v7208_v39 = vsel %vm2110_vm1, %v11936_v13, -inf  ;;  %v6102_v29 = vadd.f32 %v11705_v12, %v6051_v21  ;;  %v12912_v12 = vld [vmem:[#allocation102_spill] sm:$0xff]  ;;  %v12929_v21 = vld [vmem:[#allocation95_spill] sm:$0xff] }
 0xf94   : > { %7209 = vmax.xlane.f32.xlu0 %v7208_v39  ;;  %7313 = vrot.lane.b32.xlu2 %v10238_v34, %s9009_s2  ;;  %v3955_v34 = vadd.f32 %v10952_v6, %v3918_v45  ;;  %v12903_v39 = vld [vmem:[#allocation61_spill] sm:$0xff]  ;;  %v12906_v45 = vld [vmem:[#allocation60_spill] sm:$0xff]  ;;  %v3873_v14 = vadd.f32 %v12909_v23, %v3830_v20  ;;  %v5291_v20 = vadd.f32 %v12932_v63, %v5247_v15 }
 0xf95   : > { %v3194_v28 = vadd.f32 %v12903_v39, %v3145_v26  ;;  %v12925_v26 = vld [vmem:[#allocation140_spill] sm:$0xff] }
 0xf96   : > { %v3922_v27 = vadd.f32 %v12913_v24, %v3873_v14  ;;  %v12937_v14 = vld [vmem:[#allocation115_spill] sm:$0xff] }
 0xf97   : > { %v3231_v3 = vadd.f32 %v12906_v45, %v3194_v28  ;;  %v12930_v28 = vld [vmem:[#allocation63_spill] sm:$0xff]  ;;  %v12933_v45 = vld [vmem:[#allocation62_spill] sm:$0xff] }
 0xf9c   : > { %7307 = vrot.lane.b32.xlu2 %v10230_v1, %s9009_s2  ;;  %v4511_v1 = vadd.f32 %v12886_v56, %v11169_v46  ;;  %v12894_v46 = vld [vmem:[#allocation87_spill] sm:$0xff]  ;;  %v12910_v56 = vld [vmem:[#allocation128_spill] sm:$0xff] }
 0xf9e   : > { %v4553_v6 = vadd.f32 %v12889_v16, %v4511_v1  ;;  %v12911_v1 = vld [vmem:[#allocation127_spill] sm:$0xff]  ;;  %v12914_v16 = vld [vmem:[#allocation130_spill] sm:$0xff] }
 0xf9f   : > { %v5971_v50 = vadd.f32 %v12911_v1, %v12910_v56  ;;  %v5335_v56 = vadd.f32 %v12937_v14, %v5291_v20  ;;  %v12947_v20 = vld [vmem:[#allocation24_spill] sm:$0xff] }
 0xfa4   : > { %7633 = vrot.lane.b32.xlu2 %v3955_v34, %s9008_s25  ;;  %v6139_v34 = vadd.f32 %v12907_v48, %v6102_v29  ;;  %v12934_v48 = vld [vmem:[#allocation103_spill] sm:$0xff] }
 0xfa5   : > { %7309 = vrot.lane.b32.xlu1 %v10226_v58, %s9009_s2  ;;  %v4595_v58 = vadd.f32 %v12894_v46, %v4553_v6  ;;  %v6014_v6 = vadd.f32 %v12914_v16, %v5971_v50  ;;  %v12919_v46 = vld [vmem:[#allocation92_spill] sm:$0xff]  ;;  %v12939_v50 = vld [vmem:[#allocation98_spill] sm:$0xff] }
 0xfa8   : > { %7311 = vrot.lane.b32.xlu0 %v10228_v47, %s9009_s2  ;;  %v4646_v47 = vadd.f32 %v12895_v40, %v4595_v58  ;;  %v12920_v58 = vld [vmem:[#allocation89_spill] sm:$0xff]  ;;  %v12921_v40 = vld [vmem:[#allocation131_spill] sm:$0xff] }
 0xfa9   : > { %v4519_v53 = vadd.f32 %v12920_v58, %v12919_v46 }
 0xfaa   : > { %v4683_v7 = vadd.f32 %v12897_v36, %v4646_v47  ;;  %v6057_v47 = vadd.f32 %v12921_v40, %v6014_v6  ;;  %v3107_v36 = vadd.f32 %v12923_v44, %v3063_v59  ;;  %v12942_v6 = vld [vmem:[#allocation106_spill] sm:$0xff] }
 0xfac   : > { %7665 = vrot.lane.b32.xlu2 %v5411_v31, %s9006_s4  ;;  %v6106_v32 = vadd.f32 %v12922_v18, %v6057_v47  ;;  %v3151_v62 = vadd.f32 %v12926_v52, %v3107_v36 }
 0xfad   : > { %7617 = vrot.lane.b32.xlu1 %v3227_v49, %s9009_s2  ;;  %v3959_v49 = vadd.f32 %v12916_v4, %v3922_v27  ;;  %v12941_v27 = vld [vmem:[#allocation99_spill] sm:$0xff] }
 0xfae   : > { %v6143_v8 = vadd.f32 %v12925_v26, %v6106_v32  ;;  %v3198_v29 = vadd.f32 %v12930_v28, %v3151_v62  ;;  %v12945_v28 = vld [vmem:[#allocation22_spill] sm:$0xff] }
 0xfb4   : > { %7697 = vrot.lane.b32.xlu2 %v11916_v60, %s9004_s13  ;;  %v12908_v60 = vld [vmem:[#allocation91_spill] sm:$0xff] }
 0xfb5   : > { %7649 = vrot.lane.b32.xlu1 %v4683_v7, %s9007_s29  ;;  %v4601_v17 = vadd.f32 %v12908_v60, %v4558_v51  ;;  %v12924_v7 = vld [vmem:[#allocation94_spill] sm:$0xff]  ;;  %v12935_v60 = vld [vmem:[#allocation96_spill] sm:$0xff] }
 0xfb6   : > { %v4563_v57 = vadd.f32 %v12924_v7, %v4519_v53 }
 0xfb7   : > { %v4650_v22 = vadd.f32 %v12912_v12, %v4601_v17  ;;  %v12936_v17 = vld [vmem:[#allocation93_spill] sm:$0xff] }
 0xfb8   : > { %v4607_v39 = vadd.f32 %v12929_v21, %v4563_v57  ;;  %v4523_v23 = vadd.f32 %v12936_v17, %v12935_v60  ;;  %v12944_v21 = vld [vmem:[#allocation146_spill] sm:$0xff] }
 0xfb9   : > { %v4687_v31 = vadd.f32 %v12915_v38, %v4650_v22  ;;  %v12940_v22 = vld [vmem:[#allocation123_spill] sm:$0xff] }
 0xfba   : > { %v4654_v51 = vadd.f32 %v12931_v5, %v4607_v39  ;;  %v4568_v12 = vadd.f32 %v12939_v50, %v4523_v23 }
 0xfbc   : > { %7619 = vrot.lane.b32.xlu2 %v3231_v3, %s9009_s2  ;;  %v3235_v3 = vadd.f32 %v12933_v45, %v3198_v29  ;;  %v4613_v16 = vadd.f32 %v12941_v27, %v4568_v12  ;;  %v12946_v29 = vld [vmem:[#allocation28_spill] sm:$0xff]  ;;  %v12952_v27 = vld [vmem:[#allocation110_spill] sm:$0xff] }
 0xfbd   : > { %7681 = vrot.lane.b32.xlu1 %v6139_v34, %s9005_s3  ;;  %v4691_v34 = vadd.f32 %v12934_v48, %v4654_v51  ;;  %v2323_v5 = vadd.f32 %v12946_v29, %v12945_v28  ;;  %v12948_v48 = vld [vmem:[#allocation108_spill] sm:$0xff]  ;;  %v12960_v28 = vld [vmem:[#allocation74_spill] sm:$0xff] }
 0xfbe   : > { %v4658_v38 = vadd.f32 %v12942_v6, %v4613_v16 }
 0xfbf   : > { %v2365_v45 = vadd.f32 %v12947_v20, %v2323_v5  ;;  %v12961_v5 = vld [vmem:[#allocation132_spill] sm:$0xff] }
 0xfc4   : > { %7651 = vrot.lane.b32.xlu2 %v4687_v31, %s9007_s29  ;;  %v12943_v31 = vld [vmem:[#allocation105_spill] sm:$0xff] }
 0xfc5   : > { %7635 = vrot.lane.b32.xlu1 %v3959_v49, %s9008_s25  ;;  %v4695_v4 = vadd.f32 %v12943_v31, %v4658_v38 }
 0xfcc   : > { %7699 = vrot.lane.b32.xlu2 %v11918_v61, %s9004_s13  ;;  %v12938_v61 = vld [vmem:[#allocation124_spill] sm:$0xff] }
 0xfcd   : > { %7683 = vrot.lane.b32.xlu1 %v6143_v8, %s9005_s3  ;;  %v5382_v1 = vadd.f32 %v12938_v61, %v5335_v56  ;;  %v12950_v61 = vld [vmem:[#allocation30_spill] sm:$0xff] }
 0xfcf   : > { %v5419_v24 = vadd.f32 %v12940_v22, %v5382_v1  ;;  %v2407_v1 = vadd.f32 %v12950_v61, %v2365_v45  ;;  %v12951_v22 = vld [vmem:[#allocation39_spill] sm:$0xff]  ;;  %v12964_v45 = vld [vmem:[#allocation134_spill] sm:$0xff] }
 0xfd0   : > { %v12968_v61 = vld [vmem:[#allocation135_spill] sm:$0xff] }
 0xfd4   : > { %7621 = vrot.lane.b32.xlu2 %v3235_v3, %s9009_s2 }
 0xfd5   : > { %7653 = vrot.lane.b32.xlu1 %v4691_v34, %s9007_s29  ;;  %v12949_v34 = vld [vmem:[#allocation107_spill] sm:$0xff] }
 0xfd6   : > { %v5243_v60 = vadd.f32 %v12949_v34, %v12948_v48  ;;  %v12965_v34 = vld [vmem:[#allocation80_spill] sm:$0xff] }
 0xfd8   : > { %v5286_v16 = vadd.f32 %v12952_v27, %v5243_v60  ;;  %v12972_v27 = vld [vmem:[#allocation58_spill] sm:$0xff] }
 0xfdc   : > { %7669 = vrot.lane.b32.xlu2 %v5419_v24, %s9006_s4  ;;  %v2458_v24 = vadd.f32 %v12951_v22, %v2407_v1 }
 0xfdd   : > { %7701 = vrot.lane.b32.xlu1 %v11920_v35, %s9004_s13 }
 0xfe4   : > { %7655 = vrot.lane.b32.xlu2 %v4695_v4, %s9007_s29 }
 0xfef   : > { %v7201_v49 = vpop.xlane.xlu2 %7200 }
 0xff0   : > { %v7211_v11 = vsub.f32 %v11924_v37, %v7201_v49 }
 0xff2   : > { %v7215_v54 = vmul.f32 1.442695, %v7211_v11 }
 0xff4   : > { %8706 = vpow2.f32 %v7215_v54  ;;  %v12953_v54 = vld [vmem:[#allocation36_spill] sm:$0xff] }
 0xff7   : > { %v7204_v59 = vpop.xlane.xlu0 %7203  ;;  %v7314_v46 = vpop.permute.xlu2 %7313 }
 0xff8   : > { %v7212_v58 = vsub.f32 %v11928_v42, %v7204_v59  ;;  %v12047_v53 = vand.u32 4294901760, %v7314_v46  ;;  %v2495_v59 = vadd.f32 %v12953_v54, %v2458_v24  ;;  %v12971_v24 = vld [vmem:[#allocation142_spill] sm:$0xff] }
 0xffa   : > { %v8707_v40 = vpop.eup %8706  ;;  %v7217_v47 = vmul.f32 1.442695, %v7212_v58  ;;  %v12050_v35 = vsub.f32 %v7314_v46, %v12047_v53  ;;  %7344 = vmatpush.msrb.mxu0 %v12047_v53  ;;  %7495 = vmatpush.msrb.mxu3 %v12047_v53  ;;  %v12954_v46 = vld [vmem:[#allocation71_spill] sm:$0xff]  ;;  %v12955_v58 = vld [vmem:[#allocation68_spill] sm:$0xff] }
 0xffb   : > { %v12055_v18 = vmul.f32 %v11748_v2, %v8707_v40  ;;  %v3791_v40 = vadd.f32 %v12955_v58, %v12954_v46  ;;  %v12979_v58 = vld [vmem:[#allocation126_spill] sm:$0xff] }
 0xffc   : > { %8708 = vpow2.f32 %v7217_v47  ;;  %v7398_v37 = vand.u32 4294901760, %v12050_v35  ;;  %7451 = vmatpush.msrb.mxu2 %v12050_v35  ;;  %v12956_v47 = vld [vmem:[#allocation111_spill] sm:$0xff] }
 0xffd   : > { %v7231_v42 = vsel %vm2110_vm1, %v12055_v18, 0.0 }
 0xffe   : > { %v7399_v32 = vsub.f32 %v12050_v35, %v7398_v37  ;;  %7232 = vadd.xlane.f32.xlu0 %v7231_v42  ;;  %v5329_v35 = vadd.f32 %v12956_v47, %v5286_v16  ;;  %v12980_v47 = vld [vmem:[#allocation125_spill] sm:$0xff] }
 0xfff   : > { %v7207_v44 = vpop.xlane.xlu1 %7206  ;;  %v7308_v51 = vpop.permute.xlu2 %7307 }
0x1000   : > { %v7400_v36 = vand.u32 4294901760, %v7399_v32  ;;  %v7213_v7 = vsub.f32 %v11932_v43, %v7207_v44  ;;  %v12081_v63 = vand.u32 4294901760, %v7308_v51  ;;  %v12957_v44 = vld [vmem:[#allocation122_spill] sm:$0xff] }
0x1002   : > { %v8709_v57 = vpop.eup %8708  ;;  %v7219_v26 = vmul.f32 1.442695, %v7213_v7  ;;  %7401 = vmatpush.msrb.mxu1 %v7400_v36  ;;  %v7415_v14 = vsub.f32 %v7308_v51, %v12081_v63  ;;  %v5378_v36 = vadd.f32 %v12957_v44, %v5329_v35  ;;  %v12962_v51 = vld [vmem:[#allocation129_spill] sm:$0xff] }
0x1003   : > { %v12064_v2 = vmul.f32 %v11756_v9, %v8709_v57 }
0x1004   : > { %8710 = vpow2.f32 %v7219_v26  ;;  %v7416_v4 = vand.u32 4294901760, %v7415_v14  ;;  %v12958_v26 = vld [vmem:[#allocation73_spill] sm:$0xff] }
0x1005   : > { %v7234_v8 = vsel %vm2110_vm1, %v12064_v2, 0.0 }
0x1006   : > { %7235 = vadd.xlane.f32.xlu0 %v7234_v8  ;;  %v7417_v32 = vsub.f32 %v7415_v14, %v7416_v4  ;;  %v3835_v8 = vadd.f32 %v12958_v26, %v3791_v40 }
0x1007   : > { %v7210_v52 = vpop.xlane.xlu0 %7209  ;;  %v7634_v6 = vpop.permute.xlu2 %7633 }
0x1008   : > { %v7214_v62 = vsub.f32 %v11936_v13, %v7210_v52  ;;  %v3879_v29 = vadd.f32 %v12960_v28, %v3835_v8  ;;  %v7227_v28 = vadd.f32 3.125e-08, %v12055_v18 }
0x100a   : > { %v8711_v25 = vpop.eup %8710  ;;  %v7221_v10 = vmul.f32 1.442695, %v7214_v62 }
0x100b   : > { %v12070_v15 = vmul.f32 %v11769_v19, %v8711_v25  ;;  %v12959_v25 = vld [vmem:[#allocation121_spill] sm:$0xff] }
0x100c   : > { %8712 = vpow2.f32 %v7221_v10  ;;  %v5415_v10 = vadd.f32 %v12959_v25, %v5378_v36 }
0x100d   : > { %v7237_v43 = vsel %vm2110_vm1, %v12070_v15, 0.0 }
0x100e   : > { %7238 = vadd.xlane.f32.xlu0 %v7237_v43 }
0x100f   : > { %v7666_v43 = vpop.permute.xlu2 %7665 }
0x1012   : > { %v8713_v9 = vpop.eup %8712 }
0x1013   : > { %v12075_v39 = vmul.f32 %v12944_v21, %v8713_v9 }
0x1015   : > { %v7240_v13 = vsel %vm2110_vm1, %v12075_v39, 0.0 }
0x1016   : > { %7241 = vadd.xlane.f32.xlu0 %v7240_v13  ;;  %v5975_v13 = vadd.f32 %v12962_v51, %v12961_v5 }
0x1017   : > { %v7310_v19 = vpop.permute.xlu1 %7309 }
0x1018   : > { %v7347_v3 = vand.u32 4294901760, %v7310_v19  ;;  %v6019_v48 = vadd.f32 %v12964_v45, %v5975_v13 }
0x101a   : > { %v7409_v17 = vsub.f32 %v7310_v19, %v7347_v3  ;;  %v7312_v23 = vpop.permute.xlu0 %7311  ;;  %v12963_v19 = vld [vmem:[#allocation81_spill] sm:$0xff]  ;;  %v6063_v1 = vadd.f32 %v12968_v61, %v6019_v48 }
0x101b   : > { %v7345_v56 = vand.u32 4294901760, %v7312_v23  ;;  %v3926_v20 = vadd.f32 %v12963_v19, %v3879_v29 }
0x101c   : > { %v7410_v12 = vand.u32 4294901760, %v7409_v17 }
0x101d   : > { %v7403_v50 = vsub.f32 %v7312_v23, %v7345_v56  ;;  %7346 = vmatpush.msrb.mxu0 %v7345_v56  ;;  %7497 = vmatpush.msrb.mxu3 %v7345_v56  ;;  %v3963_v60 = vadd.f32 %v12965_v34, %v3926_v20  ;;  %v12967_v23 = vld [vmem:[#allocation53_spill] sm:$0xff] }
0x101e   : > { %v7411_v11 = vsub.f32 %v7409_v17, %v7410_v12 }
0x101f   : > { %v7618_v38 = vpop.permute.xlu1 %7617  ;;  %7348 = vmatpush.msrb.mxu0 %v7347_v3  ;;  %7454 = vmatpush.msrb.mxu2 %v7403_v50  ;;  %v7404_v31 = vand.u32 4294901760, %v7403_v50 }
0x1020   : > { %7499 = vmatpush.msrb.mxu3 %v7347_v3  ;;  %v7725_v7 = vsel %vm1803_vm0, %v2495_v59, %v7618_v38  ;;  %v7412_v57 = vand.u32 4294901760, %v7411_v11  ;;  %v12977_v11 = vld [vmem:[#allocation64_spill] sm:$0xff]  ;;  %v12978_v59 = vld [vmem:[#allocation119_spill] sm:$0xff] }
0x1021   : > { %7350 = vmatpush.msrb.mxu0 %v12081_v63  ;;  %7457 = vmatpush.msrb.mxu2 %v7409_v17  ;;  %v7405_v49 = vsub.f32 %v7403_v50, %v7404_v31  ;;  %v7729_v62 = vsel %vm2110_vm1, %v7725_v7, %v7634_v6  ;;  %v12966_v17 = vld [vmem:[#allocation55_spill] sm:$0xff]  ;;  %v12974_v6 = vld [vmem:[#allocation113_spill] sm:$0xff] }
0x1022   : > { %7501 = vmatpush.msrb.mxu3 %v12081_v63 }
0x1023   : > { %7542 = vmatpush.msra.mxu0 %v7398_v37  ;;  %7460 = vmatpush.msrb.mxu2 %v7415_v14  ;;  %v7406_v42 = vand.u32 4294901760, %v7405_v49  ;;  %v7418_v37 = vand.u32 4294901760, %v7417_v32  ;;  %v3067_v14 = vadd.f32 %v12967_v23, %v12966_v17 }
0x1025   : > { %7546 = vmatpush.msra.mxu0 %v7404_v31  ;;  %7407 = vmatpush.msrb.mxu1 %v7406_v42 }
0x1027   : > { %7550 = vmatpush.msra.mxu0 %v7410_v12  ;;  %v7650_v52 = vpop.permute.xlu1 %7649  ;;  %7413 = vmatpush.msrb.mxu1 %v7412_v57  ;;  %v12970_v12 = vld [vmem:[#allocation56_spill] sm:$0xff] }
0x1028   : > { %v7734_v9 = vsel %vm7733_vm2, %v7729_v62, %v7650_v52  ;;  %v3112_v22 = vadd.f32 %v12970_v12, %v3067_v14 }
0x1029   : > { %7554 = vmatpush.msra.mxu0 %v7416_v4  ;;  %7419 = vmatpush.msrb.mxu1 %v7418_v37  ;;  %v12103_v21 = vsel %vm7738_vm3, %v7734_v9, %v7666_v43  ;;  %v12976_v4 = vld [vmem:[#allocation118_spill] sm:$0xff] }
0x102a   : > { %7667 = vrot.lane.b32.xlu0 %v5415_v10, %s9006_s4  ;;  %v3157_v16 = vadd.f32 %v12972_v27, %v3112_v22  ;;  %v7228_v22 = vadd.f32 3.125e-08, %v12064_v2 }
0x102b   : > { %7585 = vmatpush.msra.mxu1 %v12047_v53  ;;  %v12969_v53 = vld [vmem:[#allocation143_spill] sm:$0xff] }
0x102c   : > { %v6110_v50 = vadd.f32 %v12969_v53, %v6063_v1 }
0x102d   : > { %7587 = vmatpush.msra.mxu1 %v7345_v56 }
0x102e   : > { %v6147_v56 = vadd.f32 %v12971_v24, %v6110_v50 }
0x102f   : > { %7589 = vmatpush.msra.mxu1 %v7347_v3  ;;  %v12973_v3 = vld [vmem:[#allocation116_spill] sm:$0xff] }
0x1030   : > { %v5251_v38 = vadd.f32 %v12974_v6, %v12973_v3 }
0x1031   : > { %7591 = vmatpush.msra.mxu1 %v12081_v63  ;;  %v12975_v63 = vld [vmem:[#allocation65_spill] sm:$0xff] }
0x1032   : > { %7637 = vrot.lane.b32.xlu0 %v3963_v60, %s9008_s25  ;;  %v3202_v31 = vadd.f32 %v12975_v63, %v3157_v16  ;;  %v5296_v49 = vadd.f32 %v12976_v4, %v5251_v38 }
0x1034   : > { %v3239_v54 = vadd.f32 %v12977_v11, %v3202_v31  ;;  %v5341_v46 = vadd.f32 %v12978_v59, %v5296_v49 }
0x1036   : > { %v5386_v40 = vadd.f32 %v12979_v58, %v5341_v46 }
0x1038   : > { %v5423_v35 = vadd.f32 %v12980_v47, %v5386_v40 }
0x103a   : > { %7685 = vrot.lane.b32.xlu0 %v6147_v56, %s9005_s3 }
0x1042   : > { %7623 = vrot.lane.b32.xlu0 %v3239_v54, %s9009_s2  ;;  %v7229_v54 = vadd.f32 3.125e-08, %v12070_v15 }
0x104a   : > { %7671 = vrot.lane.b32.xlu0 %v5423_v35, %s9006_s4 }
0x1071   : > { %v7233_v42 = vpop.xlane.xlu0 %7232 }
0x1072   : > { %v7243_v32 = vadd.f32 1e-06, %v7233_v42 }
0x1074   : > { %8714 = vrcp.f32 %v7243_v32  ;;  %v7258_v8 = vand.u32 2147483648, %v7243_v32  ;;  %v7256_v62 = vand.u32 2147483647, %v7243_v32  ;;  %vm7252_vm5 = vweird.f32 %v7243_v32 }
0x1076   : > { %v7259_v43 = vor.u32 1.1754944e-38, %v7258_v8  ;;  %vm7257_vm7 = vcmp.eq.f32.partialorder %v7256_v62, 8.507059e+37 }
0x1079   : > { %v7236_v44 = vpop.xlane.xlu0 %7235 }
0x107a   : > { %v8715_v36 = vpop.eup %8714  ;;  %v7244_v7 = vadd.f32 1e-06, %v7236_v44 }
0x107b   : > { %v7248_v57 = vmul.f32 %v8715_v36, %v7243_v32  ;;  %vm7253_vm4 = vweird.f32 %v8715_v36 }
0x107c   : > { %8716 = vrcp.f32 %v7244_v7  ;;  %vm7254_vm6 = vmor %vm7252_vm5, %vm7253_vm4  ;;  %v7273_v20 = vand.u32 2147483648, %v7244_v7  ;;  %v7271_v60 = vand.u32 2147483647, %v7244_v7  ;;  %vm7267_vm9 = vweird.f32 %v7244_v7 }
0x107d   : > { %v7249_v26 = vsub.f32 1.0, %v7248_v57 }
0x107e   : > { %v7274_v53 = vor.u32 1.1754944e-38, %v7273_v20  ;;  %vm7272_vm11 = vcmp.eq.f32.partialorder %v7271_v60, 8.507059e+37 }
0x107f   : > { %v7250_v52 = vmul.f32 %v8715_v36, %v7249_v26 }
0x1081   : > { %v7251_v37 = vadd.f32 %v8715_v36, %v7250_v52  ;;  %v7239_v25 = vpop.xlane.xlu0 %7238 }
0x1082   : > { %v8717_v10 = vpop.eup %8716  ;;  %v7245_v9 = vadd.f32 1e-06, %v7239_v25  ;;  %v7230_v25 = vadd.f32 3.125e-08, %v12075_v39 }
0x1083   : > { %v7255_v29 = vsel %vm7254_vm6, %v8715_v36, %v7251_v37  ;;  %v7263_v5 = vmul.f32 %v8717_v10, %v7244_v7  ;;  %vm7268_vm8 = vweird.f32 %v8717_v10 }
0x1084   : > { %v7260_v51 = vsel %vm7257_vm7, %v7259_v43, %v7255_v29  ;;  %8718 = vrcp.f32 %v7245_v9  ;;  %vm7269_vm10 = vmor %vm7267_vm9, %vm7268_vm8  ;;  %v7288_v27 = vand.u32 2147483648, %v7245_v9  ;;  %v7286_v6 = vand.u32 2147483647, %v7245_v9 }
0x1085   : > { %v7264_v13 = vsub.f32 1.0, %v7263_v5  ;;  %v7261_v19 = vmul.f32 %v7260_v51, %v7227_v28  ;;  %vm7282_vm13 = vweird.f32 %v7245_v9  ;;  %vm7743_vm8 = vcmask 654336  }
0x1086   : > { %v7289_v59 = vor.u32 1.1754944e-38, %v7288_v27  ;;  %vm7287_vm15 = vcmp.eq.f32.partialorder %v7286_v6, 8.507059e+37  ;;  %v12981_v27 = vld [vmem:[#allocation75_spill] sm:$0xff]  ;;  %vm7748_vm9 = vcmask 785408  }
0x1087   : > { %v7265_v45 = vmul.f32 %v8717_v10, %v7264_v13  ;;  %v7320_v48 = vsel %vm2110_vm1, %v7261_v19, 0  ;;  %v12136_v34 = vadd.f32 %v7261_v19, %v11844_v33 }
0x1088   : > { %v12138_v17 = vand.u32 4294901760, %v7320_v48 }
0x1089   : > { %v7266_v23 = vadd.f32 %v8717_v10, %v7265_v45  ;;  %v7242_v18 = vpop.xlane.xlu0 %7241 }
0x108a   : > { %v8719_v14 = vpop.eup %8718  ;;  %v7246_v61 = vadd.f32 1e-06, %v7242_v18  ;;  %7421 = vmatmul.f32.vlgmr.msrb.gmra.mxu1 %v12138_v17  ;;  %v7352_v1 = vsub.f32 %v7320_v48, %v12138_v17 }
0x108b   : > { %v7278_v50 = vmul.f32 %v8719_v14, %v7245_v9  ;;  %v7270_v12 = vsel %vm7269_vm10, %v8717_v10, %v7266_v23  ;;  %vm7283_vm12 = vweird.f32 %v8719_v14  ;;  %vm7753_vm10 = vcmask 916480  }
0x108c   : > { %8720 = vrcp.f32 %v7246_v61  ;;  %7463 = vmatmul.f32.vlgmr.msrb.gmra.mxu2 %v7352_v1  ;;  %v7353_v24 = vand.u32 4294901760, %v7352_v1  ;;  %v7275_v56 = vsel %vm7272_vm11, %v7274_v53, %v7270_v12  ;;  %vm7284_vm14 = vmor %vm7282_vm13, %vm7283_vm12  ;;  %v7301_v32 = vand.u32 2147483647, %v7246_v61 }
0x108d   : > { %v7279_v33 = vsub.f32 1.0, %v7278_v50  ;;  %v7276_v16 = vmul.f32 %v7275_v56, %v7228_v22  ;;  %v7303_v44 = vand.u32 2147483648, %v7246_v61  ;;  %vm7297_vm5 = vweird.f32 %v7246_v61 }
0x108e   : > { %7505 = vmatmul.f32.vlgmr.msrb.gmra.mxu3 %v7353_v24  ;;  %v7354_v38 = vsub.f32 %v7352_v1, %v7353_v24  ;;  %vm7302_vm7 = vcmp.eq.f32.partialorder %v7301_v32, 8.507059e+37  ;;  %vm8240_vm11 = vcmask 252928  }
0x108f   : > { %v7280_v3 = vmul.f32 %v8719_v14, %v7279_v33  ;;  %v7323_v63 = vsel %vm2110_vm1, %v7276_v16, 0  ;;  %v12145_v31 = vadd.f32 %v7276_v16, %v11861_v0  ;;  %v7304_v62 = vor.u32 1.1754944e-38, %v7303_v44  ;;  %v12982_v16 = vld [vmem:[#allocation72_spill] sm:$0xff] }
0x1090   : > { %v7355_v2 = vand.u32 4294901760, %v7354_v38  ;;  %v7359_v49 = vand.u32 4294901760, %v7323_v63 }
0x1091   : > { %v7281_v4 = vadd.f32 %v8719_v14, %v7280_v3  ;;  %v3795_v3 = vadd.f32 %v12982_v16, %v12981_v27 }
0x1092   : > { %v8721_v11 = vpop.eup %8720  ;;  %7356 = vmatmul.f32.vlgmr.msrb.gmra.mxu0 %v7355_v2  ;;  %7425 = vmatmul.f32.gmra.mxu1 %v7359_v49  ;;  %v7360_v58 = vsub.f32 %v7323_v63, %v7359_v49 }
0x1093   : > { %v7293_v46 = vmul.f32 %v8721_v11, %v7246_v61  ;;  %v7285_v40 = vsel %vm7284_vm14, %v8719_v14, %v7281_v4  ;;  %vm7298_vm4 = vweird.f32 %v8721_v11 }
0x1094   : > { %v7290_v47 = vsel %vm7287_vm15, %v7289_v59, %v7285_v40  ;;  %7468 = vmatmul.f32.gmra.mxu2 %v7360_v58  ;;  %v7361_v0 = vand.u32 4294901760, %v7360_v58  ;;  %vm7299_vm6 = vmor %vm7297_vm5, %vm7298_vm4  ;;  %v12984_v40 = vld [vmem:[#allocation77_spill] sm:$0xff] }
0x1095   : > { %v7294_v35 = vsub.f32 1.0, %v7293_v46  ;;  %v7291_v42 = vmul.f32 %v7290_v47, %v7229_v54 }
0x1096   : > { %7511 = vmatmul.f32.gmra.mxu3 %v7361_v0  ;;  %v7362_v7 = vsub.f32 %v7360_v58, %v7361_v0 }
0x1097   : > { %v7295_v36 = vmul.f32 %v8721_v11, %v7294_v35  ;;  %v7326_v15 = vsel %vm2110_vm1, %v7291_v42, 0  ;;  %v12150_v57 = vadd.f32 %v7291_v42, %v11881_v41  ;;  %v12985_v42 = vld [vmem:[#allocation83_spill] sm:$0xff] }
0x1098   : > { %v7367_v26 = vand.u32 4294901760, %v7326_v15  ;;  %v7363_v52 = vand.u32 4294901760, %v7362_v7  ;;  %v12986_v7 = vld [vmem:[#allocation136_spill] sm:$0xff] }
0x1099   : > { %v7296_v8 = vadd.f32 %v8721_v11, %v7295_v36 }
0x109a   : > { %v7368_v37 = vsub.f32 %v7326_v15, %v7367_v26  ;;  %7364 = vmatmul.f32.gmra.mxu0 %v7363_v52  ;;  %7429 = vmatmul.f32.gmra.mxu1 %v7367_v26  ;;  %v12987_v15 = vld [vmem:[#allocation133_spill] sm:$0xff]  ;;  %v12988_v52 = vld [vmem:[#allocation82_spill] sm:$0xff] }
0x109b   : > { %v7300_v10 = vsel %vm7299_vm6, %v8721_v11, %v7296_v8 }
0x109c   : > { %v7369_v43 = vand.u32 4294901760, %v7368_v37  ;;  %v7305_v9 = vsel %vm7302_vm7, %v7304_v62, %v7300_v10  ;;  %7473 = vmatmul.f32.gmra.mxu2 %v7368_v37  ;;  %v7772_v10 = vld [vmem:[#allocation10 + $0x70] sm:$0xff] }
0x109d   : > { %v7306_v28 = vmul.f32 %v7305_v9, %v7230_v25  ;;  %v7773_v25 = vld [vmem:[#allocation10 + $0x78] sm:$0xff] }
0x109e   : > { %v7370_v29 = vsub.f32 %v7368_v37, %v7369_v43  ;;  %7517 = vmatmul.f32.gmra.mxu3 %v7369_v43  ;;  %v7771_v43 = vld [vmem:[#allocation10 + $0x68] sm:$0xff] }
0x109f   : > { %v7329_v41 = vsel %vm2110_vm1, %v7306_v28, 0  ;;  %v12155_v5 = vadd.f32 %v7306_v28, %v11903_v30  ;;  %v12169_v28 = vand.u32 4294901760, %v7773_v25 }
0x10a0   : > { %v7371_v51 = vand.u32 4294901760, %v7370_v29  ;;  %v7375_v13 = vand.u32 4294901760, %v7329_v41  ;;  %v12171_v29 = vand.u32 4294901760, %v7772_v10 }
0x10a1   : > { %8026 = vmatpush.msrb.mxu1 %v12169_v28  ;;  %7779 = vmatpush.msra.mxu2 %v12169_v28 }
0x10a2   : > { %v7376_v19 = vsub.f32 %v7329_v41, %v7375_v13  ;;  %7372 = vmatmul.f32.gmra.mxu0 %v7371_v51  ;;  %7433 = vmatmul.f32.gmra.mxu1 %v7375_v13  ;;  %v12173_v41 = vand.u32 4294901760, %v7771_v43  ;;  %v7770_v51 = vld [vmem:[#allocation10 + $0x60] sm:$0xff] }
0x10a3   : > { %8028 = vmatpush.msrb.mxu1 %v12171_v29  ;;  %7781 = vmatpush.msra.mxu2 %v12171_v29 }
0x10a4   : > { %v7377_v39 = vand.u32 4294901760, %v7376_v19  ;;  %7478 = vmatmul.f32.gmra.mxu2 %v7376_v19 }
0x10a5   : > { %8030 = vmatpush.msrb.mxu1 %v12173_v41  ;;  %7783 = vmatpush.msra.mxu2 %v12173_v41 }
0x10a6   : > { %v7378_v20 = vsub.f32 %v7376_v19, %v7377_v39  ;;  %7523 = vmatmul.f32.gmra.mxu3 %v7377_v39  ;;  %v7768_v19 = vld [vmem:[#allocation10 + $0x50] sm:$0xff]  ;;  %v12989_v39 = vld [vmem:[#allocation138_spill] sm:$0xff] }
0x10a8   : > { %v7379_v45 = vand.u32 4294901760, %v7378_v20 }
0x10aa   : > { %7380 = vmatmul.f32.gmra.mxu0 %v7379_v45  ;;  %7593 = vmatmul.f32.vlgmr.msra.gmra.mxu1 %v12138_v17 }
0x10b2   : > { %7556 = vmatmul.f32.vlgmr.msra.gmra.mxu0 %v12138_v17  ;;  %7597 = vmatmul.f32.gmra.mxu1 %v7359_v49 }
0x10ba   : > { %7560 = vmatmul.f32.gmra.mxu0 %v7359_v49  ;;  %7601 = vmatmul.f32.gmra.mxu1 %v7367_v26  ;;  %v12983_v49 = vld [vmem:[#allocation76_spill] sm:$0xff] }
0x10bb   : > { %v3840_v11 = vadd.f32 %v12983_v49, %v3795_v3 }
0x10bd   : > { %v3885_v47 = vadd.f32 %v12984_v40, %v3840_v11  ;;  %v7765_v40 = vld [vmem:[#allocation10 + $0x38] sm:$0xff] }
0x10bf   : > { %v3930_v32 = vadd.f32 %v12985_v42, %v3885_v47  ;;  %v7764_v47 = vld [vmem:[#allocation10 + $0x30] sm:$0xff] }
0x10c1   : > { %v3967_v62 = vadd.f32 %v12988_v52, %v3930_v32  ;;  %v12243_v52 = vand.u32 4294901760, %v7765_v40 }
0x10c2   : > { %7564 = vmatmul.f32.gmra.mxu0 %v7367_v26  ;;  %7605 = vmatmul.f32.gmra.mxu1 %v7375_v13  ;;  %v5979_v26 = vadd.f32 %v12987_v15, %v12986_v7 }
0x10c4   : > { %v6024_v20 = vadd.f32 %v12989_v39, %v5979_v26 }
0x10ca   : > { %7568 = vmatmul.f32.gmra.mxu0 %v7375_v13  ;;  %v7769_v13 = vld [vmem:[#allocation10 + $0x58] sm:$0xff] }
0x1107   : > { %v7422_v30 = vpop.f32.mrf.mxu1 }
0x110f   : > { %v7357_v48 = vpop.f32.mrf.mxu0  ;;  %v7426_v60 = vpop.f32.mrf.mxu1 }
0x1110   : > { %v7464_v1 = vpop.f32.mrf.mxu2  ;;  %v7423_v53 = vadd.f32 %v7422_v30, %v7357_v48  ;;  %v12176_v48 = vand.u32 4294901760, %v7770_v51 }
0x1111   : > { %v7506_v50 = vpop.f32.mrf.mxu3 }
0x1112   : > { %v7465_v22 = vadd.f32 %v7464_v1, %v7423_v53  ;;  %v12183_v1 = vsub.f32 %v7773_v25, %v12169_v28  ;;  %v12186_v53 = vsub.f32 %v7772_v10, %v12171_v29  ;;  %8032 = vmatpush.msrb.mxu1 %v12176_v48  ;;  %7785 = vmatpush.msra.mxu2 %v12176_v48 }
0x1114   : > { %v7507_v24 = vadd.f32 %v7506_v50, %v7465_v22  ;;  %v12189_v50 = vsub.f32 %v7771_v43, %v12173_v41  ;;  %v12193_v22 = vsub.f32 %v7770_v51, %v12176_v48  ;;  %v7845_v27 = vand.u32 4294901760, %v12183_v1  ;;  %7958 = vmatpush.msrb.mxu0 %v12183_v1 }
0x1115   : > { %v7851_v16 = vand.u32 4294901760, %v12186_v53 }
0x1116   : > { %v7857_v3 = vand.u32 4294901760, %v12189_v50  ;;  %7961 = vmatpush.msrb.mxu0 %v12186_v53 }
0x1117   : > { %v7365_v23 = vpop.f32.mrf.mxu0  ;;  %v7430_v18 = vpop.f32.mrf.mxu1  ;;  %v7852_v49 = vsub.f32 %v12186_v53, %v7851_v16 }
0x1118   : > { %v7469_v17 = vpop.f32.mrf.mxu2  ;;  %v7427_v56 = vadd.f32 %v7426_v60, %v7365_v23  ;;  %v12178_v60 = vand.u32 4294901760, %v7769_v13  ;;  %v12180_v23 = vand.u32 4294901760, %v7768_v19  ;;  %7964 = vmatpush.msrb.mxu0 %v12189_v50  ;;  %v7668_v53 = vpop.permute.xlu0 %7667 }
0x1119   : > { %v7512_v63 = vpop.f32.mrf.mxu3 }
0x111a   : > { %v7470_v4 = vadd.f32 %v7469_v17, %v7427_v56  ;;  %7967 = vmatpush.msrb.mxu0 %v12193_v22  ;;  %8034 = vmatpush.msrb.mxu1 %v12178_v60 }
0x111b   : > { %7787 = vmatpush.msra.mxu2 %v12178_v60 }
0x111c   : > { %v7513_v59 = vadd.f32 %v7512_v63, %v7470_v4  ;;  %v12990_v63 = vld [vmem:[#allocation139_spill] sm:$0xff]  ;;  %8036 = vmatpush.msrb.mxu1 %v12180_v23 }
0x111d   : > { %v6069_v4 = vadd.f32 %v12990_v63, %v6024_v20  ;;  %7789 = vmatpush.msra.mxu2 %v12180_v23 }
0x111f   : > { %v7373_v14 = vpop.f32.mrf.mxu0  ;;  %v7434_v61 = vpop.f32.mrf.mxu1 }
0x1120   : > { %v7431_v46 = vadd.f32 %v7430_v18, %v7373_v14  ;;  %v7474_v58 = vpop.f32.mrf.mxu2  ;;  %v7767_v18 = vld [vmem:[#allocation10 + $0x48] sm:$0xff] }
0x1121   : > { %v7518_v8 = vpop.f32.mrf.mxu3  ;;  %v12199_v17 = vand.u32 4294901760, %v7767_v18 }
0x1122   : > { %v7475_v44 = vadd.f32 %v7474_v58, %v7431_v46 }
0x1123   : > { %v12229_v58 = vsub.f32 %v7767_v18, %v12199_v17  ;;  %8038 = vmatpush.msrb.mxu1 %v12199_v17  ;;  %7791 = vmatpush.msra.mxu2 %v12199_v17 }
0x1124   : > { %v7519_v9 = vadd.f32 %v7518_v8, %v7475_v44  ;;  %v7853_v44 = vand.u32 4294901760, %v7852_v49  ;;  %v8216_v49 = vmul.f32 0.125, %v12136_v34 }
0x1125   : > { %v7881_v43 = vand.u32 4294901760, %v12229_v58 }
0x1127   : > { %v7381_v12 = vpop.f32.mrf.mxu0  ;;  %v7594_v33 = vpop.f32.mrf.mxu1 }
0x1128   : > { %v7435_v37 = vadd.f32 %v7434_v61, %v7381_v12  ;;  %v7479_v14 = vpop.f32.mrf.mxu2 }
0x112a   : > { %v7480_v12 = vadd.f32 %v7479_v14, %v7435_v37  ;;  %v7882_v14 = vsub.f32 %v12229_v58, %v7881_v43 }
0x112f   : > { %v7557_v6 = vpop.f32.mrf.mxu0  ;;  %v7598_v54 = vpop.f32.mrf.mxu1 }
0x1130   : > { %v7558_v38 = vadd.f32 %v7557_v6, %v7507_v24  ;;  %v7766_v24 = vld [vmem:[#allocation10 + $0x40] sm:$0xff]  ;;  %v7863_v6 = vand.u32 4294901760, %v12193_v22 }
0x1131   : > { %v12220_v11 = vand.u32 4294901760, %v7766_v24 }
0x1132   : > { %v7595_v2 = vadd.f32 %v7594_v33, %v7558_v38  ;;  %v12197_v33 = vsub.f32 %v7769_v13, %v12178_v60  ;;  %v12209_v38 = vsub.f32 %v7768_v19, %v12180_v23  ;;  %v7864_v7 = vsub.f32 %v12193_v22, %v7863_v6  ;;  %v12996_v22 = vld [vmem:[#allocation26_spill] sm:$0xff] }
0x1133   : > { %v12240_v26 = vsub.f32 %v7766_v24, %v12220_v11  ;;  %v12256_v19 = vsub.f32 %v7765_v40, %v12243_v52  ;;  %8040 = vmatpush.msrb.mxu1 %v12220_v11  ;;  %7793 = vmatpush.msra.mxu2 %v12220_v11  ;;  %v8225_v40 = vmul.f32 0.125, %v12155_v5  ;;  %v7761_v5 = vld [vmem:[#allocation10 + $0x18] sm:$0xff] }
0x1134   : > { %7713 = vrot.lane.b32.xlu1 %v7595_v2, %s9003_s11  ;;  %v7846_v2 = vsub.f32 %v12183_v1, %v7845_v27  ;;  %v7869_v46 = vand.u32 4294901760, %v12197_v33  ;;  %v7875_v15 = vand.u32 4294901760, %v12209_v38  ;;  %v7865_v39 = vand.u32 4294901760, %v7864_v7  ;;  %7970 = vmatpush.msrb.mxu0 %v12197_v33 }
0x1135   : > { %8042 = vmatpush.msrb.mxu1 %v12243_v52  ;;  %7795 = vmatpush.msra.mxu2 %v12243_v52 }
0x1136   : > { %v7847_v32 = vand.u32 4294901760, %v7846_v2  ;;  %v7870_v10 = vsub.f32 %v12197_v33, %v7869_v46  ;;  %v7876_v20 = vsub.f32 %v12209_v38, %v7875_v15  ;;  %7973 = vmatpush.msrb.mxu0 %v12209_v38  ;;  %v8223_v2 = vmul.f32 0.125, %v12145_v31  ;;  %v12998_v38 = vld [vmem:[#allocation27_spill] sm:$0xff] }
0x1137   : > { %v7561_v35 = vpop.f32.mrf.mxu0  ;;  %v7602_v45 = vpop.f32.mrf.mxu1 }
0x1138   : > { %v7562_v0 = vadd.f32 %v7561_v35, %v7513_v59  ;;  %v7858_v59 = vsub.f32 %v12189_v50, %v7857_v3  ;;  %v12991_v35 = vld [vmem:[#allocation145_spill] sm:$0xff]  ;;  %7848 = vmatpush.msra.mxu3 %v7847_v32  ;;  %v7871_v18 = vand.u32 4294901760, %v7870_v10  ;;  %7976 = vmatpush.msrb.mxu0 %v12229_v58  ;;  %v12327_v10 = vand.u32 4294901760, %v7761_v5  ;;  %v12993_v50 = vld [vmem:[#allocation31_spill] sm:$0xff]  ;;  %v12999_v58 = vld [vmem:[#allocation34_spill] sm:$0xff] }
0x113a   : > { %v7599_v36 = vadd.f32 %v7598_v54, %v7562_v0  ;;  %v7524_v54 = vpop.f32.mrf.mxu3  ;;  %v6114_v0 = vadd.f32 %v12991_v35, %v6069_v4  ;;  %v7859_v25 = vand.u32 4294901760, %v7858_v59  ;;  %7854 = vmatpush.msra.mxu3 %v7853_v44  ;;  %v8224_v4 = vmul.f32 0.125, %v12150_v57  ;;  %7979 = vmatpush.msrb.mxu0 %v12240_v26  ;;  %v12302_v57 = vpop.permute.xlu2 %7697  ;;  %v7762_v44 = vld [vmem:[#allocation10 + $0x20] sm:$0xff] }
0x113b   : > { %v7525_v42 = vadd.f32 %v7524_v54, %v7480_v12  ;;  %v7877_v12 = vand.u32 4294901760, %v7876_v20 }
0x113c   : > { %7715 = vrot.lane.b32.xlu1 %v7599_v36, %s9003_s11  ;;  %7860 = vmatpush.msra.mxu3 %v7859_v25 }
0x113d   : > { %7982 = vmatpush.msrb.mxu0 %v12256_v19 }
0x113e   : > { %7866 = vmatpush.msra.mxu3 %v7865_v39  ;;  %v12336_v39 = vsub.f32 %v7761_v5, %v12327_v10 }
0x113f   : > { %v7565_v30 = vpop.f32.mrf.mxu0  ;;  %v7606_v37 = vpop.f32.mrf.mxu1 }
0x1140   : > { %v7566_v61 = vadd.f32 %v7565_v30, %v7519_v9  ;;  %v12992_v9 = vld [vmem:[#allocation144_spill] sm:$0xff]  ;;  %7872 = vmatpush.msra.mxu3 %v7871_v18  ;;  %v7759_v18 = vld [vmem:[#allocation10 + $0x8] sm:$0xff] }
0x1141   : > { %v6151_v51 = vadd.f32 %v12992_v9, %v6114_v0  ;;  %v7763_v0 = vld [vmem:[#allocation10 + $0x28] sm:$0xff]  ;;  %v7760_v9 = vld [vmem:[#allocation10 + $0x10] sm:$0xff] }
0x1142   : > { %v7603_v56 = vadd.f32 %v7602_v45, %v7566_v61  ;;  %v7887_v45 = vand.u32 4294901760, %v12240_v26  ;;  %v7893_v61 = vand.u32 4294901760, %v12256_v19  ;;  %7878 = vmatpush.msra.mxu3 %v7877_v12  ;;  %v12311_v32 = vand.u32 4294901760, %v7763_v0 }
0x1143   : > { %v12339_v20 = vand.u32 4294901760, %v7760_v9 }
0x1144   : > { %7717 = vrot.lane.b32.xlu2 %v7603_v56, %s9003_s11  ;;  %7639 = vrot.lane.b32.xlu1 %v3967_v62, %s9008_s25  ;;  %v12245_v62 = vand.u32 4294901760, %v7764_v47  ;;  %v7883_v56 = vand.u32 4294901760, %v7882_v14  ;;  %v7894_v63 = vsub.f32 %v12256_v19, %v7893_v61  ;;  %v12316_v7 = vsub.f32 %v7763_v0, %v12311_v32  ;;  %v13002_v19 = vld [vmem:[#allocation41_spill] sm:$0xff] }
0x1146   : > { %v12265_v30 = vsub.f32 %v7764_v47, %v12245_v62  ;;  %7884 = vmatpush.msra.mxu3 %v7883_v56  ;;  %v7895_v31 = vand.u32 4294901760, %v7894_v63  ;;  %8044 = vmatpush.msrb.mxu1 %v12245_v62  ;;  %v12305_v47 = vpop.permute.xlu2 %7619  ;;  %v12348_v56 = vsub.f32 %v7760_v9, %v12339_v20  ;;  %v12352_v63 = vand.u32 4294901760, %v7759_v18 }
0x1147   : > { %v7569_v36 = vpop.f32.mrf.mxu0  ;;  %7797 = vmatpush.msra.mxu2 %v12245_v62 }
0x1148   : > { %v7570_v8 = vadd.f32 %v7569_v36, %v7525_v42  ;;  %v7899_v24 = vand.u32 4294901760, %v12265_v30  ;;  %7985 = vmatpush.msrb.mxu0 %v12265_v30  ;;  %v12309_v42 = vpop.permute.xlu1 %7681  ;;  %8046 = vmatpush.msrb.mxu1 %v12311_v32 }
0x1149   : > { %7799 = vmatpush.msra.mxu2 %v12311_v32 }
0x114a   : > { %v7607_v13 = vadd.f32 %v7606_v37, %v7570_v8  ;;  %v7900_v59 = vsub.f32 %v12265_v30, %v7899_v24  ;;  %v12318_v8 = vand.u32 4294901760, %v7762_v44  ;;  %v7905_v37 = vand.u32 4294901760, %v12316_v7  ;;  %7988 = vmatpush.msrb.mxu0 %v12316_v7 }
0x114c   : > { %7719 = vrot.lane.b32.xlu0 %v7607_v13, %s9003_s11  ;;  %7703 = vrot.lane.b32.xlu2 %v11922_v55, %s9004_s13  ;;  %v7888_v55 = vsub.f32 %v12240_v26, %v7887_v45  ;;  %v7901_v34 = vand.u32 4294901760, %v7900_v59  ;;  %v12324_v25 = vsub.f32 %v7762_v44, %v12318_v8  ;;  %v7923_v59 = vand.u32 4294901760, %v12348_v56  ;;  %s8282_s11 = sshll.u32 %s424_s14, 4  ;;  %s8284_s13 = sshll.u32 %s8280_s24, 4  ;;  %s8283_s11 = int_to_ptr.vmem [resolvable:$true] %s8282_s11  ;;  %s8285_s13 = int_to_ptr.hbm [resolvable:$true] %s8284_s13 }
0x114d   : > { %7687 = vrot.lane.b32.xlu1 %v6151_v51, %s9005_s3  ;;  %8048 = vmatpush.msrb.mxu1 %v12318_v8  ;;  %v7906_v51 = vsub.f32 %v12316_v7, %v7905_v37  ;;  %s8250_s3 = scalar_lea.sflag [#allocation13], %s9199_s15  ;;  %s8898_s4 = sshra.s32 %s8285_s13, 4  ;;  %s8899_s4 = int_to_ptr.hbm [resolvable:$true] %s8898_s4 }
0x114e   : > { %v7889_v54 = vand.u32 4294901760, %v7888_v55  ;;  %v12307_v35 = vpop.permute.xlu2 %7651  ;;  %7801 = vmatpush.msra.mxu2 %v12318_v8  ;;  %v7911_v13 = vand.u32 4294901760, %v12324_v25  ;;  %7991 = vmatpush.msrb.mxu0 %v12324_v25  ;;  %v7917_v55 = vand.u32 4294901760, %v12336_v39  ;;  %v7924_v44 = vsub.f32 %v12348_v56, %v7923_v59  ;;  %s8900_s29 = scalar_lea.hbm %s8899_s4, 1  ;;  %p8905_p10 = scmp.lt.s32.totalorder %s8899_s4, %s12579_s7 }
0x114f   : > { %8050 = vmatpush.msrb.mxu1 %v12327_v10  ;;  %v7907_v14 = vand.u32 4294901760, %v7906_v51  ;;  %p8901_p4 = scmp.ne.s32.totalorder %s8899_s4, %s8900_s29 }
0x1150   : > { %7890 = vmatpush.msra.mxu3 %v7889_v54  ;;  %7803 = vmatpush.msra.mxu2 %v12327_v10  ;;  %v7912_v12 = vsub.f32 %v12324_v25, %v7911_v13  ;;  %v7918_v54 = vsub.f32 %v12336_v39, %v7917_v55  ;;  %v7925_v51 = vand.u32 4294901760, %v7924_v44 }
0x1151   : > { %7994 = vmatpush.msrb.mxu0 %v12336_v39  ;;  %8052 = vmatpush.msrb.mxu1 %v12339_v20  ;;  %p8902_p8 = pnand %p8901_p4, %p9144_p7 }
0x1152   : > { %7896 = vmatpush.msra.mxu3 %v7895_v31  ;;  %7805 = vmatpush.msra.mxu2 %v12339_v20  ;;  %v7919_v0 = vand.u32 4294901760, %v7918_v54 }
0x1153   : > { %7997 = vmatpush.msrb.mxu0 %v12348_v56  ;;  %8054 = vmatpush.msrb.mxu1 %v12352_v63  ;;  %v13005_v56 = vld [vmem:[#allocation35_spill] sm:$0xff]  ;;  %p8903_p9 = pneg %p8902_p8 }
0x1154   : > { %8231 = vrot.lane.b32.xlu0 %v8224_v4, %s9010_s17  ;;  %8229 = vrot.lane.b32.xlu2 %v8223_v2, %s9010_s17  ;;  %v7758_v4 = vld [vmem:[#allocation10] sm:$0xff]  ;;  %v12355_v2 = vpop.permute.xlu1 %7635 }
0x1155   : > { %8218 = vrot.lane.b32.xlu1 %v8216_v49, %s9010_s17  ;;  %7902 = vmatpush.msra.mxu3 %v7901_v34  ;;  %v7913_v49 = vand.u32 4294901760, %v7912_v12  ;;  %v12362_v31 = vand.u32 4294901760, %v7758_v4  ;;  %v12365_v34 = vsub.f32 %v7759_v18, %v12352_v63 }
0x1156   : > { %v12313_v36 = vpop.permute.xlu2 %7699  ;;  %7807 = vmatpush.msra.mxu2 %v12352_v63 }
0x1157   : > { %7908 = vmatpush.msra.mxu3 %v7907_v14  ;;  %v12375_v5 = vsub.f32 %v7758_v4, %v12362_v31  ;;  %v7929_v9 = vand.u32 4294901760, %v12365_v34  ;;  %8000 = vmatpush.msrb.mxu0 %v12365_v34 }
0x1158   : > { %8056 = vmatpush.msrb.mxu1 %v12362_v31  ;;  %7809 = vmatpush.msra.mxu2 %v12362_v31 }
0x1159   : > { %7914 = vmatpush.msra.mxu3 %v7913_v49  ;;  %v7935_v18 = vand.u32 4294901760, %v12375_v5  ;;  %v7930_v14 = vsub.f32 %v12365_v34, %v7929_v9  ;;  %8003 = vmatpush.msrb.mxu0 %v12375_v5 }
0x115a   : > { %8085 = vmatpush.msrb.mxu2 %v7845_v27  ;;  %v12994_v27 = vld [vmem:[#allocation25_spill] sm:$0xff] }
0x115b   : > { %7920 = vmatpush.msra.mxu3 %v7919_v0  ;;  %v7936_v12 = vsub.f32 %v12375_v5, %v7935_v18  ;;  %v7931_v4 = vand.u32 4294901760, %v7930_v14  ;;  %v13007_v0 = vld [vmem:[#allocation37_spill] sm:$0xff] }
0x115c   : > { %8089 = vmatpush.msrb.mxu2 %v7851_v16  ;;  %v12393_v54 = vpop.permute.xlu1 %7683  ;;  %v2331_v16 = vadd.f32 %v12994_v27, %v12993_v50  ;;  %v13009_v27 = vld [vmem:[#allocation45_spill] sm:$0xff] }
0x115d   : > { %8233 = vrot.lane.b32.xlu1 %v8225_v40, %s9010_s17  ;;  %7926 = vmatpush.msra.mxu3 %v7925_v51  ;;  %v7937_v49 = vand.u32 4294901760, %v7936_v12  ;;  %s8904_s17 = scalar_lea.hbm %s12579_s7, 2 }
0x115e   : > { %v12369_v40 = vpop.permute.xlu2 %7621  ;;  %8093 = vmatpush.msrb.mxu2 %v7857_v3  ;;  %v12997_v3 = vld [vmem:[#allocation33_spill] sm:$0xff]  ;;  %p8906_p2 = scmp.lt.s32.totalorder %s8904_s17, %s8900_s29 }
0x115f   : > { %7932 = vmatpush.msra.mxu3 %v7931_v4 }
0x1160   : > { %8097 = vmatpush.msrb.mxu2 %v7863_v6  ;;  %v2375_v6 = vadd.f32 %v12997_v3, %v2331_v16  ;;  %p8907_p11 = por %p8906_p2, %p8905_p10 }
0x1161   : > { %7938 = vmatpush.msra.mxu3 %v7937_v49  ;;  %v13008_v49 = vld [vmem:[#allocation38_spill] sm:$0xff] }
0x1162   : > { %8101 = vmatpush.msrb.mxu2 %v7869_v46  ;;  %v7638_v46 = vpop.permute.xlu0 %7637  ;;  %p8908_p12 = pnand %p8907_p11, %p8903_p9 }
0x1163   : > { %8164 = vmatpush.msrb.mxu3 %v12169_v28  ;;  %v12995_v28 = vld [vmem:[#allocation23_spill] sm:$0xff] }
0x1164   : > { %8105 = vmatpush.msrb.mxu2 %v7875_v15  ;;  %v2327_v33 = vadd.f32 %v12996_v22, %v12995_v28  ;;  %v2419_v15 = vadd.f32 %v12999_v58, %v2375_v6 }
0x1165   : > { %8166 = vmatpush.msrb.mxu3 %v12171_v29  ;;  %v7654_v29 = vpop.permute.xlu1 %7653 }
0x1166   : > { %v12397_v1 = vpop.permute.xlu2 %7669  ;;  %8109 = vmatpush.msrb.mxu2 %v7881_v43  ;;  %v13001_v43 = vld [vmem:[#allocation43_spill] sm:$0xff] }
0x1167   : > { %8168 = vmatpush.msrb.mxu3 %v12173_v41 }
0x1168   : > { %8113 = vmatpush.msrb.mxu2 %v7887_v45 }
0x1169   : > { %8170 = vmatpush.msrb.mxu3 %v12176_v48  ;;  %v2370_v48 = vadd.f32 %v12998_v38, %v2327_v33 }
0x116a   : > { %8117 = vmatpush.msrb.mxu2 %v7893_v61  ;;  %v7686_v25 = vpop.permute.xlu0 %7685 }
0x116b   : > { %8172 = vmatpush.msrb.mxu3 %v12178_v60  ;;  %v13000_v60 = vld [vmem:[#allocation29_spill] sm:$0xff] }
0x116c   : > { %8121 = vmatpush.msrb.mxu2 %v7899_v24  ;;  %v2413_v26 = vadd.f32 %v13000_v60, %v2370_v48  ;;  %v13004_v24 = vld [vmem:[#allocation40_spill] sm:$0xff] }
0x116d   : > { %8174 = vmatpush.msrb.mxu3 %v12180_v23  ;;  %v2466_v23 = vadd.f32 %v13001_v43, %v2419_v15 }
0x116e   : > { %v12419_v41 = vpop.permute.xlu2 %7655  ;;  %8125 = vmatpush.msrb.mxu2 %v7905_v37  ;;  %v2462_v45 = vadd.f32 %v13002_v19, %v2413_v26 }
0x116f   : > { %8176 = vmatpush.msrb.mxu3 %v12199_v17  ;;  %v7702_v17 = vpop.permute.xlu1 %7701 }
0x1170   : > { %8129 = vmatpush.msrb.mxu2 %v7911_v13  ;;  %v7744_v13 = vsel %vm7743_vm8, %v12103_v21, %v12309_v42 }
0x1171   : > { %8178 = vmatpush.msrb.mxu3 %v12220_v11  ;;  %v13003_v11 = vld [vmem:[#allocation42_spill] sm:$0xff] }
0x1172   : > { %8133 = vmatpush.msrb.mxu2 %v7917_v55  ;;  %v2503_v61 = vadd.f32 %v13003_v11, %v2466_v23  ;;  %v7624_v5 = vpop.permute.xlu0 %7623 }
0x1173   : > { %8180 = vmatpush.msrb.mxu3 %v12243_v52  ;;  %v2499_v52 = vadd.f32 %v13004_v24, %v2462_v45 }
0x1174   : > { %8137 = vmatpush.msrb.mxu2 %v7923_v59  ;;  %v7727_v7 = vsel %vm1803_vm0, %v2503_v61, %v12369_v40 }
0x1175   : > { %8182 = vmatpush.msrb.mxu3 %v12245_v62  ;;  %v7731_v37 = vsel %vm2110_vm1, %v7727_v7, %v7638_v46  ;;  %v7726_v62 = vsel %vm1803_vm0, %v2499_v52, %v12305_v47  ;;  %v7749_v47 = vsel %vm7748_vm9, %v7744_v13, %v12302_v57 }
0x1176   : > { %8141 = vmatpush.msrb.mxu2 %v7929_v9  ;;  %v7736_v39 = vsel %vm7733_vm2, %v7731_v37, %v7654_v29 }
0x1177   : > { %8184 = vmatpush.msrb.mxu3 %v12311_v32  ;;  %v7730_v32 = vsel %vm2110_vm1, %v7726_v62, %v12355_v2  ;;  %v13006_v2 = vld [vmem:[#allocation32_spill] sm:$0xff]  ;;  %v7741_v34 = vsel %vm7738_vm3, %v7736_v39, %v12397_v1 }
0x1178   : > { %8145 = vmatpush.msrb.mxu2 %v7935_v18  ;;  %v7735_v21 = vsel %vm7733_vm2, %v7730_v32, %v12307_v35  ;;  %v2335_v59 = vadd.f32 %v13006_v2, %v13005_v56  ;;  %v7746_v57 = vsel %vm7743_vm8, %v7741_v34, %v7686_v25 }
0x1179   : > { %8186 = vmatpush.msrb.mxu3 %v12318_v8  ;;  %v7751_v9 = vsel %vm7748_vm9, %v7746_v57, %v7702_v17 }
0x117a   : > { %v2380_v44 = vadd.f32 %v13007_v0, %v2335_v59  ;;  %v7672_v3 = vpop.permute.xlu0 %7671 }
0x117b   : > { %8188 = vmatpush.msrb.mxu3 %v12327_v10  ;;  %v7740_v10 = vsel %vm7738_vm3, %v7735_v21, %v7668_v53 }
0x117c   : > { %v7745_v35 = vsel %vm7743_vm8, %v7740_v10, %v12393_v54  ;;  %v2425_v54 = vadd.f32 %v13008_v49, %v2380_v44 }
0x117d   : > { %8190 = vmatpush.msrb.mxu3 %v12339_v20 }
0x117e   : > { %v2470_v16 = vadd.f32 %v13009_v27, %v2425_v54 }
0x117f   : > { %8192 = vmatpush.msrb.mxu3 %v12352_v63 }
0x1181   : > { %8194 = vmatpush.msrb.mxu3 %v12362_v31  ;;  %v7750_v31 = vsel %vm7748_vm9, %v7745_v35, %v12313_v36  ;;  %v13010_v36 = vld [vmem:[#allocation44_spill] sm:$0xff] }
0x1182   : > { %v2507_v29 = vadd.f32 %v13010_v36, %v2470_v16 }
0x1184   : > { %v7728_v48 = vsel %vm1803_vm0, %v2507_v29, %v7624_v5  ;;  %vm8221_vm0 = vcmask 245760  }
0x119e   : > { %v7718_v30 = vpop.permute.xlu2 %7717 }
0x119f   : > { %v7756_v63 = vsel %vm7753_vm10, %v7751_v9, %v7718_v30 }
0x11a0   : > { %v7826_v1 = vand.u32 4294901760, %v7756_v63 }
0x11a2   : > { %v7827_v22 = vsub.f32 %v7756_v63, %v7826_v1 }
0x11a4   : > { %v7828_v58 = vand.u32 4294901760, %v7827_v22 }
0x11a6   : > { %v7714_v8 = vpop.permute.xlu1 %7713  ;;  %v7704_v55 = vpop.permute.xlu2 %7703  ;;  %v7829_v26 = vsub.f32 %v7827_v22, %v7828_v58 }
0x11a7   : > { %v7754_v42 = vsel %vm7753_vm10, %v7749_v47, %v7714_v8 }
0x11a8   : > { %v12472_v40 = vand.u32 4294901760, %v7754_v42  ;;  %v7830_v17 = vand.u32 4294901760, %v7829_v26 }
0x11aa   : > { %v7811_v20 = vsub.f32 %v7754_v42, %v12472_v40  ;;  %7940 = vmatmul.f32.vlgmr.msra.gmra.mxu3 %v12472_v40 }
0x11ac   : > { %v7812_v51 = vand.u32 4294901760, %v7811_v20  ;;  %8006 = vmatmul.f32.vlgmr.msrb.gmra.mxu0 %v7811_v20 }
0x11ae   : > { %v7813_v18 = vsub.f32 %v7811_v20, %v7812_v51  ;;  %v7716_v14 = vpop.permute.xlu1 %7715  ;;  %v8230_v12 = vpop.permute.xlu2 %8229  ;;  %8060 = vmatmul.f32.vlgmr.msrb.gmra.mxu1 %v7812_v51 }
0x11af   : > { %v7755_v4 = vsel %vm7753_vm10, %v7750_v31, %v7716_v14  ;;  %8241 = vst.msk [vmem:[%s12486_s20 + $0x7] sm:$0xff] %vm8240_vm11, %v8230_v12 }
0x11b0   : > { %v7814_v53 = vand.u32 4294901760, %v7813_v18  ;;  %v7818_v50 = vand.u32 4294901760, %v7755_v4 }
0x11b2   : > { %v7819_v28 = vsub.f32 %v7755_v4, %v7818_v50  ;;  %7815 = vmatmul.f32.vlgmr.msra.gmra.mxu2 %v7814_v53  ;;  %7944 = vmatmul.f32.gmra.mxu3 %v7818_v50 }
0x11b4   : > { %8011 = vmatmul.f32.gmra.mxu0 %v7819_v28  ;;  %v7820_v33 = vand.u32 4294901760, %v7819_v28 }
0x11b6   : > { %v7640_v6 = vpop.permute.xlu1 %7639  ;;  %8066 = vmatmul.f32.gmra.mxu1 %v7820_v33  ;;  %v7821_v38 = vsub.f32 %v7819_v28, %v7820_v33 }
0x11b7   : > { %v7732_v15 = vsel %vm2110_vm1, %v7728_v48, %v7640_v6  ;;  %vm8238_vm1 = vcmask 252929  }
0x11b8   : > { %v7822_v46 = vand.u32 4294901760, %v7821_v38  ;;  %v7737_v60 = vsel %vm7733_vm2, %v7732_v15, %v12419_v41 }
0x11b9   : > { %v7742_v19 = vsel %vm7738_vm3, %v7737_v60, %v7672_v3 }
0x11ba   : > { %7823 = vmatmul.f32.gmra.mxu2 %v7822_v46  ;;  %7948 = vmatmul.f32.gmra.mxu3 %v7826_v1 }
0x11bc   : > { %8016 = vmatmul.f32.gmra.mxu0 %v7827_v22 }
0x11be   : > { %v7720_v43 = vpop.permute.xlu0 %7719  ;;  %8072 = vmatmul.f32.gmra.mxu1 %v7828_v58 }
0x11bf   : > { %v7688_v23 = vpop.permute.xlu1 %7687 }
0x11c0   : > { %v7747_v45 = vsel %vm7743_vm8, %v7742_v19, %v7688_v23 }
0x11c1   : > { %v7752_v30 = vsel %vm7748_vm9, %v7747_v45, %v7704_v55 }
0x11c2   : > { %v7757_v11 = vsel %vm7753_vm10, %v7752_v30, %v7720_v43  ;;  %7831 = vmatmul.f32.gmra.mxu2 %v7830_v17 }
0x11c3   : > { %v7834_v61 = vand.u32 4294901760, %v7757_v11 }
0x11c5   : > { %7952 = vmatmul.f32.gmra.mxu3 %v7834_v61  ;;  %v7835_v41 = vsub.f32 %v7757_v11, %v7834_v61 }
0x11c6   : > { %v8232_v24 = vpop.permute.xlu0 %8231 }
0x11c7   : > { %8242 = vst.msk [vmem:[%s12486_s20 + $0xf] sm:$0xff] %vm8240_vm11, %v8232_v24  ;;  %v8219_v52 = vpop.permute.xlu1 %8218  ;;  %8021 = vmatmul.f32.gmra.mxu0 %v7835_v41  ;;  %v7836_v7 = vand.u32 4294901760, %v7835_v41 }
0x11c8   : > { %8222 = vst.msk [vmem:[%s424_s14] sm:$0x1] %vm8221_vm0, %v8219_v52 }
0x11c9   : > { %8239 = vst.msk [vmem:[%s12486_s20 - $0x1] sm:$0xfe] %vm8238_vm1, %v8219_v52  ;;  %8078 = vmatmul.f32.gmra.mxu1 %v7836_v7  ;;  %v7837_v37 = vsub.f32 %v7835_v41, %v7836_v7 }
0x11cb   : > { %v7838_v25 = vand.u32 4294901760, %v7837_v37 }
0x11cd   : > { %7839 = vmatmul.f32.gmra.mxu2 %v7838_v25  ;;  %8196 = vmatmul.f32.vlgmr.msrb.gmra.mxu3 %v12472_v40 }
0x11cf   : > { %v8234_v62 = vpop.permute.xlu1 %8233 }
0x11d0   : > { %8243 = vst.msk [vmem:[%s12486_s20 + $0x17] sm:$0xff] %vm8240_vm11, %v8234_v62 }
0x11d5   : > { %8147 = vmatmul.f32.vlgmr.msrb.gmra.mxu2 %v12472_v40  ;;  %8200 = vmatmul.f32.gmra.mxu3 %v7818_v50 }
0x11dd   : > { %8151 = vmatmul.f32.gmra.mxu2 %v7818_v50  ;;  %8204 = vmatmul.f32.gmra.mxu3 %v7826_v1 }
0x11e5   : > { %8155 = vmatmul.f32.gmra.mxu2 %v7826_v1  ;;  %8208 = vmatmul.f32.gmra.mxu3 %v7834_v61 }
0x11ed   : > { %8159 = vmatmul.f32.gmra.mxu2 %v7834_v61 }
0x11ee   : > { %8911 = shalt.err (!%p8908_p12)
}
0x11ef   : > { %8509 = dma.vmem_to_hbm [thread:$0]  (%p9144_p7), %s8283_s11, 16, %s8285_s13, %s8250_s3   ;;  %v8593_v55 = vld [vmem:[%s12577_s5] ss:$0 sm:$0xff] }
0x11f0   : > { %s12532_s20 = scalar_lea.vmem [#allocation11], %s9202_s0  ;;  %s8491_s0 = sshll.u32 %s9079_s9, 5 }
0x11f1   : > { %s8265_s22 = scalar_lea.hbm %s12578_s6, %s8491_s0  ;;  %s8266_s24 = sshll.u32 %s12532_s20, 4  ;;  %s8267_s24 = int_to_ptr.vmem [resolvable:$true] %s8266_s24 }
0x11f2   : > { %s8268_s11 = sshll.u32 %s8265_s22, 4  ;;  %s8245_s9 = scalar_lea.sflag [#allocation4], %s9199_s15  ;;  %s8269_s11 = int_to_ptr.hbm [resolvable:$true] %s8268_s11 }
0x11f3   : > { %s8926_s13 = sshra.s32 %s8269_s11, 4  ;;  %s8932_s25 = scalar_lea.hbm %s12578_s6, 64  ;;  %s8927_s13 = int_to_ptr.hbm [resolvable:$true] %s8926_s13 }
0x11f4   : > { %s8928_s3 = scalar_lea.hbm %s8927_s13, 32  ;;  %p8933_p5 = scmp.lt.s32.totalorder %s8927_s13, %s12578_s6 }
0x11f5   : > { %p8929_p13 = scmp.ne.s32.totalorder %s8927_s13, %s8928_s3  ;;  %p8934_p1 = scmp.lt.s32.totalorder %s8932_s25, %s8928_s3 }
0x11f7   : > { %p8930_p0 = pnand %p8929_p13, %p9144_p7  ;;  %p8935_p4 = por %p8934_p1, %p8933_p5 }
0x11f9   : > { %p8931_p3 = pneg %p8930_p0 }
0x11fb   : > { %p8936_p8 = pnand %p8935_p4, %p8931_p3 }
0x1229   : > { %v8007_v2 = vpop.f32.mrf.mxu0 }
0x122b   : > { %v8061_v34 = vpop.f32.mrf.mxu1 }
0x122d   : > { %v7941_v13 = vpop.f32.mrf.mxu3 }
0x1231   : > { %v8012_v44 = vpop.f32.mrf.mxu0 }
0x1233   : > { %v8067_v14 = vpop.f32.mrf.mxu1 }
0x1235   : > { %v7816_v32 = vpop.f32.mrf.mxu2  ;;  %v7945_v39 = vpop.f32.mrf.mxu3 }
0x1236   : > { %v7817_v56 = vadd.f32 %v8593_v55, %v7816_v32 }
0x1238   : > { %v7942_v59 = vadd.f32 %v7941_v13, %v7817_v56 }
0x1239   : > { %v8017_v1 = vpop.f32.mrf.mxu0 }
0x123a   : > { %v8008_v57 = vadd.f32 %v8007_v2, %v7942_v59 }
0x123b   : > { %v8073_v16 = vpop.f32.mrf.mxu1 }
0x123c   : > { %v8062_v0 = vadd.f32 %v8061_v34, %v8008_v57 }
0x123d   : > { %v7824_v8 = vpop.f32.mrf.mxu2  ;;  %v7949_v47 = vpop.f32.mrf.mxu3 }
0x123e   : > { %v7825_v40 = vadd.f32 %v8593_v55, %v7824_v8 }
0x1240   : > { %v7946_v35 = vadd.f32 %v7945_v39, %v7825_v40 }
0x1242   : > { %v8013_v18 = vadd.f32 %v8012_v44, %v7946_v35 }
0x1244   : > { %v8068_v4 = vadd.f32 %v8067_v14, %v8013_v18  ;;  %v8022_v3 = vpop.f32.mrf.mxu0 }
0x1245   : > { %v7832_v21 = vpop.f32.mrf.mxu2 }
0x1246   : > { %v7833_v51 = vadd.f32 %v8593_v55, %v7832_v21  ;;  %v8079_v48 = vpop.f32.mrf.mxu1 }
0x1248   : > { %v7953_v42 = vpop.f32.mrf.mxu3  ;;  %v7950_v12 = vadd.f32 %v7949_v47, %v7833_v51 }
0x124a   : > { %v8018_v27 = vadd.f32 %v8017_v1, %v7950_v12 }
0x124c   : > { %v8074_v22 = vadd.f32 %v8073_v16, %v8018_v27 }
0x1250   : > { %v7840_v10 = vpop.f32.mrf.mxu2  ;;  %v8197_v20 = vpop.f32.mrf.mxu3 }
0x1251   : > { %v7841_v53 = vadd.f32 %v8593_v55, %v7840_v10 }
0x1253   : > { %v7954_v28 = vadd.f32 %v7953_v42, %v7841_v53 }
0x1255   : > { %v8023_v38 = vadd.f32 %v8022_v3, %v7954_v28 }
0x1257   : > { %v8080_v46 = vadd.f32 %v8079_v48, %v8023_v38 }
0x1258   : > { %v8148_v5 = vpop.f32.mrf.mxu2  ;;  %v8201_v31 = vpop.f32.mrf.mxu3 }
0x1259   : > { %v8149_v9 = vadd.f32 %v8148_v5, %v8062_v0 }
0x125b   : > { %v8198_v63 = vadd.f32 %v8197_v20, %v8149_v9 }
0x125d   : > { %8212 = vst [vmem:[%s12532_s20] sm:$0xff] %v8198_v63 }
0x1260   : > { %v8152_v49 = vpop.f32.mrf.mxu2  ;;  %v8205_v33 = vpop.f32.mrf.mxu3 }
0x1261   : > { %v8153_v54 = vadd.f32 %v8152_v49, %v8068_v4 }
0x1263   : > { %v8202_v50 = vadd.f32 %v8201_v31, %v8153_v54 }
0x1265   : > { %8213 = vst [vmem:[%s12532_s20 + $0x8] sm:$0xff] %v8202_v50 }
0x1268   : > { %v8156_v36 = vpop.f32.mrf.mxu2  ;;  %v8209_v60 = vpop.f32.mrf.mxu3 }
0x1269   : > { %v8157_v29 = vadd.f32 %v8156_v36, %v8074_v22 }
0x126b   : > { %v8206_v6 = vadd.f32 %v8205_v33, %v8157_v29 }
0x126d   : > { %8214 = vst [vmem:[%s12532_s20 + $0x10] sm:$0xff] %v8206_v6 }
0x1270   : > { %v8160_v58 = vpop.f32.mrf.mxu2 }
0x1271   : > { %v8161_v15 = vadd.f32 %v8160_v58, %v8080_v46 }
0x1273   : > { %v8210_v26 = vadd.f32 %v8209_v60, %v8161_v15 }
0x1275   : > { %8215 = vst [vmem:[%s12532_s20 + $0x18] sm:$0xff] %v8210_v26 }
0x1276   : > { %8939 = shalt.err (!%p8936_p8)
}
0x1277   : > { %s9011_s15 = smov 128   ;;  %s9012_s23 = smov 8  }
0x1278   : > { %8508 = dma.vmem_to_hbm [thread:$0]  (%p9144_p7), %s8267_s24, 512, %s8269_s11, %s8245_s9, %s9011_s15, %s9011_s15, %s9012_s23  }
0x1279 PF: > { %s8299_s18 = sand.u32 1, %s8982_s27   ;;  %p13011_p9 = scmp.ge.s32.totalorder %s8994_s30, 2 }
0x127a   : > { %s8300_s26 = scalar_lea.sflag [#allocation4], %s8299_s18 }
0x127b   : > { %p8530_p10 = pnand %p13011_p9, %p9093_p6 }
0x127d   : > { %p8531_p2 = pneg %p8530_p10 }
0x127f   : > { %8973 = dma.done.wait (%p8531_p2), %s8300_s26, 512  }
0x1280   : > { %8975 = vsyncadd (%p8531_p2), %s8300_s26, 4294966784  ;;  %s8310_s10 = scalar_lea.sflag [#allocation13], %s8299_s18 }
0x1281   : > { %8977 = dma.done.wait (%p8531_p2), %s8310_s10, 16  }
0x1282   : > { %8979 = vsyncadd (%p8531_p2), %s8310_s10, 4294967280  ;;  %s13012_s20 = sld [smem:[#allocation20_spill]]  ;;  %p29_p7 = scmp.ge.s32.totalorder %s9130_s21, 4  }
0x1283   : > { %s13013_s29 = sld [smem:[#allocation21_spill]]  ;;  %s13014_s27 = smov %s8986_s28 }
0x1284   : > { %s13016_s30 = smov %s9130_s21  ;;  %31 = sbr.rel (!%p29_p7) target bundleno = 15 (0xf), region = 143 }
0x1288   : > { %s13015_s28 = smov %s13012_s20 }
0x1289   :  { %8323 = vsyncpa [#allocation3], 1 }
0x128a   :  { %8325 = vsyncpa [#allocation3 + $0x1], 1 }
0x128b   :  { %8326 = vsyncpa [#allocation6], 1 }
0x128c   :  { %8328 = vsyncpa [#allocation6 + $0x1], 1 }
0x128d   :  { %8329 = vsyncpa [#allocation9], 1 }
0x128e   :  { %8330 = vsyncpa [#allocation4], 1 }
0x128f   :  { %8332 = vsyncpa [#allocation4 + $0x1], 1 }
0x1290   :  { %8333 = vsyncpa [#allocation13], 1 }
0x1291   :  { %8335 = vsyncpa [#allocation13 + $0x1], 1 }

</bundles_post_ra>
